<compile_context>
chip_gen: v5e
topology: v5e:2x2
jax: 0.10.0
libtpu: 0.0.40
codegen_flags: <defaults>
</compile_context>

<pallas_src>
import jax
import jax.numpy as jnp
from jax.experimental import pallas as pl
from jax.experimental.pallas import tpu as pltpu

PATCH = 14
EMBED = 1024                   # dinov2_vitl14_reg embed_dim
H1, H2 = 512, 256              # fc1 / fc2 widths
N_OUT = 30 * 30 * 11           # 9900 = fc3 width
TILE_N = 4992                  # 39 * 128 lanes per fc3 tile  -> grid of 2
N_PAD = 2 * TILE_N             # 9984 = 78 * 128 (zero-padded fc3 width)
VMEM_LIMIT = 32 * 1024 * 1024  # <= physical VMEM on v5e/v6e/v7x


# ---------------------------------------------------------------------------
# Kernels
# ---------------------------------------------------------------------------
def fused_kernel(xm_ref, wf_ref, bf_ref, w2_ref, b2_ref, w3_ref, b3_ref,
                 out_ref, h2_ref):
    """Single-TC path: head (folded embed+fc1, fc2) once, fc3 tiled over N."""
    @pl.when(pl.program_id(0) == 0)
    def _():
        h1 = jnp.maximum(
            jnp.dot(xm_ref[...], wf_ref[...],
                    preferred_element_type=jnp.float32) + bf_ref[...], 0.0)
        h2 = jnp.maximum(
            jnp.dot(h1.astype(jnp.bfloat16), w2_ref[...],
                    preferred_element_type=jnp.float32) + b2_ref[...], 0.0)
        h2_ref[...] = h2.astype(jnp.bfloat16)
    out_ref[...] = (jnp.dot(h2_ref[...], w3_ref[...],
                            preferred_element_type=jnp.float32) + b3_ref[...])


def head_kernel(xm_ref, wf_ref, bf_ref, w2_ref, b2_ref, h2_ref):
    """v7x split path: folded embed+fc1 (relu) + fc2 (relu)."""
    h1 = jnp.maximum(
        jnp.dot(xm_ref[...], wf_ref[...],
                preferred_element_type=jnp.float32) + bf_ref[...], 0.0)
    h2 = jnp.maximum(
        jnp.dot(h1.astype(jnp.bfloat16), w2_ref[...],
                preferred_element_type=jnp.float32) + b2_ref[...], 0.0)
    h2_ref[...] = h2.astype(h2_ref.dtype)


def fc3_kernel(h2_ref, w3_ref, b3_ref, out_ref):
    """v7x split path: fc3, one lane-dense TILE_N output tile per grid step."""
    out_ref[...] = (jnp.dot(h2_ref[...], w3_ref[...],
                            preferred_element_type=jnp.float32) + b3_ref[...])


# ---------------------------------------------------------------------------
# Wrapper glue
# ---------------------------------------------------------------------------
def _patch_mean(x):
    """(B,3,H,W) -> (B, 14*14*3) mean-over-patches, no (B,P,588) copy."""
    B, C, H, W = x.shape
    ph, pw = H // PATCH, W // PATCH
    xm = x.reshape(B, C, ph, PATCH, pw, PATCH).mean(axis=(2, 4))   # (B,C,14,14)
    return xm.transpose(0, 2, 3, 1).reshape(B, PATCH * PATCH * C)  # (pi,pj,c)


def prepare_params(params):
    """One-time (outside the jitted forward): fold wp@w1, pad, cast to bf16."""
    wp, bp, w1, b1, w2, b2, w3, b3 = params
    d_patch = wp.shape[0]
    d_pad = ((d_patch + 127) // 128) * 128                 # 588 -> 640
    w_fold = jnp.dot(wp, w1)                               # (588, 512) f32
    b_fold = jnp.dot(bp, w1) + b1                          # (1, 512)   f32
    wf = jnp.pad(w_fold, ((0, d_pad - d_patch), (0, 0))).astype(jnp.bfloat16)
    w2b = w2.astype(jnp.bfloat16)
    w3p = jnp.pad(w3, ((0, 0), (0, N_PAD - N_OUT))).astype(jnp.bfloat16)
    b3p = jnp.pad(b3, ((0, 0), (0, N_PAD - N_OUT)))        # f32
    return (wf, b_fold, w2b, b2, w3p, b3p)


def _pad_inputs(x, d_pad):
    B = x.shape[0]
    b_pad = ((B + 15) // 16) * 16                          # bf16 sublane tile
    xm = _patch_mean(x)
    xm = jnp.pad(xm, ((0, b_pad - B), (0, d_pad - xm.shape[1])))
    return xm.astype(jnp.bfloat16), b_pad


@jax.jit
def _forward_fused(x, prepped):
    """Single pallas_call; best on single-TC v5e/v6e."""
    wf, bf, w2b, b2, w3p, b3p = prepped
    B = x.shape[0]
    d_pad = wf.shape[0]
    xm, b_pad = _pad_inputs(x, d_pad)

    cost = pl.CostEstimate(
        flops=2 * b_pad * (d_pad * H1 + H1 * H2 + H2 * N_PAD),
        transcendentals=0,
        bytes_accessed=(xm.size * 2 + wf.size * 2 + bf.size * 4 + w2b.size * 2
                        + b2.size * 4 + w3p.size * 2 + b3p.size * 4
                        + b_pad * N_PAD * 4))

    out = pl.pallas_call(
        fused_kernel,
        out_shape=jax.ShapeDtypeStruct((b_pad, N_PAD), jnp.float32),
        grid_spec=pltpu.PrefetchScalarGridSpec(
            num_scalar_prefetch=0,
            grid=(N_PAD // TILE_N,),
            in_specs=[
                pl.BlockSpec((b_pad, d_pad), lambda j: (0, 0)),
                pl.BlockSpec((d_pad, H1), lambda j: (0, 0)),
                pl.BlockSpec((1, H1), lambda j: (0, 0)),
                pl.BlockSpec((H1, H2), lambda j: (0, 0)),
                pl.BlockSpec((1, H2), lambda j: (0, 0)),
                pl.BlockSpec((H2, TILE_N), lambda j: (0, j)),
                pl.BlockSpec((1, TILE_N), lambda j: (0, j)),
            ],
            out_specs=pl.BlockSpec((b_pad, TILE_N), lambda j: (0, j)),
            scratch_shapes=[pltpu.VMEM((b_pad, H2), jnp.bfloat16)],
        ),
        compiler_params=pltpu.CompilerParams(
            dimension_semantics=("arbitrary",),   # scratch h2 carried across j
            vmem_limit_bytes=VMEM_LIMIT,
        ),
        cost_estimate=cost,
    )(xm, wf, bf, w2b, b2, w3p, b3p)

    return out[:B, :N_OUT].reshape(B, 11, 30, 30)


@jax.jit
def _forward_split(x, prepped):
    """Two calls; fc3 axis stays 'parallel' so v7x shards it across 2 TCs."""
    wf, bf, w2b, b2, w3p, b3p = prepped
    B = x.shape[0]
    d_pad = wf.shape[0]
    xm, b_pad = _pad_inputs(x, d_pad)

    head_cost = pl.CostEstimate(
        flops=2 * b_pad * (d_pad * H1 + H1 * H2), transcendentals=0,
        bytes_accessed=(xm.size * 2 + wf.size * 2 + bf.size * 4
                        + w2b.size * 2 + b2.size * 4 + b_pad * H2 * 2))
    # grid=(1,): head weights are tiny (~0.7 MB), double-buffering overhead
    # is negligible so the default pipeline_mode is kept.
    h2 = pl.pallas_call(
        head_kernel,
        out_shape=jax.ShapeDtypeStruct((b_pad, H2), jnp.bfloat16),
        grid_spec=pltpu.PrefetchScalarGridSpec(
            num_scalar_prefetch=0,
            grid=(1,),
            in_specs=[
                pl.BlockSpec((b_pad, d_pad), lambda i: (0, 0)),
                pl.BlockSpec((d_pad, H1), lambda i: (0, 0)),
                pl.BlockSpec((1, H1), lambda i: (0, 0)),
                pl.BlockSpec((H1, H2), lambda i: (0, 0)),
                pl.BlockSpec((1, H2), lambda i: (0, 0)),
            ],
            out_specs=pl.BlockSpec((b_pad, H2), lambda i: (0, 0)),
        ),
        compiler_params=pltpu.CompilerParams(
            dimension_semantics=("arbitrary",),
            vmem_limit_bytes=VMEM_LIMIT,
        ),
        cost_estimate=head_cost,
    )(xm, wf, bf, w2b, b2)

    fc3_cost = pl.CostEstimate(
        flops=2 * b_pad * H2 * N_PAD, transcendentals=0,
        bytes_accessed=(h2.size * 2 + w3p.size * 2 + b3p.size * 4
                        + b_pad * N_PAD * 4))
    out = pl.pallas_call(
        fc3_kernel,
        out_shape=jax.ShapeDtypeStruct((b_pad, N_PAD), jnp.float32),
        grid_spec=pltpu.PrefetchScalarGridSpec(
            num_scalar_prefetch=0,
            grid=(N_PAD // TILE_N,),
            in_specs=[
                pl.BlockSpec((b_pad, H2), lambda j: (0, 0)),
                pl.BlockSpec((H2, TILE_N), lambda j: (0, j)),
                pl.BlockSpec((1, TILE_N), lambda j: (0, j)),
            ],
            out_specs=pl.BlockSpec((b_pad, TILE_N), lambda j: (0, j)),
        ),
        compiler_params=pltpu.CompilerParams(
            dimension_semantics=("parallel",),
            vmem_limit_bytes=VMEM_LIMIT,
        ),
        cost_estimate=fc3_cost,
    )(h2, w3p, b3p)

    return out[:B, :N_OUT].reshape(B, 11, 30, 30)


def dino_arc_forward(x, prepped):
    try:
        kind = jax.devices()[0].device_kind.lower()
    except Exception:
        kind = ""
    multi_tc = ("v7" in kind) or ("7x" in kind)   # 2 TensorCores per chip
    return (_forward_split if multi_tc else _forward_fused)(x, prepped)


# ---------------------------------------------------------------------------
# Params / reference
# ---------------------------------------------------------------------------
def init_params(key):
    ks = jax.random.split(key, 8)
    d_patch = PATCH * PATCH * 3
    s = 0.02
    wp = jax.random.normal(ks[0], (d_patch, EMBED), jnp.float32) * s
    bp = jax.random.normal(ks[1], (1, EMBED), jnp.float32) * s
    w1 = jax.random.normal(ks[2], (EMBED, H1), jnp.float32) * s
    b1 = jax.random.normal(ks[3], (1, H1), jnp.float32) * s
    w2 = jax.random.normal(ks[4], (H1, H2), jnp.float32) * s
    b2 = jax.random.normal(ks[5], (1, H2), jnp.float32) * s
    w3 = jax.random.normal(ks[6], (H2, N_OUT), jnp.float32) * s
    b3 = jax.random.normal(ks[7], (1, N_OUT), jnp.float32) * s
    return (wp, bp, w1, b1, w2, b2, w3, b3)


def reference_forward(x, params):
    """Pure-JAX reference mirroring the kernel math (folded wp@w1, bf16, f32 acc)."""
    wp, bp, w1, b1, w2, b2, w3, b3 = params
    B = x.shape[0]
    xm = _patch_mean(x).astype(jnp.bfloat16)
    w_fold = jnp.dot(wp, w1).astype(jnp.bfloat16)
    b_fold = jnp.dot(bp, w1) + b1
    h1 = jnp.maximum(
        jnp.dot(xm, w_fold, preferred_element_type=jnp.float32) + b_fold, 0.0)
    h2 = jnp.maximum(
        jnp.dot(h1.astype(jnp.bfloat16), w2.astype(jnp.bfloat16),
                preferred_element_type=jnp.float32) + b2, 0.0)
    out = jnp.dot(h2.astype(jnp.bfloat16), w3.astype(jnp.bfloat16),
                  preferred_element_type=jnp.float32) + b3
    return out.reshape(B, 11, 30, 30)


if __name__ == "__main__":
    key = jax.random.PRNGKey(0)
    k_x, k_p = jax.random.split(key)
    # small shapes: batch=2, 3-channel 28x28 image (2x2 = 4 patches of 14x14)
    x = jax.random.normal(k_x, (2, 3, 28, 28), jnp.float32)
    params = init_params(k_p)

    prepped = jax.block_until_ready(prepare_params(params))   # one-time prep
    y = jax.block_until_ready(dino_arc_forward(x, prepped))
    y_ref = reference_forward(x, params)

    assert y.shape == (2, 11, 30, 30), y.shape
    assert jnp.allclose(y, y_ref, rtol=2e-2, atol=2e-3), \
        float(jnp.max(jnp.abs(y - y_ref)))
    print("KERNEL_OK")
</pallas_src>

<mosaic_0001>
module attributes {stable_mosaic.version = 11 : i64} {
  func.func @fused_kernel(%arg0: i32, %arg1: memref<16x640xbf16, #tpu.memory_space<vmem>>, %arg2: memref<640x512xbf16, #tpu.memory_space<vmem>>, %arg3: memref<1x512xf32, #tpu.memory_space<vmem>>, %arg4: memref<512x256xbf16, #tpu.memory_space<vmem>>, %arg5: memref<1x256xf32, #tpu.memory_space<vmem>>, %arg6: memref<256x4992xbf16, #tpu.memory_space<vmem>>, %arg7: memref<1x4992xf32, #tpu.memory_space<vmem>>, %arg8: memref<16x4992xf32, #tpu.memory_space<vmem>>, %arg9: memref<16x256xbf16, #tpu.memory_space<vmem>>) attributes {dimension_semantics = [#tpu.dimension_semantics<arbitrary>], iteration_bounds = array<i64: 2>, scalar_prefetch = 0 : i64, scratch_operands = 1 : i64, tpu.core_type = #tpu.core_type<tc>, window_params = [{pipeline_mode = #tpu.pipeline_mode<synchronous>, transform_indices = @transform_0, window_bounds = array<i64: 16, 640>}, {pipeline_mode = #tpu.pipeline_mode<synchronous>, transform_indices = @transform_1, window_bounds = array<i64: 640, 512>}, {pipeline_mode = #tpu.pipeline_mode<synchronous>, transform_indices = @transform_2, window_bounds = array<i64: 1, 512>}, {pipeline_mode = #tpu.pipeline_mode<synchronous>, transform_indices = @transform_3, window_bounds = array<i64: 512, 256>}, {pipeline_mode = #tpu.pipeline_mode<synchronous>, transform_indices = @transform_4, window_bounds = array<i64: 1, 256>}, {transform_indices = @transform_5, window_bounds = array<i64: 256, 4992>}, {transform_indices = @transform_6, window_bounds = array<i64: 1, 4992>}, {transform_indices = @transform_7, window_bounds = array<i64: 16, 4992>}]} {
    %c0_i32 = arith.constant 0 : i32
    %0 = arith.cmpi eq, %arg0, %c0_i32 : i32
    %1 = arith.extui %0 : i1 to i32
    %c0_i32_0 = arith.constant 0 : i32
    %2 = arith.cmpi ne, %1, %c0_i32_0 : i32
    scf.if %2 {
      %c0_8 = arith.constant 0 : index
      %c0_9 = arith.constant 0 : index
      %10 = vector.load %arg1[%c0_8, %c0_9] : memref<16x640xbf16, #tpu.memory_space<vmem>>, vector<16x640xbf16>
      %c0_10 = arith.constant 0 : index
      %c0_11 = arith.constant 0 : index
      %11 = vector.load %arg2[%c0_10, %c0_11] : memref<640x512xbf16, #tpu.memory_space<vmem>>, vector<640x512xbf16>
      %cst_12 = arith.constant dense<0.000000e+00> : vector<16x512xf32>
      %12 = tpu.matmul %10, %11, %cst_12 {dimension_numbers = #tpu.dot_dimension_numbers<[1], [0], [0], [1], [0, 0, 1, 1], [], []>} : vector<16x640xbf16>, vector<640x512xbf16>, vector<16x512xf32> -> vector<16x512xf32>
      %c0_13 = arith.constant 0 : index
      %c0_14 = arith.constant 0 : index
      %13 = vector.load %arg3[%c0_13, %c0_14] : memref<1x512xf32, #tpu.memory_space<vmem>>, vector<1x512xf32>
      %14 = vector.broadcast %13 : vector<1x512xf32> to vector<16x512xf32>
      %15 = arith.addf %12, %14 : vector<16x512xf32>
      %cst_15 = arith.constant 0.000000e+00 : f32
      %16 = vector.broadcast %cst_15 : f32 to vector<16x512xf32>
      %17 = arith.maximumf %15, %16 : vector<16x512xf32>
      %18 = arith.truncf %17 : vector<16x512xf32> to vector<16x512xbf16>
      %c0_16 = arith.constant 0 : index
      %c0_17 = arith.constant 0 : index
      %19 = vector.load %arg4[%c0_16, %c0_17] : memref<512x256xbf16, #tpu.memory_space<vmem>>, vector<512x256xbf16>
      %cst_18 = arith.constant dense<0.000000e+00> : vector<16x256xf32>
      %20 = tpu.matmul %18, %19, %cst_18 {dimension_numbers = #tpu.dot_dimension_numbers<[1], [0], [0], [1], [0, 0, 1, 1], [], []>} : vector<16x512xbf16>, vector<512x256xbf16>, vector<16x256xf32> -> vector<16x256xf32>
      %c0_19 = arith.constant 0 : index
      %c0_20 = arith.constant 0 : index
      %21 = vector.load %arg5[%c0_19, %c0_20] : memref<1x256xf32, #tpu.memory_space<vmem>>, vector<1x256xf32>
      %22 = vector.broadcast %21 : vector<1x256xf32> to vector<16x256xf32>
      %23 = arith.addf %20, %22 : vector<16x256xf32>
      %cst_21 = arith.constant 0.000000e+00 : f32
      %24 = vector.broadcast %cst_21 : f32 to vector<16x256xf32>
      %25 = arith.maximumf %23, %24 : vector<16x256xf32>
      %26 = arith.truncf %25 : vector<16x256xf32> to vector<16x256xbf16>
      %c0_22 = arith.constant 0 : index
      %c0_23 = arith.constant 0 : index
      %27 = vector.load %arg9[%c0_22, %c0_23] : memref<16x256xbf16, #tpu.memory_space<vmem>>, vector<16x256xbf16>
      tpu.vector_store %arg9[%c0_22, %c0_23], %26 {strides = array<i32>} : memref<16x256xbf16, #tpu.memory_space<vmem>>, vector<16x256xbf16>,
    } else {
    }
    %c0 = arith.constant 0 : index
    %c0_1 = arith.constant 0 : index
    %3 = vector.load %arg9[%c0, %c0_1] : memref<16x256xbf16, #tpu.memory_space<vmem>>, vector<16x256xbf16>
    %c0_2 = arith.constant 0 : index
    %c0_3 = arith.constant 0 : index
    %4 = vector.load %arg6[%c0_2, %c0_3] : memref<256x4992xbf16, #tpu.memory_space<vmem>>, vector<256x4992xbf16>
    %cst = arith.constant dense<0.000000e+00> : vector<16x4992xf32>
    %5 = tpu.matmul %3, %4, %cst {dimension_numbers = #tpu.dot_dimension_numbers<[1], [0], [0], [1], [0, 0, 1, 1], [], []>} : vector<16x256xbf16>, vector<256x4992xbf16>, vector<16x4992xf32> -> vector<16x4992xf32>
    %c0_4 = arith.constant 0 : index
    %c0_5 = arith.constant 0 : index
    %6 = vector.load %arg7[%c0_4, %c0_5] : memref<1x4992xf32, #tpu.memory_space<vmem>>, vector<1x4992xf32>
    %7 = vector.broadcast %6 : vector<1x4992xf32> to vector<16x4992xf32>
    %8 = arith.addf %5, %7 : vector<16x4992xf32>
    %c0_6 = arith.constant 0 : index
    %c0_7 = arith.constant 0 : index
    %9 = vector.load %arg8[%c0_6, %c0_7] : memref<16x4992xf32, #tpu.memory_space<vmem>>, vector<16x4992xf32>
    tpu.vector_store %arg8[%c0_6, %c0_7], %8 {strides = array<i32>} : memref<16x4992xf32, #tpu.memory_space<vmem>>, vector<16x4992xf32>,
    return
  }
  func.func @transform_0(%arg0: i32) -> (i32, i32) {
    %c0_i32 = arith.constant 0 : i32
    %c0_i32_0 = arith.constant 0 : i32
    %c0_i32_1 = arith.constant 0 : i32
    return %c0_i32, %c0_i32_0 : i32, i32
  }
  func.func @transform_1(%arg0: i32) -> (i32, i32) {
    %c0_i32 = arith.constant 0 : i32
    %c0_i32_0 = arith.constant 0 : i32
    %c0_i32_1 = arith.constant 0 : i32
    return %c0_i32, %c0_i32_0 : i32, i32
  }
  func.func @transform_2(%arg0: i32) -> (i32, i32) {
    %c0_i32 = arith.constant 0 : i32
    %c0_i32_0 = arith.constant 0 : i32
    %c0_i32_1 = arith.constant 0 : i32
    return %c0_i32, %c0_i32_0 : i32, i32
  }
  func.func @transform_3(%arg0: i32) -> (i32, i32) {
    %c0_i32 = arith.constant 0 : i32
    %c0_i32_0 = arith.constant 0 : i32
    %c0_i32_1 = arith.constant 0 : i32
    return %c0_i32, %c0_i32_0 : i32, i32
  }
  func.func @transform_4(%arg0: i32) -> (i32, i32) {
    %c0_i32 = arith.constant 0 : i32
    %c0_i32_0 = arith.constant 0 : i32
    %c0_i32_1 = arith.constant 0 : i32
    return %c0_i32, %c0_i32_0 : i32, i32
  }
  func.func @transform_5(%arg0: i32) -> (i32, i32) {
    %c0_i32 = arith.constant 0 : i32
    %c0_i32_0 = arith.constant 0 : i32
    return %c0_i32, %arg0 : i32, i32
  }
  func.func @transform_6(%arg0: i32) -> (i32, i32) {
    %c0_i32 = arith.constant 0 : i32
    %c0_i32_0 = arith.constant 0 : i32
    return %c0_i32, %arg0 : i32, i32
  }
  func.func @transform_7(%arg0: i32) -> (i32, i32) {
    %c0_i32 = arith.constant 0 : i32
    %c0_i32_0 = arith.constant 0 : i32
    return %c0_i32, %arg0 : i32, i32
  }
}

</mosaic_0001>

<bundles_post_ra>
// kernel: _forward_fused.1
= control target key start
LH: loop header
LB: loop body
LE: loop exit
PB: predicated region body
PF: predicated region fallthrough
CT: control target
= control target key end

     0   :  { %s14089_s0 = inlined_call_operand.vmem [shape: bf16[16,640], index: 0, kind: input, shape index: {}]   ;;  %s14090_s1 = inlined_call_operand.hbm [shape: bf16[640,512], index: 1, kind: input, shape index: {}]   ;;  %s14091_s2 = inlined_call_operand.hbm [shape: f32[1,512], index: 2, kind: input, shape index: {}]   ;;  %s14092_s3 = inlined_call_operand.hbm [shape: bf16[512,256], index: 3, kind: input, shape index: {}]   ;;  %s14093_s4 = inlined_call_operand.hbm [shape: f32[1,256], index: 4, kind: input, shape index: {}]   ;;  %s14094_s5 = inlined_call_operand.hbm [shape: bf16[256,9984], index: 5, kind: input, shape index: {}]   ;;  %s14095_s6 = inlined_call_operand.hbm [shape: f32[1,9984], index: 6, kind: input, shape index: {}]   ;;  %s14096_s7 = inlined_call_operand.vmem [shape: f32[16,9984], index: 7, kind: output, shape index: {}]  }
   0x1   :  { %14100 = sst [smem:[#allocation19_spill]] %s14090_s1 }
   0x2   :  { %14101 = sst [smem:[#allocation20_spill]] %s14091_s2 }
   0x3   :  { %14102 = sst [smem:[#allocation21_spill]] %s14094_s5 }
   0x4   :  { %12 = vsyncpa [#allocation4], 0 }
   0x5   :  { %13 = vsyncpa [#allocation6], 0 }
   0x6   :  { %14 = vsyncpa [#allocation9], 0  ;;  %s12222_s24 = smov 0   ;;  %s12224_s25 = smov 0  }
   0x7   :  { %s12226_s26 = smov 0   ;;  %s12228_s27 = smov 0  }
   0x8 LB: > { %s12241_s28 = sadd.s32 4294967295, %s12169_s27   ;;  %s12244_s29 = sadd.s32 1, %s12169_s27   ;;  %s12169_s27 = sphi %s12228_s27, %s14116_s27   ;;  %s12165_s26 = sphi %s12226_s26, %s14120_s26   ;;  %s12161_s25 = sphi %s12224_s25, %s14119_s25   ;;  %s12157_s24 = sphi %s12222_s24, %s14118_s24  }
   0x9   : > { %14103 = sst [smem:[#allocation17_spill]] %s12244_s29  ;;  %s129_s30 = ssub.s32 %s12169_s27, %s12244_s29 }
   0xa   : > { %s132_s8 = sadd.s32 1, %s12165_s26  ;;  %p130_p0 = scmp.eq.s32.totalorder %s129_s30, 0 }
   0xb   : > { %p139_p1 = scmp.ne.s32.totalorder %s12165_s26, %s12161_s25  ;;  %p140_p2 = scmp.eq.s32.totalorder %s12169_s27, 0 }
   0xc   : > { %p145_p3 = scmp.ne.s32.totalorder %s12161_s25, %s12157_s24  ;;  %p146_p5 = scmp.eq.s32.totalorder %s12241_s28, 0 }
   0xd   : > { %s12254_s9 = scalar_select %p130_p0, %s12165_s26, %s132_s8  }
   0xe   : > { %p12256_p4 = por %p140_p2, %p139_p1  ;;  %p195_p6 = scmp.eq.s32.totalorder %s12241_s28, 1 }
   0xf   : > { %14104 = sst [smem:[#allocation18_spill]] %s12254_s9  ;;  %p7550_p7 = scmp.ge.s32.totalorder %s12169_s27, 1 }
  0x10   : > { %p12265_p8 = por %p146_p5, %p145_p3  ;;  %p208_p9 = scmp.lt.s32.totalorder %s12169_s27, 3 }
  0x11   : > { %p12270_p10 = por %p195_p6, %p139_p1  ;;  %s14109_s1 = sld [smem:[#allocation19_spill]] }
  0x12   : > { %p12275_p12 = pnand %p7550_p7, %p208_p9  ;;  %s12171_s17 = smov [#allocation3]  }
  0x13   : > { %s224_s18 = sshll.u32 %s12171_s17, 4  ;;  %p11892_p1 = scmp.lt.s32.totalorder %s12169_s27, 2  ;;  %s225_s18 = int_to_ptr.vmem [resolvable:$true] %s224_s18 }
  0x14   : > { %p11868_p13 = pneg %p12275_p12  ;;  %s14111_s2 = sld [smem:[#allocation20_spill]] }
  0x15   : > { %s12172_s23 = smov 256   ;;  %s12173_s24 = smov 16  }
  0x16   : > { %p12286_p0 = pnand %p11868_p13, %p146_p5  ;;  %p12298_p2 = pnand %p11892_p1, %p12256_p4 }
  0x17   : > { %s222_s16 = sshll.u32 %s14109_s1, 4  ;;  %s276_s8 = sand.u32 1, %s12169_s27   ;;  %s223_s16 = int_to_ptr.hbm [resolvable:$true] %s222_s16 }
  0x18   : > { %11871 = dma.hbm_to_vmem [thread:$0]  (!%p12286_p0), %s223_s16, 20480, %s225_s18, [#allocation4], %s12172_s23, %s12172_s23, %s12173_s24  }
  0x19   : > { %s12174_s14 = smov [#allocation5]   ;;  %s14097_s17 = sand.u32 1, %s12165_s26  }
  0x1a   : > { %s237_s22 = sshll.u32 %s14111_s2, 4  ;;  %s239_s15 = sshll.u32 %s12174_s14, 4  ;;  %s238_s22 = int_to_ptr.hbm [resolvable:$true] %s237_s22  ;;  %s240_s15 = int_to_ptr.vmem [resolvable:$true] %s239_s15 }
  0x1b   : > { %11874 = dma.hbm_to_vmem [thread:$0]  (!%p12286_p0), %s238_s22, 64, %s240_s15, [#allocation6]  }
  0x1c   : > { %s10986_s20 = smul.u32 156, %s12169_s27  ;;  %s14113_s5 = sld [smem:[#allocation21_spill]] }
  0x1d   : > { %s11843_s21 = smul.u32 4992, %s14097_s17  ;;  %s12312_s2 = scalar_lea.sflag [#allocation4], %s276_s8 }
  0x1e   : > { %p12007_p4 = pneg %p12298_p2 }
  0x1f   : > { %s280_s23 = scalar_lea.vmem [#allocation10], %s11843_s21 }
  0x20   : > { %s288_s24 = sshll.u32 %s280_s23, 4  ;;  %s289_s24 = int_to_ptr.vmem [resolvable:$true] %s288_s24 }
  0x22   : > { %s285_s10 = scalar_lea.hbm %s14113_s5, %s10986_s20  ;;  %s12010_s15 = scalar_lea.hbm %s14113_s5, 9984 }
  0x23   : > { %s286_s18 = sshll.u32 %s285_s10, 4  ;;  %s287_s18 = int_to_ptr.hbm [resolvable:$true] %s286_s18 }
  0x24   : > { %s12003_s14 = sshra.s32 %s287_s18, 4  ;;  %s12004_s14 = int_to_ptr.hbm [resolvable:$true] %s12003_s14 }
  0x25   : > { %s12005_s9 = scalar_lea.hbm %s12004_s14, 4992  ;;  %p12011_p9 = scmp.lt.s32.totalorder %s12004_s14, %s14113_s5 }
  0x26   : > { %p12006_p3 = scmp.ne.s32.totalorder %s12004_s14, %s12005_s9  ;;  %p12012_p13 = scmp.lt.s32.totalorder %s12010_s15, %s12005_s9 }
  0x28   : > { %p12008_p6 = pnand %p12007_p4, %p12006_p3  ;;  %p12013_p1 = por %p12012_p13, %p12011_p9 }
  0x2a   : > { %p12009_p7 = pneg %p12008_p6 }
  0x2c   : > { %p12014_p11 = pnand %p12013_p1, %p12009_p7 }
  0x2e   : > { %12017 = shalt.err (!%p12014_p11)
}
  0x2f   : > { %s12175_s8 = smov 4992   ;;  %s12176_s16 = smov 2496  }
  0x30   : > { %s12177_s10 = smov 156   ;;  %s248_s1 = sshll.u32 %s14092_s3, 4  ;;  %s249_s1 = int_to_ptr.hbm [resolvable:$true] %s248_s1 }
  0x31   : > { %11884 = dma.hbm_to_vmem [thread:$0]  (!%p12298_p2), %s287_s18, 79872, %s289_s24, %s12312_s2, %s12175_s8, %s12176_s16, %s12177_s10  }
  0x32   : > { %s12178_s9 = smov [#allocation7]   ;;  %s263_s21 = sshll.u32 %s14093_s4, 4  ;;  %s264_s21 = int_to_ptr.hbm [resolvable:$true] %s263_s21 }
  0x33   : > { %s250_s14 = sshll.u32 %s12178_s9, 4  ;;  %s12179_s17 = smov 128   ;;  %s251_s14 = int_to_ptr.vmem [resolvable:$true] %s250_s14 }
  0x34   : > { %s12180_s5 = smov 8   ;;  %s12181_s29 = smov [#allocation8]  }
  0x35   : > { %11877 = dma.hbm_to_vmem [thread:$0]  (!%p12286_p0), %s249_s1, 8192, %s251_s14, [#allocation6], %s12179_s17, %s12179_s17, %s12180_s5  }
  0x36   : > { %s265_s18 = sshll.u32 %s12181_s29, 4  ;;  %s14114_s24 = sand.u32 1, %s12165_s26   ;;  %s266_s18 = int_to_ptr.vmem [resolvable:$true] %s265_s18 }
  0x37   : > { %s11844_s8 = smul.u32 39, %s14114_s24  ;;  %s12100_s19 = scalar_lea.hbm %s14095_s6, 78 }
  0x38   : > { %s303_s16 = smul.u32 39, %s12169_s27 }
  0x39   : > { %11880 = dma.hbm_to_vmem [thread:$0]  (!%p12286_p0), %s264_s21, 32, %s266_s18, [#allocation9]  }
  0x3a   : > { %s306_s22 = scalar_lea.hbm %s14095_s6, %s303_s16  ;;  %s302_s15 = scalar_lea.vmem [#allocation11], %s11844_s8 }
  0x3b   : > { %s308_s9 = sshll.u32 %s306_s22, 4  ;;  %s310_s20 = sshll.u32 %s302_s15, 4  ;;  %s309_s9 = int_to_ptr.hbm [resolvable:$true] %s308_s9  ;;  %s311_s20 = int_to_ptr.vmem [resolvable:$true] %s310_s20 }
  0x3c   : > { %s12093_s5 = sshra.s32 %s309_s9, 4  ;;  %s12094_s5 = int_to_ptr.hbm [resolvable:$true] %s12093_s5 }
  0x3d   : > { %s12095_s17 = scalar_lea.hbm %s12094_s5, 39  ;;  %p12101_p0 = scmp.lt.s32.totalorder %s12094_s5, %s14095_s6 }
  0x3e   : > { %p12096_p11 = scmp.ne.s32.totalorder %s12094_s5, %s12095_s17  ;;  %p12102_p7 = scmp.lt.s32.totalorder %s12100_s19, %s12095_s17 }
  0x40   : > { %p12098_p3 = pnand %p12096_p11, %p12007_p4  ;;  %p12103_p9 = por %p12102_p7, %p12101_p0 }
  0x42   : > { %p12099_p6 = pneg %p12098_p3 }
  0x44   : > { %p12104_p13 = pnand %p12103_p9, %p12099_p6 }
  0x46   : > { %12107 = shalt.err (!%p12104_p13)
}
  0x47   : > { %11887 = dma.hbm_to_vmem [thread:$0]  (!%p12298_p2), %s309_s9, 624, %s311_s20, %s12312_s2  }
  0x48   : > { %319 = sbr.rel (%p12275_p12) target bundleno = 1358 (0x54e), region = 48 }
  0x4d   : > { %12140 = dma.done.wait (%p146_p5), [#allocation4], 20480  }
  0x4e   : > { %12142 = vsyncadd (%p146_p5), [#allocation4], 4294946816 }
  0x4f   : > { %12144 = dma.done.wait (%p146_p5), [#allocation6], 8256  }
  0x50   : > { %12146 = vsyncadd (%p146_p5), [#allocation6], 4294959040 }
  0x51   : > { %12148 = dma.done.wait (%p146_p5), [#allocation9], 32  }
  0x52   : > { %12150 = vsyncadd (%p146_p5), [#allocation9], 4294967264  ;;  %s341_s2 = sand.u32 1, %s12241_s28   ;;  %s343_s13 = sand.u32 1, %s12161_s25  }
  0x53   : > { %s11845_s30 = smul.u32 4992, %s343_s13  ;;  %s342_s21 = scalar_lea.sflag [#allocation4], %s341_s2 }
  0x55   : > { %s12372_s18 = scalar_lea.vmem [#allocation10], %s11845_s30 }
  0x56   : > { %12152 = dma.done.wait (%p12265_p8), %s342_s21, 80496  }
  0x57   : > { %12154 = vsyncadd (%p12265_p8), %s342_s21, 4294886800  ;;  %s11846_s24 = smul.u32 39, %s343_s13  ;;  %p14115_p5 = scmp.ne.s32.totalorder %s12241_s28, 0 }
  0x58   : > { %s11847_s8 = smul.u32 624, %s343_s13 }
  0x59   : > { %s12378_s16 = scalar_lea.vmem [#allocation11], %s11846_s24  ;;  %397 = sbr.rel (%p14115_p5) target bundleno = 569 (0x239), region = 76 }
  0x5a   : > { %s12380_s10 = scalar_lea.vmem [#allocation12], %s11847_s8 }
  0x5e   : > { %v7697_v0 = vld [vmem:[#allocation3 + $0xe0] sm:$0xf]  ;;  %v11022_v1 = vld [vmem:[#allocation3 + $0xec] sm:$0xf0] }
  0x5f   : > { %v7825_v2 = vld [vmem:[#allocation3 + $0x1e0] sm:$0xf]  ;;  %v7698_v3 = vor.u32 %v11022_v1, %v7697_v0  ;;  %v11054_v4 = vld [vmem:[#allocation3 + $0x1ec] sm:$0xf0] }
  0x60   : > { %v7953_v5 = vld [vmem:[#allocation3 + $0x2e0] sm:$0xf]  ;;  %v11086_v6 = vld [vmem:[#allocation3 + $0x2ec] sm:$0xf0]  ;;  %v7826_v7 = vor.u32 %v11054_v4, %v7825_v2 }
  0x61   : > { %v7954_v8 = vor.u32 %v11086_v6, %v7953_v5  ;;  %v8081_v9 = vld [vmem:[#allocation3 + $0x3e0] sm:$0xf]  ;;  %v11118_v10 = vld [vmem:[#allocation3 + $0x3ec] sm:$0xf0]  ;;  %1400 = vmatpush.bf16.msra.mxu0 %v7698_v3 }
  0x62   : > { %v7681_v11 = vld [vmem:[#allocation3 + $0xc0] sm:$0xf]  ;;  %v8082_v12 = vor.u32 %v11118_v10, %v8081_v9  ;;  %v11018_v13 = vld [vmem:[#allocation3 + $0xcc] sm:$0xf0]  ;;  %1414 = vmatpush.bf16.msra.mxu1 %v7826_v7 }
  0x63   : > { %v7809_v14 = vld [vmem:[#allocation3 + $0x1c0] sm:$0xf]  ;;  %v11050_v15 = vld [vmem:[#allocation3 + $0x1cc] sm:$0xf0]  ;;  %1428 = vmatpush.bf16.msra.mxu2 %v7954_v8  ;;  %v7682_v16 = vor.u32 %v11018_v13, %v7681_v11 }
  0x64   : > { %v7810_v17 = vor.u32 %v11050_v15, %v7809_v14  ;;  %v7937_v18 = vld [vmem:[#allocation3 + $0x2c0] sm:$0xf]  ;;  %v11082_v19 = vld [vmem:[#allocation3 + $0x2cc] sm:$0xf0]  ;;  %1442 = vmatpush.bf16.msra.mxu3 %v8082_v12 }
  0x65   : > { %v8065_v20 = vld [vmem:[#allocation3 + $0x3c0] sm:$0xf]  ;;  %v7938_v21 = vor.u32 %v11082_v19, %v7937_v18  ;;  %v11114_v22 = vld [vmem:[#allocation3 + $0x3cc] sm:$0xf0]  ;;  %1401 = vmatpush.bf16.msra.mxu0 %v7682_v16 }
  0x66   : > { %v7665_v23 = vld [vmem:[#allocation3 + $0xa0] sm:$0xf]  ;;  %v11014_v24 = vld [vmem:[#allocation3 + $0xac] sm:$0xf0]  ;;  %v8066_v25 = vor.u32 %v11114_v22, %v8065_v20  ;;  %1415 = vmatpush.bf16.msra.mxu1 %v7810_v17 }
  0x67   : > { %v7793_v26 = vld [vmem:[#allocation3 + $0x1a0] sm:$0xf]  ;;  %v11046_v27 = vld [vmem:[#allocation3 + $0x1ac] sm:$0xf0]  ;;  %v7666_v29 = vor.u32 %v11014_v24, %v7665_v23  ;;  %1429 = vmatpush.bf16.msra.mxu2 %v7938_v21 }
  0x68   : > { %v7921_v28 = vld [vmem:[#allocation3 + $0x2a0] sm:$0xf]  ;;  %v11078_v30 = vld [vmem:[#allocation3 + $0x2ac] sm:$0xf0]  ;;  %v7794_v33 = vor.u32 %v11046_v27, %v7793_v26  ;;  %1443 = vmatpush.bf16.msra.mxu3 %v8066_v25 }
  0x69   : > { %v8049_v31 = vld [vmem:[#allocation3 + $0x3a0] sm:$0xf]  ;;  %v11110_v32 = vld [vmem:[#allocation3 + $0x3ac] sm:$0xf0]  ;;  %v7922_v34 = vor.u32 %v11078_v30, %v7921_v28  ;;  %1402 = vmatpush.bf16.msra.mxu0 %v7666_v29  ;;  %v11020_v30 = vld [vmem:[#allocation3 + $0xe4] sm:$0xf] }
  0x6a   : > { %v7649_v35 = vld [vmem:[#allocation3 + $0x80] sm:$0xf]  ;;  %v11010_v36 = vld [vmem:[#allocation3 + $0x8c] sm:$0xf0]  ;;  %v8050_v38 = vor.u32 %v11110_v32, %v8049_v31  ;;  %1416 = vmatpush.bf16.msra.mxu1 %v7794_v33  ;;  %v7699_v32 = vld [vmem:[#allocation3 + $0xf0] sm:$0xf0] }
  0x6b   : > { %v7777_v37 = vld [vmem:[#allocation3 + $0x180] sm:$0xf]  ;;  %v11042_v39 = vld [vmem:[#allocation3 + $0x18c] sm:$0xf0]  ;;  %v7650_v44 = vor.u32 %v11010_v36, %v7649_v35  ;;  %1430 = vmatpush.bf16.msra.mxu2 %v7922_v34  ;;  %v11052_v33 = vld [vmem:[#allocation3 + $0x1e4] sm:$0xf] }
  0x6c   : > { %v7905_v40 = vld [vmem:[#allocation3 + $0x280] sm:$0xf]  ;;  %v11074_v41 = vld [vmem:[#allocation3 + $0x28c] sm:$0xf0]  ;;  %v7778_v45 = vor.u32 %v11042_v39, %v7777_v37  ;;  %1444 = vmatpush.bf16.msra.mxu3 %v8050_v38  ;;  %v7827_v34 = vld [vmem:[#allocation3 + $0x1f0] sm:$0xf0] }
  0x6d   : > { %v8033_v42 = vld [vmem:[#allocation3 + $0x380] sm:$0xf]  ;;  %v11106_v43 = vld [vmem:[#allocation3 + $0x38c] sm:$0xf0]  ;;  %v7906_v46 = vor.u32 %v11074_v41, %v7905_v40  ;;  %1403 = vmatpush.bf16.msra.mxu0 %v7650_v44  ;;  %v11084_v37 = vld [vmem:[#allocation3 + $0x2e4] sm:$0xf] }
  0x6e   : > { %v7633_v47 = vld [vmem:[#allocation3 + $0x60] sm:$0xf]  ;;  %v11006_v48 = vld [vmem:[#allocation3 + $0x6c] sm:$0xf0]  ;;  %v8034_v50 = vor.u32 %v11106_v43, %v8033_v42  ;;  %1417 = vmatpush.bf16.msra.mxu1 %v7778_v45  ;;  %v7955_v38 = vld [vmem:[#allocation3 + $0x2f0] sm:$0xf0]  ;;  %v7702_v42 = vor.u32 %v11020_v30, %v7699_v32  ;;  %v7830_v43 = vor.u32 %v11052_v33, %v7827_v34 }
  0x6f   : > { %v7761_v49 = vld [vmem:[#allocation3 + $0x160] sm:$0xf]  ;;  %v11038_v51 = vld [vmem:[#allocation3 + $0x16c] sm:$0xf0]  ;;  %v7634_v56 = vor.u32 %v11006_v48, %v7633_v47  ;;  %1431 = vmatpush.bf16.msra.mxu2 %v7906_v46  ;;  %v11016_v45 = vld [vmem:[#allocation3 + $0xc4] sm:$0xf]  ;;  %v7958_v47 = vor.u32 %v11084_v37, %v7955_v38 }
  0x70   : > { %v7889_v52 = vld [vmem:[#allocation3 + $0x260] sm:$0xf]  ;;  %v11070_v53 = vld [vmem:[#allocation3 + $0x26c] sm:$0xf0]  ;;  %v7762_v57 = vor.u32 %v11038_v51, %v7761_v49  ;;  %1445 = vmatpush.bf16.msra.mxu3 %v8034_v50  ;;  %v7683_v46 = vld [vmem:[#allocation3 + $0xd0] sm:$0xf0] }
  0x71   : > { %v8017_v54 = vld [vmem:[#allocation3 + $0x360] sm:$0xf]  ;;  %v11102_v55 = vld [vmem:[#allocation3 + $0x36c] sm:$0xf0]  ;;  %v7890_v58 = vor.u32 %v11070_v53, %v7889_v52  ;;  %1404 = vmatpush.bf16.msra.mxu0 %v7634_v56  ;;  %v11048_v48 = vld [vmem:[#allocation3 + $0x1c4] sm:$0xf]  ;;  %v7686_v56 = vor.u32 %v11016_v45, %v7683_v46 }
  0x72   : > { %v7617_v59 = vld [vmem:[#allocation3 + $0x40] sm:$0xf]  ;;  %v11002_v60 = vld [vmem:[#allocation3 + $0x4c] sm:$0xf0]  ;;  %v8018_v62 = vor.u32 %v11102_v55, %v8017_v54  ;;  %1418 = vmatpush.bf16.msra.mxu1 %v7762_v57  ;;  %v7811_v49 = vld [vmem:[#allocation3 + $0x1d0] sm:$0xf0] }
  0x73   : > { %v7745_v61 = vld [vmem:[#allocation3 + $0x140] sm:$0xf]  ;;  %v11034_v63 = vld [vmem:[#allocation3 + $0x14c] sm:$0xf0]  ;;  %v7618_v4 = vor.u32 %v11002_v60, %v7617_v59  ;;  %1432 = vmatpush.bf16.msra.mxu2 %v7890_v58  ;;  %v11080_v50 = vld [vmem:[#allocation3 + $0x2c4] sm:$0xf]  ;;  %v7814_v57 = vor.u32 %v11048_v48, %v7811_v49 }
  0x74   : > { %v7873_v0 = vld [vmem:[#allocation3 + $0x240] sm:$0xf]  ;;  %v11066_v1 = vld [vmem:[#allocation3 + $0x24c] sm:$0xf0]  ;;  %v7746_v5 = vor.u32 %v11034_v63, %v7745_v61  ;;  %1446 = vmatpush.bf16.msra.mxu3 %v8018_v62  ;;  %v7939_v51 = vld [vmem:[#allocation3 + $0x2d0] sm:$0xf0] }
  0x75   : > { %v8001_v2 = vld [vmem:[#allocation3 + $0x340] sm:$0xf]  ;;  %v11098_v3 = vld [vmem:[#allocation3 + $0x34c] sm:$0xf0]  ;;  %v7874_v6 = vor.u32 %v11066_v1, %v7873_v0  ;;  %1405 = vmatpush.bf16.msra.mxu0 %v7618_v4  ;;  %v10989_v53 = vld [vmem:[%s14089_s0 + $0x10] sm:$0xf0]  ;;  %v7942_v61 = vor.u32 %v11080_v50, %v7939_v51 }
  0x76   : > { %v7601_v7 = vld [vmem:[#allocation3 + $0x20] sm:$0xf]  ;;  %v10998_v8 = vld [vmem:[#allocation3 + $0x2c] sm:$0xf0]  ;;  %v8002_v10 = vor.u32 %v11098_v3, %v8001_v2  ;;  %1419 = vmatpush.bf16.msra.mxu1 %v7746_v5  ;;  %v11012_v60 = vld [vmem:[#allocation3 + $0xa4] sm:$0xf] }
  0x77   : > { %v7729_v9 = vld [vmem:[#allocation3 + $0x120] sm:$0xf]  ;;  %v11030_v11 = vld [vmem:[#allocation3 + $0x12c] sm:$0xf0]  ;;  %v7602_v16 = vor.u32 %v10998_v8, %v7601_v7  ;;  %1433 = vmatpush.bf16.msra.mxu2 %v7874_v6  ;;  %v7667_v62 = vld [vmem:[#allocation3 + $0xb0] sm:$0xf0] }
  0x78   : > { %v7857_v12 = vld [vmem:[#allocation3 + $0x220] sm:$0xf]  ;;  %v11062_v13 = vld [vmem:[#allocation3 + $0x22c] sm:$0xf0]  ;;  %v7730_v19 = vor.u32 %v11030_v11, %v7729_v9  ;;  %1447 = vmatpush.bf16.msra.mxu3 %v8002_v10  ;;  %v11044_v63 = vld [vmem:[#allocation3 + $0x1a4] sm:$0xf]  ;;  %v7670_v8 = vor.u32 %v11012_v60, %v7667_v62 }
  0x79   : > { %v7985_v14 = vld [vmem:[#allocation3 + $0x320] sm:$0xf]  ;;  %v11094_v15 = vld [vmem:[#allocation3 + $0x32c] sm:$0xf0]  ;;  %v7858_v20 = vor.u32 %v11062_v13, %v7857_v12  ;;  %1406 = vmatpush.bf16.msra.mxu0 %v7602_v16  ;;  %v7795_v0 = vld [vmem:[#allocation3 + $0x1b0] sm:$0xf0] }
  0x7a   : > { %v7585_v17 = vld [vmem:[#allocation3] sm:$0xf]  ;;  %v10994_v18 = vld [vmem:[#allocation3 + $0xc] sm:$0xf0]  ;;  %v7986_v24 = vor.u32 %v11094_v15, %v7985_v14  ;;  %1420 = vmatpush.bf16.msra.mxu1 %v7730_v19  ;;  %v11076_v1 = vld [vmem:[#allocation3 + $0x2a4] sm:$0xf]  ;;  %v7798_v9 = vor.u32 %v11044_v63, %v7795_v0 }
  0x7b   : > { %v7713_v21 = vld [vmem:[#allocation3 + $0x100] sm:$0xf]  ;;  %v11026_v22 = vld [vmem:[#allocation3 + $0x10c] sm:$0xf0]  ;;  %v7586_v31 = vor.u32 %v10994_v18, %v7585_v17  ;;  %1434 = vmatpush.bf16.msra.mxu2 %v7858_v20  ;;  %v7923_v2 = vld [vmem:[#allocation3 + $0x2b0] sm:$0xf0] }
  0x7c   : > { %v7841_v23 = vld [vmem:[#allocation3 + $0x200] sm:$0xf]  ;;  %v11058_v25 = vld [vmem:[#allocation3 + $0x20c] sm:$0xf0]  ;;  %v7714_v35 = vor.u32 %v11026_v22, %v7713_v21  ;;  %1448 = vmatpush.bf16.msra.mxu3 %v7986_v24  ;;  %v11008_v6 = vld [vmem:[#allocation3 + $0x84] sm:$0xf]  ;;  %v7926_v13 = vor.u32 %v11076_v1, %v7923_v2 }
  0x7d   : > { %v7969_v26 = vld [vmem:[#allocation3 + $0x300] sm:$0xf]  ;;  %v11090_v27 = vld [vmem:[#allocation3 + $0x30c] sm:$0xf0]  ;;  %v7842_v36 = vor.u32 %v11058_v25, %v7841_v23  ;;  %1407 = vmatpush.bf16.msra.mxu0 %v7586_v31  ;;  %v7651_v7 = vld [vmem:[#allocation3 + $0x90] sm:$0xf0] }
  0x7e   : > { %v8209_v28 = vld [vmem:[#allocation3 + $0x4e0] sm:$0xf]  ;;  %v11150_v29 = vld [vmem:[#allocation3 + $0x4ec] sm:$0xf0]  ;;  %v7970_v39 = vor.u32 %v11090_v27, %v7969_v26  ;;  %1421 = vmatpush.bf16.msra.mxu1 %v7714_v35  ;;  %v7573_v10 = vld [vmem:[%s14089_s0 + $0x8] sm:$0xf]  ;;  %v7654_v24 = vor.u32 %v11008_v6, %v7651_v7 }
  0x7f   : > { %v8210_v40 = vor.u32 %v11150_v29, %v8209_v28  ;;  %v8193_v41 = vld [vmem:[#allocation3 + $0x4c0] sm:$0xf]  ;;  %v11146_v44 = vld [vmem:[#allocation3 + $0x4cc] sm:$0xf0]  ;;  %1435 = vmatpush.bf16.msra.mxu2 %v7842_v36  ;;  %v10990_v11 = vld [vmem:[%s14089_s0 + $0x18] sm:$0xf0] }
  0x80   : > { %v7565_v52 = vld [vmem:[%s14089_s0] sm:$0xf]  ;;  %1449 = vmatpush.bf16.msra.mxu3 %v7970_v39  ;;  %v8194_v54 = vor.u32 %v11146_v44, %v8193_v41  ;;  %v8177_v58 = vld [vmem:[#allocation3 + $0x4a0] sm:$0xf]  ;;  %v10988_v12 = vld [vmem:[%s14089_s0 + $0xc] sm:$0xf]  ;;  %v12402_v16 = vor.u32 %v10990_v11, %v7573_v10 }
  0x81   : > { %1456 = vmatpush.bf16.msrb.mxu0 %v8210_v40  ;;  %v12390_v55 = vor.u32 %v10989_v53, %v7565_v52  ;;  %v11142_v59 = vld [vmem:[#allocation3 + $0x4ac] sm:$0xf0]  ;;  %v8161_v3 = vld [vmem:[#allocation3 + $0x480] sm:$0xf]  ;;  %v11040_v14 = vld [vmem:[#allocation3 + $0x184] sm:$0xf] }
  0x82   : > { %1470 = vmatpush.bf16.msrb.mxu1 %v7702_v42  ;;  %v8178_v4 = vor.u32 %v11142_v59, %v8177_v58  ;;  %v11138_v5 = vld [vmem:[#allocation3 + $0x48c] sm:$0xf0]  ;;  %v7779_v15 = vld [vmem:[#allocation3 + $0x190] sm:$0xf0]  ;;  %v11072_v18 = vld [vmem:[#allocation3 + $0x284] sm:$0xf]  ;;  %1436 = vmatmul.bf16.vlgmr.msra.gmra.mxu2 %v12402_v16 }
  0x83   : > { %1484 = vmatpush.bf16.msrb.mxu2 %v7830_v43  ;;  %1408 = vmatmul.bf16.vlgmr.msra.gmra.mxu0 %v12390_v55  ;;  %v7575_v17 = vld [vmem:[%s14089_s0 + $0x1c] sm:$0xf0]  ;;  %v7907_v19 = vld [vmem:[#allocation3 + $0x290] sm:$0xf0]  ;;  %v8162_v21 = vor.u32 %v11138_v5, %v8161_v3  ;;  %v8145_v22 = vld [vmem:[#allocation3 + $0x460] sm:$0xf]  ;;  %v7782_v25 = vor.u32 %v11040_v14, %v7779_v15 }
  0x84   : > { %1498 = vmatpush.bf16.msrb.mxu3 %v7958_v47  ;;  %v12407_v20 = vor.u32 %v10988_v12, %v7575_v17  ;;  %v11134_v23 = vld [vmem:[#allocation3 + $0x46c] sm:$0xf0]  ;;  %v11004_v26 = vld [vmem:[#allocation3 + $0x64] sm:$0xf]  ;;  %v10987_v27 = vld [vmem:[%s14089_s0 + $0x4] sm:$0xf]  ;;  %v7910_v29 = vor.u32 %v11072_v18, %v7907_v19 }
  0x85   : > { %1457 = vmatpush.bf16.msrb.mxu0 %v8194_v54  ;;  %v7567_v28 = vld [vmem:[%s14089_s0 + $0x14] sm:$0xf0]  ;;  %v7635_v30 = vld [vmem:[#allocation3 + $0x70] sm:$0xf0]  ;;  %v11036_v31 = vld [vmem:[#allocation3 + $0x164] sm:$0xf]  ;;  %v8146_v36 = vor.u32 %v11134_v23, %v8145_v22 }
  0x86   : > { %1471 = vmatpush.bf16.msrb.mxu1 %v7686_v56  ;;  %v7763_v32 = vld [vmem:[#allocation3 + $0x170] sm:$0xf0]  ;;  %v12416_v33 = vor.u32 %v10987_v27, %v7567_v28  ;;  %v11068_v34 = vld [vmem:[#allocation3 + $0x264] sm:$0xf]  ;;  %1450 = vmatmul.bf16.vlgmr.msra.gmra.mxu3 %v12407_v20  ;;  %v7638_v37 = vor.u32 %v11004_v26, %v7635_v30  ;;  %v8129_v39 = vld [vmem:[#allocation3 + $0x440] sm:$0xf] }
  0x87   : > { %1485 = vmatpush.bf16.msrb.mxu2 %v7814_v57  ;;  %v7891_v35 = vld [vmem:[#allocation3 + $0x270] sm:$0xf0]  ;;  %v7766_v38 = vor.u32 %v11036_v31, %v7763_v32  ;;  %v11130_v40 = vld [vmem:[#allocation3 + $0x44c] sm:$0xf0]  ;;  %v11000_v41 = vld [vmem:[#allocation3 + $0x44] sm:$0xf] }
  0x88   : > { %1499 = vmatpush.bf16.msrb.mxu3 %v7942_v61  ;;  %1422 = vmatmul.bf16.vlgmr.msra.gmra.mxu1 %v12416_v33  ;;  %v7894_v42 = vor.u32 %v11068_v34, %v7891_v35  ;;  %v7619_v43 = vld [vmem:[#allocation3 + $0x50] sm:$0xf0]  ;;  %v11032_v44 = vld [vmem:[#allocation3 + $0x144] sm:$0xf]  ;;  %v8130_v48 = vor.u32 %v11130_v40, %v8129_v39  ;;  %v8113_v51 = vld [vmem:[#allocation3 + $0x420] sm:$0xf] }
  0x89   : > { %1458 = vmatpush.bf16.msrb.mxu0 %v8178_v4  ;;  %v7747_v45 = vld [vmem:[#allocation3 + $0x150] sm:$0xf0]  ;;  %v11064_v46 = vld [vmem:[#allocation3 + $0x244] sm:$0xf]  ;;  %v7622_v49 = vor.u32 %v11000_v41, %v7619_v43  ;;  %v11126_v52 = vld [vmem:[#allocation3 + $0x42c] sm:$0xf0] }
  0x8a   : > { %1472 = vmatpush.bf16.msrb.mxu1 %v7670_v8  ;;  %v7875_v47 = vld [vmem:[#allocation3 + $0x250] sm:$0xf0]  ;;  %v7750_v50 = vor.u32 %v11032_v44, %v7747_v45  ;;  %v10996_v53 = vld [vmem:[#allocation3 + $0x24] sm:$0xf]  ;;  %v8114_v61 = vor.u32 %v11126_v52, %v8113_v51  ;;  %v8097_v62 = vld [vmem:[#allocation3 + $0x400] sm:$0xf] }
  0x8b   : > { %1486 = vmatpush.bf16.msrb.mxu2 %v7798_v9  ;;  %v7878_v54 = vor.u32 %v11064_v46, %v7875_v47  ;;  %v7603_v56 = vld [vmem:[#allocation3 + $0x30] sm:$0xf0]  ;;  %v11028_v57 = vld [vmem:[#allocation3 + $0x124] sm:$0xf]  ;;  %v11122_v63 = vld [vmem:[#allocation3 + $0x40c] sm:$0xf0] }
  0x8c   : > { %1500 = vmatpush.bf16.msrb.mxu3 %v7926_v13  ;;  %v7731_v58 = vld [vmem:[#allocation3 + $0x130] sm:$0xf0]  ;;  %v11060_v59 = vld [vmem:[#allocation3 + $0x224] sm:$0xf]  ;;  %v7606_v1 = vor.u32 %v10996_v53, %v7603_v56  ;;  %v8098_v13 = vor.u32 %v11122_v63, %v8097_v62  ;;  %v7705_v14 = vld [vmem:[#allocation3 + $0xe8] sm:$0xf] }
  0x8d   : > { %1459 = vmatpush.bf16.msrb.mxu0 %v8162_v21  ;;  %v7859_v60 = vld [vmem:[#allocation3 + $0x230] sm:$0xf0]  ;;  %v10992_v0 = vld [vmem:[#allocation3 + $0x4] sm:$0xf]  ;;  %v7734_v2 = vor.u32 %v11028_v57, %v7731_v58  ;;  %v11023_v15 = vld [vmem:[#allocation3 + $0xf4] sm:$0xf0] }
  0x8e   : > { %1473 = vmatpush.bf16.msrb.mxu1 %v7654_v24  ;;  %v7587_v3 = vld [vmem:[#allocation3 + $0x10] sm:$0xf0]  ;;  %v11024_v4 = vld [vmem:[#allocation3 + $0x104] sm:$0xf]  ;;  %v7862_v6 = vor.u32 %v11060_v59, %v7859_v60  ;;  %v7833_v17 = vld [vmem:[#allocation3 + $0x1e8] sm:$0xf]  ;;  %v7706_v27 = vor.u32 %v11023_v15, %v7705_v14 }
  0x8f   : > { %1487 = vmatpush.bf16.msrb.mxu2 %v7782_v25  ;;  %v7715_v5 = vld [vmem:[#allocation3 + $0x110] sm:$0xf0]  ;;  %v11056_v7 = vld [vmem:[#allocation3 + $0x204] sm:$0xf]  ;;  %v7590_v18 = vor.u32 %v10992_v0, %v7587_v3  ;;  %v11055_v21 = vld [vmem:[#allocation3 + $0x1f4] sm:$0xf0] }
  0x90   : > { %1501 = vmatpush.bf16.msrb.mxu3 %v7910_v29  ;;  %v7843_v8 = vld [vmem:[#allocation3 + $0x210] sm:$0xf0]  ;;  %v11116_v9 = vld [vmem:[#allocation3 + $0x3e4] sm:$0xf]  ;;  %v7718_v19 = vor.u32 %v11024_v4, %v7715_v5  ;;  %v7581_v22 = vld [vmem:[%s14089_s0 + $0x10] sm:$0xf]  ;;  %v7834_v31 = vor.u32 %v11055_v21, %v7833_v17 }
  0x91   : > { %1460 = vmatpush.bf16.msrb.mxu0 %v8146_v36  ;;  %v8083_v10 = vld [vmem:[#allocation3 + $0x3f0] sm:$0xf0]  ;;  %v11148_v11 = vld [vmem:[#allocation3 + $0x4e4] sm:$0xf]  ;;  %v7846_v24 = vor.u32 %v11056_v7, %v7843_v8  ;;  %v7689_v35 = vld [vmem:[#allocation3 + $0xc8] sm:$0xf] }
  0x92   : > { %1474 = vmatpush.bf16.msrb.mxu1 %v7638_v37  ;;  %v8211_v12 = vld [vmem:[#allocation3 + $0x4f0] sm:$0xf0]  ;;  %v8086_v25 = vor.u32 %v11116_v9, %v8083_v10  ;;  %v11112_v28 = vld [vmem:[#allocation3 + $0x3c4] sm:$0xf]  ;;  %v11019_v36 = vld [vmem:[#allocation3 + $0xd4] sm:$0xf0] }
  0x93   : > { %1488 = vmatpush.bf16.msrb.mxu2 %v7766_v38  ;;  %v10991_v23 = vld [vmem:[%s14089_s0 + $0x20] sm:$0xf0]  ;;  %v8214_v26 = vor.u32 %v11148_v11, %v8211_v12  ;;  %v11144_v30 = vld [vmem:[#allocation3 + $0x4c4] sm:$0xf]  ;;  %v7817_v37 = vld [vmem:[#allocation3 + $0x1c8] sm:$0xf]  ;;  %v7690_v41 = vor.u32 %v11019_v36, %v7689_v35 }
  0x94   : > { %1502 = vmatpush.bf16.msrb.mxu3 %v7894_v42  ;;  %v8067_v29 = vld [vmem:[#allocation3 + $0x3d0] sm:$0xf0]  ;;  %v12426_v32 = vor.u32 %v10991_v23, %v7581_v22  ;;  %v11051_v38 = vld [vmem:[#allocation3 + $0x1d4] sm:$0xf0]  ;;  %v11108_v42 = vld [vmem:[#allocation3 + $0x3a4] sm:$0xf] }
  0x95   : > { %1461 = vmatpush.bf16.msrb.mxu0 %v8130_v48  ;;  %v8195_v34 = vld [vmem:[#allocation3 + $0x4d0] sm:$0xf0]  ;;  %v8070_v39 = vor.u32 %v11112_v28, %v8067_v29  ;;  %v11140_v44 = vld [vmem:[#allocation3 + $0x4a4] sm:$0xf]  ;;  %v7818_v45 = vor.u32 %v11051_v38, %v7817_v37  ;;  %v7673_v47 = vld [vmem:[#allocation3 + $0xa8] sm:$0xf] }
  0x96   : > { %1475 = vmatpush.bf16.msrb.mxu1 %v7622_v49  ;;  %v8198_v40 = vor.u32 %v11144_v30, %v8195_v34  ;;  %v8051_v43 = vld [vmem:[#allocation3 + $0x3b0] sm:$0xf0]  ;;  %v11015_v48 = vld [vmem:[#allocation3 + $0xb4] sm:$0xf0]  ;;  %v7801_v49 = vld [vmem:[#allocation3 + $0x1a8] sm:$0xf] }
  0x97   : > { %1489 = vmatpush.bf16.msrb.mxu2 %v7750_v50  ;;  %v8179_v46 = vld [vmem:[#allocation3 + $0x4b0] sm:$0xf0]  ;;  %v11047_v50 = vld [vmem:[#allocation3 + $0x1b4] sm:$0xf0]  ;;  %v8054_v51 = vor.u32 %v11108_v42, %v8051_v43  ;;  %v7674_v53 = vor.u32 %v11015_v48, %v7673_v47  ;;  %v11136_v57 = vld [vmem:[#allocation3 + $0x484] sm:$0xf] }
  0x98   : > { %1503 = vmatpush.bf16.msrb.mxu3 %v7878_v54  ;;  %v8182_v52 = vor.u32 %v11140_v44, %v8179_v46  ;;  %v11104_v54 = vld [vmem:[#allocation3 + $0x384] sm:$0xf]  ;;  %v8035_v56 = vld [vmem:[#allocation3 + $0x390] sm:$0xf0]  ;;  %v7802_v58 = vor.u32 %v11047_v50, %v7801_v49  ;;  %v7657_v60 = vld [vmem:[#allocation3 + $0x88] sm:$0xf] }
  0x99   : > { %1462 = vmatpush.bf16.msrb.mxu0 %v8114_v61  ;;  %v8163_v59 = vld [vmem:[#allocation3 + $0x490] sm:$0xf0]  ;;  %v11011_v61 = vld [vmem:[#allocation3 + $0x94] sm:$0xf0]  ;;  %v7785_v62 = vld [vmem:[#allocation3 + $0x188] sm:$0xf]  ;;  %v8038_v0 = vor.u32 %v11104_v54, %v8035_v56 }
  0x9a   : > { %1476 = vmatpush.bf16.msrb.mxu1 %v7606_v1  ;;  %v11043_v63 = vld [vmem:[#allocation3 + $0x194] sm:$0xf0]  ;;  %v8166_v1 = vor.u32 %v11136_v57, %v8163_v59  ;;  %v11100_v3 = vld [vmem:[#allocation3 + $0x364] sm:$0xf]  ;;  %v8019_v4 = vld [vmem:[#allocation3 + $0x370] sm:$0xf0] }
  0x9b   : > { %1490 = vmatpush.bf16.msrb.mxu2 %v7734_v2  ;;  %v7658_v2 = vor.u32 %v11011_v61, %v7657_v60  ;;  %v11132_v5 = vld [vmem:[#allocation3 + $0x464] sm:$0xf]  ;;  %v8147_v7 = vld [vmem:[#allocation3 + $0x470] sm:$0xf0]  ;;  %v7641_v8 = vld [vmem:[#allocation3 + $0x68] sm:$0xf]  ;;  %v8022_v12 = vor.u32 %v11100_v3, %v8019_v4 }
  0x9c   : > { %1504 = vmatpush.bf16.msrb.mxu3 %v7862_v6  ;;  %v7786_v6 = vor.u32 %v11043_v63, %v7785_v62  ;;  %v11007_v9 = vld [vmem:[#allocation3 + $0x74] sm:$0xf0]  ;;  %v7769_v10 = vld [vmem:[#allocation3 + $0x168] sm:$0xf]  ;;  %v11096_v15 = vld [vmem:[#allocation3 + $0x344] sm:$0xf] }
  0x9d   : > { %1463 = vmatpush.bf16.msrb.mxu0 %v8098_v13  ;;  %v11039_v11 = vld [vmem:[#allocation3 + $0x174] sm:$0xf0]  ;;  %v8150_v13 = vor.u32 %v11132_v5, %v8147_v7  ;;  %v7642_v14 = vor.u32 %v11007_v9, %v7641_v8  ;;  %v8003_v17 = vld [vmem:[#allocation3 + $0x350] sm:$0xf0]  ;;  %v7625_v22 = vld [vmem:[#allocation3 + $0x48] sm:$0xf] }
  0x9e   : > { %1477 = vmatpush.bf16.msrb.mxu1 %v7590_v18  ;;  %v11128_v18 = vld [vmem:[#allocation3 + $0x444] sm:$0xf]  ;;  %v8131_v21 = vld [vmem:[#allocation3 + $0x450] sm:$0xf0]  ;;  %v11003_v23 = vld [vmem:[#allocation3 + $0x54] sm:$0xf0] }
  0x9f   : > { %1491 = vmatpush.bf16.msrb.mxu2 %v7718_v19  ;;  %v7770_v19 = vor.u32 %v11039_v11, %v7769_v10  ;;  %v7626_v28 = vor.u32 %v11003_v23, %v7625_v22  ;;  %v11092_v29 = vld [vmem:[#allocation3 + $0x324] sm:$0xf]  ;;  %v7987_v30 = vld [vmem:[#allocation3 + $0x330] sm:$0xf0]  ;;  %v7609_v36 = vld [vmem:[#allocation3 + $0x28] sm:$0xf] }
  0xa0   : > { %1505 = vmatpush.bf16.msrb.mxu3 %v7846_v24  ;;  %1464 = vmatmul.bf16.vlgmr.msrb.gmra.mxu0 %v12426_v32  ;;  %v7753_v24 = vld [vmem:[#allocation3 + $0x148] sm:$0xf]  ;;  %v8115_v35 = vld [vmem:[#allocation3 + $0x430] sm:$0xf0]  ;;  %v10999_v37 = vld [vmem:[#allocation3 + $0x34] sm:$0xf0] }
  0xa1   : > { %1512 = vmatpush.bf16.msra.mxu0 %v8086_v25  ;;  %1478 = vmatmul.bf16.vlgmr.msrb.gmra.mxu1 %v12390_v55  ;;  %v11035_v25 = vld [vmem:[#allocation3 + $0x154] sm:$0xf0]  ;;  %v7737_v38 = vld [vmem:[#allocation3 + $0x128] sm:$0xf]  ;;  %v7971_v42 = vld [vmem:[#allocation3 + $0x310] sm:$0xf0]  ;;  %v7610_v44 = vor.u32 %v10999_v37, %v7609_v36 }
  0xa2   : > { %1526 = vmatpush.bf16.msra.mxu1 %v8214_v26  ;;  %1492 = vmatmul.bf16.vlgmr.msrb.gmra.mxu2 %v12416_v33  ;;  %v8006_v26 = vor.u32 %v11096_v15, %v8003_v17  ;;  %v7754_v34 = vor.u32 %v11035_v25, %v7753_v24  ;;  %v8099_v46 = vld [vmem:[#allocation3 + $0x410] sm:$0xf0]  ;;  %v7593_v47 = vld [vmem:[#allocation3 + $0x8] sm:$0xf]  ;;  %v10995_v49 = vld [vmem:[#allocation3 + $0x14] sm:$0xf0] }
  0xa3   : > { %1540 = vmatpush.bf16.msra.mxu2 %v7706_v27  ;;  %1506 = vmatmul.bf16.vlgmr.msrb.gmra.mxu3 %v12402_v16  ;;  %v8134_v27 = vor.u32 %v11128_v18, %v8131_v21  ;;  %v7721_v50 = vld [vmem:[#allocation3 + $0x108] sm:$0xf]  ;;  %v11119_v57 = vld [vmem:[#allocation3 + $0x3f4] sm:$0xf0]  ;;  %v7594_v61 = vor.u32 %v10995_v49, %v7593_v47  ;;  %v11021_v62 = vld [vmem:[#allocation3 + $0xec] sm:$0xf] }
  0xa4   : > { %1554 = vmatpush.bf16.msra.mxu3 %v7834_v31  ;;  %v11124_v31 = vld [vmem:[#allocation3 + $0x424] sm:$0xf]  ;;  %v8089_v54 = vld [vmem:[#allocation3 + $0x3e8] sm:$0xf]  ;;  %v11151_v59 = vld [vmem:[#allocation3 + $0x4f4] sm:$0xf0] }
  0xa5   : > { %1513 = vmatpush.bf16.msra.mxu0 %v8070_v39  ;;  %v11031_v39 = vld [vmem:[#allocation3 + $0x134] sm:$0xf0]  ;;  %v8118_v43 = vor.u32 %v11124_v31, %v8115_v35  ;;  %v7707_v63 = vld [vmem:[#allocation3 + $0xf8] sm:$0xf0]  ;;  %v7945_v4 = vld [vmem:[#allocation3 + $0x2c8] sm:$0xf] }
  0xa6   : > { %1527 = vmatpush.bf16.msra.mxu1 %v8198_v40  ;;  %v7990_v40 = vor.u32 %v11092_v29, %v7987_v30  ;;  %v7738_v48 = vor.u32 %v11031_v39, %v7737_v38  ;;  %v11083_v5 = vld [vmem:[#allocation3 + $0x2d4] sm:$0xf0]  ;;  %v7710_v7 = vor.u32 %v11021_v62, %v7707_v63  ;;  %v8201_v9 = vld [vmem:[#allocation3 + $0x4c8] sm:$0xf]  ;;  %v11017_v11 = vld [vmem:[#allocation3 + $0xcc] sm:$0xf] }
  0xa7   : > { %1541 = vmatpush.bf16.msra.mxu2 %v7690_v41  ;;  %v11088_v41 = vld [vmem:[#allocation3 + $0x304] sm:$0xf]  ;;  %v11115_v8 = vld [vmem:[#allocation3 + $0x3d4] sm:$0xf0]  ;;  %v7929_v17 = vld [vmem:[#allocation3 + $0x2a8] sm:$0xf] }
  0xa8   : > { %1555 = vmatpush.bf16.msra.mxu3 %v7818_v45  ;;  %v11120_v45 = vld [vmem:[#allocation3 + $0x404] sm:$0xf]  ;;  %v7974_v56 = vor.u32 %v11088_v41, %v7971_v42  ;;  %v11147_v10 = vld [vmem:[#allocation3 + $0x4d4] sm:$0xf0]  ;;  %v8185_v23 = vld [vmem:[#allocation3 + $0x4a8] sm:$0xf] }
  0xa9   : > { %1514 = vmatpush.bf16.msra.mxu0 %v8054_v51  ;;  %v11027_v51 = vld [vmem:[#allocation3 + $0x114] sm:$0xf0]  ;;  %v8102_v60 = vor.u32 %v11120_v45, %v8099_v46  ;;  %v8202_v15 = vor.u32 %v11147_v10, %v8201_v9  ;;  %v11013_v25 = vld [vmem:[#allocation3 + $0xac] sm:$0xf]  ;;  %v7913_v30 = vld [vmem:[#allocation3 + $0x288] sm:$0xf] }
  0xaa   : > { %1528 = vmatpush.bf16.msra.mxu1 %v8182_v52  ;;  %v7961_v52 = vld [vmem:[#allocation3 + $0x2e8] sm:$0xf]  ;;  %v11079_v18 = vld [vmem:[#allocation3 + $0x2b4] sm:$0xf0]  ;;  %v11009_v39 = vld [vmem:[#allocation3 + $0x8c] sm:$0xf] }
  0xab   : > { %1542 = vmatpush.bf16.msra.mxu2 %v7674_v53  ;;  %v11087_v53 = vld [vmem:[#allocation3 + $0x2f4] sm:$0xf0]  ;;  %v8169_v37 = vld [vmem:[#allocation3 + $0x488] sm:$0xf] }
  0xac   : > { %1556 = vmatpush.bf16.msra.mxu3 %v7802_v58  ;;  %v8217_v58 = vld [vmem:[#allocation3 + $0x4e8] sm:$0xf]  ;;  %v11111_v22 = vld [vmem:[#allocation3 + $0x3b4] sm:$0xf0] }
  0xad   : > { %1515 = vmatpush.bf16.msra.mxu0 %v8038_v0  ;;  %v7722_v0 = vor.u32 %v11027_v51, %v7721_v50  ;;  %v8218_v3 = vor.u32 %v11151_v59, %v8217_v58  ;;  %v11143_v24 = vld [vmem:[#allocation3 + $0x4b4] sm:$0xf0]  ;;  %v8025_v46 = vld [vmem:[#allocation3 + $0x368] sm:$0xf]  ;;  %v11005_v51 = vld [vmem:[#allocation3 + $0x6c] sm:$0xf] }
  0xae   : > { %1529 = vmatpush.bf16.msra.mxu1 %v8166_v1  ;;  %v7962_v1 = vor.u32 %v11087_v53, %v7961_v52  ;;  %v8186_v29 = vor.u32 %v11143_v24, %v8185_v23  ;;  %v11075_v31 = vld [vmem:[#allocation3 + $0x294] sm:$0xf0]  ;;  %v8153_v49 = vld [vmem:[#allocation3 + $0x468] sm:$0xf]  ;;  %v7643_v52 = vld [vmem:[#allocation3 + $0x78] sm:$0xf0] }
  0xaf   : > { %1543 = vmatpush.bf16.msra.mxu2 %v7658_v2  ;;  %v8090_v2 = vor.u32 %v11119_v57, %v8089_v54  ;;  %v11107_v36 = vld [vmem:[#allocation3 + $0x394] sm:$0xf0]  ;;  %v7914_v41 = vor.u32 %v11075_v31, %v7913_v30  ;;  %v7881_v57 = vld [vmem:[#allocation3 + $0x248] sm:$0xf]  ;;  %v11085_v30 = vld [vmem:[#allocation3 + $0x2ec] sm:$0xf] }
  0xb0   : > { %1557 = vmatpush.bf16.msra.mxu3 %v7786_v6  ;;  %v8073_v6 = vld [vmem:[#allocation3 + $0x3c8] sm:$0xf]  ;;  %v11139_v38 = vld [vmem:[#allocation3 + $0x494] sm:$0xf0] }
  0xb1   : > { %1516 = vmatpush.bf16.msra.mxu0 %v8022_v12  ;;  %v7691_v12 = vld [vmem:[#allocation3 + $0xd8] sm:$0xf0]  ;;  %v11071_v45 = vld [vmem:[#allocation3 + $0x274] sm:$0xf0]  ;;  %v8009_v59 = vld [vmem:[#allocation3 + $0x348] sm:$0xf] }
  0xb2   : > { %1530 = vmatpush.bf16.msra.mxu1 %v8150_v13  ;;  %v7946_v13 = vor.u32 %v11083_v5, %v7945_v4  ;;  %v7694_v21 = vor.u32 %v11017_v11, %v7691_v12  ;;  %v11135_v50 = vld [vmem:[#allocation3 + $0x474] sm:$0xf0]  ;;  %v8137_v62 = vld [vmem:[#allocation3 + $0x448] sm:$0xf]  ;;  %v10997_v12 = vld [vmem:[#allocation3 + $0x2c] sm:$0xf] }
  0xb3   : > { %1544 = vmatpush.bf16.msra.mxu2 %v7642_v14  ;;  %v8074_v14 = vor.u32 %v11115_v8, %v8073_v6  ;;  %v11067_v58 = vld [vmem:[#allocation3 + $0x254] sm:$0xf0]  ;;  %v7865_v5 = vld [vmem:[#allocation3 + $0x228] sm:$0xf] }
  0xb4   : > { %1558 = vmatpush.bf16.msra.mxu3 %v7770_v19  ;;  %v8057_v19 = vld [vmem:[#allocation3 + $0x3a8] sm:$0xf]  ;;  %v11131_v63 = vld [vmem:[#allocation3 + $0x454] sm:$0xf0] }
  0xb5   : > { %1517 = vmatpush.bf16.msra.mxu0 %v8006_v26  ;;  %v7675_v26 = vld [vmem:[#allocation3 + $0xb8] sm:$0xf0]  ;;  %v8138_v4 = vor.u32 %v11131_v63, %v8137_v62  ;;  %v11063_v6 = vld [vmem:[#allocation3 + $0x234] sm:$0xf0]  ;;  %v8121_v10 = vld [vmem:[#allocation3 + $0x428] sm:$0xf] }
  0xb6   : > { %1531 = vmatpush.bf16.msra.mxu1 %v8134_v27  ;;  %v7930_v27 = vor.u32 %v11079_v18, %v7929_v17  ;;  %v7678_v35 = vor.u32 %v11013_v25, %v7675_v26  ;;  %v11095_v9 = vld [vmem:[#allocation3 + $0x334] sm:$0xf0]  ;;  %v8105_v23 = vld [vmem:[#allocation3 + $0x408] sm:$0xf]  ;;  %v10993_v26 = vld [vmem:[#allocation3 + $0xc] sm:$0xf] }
  0xb7   : > { %1545 = vmatpush.bf16.msra.mxu2 %v7626_v28  ;;  %v8058_v28 = vor.u32 %v11111_v22, %v8057_v19  ;;  %v11127_v11 = vld [vmem:[#allocation3 + $0x434] sm:$0xf0]  ;;  %v7931_v62 = vld [vmem:[#allocation3 + $0x2b8] sm:$0xf0]  ;;  %v11109_v63 = vld [vmem:[#allocation3 + $0x3ac] sm:$0xf] }
  0xb8   : > { %1559 = vmatpush.bf16.msra.mxu3 %v7754_v34  ;;  %v8041_v34 = vld [vmem:[#allocation3 + $0x388] sm:$0xf]  ;;  %v11059_v17 = vld [vmem:[#allocation3 + $0x214] sm:$0xf0]  ;;  %v8122_v19 = vor.u32 %v11127_v11, %v8121_v10  ;;  %v7915_v10 = vld [vmem:[#allocation3 + $0x298] sm:$0xf0] }
  0xb9   : > { %1518 = vmatpush.bf16.msra.mxu0 %v7990_v40  ;;  %v7659_v40 = vld [vmem:[#allocation3 + $0x98] sm:$0xf0]  ;;  %v8042_v42 = vor.u32 %v11107_v36, %v8041_v34  ;;  %v11091_v22 = vld [vmem:[#allocation3 + $0x314] sm:$0xf0]  ;;  %v11105_v11 = vld [vmem:[#allocation3 + $0x38c] sm:$0xf] }
  0xba   : > { %1532 = vmatpush.bf16.msra.mxu1 %v8118_v43  ;;  %v8170_v43 = vor.u32 %v11139_v38, %v8169_v37  ;;  %v7662_v47 = vor.u32 %v11009_v39, %v7659_v40  ;;  %v11123_v25 = vld [vmem:[#allocation3 + $0x414] sm:$0xf0]  ;;  %v7963_v34 = vld [vmem:[#allocation3 + $0x2f8] sm:$0xf0]  ;;  %v11149_v39 = vld [vmem:[#allocation3 + $0x4ec] sm:$0xf] }
  0xbb   : > { %1546 = vmatpush.bf16.msra.mxu2 %v7610_v44  ;;  %v7897_v44 = vld [vmem:[#allocation3 + $0x268] sm:$0xf]  ;;  %v8091_v36 = vld [vmem:[#allocation3 + $0x3f8] sm:$0xf0]  ;;  %v8106_v38 = vor.u32 %v11123_v25, %v8105_v23 }
  0xbc   : > { %1560 = vmatpush.bf16.msra.mxu3 %v7738_v48  ;;  %v11103_v48 = vld [vmem:[#allocation3 + $0x374] sm:$0xf0]  ;;  %v7898_v53 = vor.u32 %v11071_v45, %v7897_v44  ;;  %v8219_v40 = vld [vmem:[#allocation3 + $0x4f8] sm:$0xf0]  ;;  %v11049_v45 = vld [vmem:[#allocation3 + $0x1cc] sm:$0xf] }
  0xbd   : > { %1519 = vmatpush.bf16.msra.mxu0 %v7974_v56  ;;  %v8026_v54 = vor.u32 %v11103_v48, %v8025_v46  ;;  %v8154_v56 = vor.u32 %v11135_v50, %v8153_v49  ;;  %v7819_v46 = vld [vmem:[#allocation3 + $0x1d8] sm:$0xf0]  ;;  %v8222_v48 = vor.u32 %v11149_v39, %v8219_v40  ;;  %v11113_v50 = vld [vmem:[#allocation3 + $0x3cc] sm:$0xf] }
  0xbe   : > { %1533 = vmatpush.bf16.msra.mxu1 %v8102_v60  ;;  %v7646_v60 = vor.u32 %v11005_v51, %v7643_v52  ;;  %v7947_v49 = vld [vmem:[#allocation3 + $0x2d8] sm:$0xf0]  ;;  %v11145_v52 = vld [vmem:[#allocation3 + $0x4cc] sm:$0xf] }
  0xbf   : > { %1547 = vmatpush.bf16.msra.mxu2 %v7594_v61  ;;  %v11099_v61 = vld [vmem:[#allocation3 + $0x354] sm:$0xf0]  ;;  %v8075_v51 = vld [vmem:[#allocation3 + $0x3d8] sm:$0xf0]  ;;  %v11129_v40 = vld [vmem:[#allocation3 + $0x44c] sm:$0xf] }
  0xc0   : > { %1561 = vmatpush.bf16.msra.mxu3 %v7722_v0  ;;  %1520 = vmatmul.bf16.vlgmr.msra.gmra.mxu0 %v12407_v20  ;;  %v11001_v0 = vld [vmem:[#allocation3 + $0x4c] sm:$0xf]  ;;  %v7899_v23 = vld [vmem:[#allocation3 + $0x278] sm:$0xf0] }
  0xc1   : > { %1568 = vmatpush.bf16.msrb.mxu0 %v7962_v1  ;;  %1534 = vmatmul.bf16.vlgmr.msra.gmra.mxu1 %v12426_v32  ;;  %v7627_v1 = vld [vmem:[#allocation3 + $0x58] sm:$0xf0] }
  0xc2   : > { %1582 = vmatpush.bf16.msrb.mxu1 %v8090_v2  ;;  %1548 = vmatmul.bf16.vlgmr.msra.gmra.mxu2 %v12390_v55  ;;  %v7882_v2 = vor.u32 %v11067_v58, %v7881_v57  ;;  %v7630_v8 = vor.u32 %v11001_v0, %v7627_v1  ;;  %v8078_v57 = vor.u32 %v11113_v50, %v8075_v51  ;;  %v11045_v58 = vld [vmem:[#allocation3 + $0x1ac] sm:$0xf]  ;;  %v8059_v0 = vld [vmem:[#allocation3 + $0x3b8] sm:$0xf0] }
  0xc3   : > { %1596 = vmatpush.bf16.msrb.mxu2 %v8218_v3  ;;  %1562 = vmatmul.bf16.vlgmr.msra.gmra.mxu3 %v12416_v33  ;;  %v8010_v3 = vor.u32 %v11099_v61, %v8009_v59  ;;  %v7803_v59 = vld [vmem:[#allocation3 + $0x1b8] sm:$0xf0]  ;;  %v11141_v1 = vld [vmem:[#allocation3 + $0x4ac] sm:$0xf] }
  0xc4   : > { %1610 = vmatpush.bf16.msrb.mxu3 %v7710_v7  ;;  %v7993_v7 = vld [vmem:[#allocation3 + $0x328] sm:$0xf]  ;;  %v8027_v25 = vld [vmem:[#allocation3 + $0x378] sm:$0xf0]  ;;  %v11093_v50 = vld [vmem:[#allocation3 + $0x32c] sm:$0xf] }
  0xc5   : > { %1569 = vmatpush.bf16.msrb.mxu0 %v7946_v13  ;;  %v7611_v13 = vld [vmem:[#allocation3 + $0x38] sm:$0xf0]  ;;  %v7994_v18 = vor.u32 %v11095_v9, %v7993_v7 }
  0xc6   : > { %1583 = vmatpush.bf16.msrb.mxu1 %v8074_v14  ;;  %v7866_v14 = vor.u32 %v11063_v6, %v7865_v5  ;;  %v7614_v24 = vor.u32 %v10997_v12, %v7611_v13  ;;  %v8062_v5 = vor.u32 %v11109_v63, %v8059_v0  ;;  %v11041_v6 = vld [vmem:[#allocation3 + $0x18c] sm:$0xf]  ;;  %v7787_v7 = vld [vmem:[#allocation3 + $0x198] sm:$0xf0] }
  0xc7   : > { %1597 = vmatpush.bf16.msrb.mxu2 %v8202_v15  ;;  %v7849_v15 = vld [vmem:[#allocation3 + $0x208] sm:$0xf]  ;;  %v8043_v12 = vld [vmem:[#allocation3 + $0x398] sm:$0xf0]  ;;  %v11137_v13 = vld [vmem:[#allocation3 + $0x48c] sm:$0xf] }
  0xc8   : > { %1611 = vmatpush.bf16.msrb.mxu3 %v7694_v21  ;;  %v7977_v21 = vld [vmem:[#allocation3 + $0x308] sm:$0xf]  ;;  %v7850_v31 = vor.u32 %v11059_v17, %v7849_v15  ;;  %v7790_v15 = vor.u32 %v11041_v6, %v7787_v7  ;;  %v8011_v39 = vld [vmem:[#allocation3 + $0x358] sm:$0xf0]  ;;  %v11089_v63 = vld [vmem:[#allocation3 + $0x30c] sm:$0xf] }
  0xc9   : > { %1570 = vmatpush.bf16.msrb.mxu0 %v7930_v27  ;;  %v7595_v27 = vld [vmem:[#allocation3 + $0x18] sm:$0xf0]  ;;  %v7978_v37 = vor.u32 %v11091_v22, %v7977_v21  ;;  %v11069_v21 = vld [vmem:[#allocation3 + $0x26c] sm:$0xf] }
  0xca   : > { %1584 = vmatpush.bf16.msrb.mxu1 %v8058_v28  ;;  %v11053_v28 = vld [vmem:[#allocation3 + $0x1ec] sm:$0xf]  ;;  %v7995_v51 = vld [vmem:[#allocation3 + $0x338] sm:$0xf0] }
  0xcb   : > { %1598 = vmatpush.bf16.msrb.mxu2 %v8186_v29  ;;  %v7835_v29 = vld [vmem:[#allocation3 + $0x1f8] sm:$0xf0] }
  0xcc   : > { %1612 = vmatpush.bf16.msrb.mxu3 %v7678_v35  ;;  %v11117_v35 = vld [vmem:[#allocation3 + $0x3ec] sm:$0xf]  ;;  %v7979_v0 = vld [vmem:[#allocation3 + $0x318] sm:$0xf0] }
  0xcd   : > { %1571 = vmatpush.bf16.msrb.mxu0 %v7914_v41  ;;  %v7598_v41 = vor.u32 %v10993_v26, %v7595_v27  ;;  %v8094_v44 = vor.u32 %v11117_v35, %v8091_v36  ;;  %v11133_v26 = vld [vmem:[#allocation3 + $0x46c] sm:$0xf]  ;;  %v8155_v27 = vld [vmem:[#allocation3 + $0x478] sm:$0xf0]  ;;  %v7982_v7 = vor.u32 %v11089_v63, %v7979_v0 }
  0xce   : > { %1585 = vmatpush.bf16.msrb.mxu1 %v8042_v42  ;;  %v7838_v42 = vor.u32 %v11053_v28, %v7835_v29  ;;  %v7902_v29 = vor.u32 %v11069_v21, %v7899_v23  ;;  %v11065_v35 = vld [vmem:[#allocation3 + $0x24c] sm:$0xf]  ;;  %v8158_v36 = vor.u32 %v11133_v26, %v8155_v27  ;;  %v8345_v21 = vld [vmem:[#allocation7 + $0xf0] sm:$0xf]  ;;  %v11159_v23 = vld [vmem:[#allocation7 + $0x34] sm:$0xf0] }
  0xcf   : > { %1599 = vmatpush.bf16.msrb.mxu2 %v8170_v43  ;;  %v7966_v43 = vor.u32 %v11085_v30, %v7963_v34  ;;  %v7755_v34 = vld [vmem:[#allocation3 + $0x158] sm:$0xf0]  ;;  %v11157_v27 = vld [vmem:[#allocation7 + $0x24] sm:$0xf0] }
  0xd0   : > { %1613 = vmatpush.bf16.msrb.mxu3 %v7662_v47  ;;  %v11081_v47 = vld [vmem:[#allocation3 + $0x2cc] sm:$0xf] }
  0xd1   : > { %1572 = vmatpush.bf16.msrb.mxu0 %v7898_v53  ;;  %v8203_v53 = vld [vmem:[#allocation3 + $0x4d8] sm:$0xf0] }
  0xd2   : > { %1586 = vmatpush.bf16.msrb.mxu1 %v8026_v54  ;;  %v7822_v54 = vor.u32 %v11049_v45, %v7819_v46  ;;  %v8206_v61 = vor.u32 %v11145_v52, %v8203_v53  ;;  %v11029_v45 = vld [vmem:[#allocation3 + $0x12c] sm:$0xf]  ;;  %v7739_v46 = vld [vmem:[#allocation3 + $0x138] sm:$0xf0] }
  0xd3   : > { %1600 = vmatpush.bf16.msrb.mxu2 %v8154_v56  ;;  %v7950_v56 = vor.u32 %v11081_v47, %v7947_v49  ;;  %v11061_v47 = vld [vmem:[#allocation3 + $0x22c] sm:$0xf]  ;;  %v7867_v49 = vld [vmem:[#allocation3 + $0x238] sm:$0xf0] }
  0xd4   : > { %1614 = vmatpush.bf16.msrb.mxu3 %v7646_v60  ;;  %v11077_v60 = vld [vmem:[#allocation3 + $0x2ac] sm:$0xf]  ;;  %v8123_v53 = vld [vmem:[#allocation3 + $0x438] sm:$0xf0] }
  0xd5   : > { %1573 = vmatpush.bf16.msrb.mxu0 %v7882_v2  ;;  %v8187_v2 = vld [vmem:[#allocation3 + $0x4b8] sm:$0xf0]  ;;  %v11125_v52 = vld [vmem:[#allocation3 + $0x42c] sm:$0xf] }
  0xd6   : > { %1587 = vmatpush.bf16.msrb.mxu1 %v8010_v3  ;;  %v7806_v3 = vor.u32 %v11045_v58, %v7803_v59  ;;  %v8190_v9 = vor.u32 %v11141_v1, %v8187_v2  ;;  %v7998_v58 = vor.u32 %v11093_v50, %v7995_v51  ;;  %v7723_v59 = vld [vmem:[#allocation3 + $0x118] sm:$0xf0]  ;;  %v11121_v1 = vld [vmem:[#allocation3 + $0x40c] sm:$0xf]  ;;  %v8305_v51 = vld [vmem:[#allocation7 + $0xa0] sm:$0xf] }
  0xd7   : > { %1601 = vmatpush.bf16.msrb.mxu2 %v8138_v4  ;;  %v7934_v4 = vor.u32 %v11077_v60, %v7931_v62  ;;  %v11057_v60 = vld [vmem:[#allocation3 + $0x20c] sm:$0xf]  ;;  %v8126_v62 = vor.u32 %v11125_v52, %v8123_v53  ;;  %v8107_v2 = vld [vmem:[#allocation3 + $0x418] sm:$0xf0] }
  0xd8   : > { %1615 = vmatpush.bf16.msrb.mxu3 %v7630_v8  ;;  %v11073_v8 = vld [vmem:[#allocation3 + $0x28c] sm:$0xf] }
  0xd9   : > { %1574 = vmatpush.bf16.msrb.mxu0 %v7866_v14  ;;  %v8171_v14 = vld [vmem:[#allocation3 + $0x498] sm:$0xf0]  ;;  %v7918_v17 = vor.u32 %v11073_v8, %v7915_v10  ;;  %v8110_v8 = vor.u32 %v11121_v1, %v8107_v2  ;;  %v8273_v10 = vld [vmem:[#allocation7 + $0x60] sm:$0xf]  ;;  %v11173_v52 = vld [vmem:[#allocation7 + $0xa4] sm:$0xf0] }
  0xda   : > { %1588 = vmatpush.bf16.msrb.mxu1 %v7994_v18  ;;  %v11037_v18 = vld [vmem:[#allocation3 + $0x16c] sm:$0xf]  ;;  %v8174_v22 = vor.u32 %v11137_v13, %v8171_v14  ;;  %v8265_v13 = vld [vmem:[#allocation7 + $0x50] sm:$0xf]  ;;  %v11163_v14 = vld [vmem:[#allocation7 + $0x54] sm:$0xf0] }
  0xdb   : > { %1602 = vmatpush.bf16.msrb.mxu2 %v8122_v19  ;;  %v7771_v19 = vld [vmem:[#allocation3 + $0x178] sm:$0xf0] }
  0xdc   : > { %1616 = vmatpush.bf16.msrb.mxu3 %v7614_v24  ;;  %v11101_v24 = vld [vmem:[#allocation3 + $0x36c] sm:$0xf]  ;;  %v7774_v28 = vor.u32 %v11037_v18, %v7771_v19  ;;  %v8249_v19 = vld [vmem:[#allocation7 + $0x30] sm:$0xf] }
  0xdd   : > { %1575 = vmatpush.bf16.msrb.mxu0 %v7850_v31  ;;  %v8030_v30 = vor.u32 %v11101_v24, %v8027_v25  ;;  %v11033_v31 = vld [vmem:[#allocation3 + $0x14c] sm:$0xf] }
  0xde   : > { %1589 = vmatpush.bf16.msrb.mxu1 %v7978_v37  ;;  %v7883_v37 = vld [vmem:[#allocation3 + $0x258] sm:$0xf0]  ;;  %v11181_v25 = vld [vmem:[#allocation7 + $0xe4] sm:$0xf0] }
  0xdf   : > { %1603 = vmatpush.bf16.msrb.mxu2 %v8106_v38  ;;  %v11097_v38 = vld [vmem:[#allocation3 + $0x34c] sm:$0xf] }
  0xe0   : > { %1617 = vmatpush.bf16.msrb.mxu3 %v7598_v41  ;;  %1576 = vmatmul.bf16.vlgmr.msrb.gmra.mxu0 %v12402_v16  ;;  %v8139_v41 = vld [vmem:[#allocation3 + $0x458] sm:$0xf0] }
  0xe1   : > { %1624 = vmatpush.bf16.msra.mxu0 %v7838_v42  ;;  %1590 = vmatmul.bf16.vlgmr.msrb.gmra.mxu1 %v12407_v20  ;;  %v7758_v42 = vor.u32 %v11033_v31, %v7755_v34  ;;  %v8233_v31 = vld [vmem:[#allocation7 + $0x10] sm:$0xf]  ;;  %v11155_v34 = vld [vmem:[#allocation7 + $0x14] sm:$0xf0] }
  0xe2   : > { %1638 = vmatpush.bf16.msra.mxu1 %v7966_v43  ;;  %1604 = vmatmul.bf16.vlgmr.msrb.gmra.mxu2 %v12426_v32  ;;  %v7886_v43 = vor.u32 %v11065_v35, %v7883_v37  ;;  %v12444_v37 = vld [vmem:[#allocation5] sm:$0xf] }
  0xe3   : > { %1652 = vmatpush.bf16.msra.mxu2 %v8094_v44  ;;  %1618 = vmatmul.bf16.vlgmr.msrb.gmra.mxu3 %v12390_v55  ;;  %v8046_v55 = vor.u32 %v11105_v11, %v8043_v12  ;;  %v8014_v44 = vor.u32 %v11097_v38, %v8011_v39  ;;  %v11165_v11 = vld [vmem:[#allocation7 + $0x64] sm:$0xf0]  ;;  %v8234_v39 = vor.u32 %v11155_v34, %v8233_v31  ;;  %v11156_v31 = vld [vmem:[#allocation7 + $0x24] sm:$0xf]  ;;  %v8243_v34 = vld [vmem:[#allocation7 + $0x28] sm:$0xf0] }
  0xe4   : > { %1666 = vmatpush.bf16.msra.mxu3 %v8222_v48  ;;  %v8142_v48 = vor.u32 %v11129_v40, %v8139_v41  ;;  %v8274_v12 = vor.u32 %v11165_v11, %v8273_v10  ;;  %v11177_v38 = vld [vmem:[#allocation7 + $0xc4] sm:$0xf0]  ;;  %v8313_v41 = vld [vmem:[#allocation7 + $0xb0] sm:$0xf]  ;;  %v11160_v10 = vld [vmem:[#allocation7 + $0x44] sm:$0xf] }
  0xe5   : > { %1625 = vmatpush.bf16.msra.mxu0 %v7822_v54  ;;  %v7742_v54 = vor.u32 %v11029_v45, %v7739_v46  ;;  %v11175_v45 = vld [vmem:[#allocation7 + $0xb4] sm:$0xf0]  ;;  %v566_v46 = vperm.slane %v12444_v37, 0  ;;  %v8259_v11 = vld [vmem:[#allocation7 + $0x48] sm:$0xf0] }
  0xe6   : > { %1639 = vmatpush.bf16.msra.mxu1 %v7950_v56  ;;  %v11025_v56 = vld [vmem:[#allocation3 + $0x10c] sm:$0xf] }
  0xe7   : > { %1653 = vmatpush.bf16.msra.mxu2 %v8078_v57  ;;  %v7870_v57 = vor.u32 %v11061_v47, %v7867_v49  ;;  %v11166_v47 = vld [vmem:[#allocation7 + $0x74] sm:$0xf]  ;;  %v8314_v49 = vor.u32 %v11175_v45, %v8313_v41  ;;  %v11197_v41 = vld [vmem:[#allocation7 + $0x164] sm:$0xf0]  ;;  %v8235_v45 = vld [vmem:[#allocation7 + $0x18] sm:$0xf0] }
  0xe8   : > { %1667 = vmatpush.bf16.msra.mxu3 %v8206_v61  ;;  %v7851_v61 = vld [vmem:[#allocation3 + $0x218] sm:$0xf0] }
  0xe9   : > { %1626 = vmatpush.bf16.msra.mxu0 %v7806_v3  ;;  %v8281_v3 = vld [vmem:[#allocation7 + $0x70] sm:$0xf]  ;;  %v7854_v6 = vor.u32 %v11057_v60, %v7851_v61  ;;  %v8306_v60 = vor.u32 %v11173_v52, %v8305_v51 }
  0xea   : > { %1640 = vmatpush.bf16.msra.mxu1 %v7934_v4  ;;  %v11167_v4 = vld [vmem:[#allocation7 + $0x74] sm:$0xf0]  ;;  %v8297_v61 = vld [vmem:[#allocation7 + $0x90] sm:$0xf] }
  0xeb   : > { %1654 = vmatpush.bf16.msra.mxu2 %v8062_v5  ;;  %v7726_v5 = vor.u32 %v11025_v56, %v7723_v59  ;;  %v8393_v52 = vld [vmem:[#allocation7 + $0x150] sm:$0xf] }
  0xec   : > { %1668 = vmatpush.bf16.msra.mxu3 %v8190_v9  ;;  %v8282_v9 = vor.u32 %v11167_v4, %v8281_v3  ;;  %v11162_v3 = vld [vmem:[#allocation7 + $0x54] sm:$0xf]  ;;  %v8267_v4 = vld [vmem:[#allocation7 + $0x58] sm:$0xf0] }
  0xed   : > { %1627 = vmatpush.bf16.msra.mxu0 %v7790_v15  ;;  %v8266_v15 = vor.u32 %v11163_v14, %v8265_v13  ;;  %v8289_v13 = vld [vmem:[#allocation7 + $0x80] sm:$0xf]  ;;  %v11169_v14 = vld [vmem:[#allocation7 + $0x84] sm:$0xf0] }
  0xee   : > { %1641 = vmatpush.bf16.msra.mxu1 %v7918_v17  ;;  %v8257_v17 = vld [vmem:[#allocation7 + $0x40] sm:$0xf] }
  0xef   : > { %1655 = vmatpush.bf16.msra.mxu2 %v8046_v55  ;;  %v11161_v55 = vld [vmem:[#allocation7 + $0x44] sm:$0xf0] }
  0xf0   : > { %1669 = vmatpush.bf16.msra.mxu3 %v8174_v22  ;;  %v8258_v18 = vor.u32 %v11161_v55, %v8257_v17  ;;  %v11183_v22 = vld [vmem:[#allocation7 + $0xf4] sm:$0xf0]  ;;  %v8262_v17 = vor.u32 %v11160_v10, %v8259_v11  ;;  %v8290_v55 = vor.u32 %v11169_v14, %v8289_v13  ;;  %v8369_v13 = vld [vmem:[#allocation7 + $0x120] sm:$0xf]  ;;  %v11189_v14 = vld [vmem:[#allocation7 + $0x124] sm:$0xf0] }
  0xf1   : > { %1628 = vmatpush.bf16.msra.mxu0 %v7774_v28  ;;  %v8346_v24 = vor.u32 %v11183_v22, %v8345_v21  ;;  %v8329_v28 = vld [vmem:[#allocation7 + $0xd0] sm:$0xf] }
  0xf2   : > { %1642 = vmatpush.bf16.msra.mxu1 %v7902_v29  ;;  %v11179_v29 = vld [vmem:[#allocation7 + $0xd4] sm:$0xf0] }
  0xf3   : > { %1656 = vmatpush.bf16.msra.mxu2 %v8030_v30  ;;  %v8330_v35 = vor.u32 %v11179_v29, %v8329_v28  ;;  %v8339_v28 = vld [vmem:[#allocation7 + $0xe8] sm:$0xf0] }
  0xf4   : > { %1670 = vmatpush.bf16.msra.mxu3 %v8158_v36  ;;  %v8321_v36 = vld [vmem:[#allocation7 + $0xc0] sm:$0xf] }
  0xf5   : > { %1629 = vmatpush.bf16.msra.mxu0 %v7758_v42  ;;  %v8322_v40 = vor.u32 %v11177_v38, %v8321_v36  ;;  %v11154_v36 = vld [vmem:[#allocation7 + $0x14] sm:$0xf] }
  0xf6   : > { %1643 = vmatpush.bf16.msra.mxu1 %v7886_v43  ;;  %v8225_v43 = vld [vmem:[#allocation7] sm:$0xf]  ;;  %v8238_v51 = vor.u32 %v11154_v36, %v8235_v45  ;;  %v11215_v45 = vld [vmem:[#allocation7 + $0x1f4] sm:$0xf0] }
  0xf7   : > { %1657 = vmatpush.bf16.msra.mxu2 %v8014_v44  ;;  %v11153_v44 = vld [vmem:[#allocation7 + $0x4] sm:$0xf0] }
  0xf8   : > { %1671 = vmatpush.bf16.msra.mxu3 %v8142_v48  ;;  %v8283_v48 = vld [vmem:[#allocation7 + $0x78] sm:$0xf0]  ;;  %v8226_v50 = vor.u32 %v11153_v44, %v8225_v43 }
  0xf9   : > { %1630 = vmatpush.bf16.msra.mxu0 %v7742_v54  ;;  %v8286_v54 = vor.u32 %v11166_v47, %v8283_v48  ;;  %v8331_v47 = vld [vmem:[#allocation7 + $0xd8] sm:$0xf0] }
  0xfa   : > { %1644 = vmatpush.bf16.msra.mxu1 %v7870_v57  ;;  %v11164_v57 = vld [vmem:[#allocation7 + $0x64] sm:$0xf] }
  0xfb   : > { %1658 = vmatpush.bf16.msra.mxu2 %v7998_v58  ;;  %v8275_v58 = vld [vmem:[#allocation7 + $0x68] sm:$0xf0] }
  0xfc   : > { %1672 = vmatpush.bf16.msra.mxu3 %v8126_v62  ;;  %v11171_v62 = vld [vmem:[#allocation7 + $0x94] sm:$0xf0]  ;;  %v8278_v0 = vor.u32 %v11164_v57, %v8275_v58  ;;  %v11152_v57 = vld [vmem:[#allocation7 + $0x4] sm:$0xf]  ;;  %v8227_v58 = vld [vmem:[#allocation7 + $0x8] sm:$0xf0] }
  0xfd   : > { %1631 = vmatpush.bf16.msra.mxu0 %v7726_v5 }
  0xfe   : > { %1645 = vmatpush.bf16.msra.mxu1 %v7854_v6  ;;  %v8298_v6 = vor.u32 %v11171_v62, %v8297_v61  ;;  %v8385_v62 = vld [vmem:[#allocation7 + $0x140] sm:$0xf] }
  0xff   : > { %1659 = vmatpush.bf16.msra.mxu2 %v7982_v7  ;;  %v8270_v7 = vor.u32 %v11162_v3, %v8267_v4  ;;  %v8315_v4 = vld [vmem:[#allocation7 + $0xb8] sm:$0xf0] }
 0x100   : > { %1673 = vmatpush.bf16.msra.mxu3 %v8110_v8  ;;  %1632 = vmatmul.bf16.vlgmr.msra.gmra.mxu0 %v12416_v33  ;;  %v8337_v33 = vld [vmem:[#allocation7 + $0xe0] sm:$0xf]  ;;  %v1409_v30 = vpop.f32.mrf.mxu0 }
 0x101   : > { %2082 = vmatpush.bf16.msrb.mxu0 %v8282_v9  ;;  %1646 = vmatmul.bf16.vlgmr.msra.gmra.mxu1 %v12402_v16  ;;  %v8338_v26 = vor.u32 %v11181_v25, %v8337_v33  ;;  %v8250_v16 = vor.u32 %v11159_v23, %v8249_v19  ;;  %v1410_v56 = vadd.f32 %v1409_v30, %v566_v46  ;;  %v8347_v19 = vld [vmem:[#allocation7 + $0xf8] sm:$0xf0]  ;;  %v11158_v23 = vld [vmem:[#allocation7 + $0x34] sm:$0xf] }
 0x102   : > { %1660 = vmatmul.bf16.vlgmr.msra.gmra.mxu2 %v12407_v20  ;;  %2096 = vmatpush.bf16.msrb.mxu1 %v8346_v24  ;;  %v8241_v20 = vld [vmem:[#allocation7 + $0x20] sm:$0xf]  ;;  %v8251_v24 = vld [vmem:[#allocation7 + $0x38] sm:$0xf0] }
 0x103   : > { %1674 = vmatmul.bf16.vlgmr.msra.gmra.mxu3 %v12426_v32  ;;  %v8242_v32 = vor.u32 %v11157_v27, %v8241_v20  ;;  %v8254_v20 = vor.u32 %v11158_v23, %v8251_v24 }
 0x105   : > { %2083 = vmatpush.bf16.msrb.mxu0 %v8274_v12  ;;  %v1423_v42 = vpop.f32.mrf.mxu1  ;;  %v1437_v53 = vpop.f32.mrf.mxu2 }
 0x106   : > { %2097 = vmatpush.bf16.msrb.mxu1 %v8338_v26  ;;  %v1424_v2 = vadd.f32 %v1423_v42, %v1410_v56  ;;  %v8409_v26 = vld [vmem:[#allocation7 + $0x170] sm:$0xf]  ;;  %v11178_v42 = vld [vmem:[#allocation7 + $0xd4] sm:$0xf] }
 0x107   : > { %v8334_v48 = vor.u32 %v11178_v42, %v8331_v47 }
 0x108   : > { %v1411_v59 = vpop.f32.mrf.mxu0  ;;  %v1438_v8 = vadd.f32 %v1437_v53, %v1424_v2  ;;  %v11195_v53 = vld [vmem:[#allocation7 + $0x154] sm:$0xf0]  ;;  %v8230_v2 = vor.u32 %v11152_v57, %v8227_v58 }
 0x109   : > { %2084 = vmatpush.bf16.msrb.mxu0 %v8266_v15  ;;  %v1451_v63 = vpop.f32.mrf.mxu3  ;;  %v1412_v1 = vadd.f32 %v1411_v59, %v566_v46  ;;  %v8394_v59 = vor.u32 %v11195_v53, %v8393_v52 }
 0x10a   : > { %2098 = vmatpush.bf16.msrb.mxu1 %v8330_v35  ;;  %v1452_v21 = vadd.f32 %v1451_v63, %v1438_v8  ;;  %v11193_v63 = vld [vmem:[#allocation7 + $0x144] sm:$0xf0]  ;;  %v11172_v8 = vld [vmem:[#allocation7 + $0xa4] sm:$0xf] }
 0x10b   : > { %v8386_v3 = vor.u32 %v11193_v63, %v8385_v62 }
 0x10d   : > { %2085 = vmatpush.bf16.msrb.mxu0 %v8258_v18  ;;  %v1425_v5 = vpop.f32.mrf.mxu1  ;;  %v1439_v12 = vpop.f32.mrf.mxu2  ;;  %v11182_v18 = vld [vmem:[#allocation7 + $0xf4] sm:$0xf] }
 0x10e   : > { %2099 = vmatpush.bf16.msrb.mxu1 %v8322_v40  ;;  %v1426_v9 = vadd.f32 %v1425_v5, %v1412_v1  ;;  %v8350_v33 = vor.u32 %v11182_v18, %v8347_v19  ;;  %v8401_v40 = vld [vmem:[#allocation7 + $0x160] sm:$0xf]  ;;  %v567_v1 = vperm.slane %v12444_v37, 1  ;;  %v8377_v5 = vld [vmem:[#allocation7 + $0x130] sm:$0xf] }
 0x10f   : > { %v8402_v46 = vor.u32 %v11197_v41, %v8401_v40  ;;  %v8299_v18 = vld [vmem:[#allocation7 + $0x98] sm:$0xf0]  ;;  %v11198_v40 = vld [vmem:[#allocation7 + $0x174] sm:$0xf] }
 0x110   : > { %v1440_v22 = vadd.f32 %v1439_v12, %v1426_v9  ;;  %v8307_v9 = vld [vmem:[#allocation7 + $0xa8] sm:$0xf0]  ;;  %v8411_v41 = vld [vmem:[#allocation7 + $0x178] sm:$0xf0] }
 0x111   : > { %2086 = vmatpush.bf16.msrb.mxu0 %v8250_v16  ;;  %v1453_v25 = vpop.f32.mrf.mxu3  ;;  %v11199_v16 = vld [vmem:[#allocation7 + $0x174] sm:$0xf0]  ;;  %v8310_v12 = vor.u32 %v11172_v8, %v8307_v9  ;;  %v8414_v42 = vor.u32 %v11198_v40, %v8411_v41  ;;  %v8449_v8 = vld [vmem:[#allocation7 + $0x1c0] sm:$0xf]  ;;  %v11209_v9 = vld [vmem:[#allocation7 + $0x1c4] sm:$0xf0] }
 0x112   : > { %2100 = vmatpush.bf16.msrb.mxu1 %v8314_v49  ;;  %v8410_v27 = vor.u32 %v11199_v16, %v8409_v26  ;;  %v1454_v30 = vadd.f32 %v1453_v25, %v1440_v22  ;;  %v8361_v25 = vld [vmem:[#allocation7 + $0x110] sm:$0xf]  ;;  %v11187_v26 = vld [vmem:[#allocation7 + $0x114] sm:$0xf0]  ;;  %v11168_v16 = vld [vmem:[#allocation7 + $0x84] sm:$0xf] }
 0x113   : > { %v8417_v41 = vld [vmem:[#allocation7 + $0x180] sm:$0xf] }
 0x114   : > { %2110 = vmatpush.bf16.msrb.mxu2 %v8410_v27  ;;  %v8362_v27 = vor.u32 %v11187_v26, %v8361_v25  ;;  %v11186_v26 = vld [vmem:[#allocation7 + $0x114] sm:$0xf] }
 0x115   : > { %2087 = vmatpush.bf16.msrb.mxu0 %v8242_v32  ;;  %v11180_v32 = vld [vmem:[#allocation7 + $0xe4] sm:$0xf] }
 0x116   : > { %2101 = vmatpush.bf16.msrb.mxu1 %v8306_v60  ;;  %v8342_v35 = vor.u32 %v11180_v32, %v8339_v28  ;;  %v8323_v60 = vld [vmem:[#allocation7 + $0xc8] sm:$0xf0] }
 0x117   : > { %v8291_v32 = vld [vmem:[#allocation7 + $0x88] sm:$0xf0] }
 0x118   : > { %2111 = vmatpush.bf16.msrb.mxu2 %v8402_v46 }
 0x119   : > { %2088 = vmatpush.bf16.msrb.mxu0 %v8234_v39  ;;  %v8246_v39 = vor.u32 %v11156_v31, %v8243_v34  ;;  %v8353_v34 = vld [vmem:[#allocation7 + $0x100] sm:$0xf] }
 0x11a   : > { %2102 = vmatpush.bf16.msrb.mxu1 %v8298_v6 }
 0x11c   : > { %2112 = vmatpush.bf16.msrb.mxu2 %v8394_v59 }
 0x11d   : > { %2089 = vmatpush.bf16.msrb.mxu0 %v8226_v50  ;;  %v1465_v15 = vpop.f32.mrf.mxu0 }
 0x11e   : > { %2103 = vmatpush.bf16.msrb.mxu1 %v8290_v55  ;;  %v1466_v29 = vadd.f32 %v1465_v15, %v1452_v21  ;;  %v1479_v50 = vpop.f32.mrf.mxu1  ;;  %v11170_v55 = vld [vmem:[#allocation7 + $0x94] sm:$0xf]  ;;  %v8370_v21 = vor.u32 %v11189_v14, %v8369_v13  ;;  %v8441_v14 = vld [vmem:[#allocation7 + $0x1b0] sm:$0xf] }
 0x11f   : > { %v1480_v15 = vadd.f32 %v1479_v50, %v567_v1  ;;  %v8302_v22 = vor.u32 %v11170_v55, %v8299_v18  ;;  %v8371_v18 = vld [vmem:[#allocation7 + $0x128] sm:$0xf0] }
 0x120   : > { %v1680_v43 = vmax.f32 %v1466_v29, 0.0  ;;  %2113 = vmatpush.bf16.msrb.mxu2 %v8386_v3  ;;  %v8294_v29 = vor.u32 %v11168_v16, %v8291_v32  ;;  %v8363_v16 = vld [vmem:[#allocation7 + $0x118] sm:$0xf0]  ;;  %v8425_v32 = vld [vmem:[#allocation7 + $0x190] sm:$0xf] }
 0x121   : > { %2138 = vmatpush.bf16.msra.mxu0 %v8286_v54  ;;  %v11176_v54 = vld [vmem:[#allocation7 + $0xc4] sm:$0xf] }
 0x122   : > { %2152 = vmatpush.bf16.msra.mxu1 %v8350_v33  ;;  %v8326_v61 = vor.u32 %v11176_v54, %v8323_v60  ;;  %v8465_v54 = vld [vmem:[#allocation7 + $0x1e0] sm:$0xf]  ;;  %v11194_v60 = vld [vmem:[#allocation7 + $0x154] sm:$0xf] }
 0x125   : > { %2139 = vmatpush.bf16.msra.mxu0 %v8278_v0  ;;  %v1467_v38 = vpop.f32.mrf.mxu0  ;;  %v11174_v0 = vld [vmem:[#allocation7 + $0xb4] sm:$0xf]  ;;  %v1493_v10 = vpop.f32.mrf.mxu2 }
 0x126   : > { %2153 = vmatpush.bf16.msra.mxu1 %v8342_v35  ;;  %v1468_v44 = vadd.f32 %v1467_v38, %v1454_v30  ;;  %v8318_v6 = vor.u32 %v11174_v0, %v8315_v4  ;;  %v1507_v19 = vpop.f32.mrf.mxu3  ;;  %v1494_v23 = vadd.f32 %v1493_v10, %v1480_v15  ;;  %v11185_v35 = vld [vmem:[#allocation7 + $0x104] sm:$0xf0]  ;;  %v8457_v0 = vld [vmem:[#allocation7 + $0x1d0] sm:$0xf]  ;;  %v11192_v4 = vld [vmem:[#allocation7 + $0x144] sm:$0xf]  ;;  %v8450_v10 = vor.u32 %v11209_v9, %v8449_v8 }
 0x127   : > { %v8354_v38 = vor.u32 %v11185_v35, %v8353_v34  ;;  %v11207_v15 = vld [vmem:[#allocation7 + $0x1b4] sm:$0xf0]  ;;  %v8355_v34 = vld [vmem:[#allocation7 + $0x108] sm:$0xf0]  ;;  %v11206_v8 = vld [vmem:[#allocation7 + $0x1b4] sm:$0xf] }
 0x128   : > { %v1684_v49 = vmax.f32 %v1468_v44, 0.0  ;;  %v8473_v44 = vld [vmem:[#allocation7 + $0x1f0] sm:$0xf]  ;;  %v8442_v55 = vor.u32 %v11207_v15, %v8441_v14  ;;  %v8443_v9 = vld [vmem:[#allocation7 + $0x1b8] sm:$0xf0] }
 0x129   : > { %2140 = vmatpush.bf16.msra.mxu0 %v8270_v7  ;;  %v11191_v7 = vld [vmem:[#allocation7 + $0x134] sm:$0xf0]  ;;  %v8474_v46 = vor.u32 %v11215_v45, %v8473_v44  ;;  %v11214_v44 = vld [vmem:[#allocation7 + $0x1f4] sm:$0xf]  ;;  %v8475_v45 = vld [vmem:[#allocation7 + $0x1f8] sm:$0xf0] }
 0x12a   : > { %2154 = vmatpush.bf16.msra.mxu1 %v8334_v48  ;;  %v1688_v56 = vpack.c.bf16 %v1684_v49, %v1680_v43  ;;  %v8378_v11 = vor.u32 %v11191_v7, %v8377_v5  ;;  %v11196_v48 = vld [vmem:[#allocation7 + $0x164] sm:$0xf]  ;;  %v8403_v49 = vld [vmem:[#allocation7 + $0x168] sm:$0xf0]  ;;  %v11202_v14 = vld [vmem:[#allocation7 + $0x194] sm:$0xf] }
 0x12b   : > { %2124 = vmatpush.bf16.msrb.mxu3 %v8474_v46  ;;  %v8387_v5 = vld [vmem:[#allocation7 + $0x148] sm:$0xf0]  ;;  %v8478_v46 = vor.u32 %v11214_v44, %v8475_v45  ;;  %v8427_v15 = vld [vmem:[#allocation7 + $0x198] sm:$0xf0] }
 0x12c   : > { %2090 = vmatmul.bf16.vlgmr.msrb.gmra.mxu0 %v1688_v56  ;;  %2114 = vmatpush.bf16.msrb.mxu2 %v8378_v11  ;;  %v11190_v11 = vld [vmem:[#allocation7 + $0x134] sm:$0xf] }
 0x12d   : > { %2141 = vmatpush.bf16.msra.mxu0 %v8262_v17  ;;  %v1481_v17 = vpop.f32.mrf.mxu1  ;;  %v1495_v33 = vpop.f32.mrf.mxu2 }
 0x12e   : > { %2155 = vmatpush.bf16.msra.mxu1 %v8326_v61  ;;  %v1482_v24 = vadd.f32 %v1481_v17, %v567_v1  ;;  %v1509_v36 = vpop.f32.mrf.mxu3  ;;  %v8395_v61 = vld [vmem:[#allocation7 + $0x158] sm:$0xf0]  ;;  %v11211_v1 = vld [vmem:[#allocation7 + $0x1d4] sm:$0xf0]  ;;  %v11188_v17 = vld [vmem:[#allocation7 + $0x124] sm:$0xf] }
 0x12f   : > { %v8398_v62 = vor.u32 %v11194_v60, %v8395_v61 }
 0x130   : > { %2115 = vmatpush.bf16.msrb.mxu2 %v8370_v21  ;;  %v1496_v31 = vadd.f32 %v1495_v33, %v1482_v24  ;;  %v11205_v21 = vld [vmem:[#allocation7 + $0x1a4] sm:$0xf0]  ;;  %v568_v24 = vperm.slane %v12444_v37, 2 }
 0x131   : > { %2142 = vmatpush.bf16.msra.mxu0 %v8254_v20  ;;  %v1508_v20 = vadd.f32 %v1507_v19, %v1494_v23  ;;  %v8433_v19 = vld [vmem:[#allocation7 + $0x1a0] sm:$0xf] }
 0x132   : > { %2156 = vmatpush.bf16.msra.mxu1 %v8318_v6  ;;  %v1510_v43 = vadd.f32 %v1509_v36, %v1496_v31  ;;  %v8390_v6 = vor.u32 %v11192_v4, %v8387_v5  ;;  %v8434_v33 = vor.u32 %v11205_v21, %v8433_v19  ;;  %v11184_v31 = vld [vmem:[#allocation7 + $0x104] sm:$0xf]  ;;  %v569_v19 = vperm.slane %v12444_v37, 3 }
 0x133   : > { %v8358_v36 = vor.u32 %v11184_v31, %v8355_v34 }
 0x134   : > { %2116 = vmatpush.bf16.msrb.mxu2 %v8362_v27  ;;  %v8366_v27 = vor.u32 %v11186_v26, %v8363_v16 }
 0x135   : > { %2143 = vmatpush.bf16.msra.mxu0 %v8246_v39 }
 0x136   : > { %2157 = vmatpush.bf16.msra.mxu1 %v8310_v12  ;;  %v8379_v12 = vld [vmem:[#allocation7 + $0x138] sm:$0xf0] }
 0x137   : > { %v8382_v13 = vor.u32 %v11190_v11, %v8379_v12  ;;  %v11204_v11 = vld [vmem:[#allocation7 + $0x1a4] sm:$0xf]  ;;  %v8435_v12 = vld [vmem:[#allocation7 + $0x1a8] sm:$0xf0] }
 0x138   : > { %2117 = vmatpush.bf16.msrb.mxu2 %v8354_v38 }
 0x139   : > { %2144 = vmatpush.bf16.msra.mxu0 %v8238_v51  ;;  %v8406_v51 = vor.u32 %v11196_v48, %v8403_v49 }
 0x13a   : > { %2158 = vmatpush.bf16.msra.mxu1 %v8302_v22  ;;  %v8374_v22 = vor.u32 %v11188_v17, %v8371_v18  ;;  %v8430_v17 = vor.u32 %v11202_v14, %v8427_v15  ;;  %v8419_v18 = vld [vmem:[#allocation7 + $0x188] sm:$0xf0] }
 0x13c   : > { %2166 = vmatpush.bf16.msra.mxu2 %v8414_v42  ;;  %v11201_v42 = vld [vmem:[#allocation7 + $0x184] sm:$0xf0] }
 0x13d   : > { %2145 = vmatpush.bf16.msra.mxu0 %v8230_v2  ;;  %v1521_v28 = vpop.f32.mrf.mxu0  ;;  %v8458_v2 = vor.u32 %v11211_v1, %v8457_v0  ;;  %v11208_v1 = vld [vmem:[#allocation7 + $0x1c4] sm:$0xf] }
 0x13e   : > { %v1535_v30 = vpop.f32.mrf.mxu1  ;;  %2159 = vmatpush.bf16.msra.mxu1 %v8294_v29  ;;  %v1522_v39 = vadd.f32 %v1521_v28, %v1508_v20  ;;  %v11203_v28 = vld [vmem:[#allocation7 + $0x194] sm:$0xf0] }
 0x140   : > { %2146 = vmatmul.bf16.vlgmr.msra.gmra.mxu0 %v1688_v56  ;;  %v1536_v47 = vadd.f32 %v1535_v30, %v1522_v39  ;;  %v11213_v56 = vld [vmem:[#allocation7 + $0x1e4] sm:$0xf0]  ;;  %2167 = vmatpush.bf16.msra.mxu2 %v8406_v51  ;;  %v8426_v30 = vor.u32 %v11203_v28, %v8425_v32  ;;  %v11212_v51 = vld [vmem:[#allocation7 + $0x1e4] sm:$0xf] }
 0x141   : > { %v8466_v57 = vor.u32 %v11213_v56, %v8465_v54 }
 0x142   : > { %v1681_v58 = vmax.f32 %v1536_v47, 0.0 }
 0x143   : > { %2125 = vmatpush.bf16.msrb.mxu3 %v8466_v57 }
 0x144   : > { %2168 = vmatpush.bf16.msra.mxu2 %v8398_v62 }
 0x145   : > { %v1523_v50 = vpop.f32.mrf.mxu0  ;;  %v1549_v7 = vpop.f32.mrf.mxu2 }
 0x146   : > { %v1524_v52 = vadd.f32 %v1523_v50, %v1510_v43  ;;  %v1537_v53 = vpop.f32.mrf.mxu1  ;;  %v1563_v23 = vpop.f32.mrf.mxu3  ;;  %v1550_v20 = vadd.f32 %v1549_v7, %v568_v24  ;;  %v8418_v43 = vor.u32 %v11201_v42, %v8417_v41 }
 0x147   : > { %2126 = vmatpush.bf16.msrb.mxu3 %v8458_v2  ;;  %v8451_v2 = vld [vmem:[#allocation7 + $0x1c8] sm:$0xf0] }
 0x148   : > { %v1538_v59 = vadd.f32 %v1537_v53, %v1524_v52  ;;  %2169 = vmatpush.bf16.msra.mxu2 %v8390_v6  ;;  %v1564_v38 = vadd.f32 %v1563_v23, %v1550_v20  ;;  %v8467_v52 = vld [vmem:[#allocation7 + $0x1e8] sm:$0xf0] }
 0x149   : > { %v8470_v53 = vor.u32 %v11212_v51, %v8467_v52 }
 0x14a   : > { %v1685_v63 = vmax.f32 %v1538_v59, 0.0  ;;  %v8459_v59 = vld [vmem:[#allocation7 + $0x1d8] sm:$0xf0] }
 0x14b   : > { %2127 = vmatpush.bf16.msrb.mxu3 %v8450_v10  ;;  %v8446_v10 = vor.u32 %v11206_v8, %v8443_v9 }
 0x14c   : > { %v1689_v3 = vpack.c.bf16 %v1685_v63, %v1681_v58  ;;  %2170 = vmatpush.bf16.msra.mxu2 %v8382_v13  ;;  %v11210_v58 = vld [vmem:[#allocation7 + $0x1d4] sm:$0xf]  ;;  %v8438_v13 = vor.u32 %v11204_v11, %v8435_v12 }
 0x14d   : > { %v1551_v25 = vpop.f32.mrf.mxu2  ;;  %v8462_v60 = vor.u32 %v11210_v58, %v8459_v59 }
 0x14e   : > { %2104 = vmatmul.bf16.vlgmr.msrb.gmra.mxu1 %v1689_v3  ;;  %v1552_v39 = vadd.f32 %v1551_v25, %v568_v24  ;;  %v1565_v40 = vpop.f32.mrf.mxu3 }
 0x14f   : > { %2128 = vmatpush.bf16.msrb.mxu3 %v8442_v55  ;;  %v11200_v55 = vld [vmem:[#allocation7 + $0x184] sm:$0xf] }
 0x150   : > { %2171 = vmatpush.bf16.msra.mxu2 %v8374_v22  ;;  %v1566_v48 = vadd.f32 %v1565_v40, %v1552_v39  ;;  %v8422_v23 = vor.u32 %v11200_v55, %v8419_v18 }
 0x153   : > { %2129 = vmatpush.bf16.msrb.mxu3 %v8434_v33 }
 0x154   : > { %2172 = vmatpush.bf16.msra.mxu2 %v8366_v27 }
 0x157   : > { %2130 = vmatpush.bf16.msrb.mxu3 %v8426_v30 }
 0x158   : > { %2173 = vmatpush.bf16.msra.mxu2 %v8358_v36 }
 0x15b   : > { %2131 = vmatpush.bf16.msrb.mxu3 %v8418_v43 }
 0x15d   : > { %v1577_v29 = vpop.f32.mrf.mxu0 }
 0x15e   : > { %v1591_v35 = vpop.f32.mrf.mxu1  ;;  %2160 = vmatmul.bf16.vlgmr.msra.gmra.mxu1 %v1689_v3  ;;  %v1578_v47 = vadd.f32 %v1577_v29, %v1564_v38  ;;  %v8454_v3 = vor.u32 %v11208_v1, %v8451_v2 }
 0x15f   : > { %2180 = vmatpush.bf16.msra.mxu3 %v8478_v46 }
 0x160   : > { %v1592_v54 = vadd.f32 %v1591_v35, %v1578_v47 }
 0x163   : > { %2181 = vmatpush.bf16.msra.mxu3 %v8470_v53 }
 0x165   : > { %v1605_v49 = vpop.f32.mrf.mxu2  ;;  %v1579_v50 = vpop.f32.mrf.mxu0 }
 0x166   : > { %v1580_v56 = vadd.f32 %v1579_v50, %v1566_v48  ;;  %v1593_v57 = vpop.f32.mrf.mxu1  ;;  %v1606_v61 = vadd.f32 %v1605_v49, %v1592_v54  ;;  %v1619_v6 = vpop.f32.mrf.mxu3  ;;  %v1756_v49 = vld [vmem:[#allocation8] sm:$0x3] }
 0x167   : > { %2182 = vmatpush.bf16.msra.mxu3 %v8462_v60  ;;  %v1620_v33 = vadd.f32 %v1619_v6, %v569_v19  ;;  %v1758_v50 = vperm.slane %v1756_v49, 0  ;;  %v1759_v52 = vperm.slane %v1756_v49, 1 }
 0x168   : > { %v1594_v62 = vadd.f32 %v1593_v57, %v1580_v56  ;;  %v1682_v4 = vmax.f32 %v1606_v61, 0.0 }
 0x16b   : > { %2183 = vmatpush.bf16.msra.mxu3 %v8454_v3 }
 0x16d   : > { %v1607_v63 = vpop.f32.mrf.mxu2 }
 0x16e   : > { %v1608_v0 = vadd.f32 %v1607_v63, %v1594_v62  ;;  %v1621_v21 = vpop.f32.mrf.mxu3 }
 0x16f   : > { %2184 = vmatpush.bf16.msra.mxu3 %v8446_v10  ;;  %v1622_v16 = vadd.f32 %v1621_v21, %v569_v19 }
 0x170   : > { %v1686_v5 = vmax.f32 %v1608_v0, 0.0 }
 0x172   : > { %v1690_v7 = vpack.c.bf16 %v1686_v5, %v1682_v4 }
 0x173   : > { %2185 = vmatpush.bf16.msra.mxu3 %v8438_v13 }
 0x174   : > { %2118 = vmatmul.bf16.vlgmr.msrb.gmra.mxu2 %v1690_v7 }
 0x177   : > { %2186 = vmatpush.bf16.msra.mxu3 %v8430_v17 }
 0x17b   : > { %2187 = vmatpush.bf16.msra.mxu3 %v8422_v23 }
 0x17d   : > { %v1633_v22 = vpop.f32.mrf.mxu0 }
 0x17e   : > { %v1647_v24 = vpop.f32.mrf.mxu1  ;;  %v1634_v25 = vadd.f32 %v1633_v22, %v1620_v33 }
 0x180   : > { %v1648_v32 = vadd.f32 %v1647_v24, %v1634_v25 }
 0x184   : > { %2174 = vmatmul.bf16.vlgmr.msra.gmra.mxu2 %v1690_v7 }
 0x185   : > { %v1661_v26 = vpop.f32.mrf.mxu2  ;;  %v1635_v27 = vpop.f32.mrf.mxu0 }
 0x186   : > { %v1675_v20 = vpop.f32.mrf.mxu3  ;;  %v1636_v28 = vadd.f32 %v1635_v27, %v1622_v16  ;;  %v1662_v29 = vadd.f32 %v1661_v26, %v1648_v32  ;;  %v1649_v30 = vpop.f32.mrf.mxu1 }
 0x188   : > { %v1650_v31 = vadd.f32 %v1649_v30, %v1636_v28  ;;  %v1676_v37 = vadd.f32 %v1675_v20, %v1662_v29 }
 0x18a   : > { %v1683_v39 = vmax.f32 %v1676_v37, 0.0 }
 0x18d   : > { %v1663_v34 = vpop.f32.mrf.mxu2 }
 0x18e   : > { %v1664_v35 = vadd.f32 %v1663_v34, %v1650_v31  ;;  %v1677_v36 = vpop.f32.mrf.mxu3 }
 0x190   : > { %v1678_v38 = vadd.f32 %v1677_v36, %v1664_v35 }
 0x192   : > { %v1687_v40 = vmax.f32 %v1678_v38, 0.0 }
 0x194   : > { %v1691_v41 = vpack.c.bf16 %v1687_v40, %v1683_v39 }
 0x196   : > { %2132 = vmatmul.bf16.vlgmr.msrb.gmra.mxu3 %v1691_v41 }
 0x1a6   : > { %2188 = vmatmul.bf16.vlgmr.msra.gmra.mxu3 %v1691_v41 }
 0x1a9   : > { %v2091_v42 = vpop.f32.mrf.mxu0 }
 0x1aa   : > { %v2092_v56 = vadd.f32 %v2091_v42, %v1758_v50 }
 0x1b1   : > { %v2093_v45 = vpop.f32.mrf.mxu0 }
 0x1b2   : > { %v2094_v2 = vadd.f32 %v2093_v45, %v1758_v50 }
 0x1bd   : > { %v2147_v51 = vpop.f32.mrf.mxu0 }
 0x1be   : > { %v2148_v58 = vadd.f32 %v2147_v51, %v1759_v52 }
 0x1c5   : > { %v2149_v0 = vpop.f32.mrf.mxu0 }
 0x1c6   : > { %v2150_v5 = vadd.f32 %v2149_v0, %v1759_v52 }
 0x1cb   : > { %v2105_v43 = vpop.f32.mrf.mxu1 }
 0x1cc   : > { %v2106_v59 = vadd.f32 %v2105_v43, %v2092_v56 }
 0x1d3   : > { %v2107_v46 = vpop.f32.mrf.mxu1 }
 0x1d4   : > { %v2108_v6 = vadd.f32 %v2107_v46, %v2094_v2 }
 0x1db   : > { %v2161_v53 = vpop.f32.mrf.mxu1 }
 0x1dc   : > { %v2162_v60 = vadd.f32 %v2161_v53, %v2148_v58 }
 0x1e3   : > { %v2163_v4 = vpop.f32.mrf.mxu1 }
 0x1e4   : > { %v2164_v10 = vadd.f32 %v2163_v4, %v2150_v5 }
 0x1f7   : > { %v2119_v44 = vpop.f32.mrf.mxu2 }
 0x1f8   : > { %v2120_v61 = vadd.f32 %v2119_v44, %v2106_v59 }
 0x1ff   : > { %v2121_v47 = vpop.f32.mrf.mxu2 }
 0x200   : > { %v2122_v11 = vadd.f32 %v2121_v47, %v2108_v6 }
 0x207   : > { %v2175_v57 = vpop.f32.mrf.mxu2 }
 0x208   : > { %v2176_v62 = vadd.f32 %v2175_v57, %v2162_v60 }
 0x20f   : > { %v2177_v9 = vpop.f32.mrf.mxu2 }
 0x210   : > { %v2178_v13 = vadd.f32 %v2177_v9, %v2164_v10 }
 0x219   : > { %v2133_v48 = vpop.f32.mrf.mxu3 }
 0x21a   : > { %v2134_v63 = vadd.f32 %v2133_v48, %v2120_v61 }
 0x21c   : > { %v2194_v7 = vmax.f32 %v2134_v63, 0.0 }
 0x221   : > { %v2135_v54 = vpop.f32.mrf.mxu3 }
 0x222   : > { %v2136_v14 = vadd.f32 %v2135_v54, %v2122_v11 }
 0x224   : > { %v2196_v55 = vmax.f32 %v2136_v14, 0.0 }
 0x229   : > { %v2189_v1 = vpop.f32.mrf.mxu3 }
 0x22a   : > { %v2190_v3 = vadd.f32 %v2189_v1, %v2176_v62 }
 0x22c   : > { %v2195_v8 = vmax.f32 %v2190_v3, 0.0 }
 0x22e   : > { %v2198_v12 = vpack.c.bf16 %v2195_v8, %v2194_v7 }
 0x230   : > { %2200 = vst [vmem:[#allocation2] sm:$0xff] %v2198_v12 }
 0x231   : > { %v2191_v15 = vpop.f32.mrf.mxu3 }
 0x232   : > { %v2192_v17 = vadd.f32 %v2191_v15, %v2178_v13 }
 0x234   : > { %v2197_v18 = vmax.f32 %v2192_v17, 0.0 }
 0x236   : > { %v2199_v19 = vpack.c.bf16 %v2197_v18, %v2196_v55 }
 0x238   : > { %2201 = vst [vmem:[#allocation2 + $0x8] sm:$0xff] %v2199_v19 }
 0x239 PF: > { %v9581_v21 = vld [vmem:[%s12372_s18 + $0x888] sm:$0xf]  ;;  %v11510_v22 = vld [vmem:[%s12372_s18 + $0x920] sm:$0xf0]  ;;  %v9425_v25 = vld [vmem:[%s12372_s18 + $0x750] sm:$0xf] }
 0x23a   : > { %v10829_v23 = vld [vmem:[%s12372_s18 + $0x1248] sm:$0xf]  ;;  %v9582_v24 = vor.u32 %v11510_v22, %v9581_v21  ;;  %v11822_v33 = vld [vmem:[%s12372_s18 + $0x12e0] sm:$0xf0]  ;;  %v11471_v26 = vld [vmem:[%s12372_s18 + $0x7e8] sm:$0xf0] }
 0x23b   : > { %v10830_v16 = vor.u32 %v11822_v33, %v10829_v23  ;;  %v10673_v20 = vld [vmem:[%s12372_s18 + $0x1110] sm:$0xf]  ;;  %v11783_v27 = vld [vmem:[%s12372_s18 + $0x11a8] sm:$0xf0]  ;;  %v9426_v32 = vor.u32 %v11471_v26, %v9425_v25  ;;  %v9269_v29 = vld [vmem:[%s12372_s18 + $0x618] sm:$0xf] }
 0x23c   : > { %6078 = vmatpush.bf16.msra.mxu0 %v9582_v24  ;;  %v10674_v28 = vor.u32 %v11783_v27, %v10673_v20  ;;  %v11432_v30 = vld [vmem:[%s12372_s18 + $0x6b0] sm:$0xf0]  ;;  %v10517_v31 = vld [vmem:[%s12372_s18 + $0xfd8] sm:$0xf]  ;;  %v11491_v37 = vld [vmem:[%s12372_s18 + $0x88c] sm:$0xf] }
 0x23d   : > { %6092 = vmatpush.bf16.msra.mxu1 %v10830_v16  ;;  %v11744_v34 = vld [vmem:[%s12372_s18 + $0x1070] sm:$0xf0]  ;;  %v9583_v35 = vld [vmem:[%s12372_s18 + $0x924] sm:$0xf0]  ;;  %v9270_v38 = vor.u32 %v11432_v30, %v9269_v29  ;;  %v9113_v39 = vld [vmem:[%s12372_s18 + $0x4e0] sm:$0xf] }
 0x23e   : > { %v9586_v36 = vor.u32 %v11491_v37, %v9583_v35  ;;  %v11803_v40 = vld [vmem:[%s12372_s18 + $0x124c] sm:$0xf]  ;;  %v10831_v41 = vld [vmem:[%s12372_s18 + $0x12e4] sm:$0xf0]  ;;  %v10518_v42 = vor.u32 %v11744_v34, %v10517_v31  ;;  %v11393_v43 = vld [vmem:[%s12372_s18 + $0x578] sm:$0xf0] }
 0x23f   : > { %v10834_v44 = vor.u32 %v11803_v40, %v10831_v41  ;;  %v11452_v45 = vld [vmem:[%s12372_s18 + $0x754] sm:$0xf]  ;;  %v9427_v46 = vld [vmem:[%s12372_s18 + $0x7ec] sm:$0xf0]  ;;  %v10361_v47 = vld [vmem:[%s12372_s18 + $0xea0] sm:$0xf]  ;;  %v9114_v53 = vor.u32 %v11393_v43, %v9113_v39 }
 0x240   : > { %6079 = vmatpush.bf16.msra.mxu0 %v9426_v32  ;;  %6106 = vmatpush.bf16.msra.mxu2 %v9586_v36  ;;  %v11705_v48 = vld [vmem:[%s12372_s18 + $0xf38] sm:$0xf0]  ;;  %v9430_v49 = vor.u32 %v11452_v45, %v9427_v46  ;;  %v11764_v50 = vld [vmem:[%s12372_s18 + $0x1114] sm:$0xf]  ;;  %v10675_v51 = vld [vmem:[%s12372_s18 + $0x11ac] sm:$0xf0] }
 0x241   : > { %6093 = vmatpush.bf16.msra.mxu1 %v10674_v28  ;;  %6120 = vmatpush.bf16.msra.mxu3 %v10834_v44  ;;  %v11413_v52 = vld [vmem:[%s12372_s18 + $0x61c] sm:$0xf]  ;;  %v8957_v54 = vld [vmem:[%s12372_s18 + $0x3a8] sm:$0xf]  ;;  %v11354_v56 = vld [vmem:[%s12372_s18 + $0x440] sm:$0xf0]  ;;  %v10678_v57 = vor.u32 %v11764_v50, %v10675_v51  ;;  %v10362_v59 = vor.u32 %v11705_v48, %v10361_v47 }
 0x242   : > { %v9271_v58 = vld [vmem:[%s12372_s18 + $0x6b4] sm:$0xf0]  ;;  %v10205_v60 = vld [vmem:[%s12372_s18 + $0xd68] sm:$0xf]  ;;  %v11666_v61 = vld [vmem:[%s12372_s18 + $0xe00] sm:$0xf0]  ;;  %v8958_v4 = vor.u32 %v11354_v56, %v8957_v54 }
 0x243   : > { %v9274_v62 = vor.u32 %v11413_v52, %v9271_v58  ;;  %v11725_v63 = vld [vmem:[%s12372_s18 + $0xfdc] sm:$0xf]  ;;  %v10519_v0 = vld [vmem:[%s12372_s18 + $0x1074] sm:$0xf0]  ;;  %v11374_v1 = vld [vmem:[%s12372_s18 + $0x4e4] sm:$0xf]  ;;  %v10206_v7 = vor.u32 %v11666_v61, %v10205_v60 }
 0x244   : > { %6080 = vmatpush.bf16.msra.mxu0 %v9270_v38  ;;  %6107 = vmatpush.bf16.msra.mxu2 %v9430_v49  ;;  %v9115_v2 = vld [vmem:[%s12372_s18 + $0x57c] sm:$0xf0]  ;;  %v10522_v3 = vor.u32 %v11725_v63, %v10519_v0  ;;  %v11686_v5 = vld [vmem:[%s12372_s18 + $0xea4] sm:$0xf]  ;;  %v8801_v8 = vld [vmem:[%s12372_s18 + $0x270] sm:$0xf] }
 0x245   : > { %6094 = vmatpush.bf16.msra.mxu1 %v10518_v42  ;;  %6121 = vmatpush.bf16.msra.mxu3 %v10678_v57  ;;  %v10363_v6 = vld [vmem:[%s12372_s18 + $0xf3c] sm:$0xf0]  ;;  %v11315_v9 = vld [vmem:[%s12372_s18 + $0x308] sm:$0xf0]  ;;  %v10049_v10 = vld [vmem:[%s12372_s18 + $0xc30] sm:$0xf]  ;;  %v9118_v11 = vor.u32 %v11374_v1, %v9115_v2 }
 0x246   : > { %v11627_v12 = vld [vmem:[%s12372_s18 + $0xcc8] sm:$0xf0]  ;;  %v8959_v14 = vld [vmem:[%s12372_s18 + $0x444] sm:$0xf0]  ;;  %v10366_v15 = vor.u32 %v11686_v5, %v10363_v6  ;;  %v8802_v17 = vor.u32 %v11315_v9, %v8801_v8  ;;  %v8645_v21 = vld [vmem:[%s12372_s18 + $0x138] sm:$0xf] }
 0x247   : > { %v11335_v13 = vld [vmem:[%s12372_s18 + $0x3ac] sm:$0xf]  ;;  %v10207_v18 = vld [vmem:[%s12372_s18 + $0xe04] sm:$0xf0]  ;;  %v10050_v19 = vor.u32 %v11627_v12, %v10049_v10  ;;  %v11276_v22 = vld [vmem:[%s12372_s18 + $0x1d0] sm:$0xf0] }
 0x248   : > { %6081 = vmatpush.bf16.msra.mxu0 %v9114_v53  ;;  %6108 = vmatpush.bf16.msra.mxu2 %v9274_v62  ;;  %v11647_v55 = vld [vmem:[%s12372_s18 + $0xd6c] sm:$0xf]  ;;  %v9893_v23 = vld [vmem:[%s12372_s18 + $0xaf8] sm:$0xf]  ;;  %v8962_v24 = vor.u32 %v11335_v13, %v8959_v14  ;;  %v11588_v33 = vld [vmem:[%s12372_s18 + $0xb90] sm:$0xf0]  ;;  %v8646_v20 = vor.u32 %v11276_v22, %v8645_v21 }
 0x249   : > { %6095 = vmatpush.bf16.msra.mxu1 %v10362_v59  ;;  %6122 = vmatpush.bf16.msra.mxu3 %v10522_v3  ;;  %v11296_v25 = vld [vmem:[%s12372_s18 + $0x274] sm:$0xf]  ;;  %v8803_v26 = vld [vmem:[%s12372_s18 + $0x30c] sm:$0xf0]  ;;  %v10210_v16 = vor.u32 %v11647_v55, %v10207_v18  ;;  %v8489_v27 = vld [vmem:[%s12372_s18] sm:$0xf]  ;;  %v9894_v29 = vor.u32 %v11588_v33, %v9893_v23 }
 0x24a   : > { %v11608_v32 = vld [vmem:[%s12372_s18 + $0xc34] sm:$0xf]  ;;  %v10051_v28 = vld [vmem:[%s12372_s18 + $0xccc] sm:$0xf0]  ;;  %v11237_v30 = vld [vmem:[%s12372_s18 + $0x98] sm:$0xf0]  ;;  %v8806_v37 = vor.u32 %v11296_v25, %v8803_v26 }
 0x24b   : > { %v9737_v31 = vld [vmem:[%s12372_s18 + $0x9c0] sm:$0xf]  ;;  %v11549_v34 = vld [vmem:[%s12372_s18 + $0xa58] sm:$0xf0]  ;;  %v9589_v35 = vld [vmem:[%s12372_s18 + $0x890] sm:$0xf]  ;;  %v10054_v40 = vor.u32 %v11608_v32, %v10051_v28  ;;  %v8490_v43 = vor.u32 %v11237_v30, %v8489_v27 }
 0x24c   : > { %6082 = vmatpush.bf16.msra.mxu0 %v8958_v4  ;;  %6109 = vmatpush.bf16.msra.mxu2 %v9118_v11  ;;  %v11511_v36 = vld [vmem:[%s12372_s18 + $0x928] sm:$0xf0]  ;;  %v10837_v38 = vld [vmem:[%s12372_s18 + $0x1250] sm:$0xf]  ;;  %v11257_v41 = vld [vmem:[%s12372_s18 + $0x13c] sm:$0xf]  ;;  %v9738_v46 = vor.u32 %v11549_v34, %v9737_v31 }
 0x24d   : > { %6096 = vmatpush.bf16.msra.mxu1 %v10206_v7  ;;  %6123 = vmatpush.bf16.msra.mxu3 %v10366_v15  ;;  %v11823_v39 = vld [vmem:[%s12372_s18 + $0x12e8] sm:$0xf0]  ;;  %v8647_v42 = vld [vmem:[%s12372_s18 + $0x1d4] sm:$0xf0]  ;;  %v11569_v44 = vld [vmem:[%s12372_s18 + $0xafc] sm:$0xf]  ;;  %v9590_v47 = vor.u32 %v11511_v36, %v9589_v35 }
 0x24e   : > { %v9895_v45 = vld [vmem:[%s12372_s18 + $0xb94] sm:$0xf0]  ;;  %v11472_v49 = vld [vmem:[%s12372_s18 + $0x7f0] sm:$0xf0]  ;;  %v10838_v51 = vor.u32 %v11823_v39, %v10837_v38  ;;  %v8650_v53 = vor.u32 %v11257_v41, %v8647_v42  ;;  %v11218_v54 = vld [vmem:[%s12372_s18 + $0x4] sm:$0xf] }
 0x24f   : > { %v9433_v48 = vld [vmem:[%s12372_s18 + $0x758] sm:$0xf]  ;;  %v11784_v52 = vld [vmem:[%s12372_s18 + $0x11b0] sm:$0xf0]  ;;  %v8491_v56 = vld [vmem:[%s12372_s18 + $0x9c] sm:$0xf0]  ;;  %v9898_v57 = vor.u32 %v11569_v44, %v9895_v45 }
 0x250   : > { %6083 = vmatpush.bf16.msra.mxu0 %v8802_v17  ;;  %6110 = vmatpush.bf16.msra.mxu2 %v8962_v24  ;;  %v10681_v50 = vld [vmem:[%s12372_s18 + $0x1118] sm:$0xf]  ;;  %v11492_v58 = vld [vmem:[%s12372_s18 + $0x894] sm:$0xf]  ;;  %v9591_v59 = vld [vmem:[%s12372_s18 + $0x92c] sm:$0xf0]  ;;  %v9434_v0 = vor.u32 %v11472_v49, %v9433_v48  ;;  %v8494_v8 = vor.u32 %v11218_v54, %v8491_v56 }
 0x251   : > { %6097 = vmatpush.bf16.msra.mxu1 %v10050_v19  ;;  %6124 = vmatpush.bf16.msra.mxu3 %v10210_v16  ;;  %v11530_v60 = vld [vmem:[%s12372_s18 + $0x9c4] sm:$0xf]  ;;  %v9739_v61 = vld [vmem:[%s12372_s18 + $0xa5c] sm:$0xf0]  ;;  %v8481_v62 = vld [vmem:[#allocation2] sm:$0xf]  ;;  %v10682_v5 = vor.u32 %v11784_v52, %v10681_v50  ;;  %v9594_v12 = vor.u32 %v11492_v58, %v9591_v59 }
 0x252   : > { %v11217_v63 = vld [vmem:[#allocation2 + $0x4] sm:$0xf0]  ;;  %v11216_v4 = vld [vmem:[#allocation2 + $0x4] sm:$0xf]  ;;  %v9277_v6 = vld [vmem:[%s12372_s18 + $0x620] sm:$0xf]  ;;  %v9742_v13 = vor.u32 %v11530_v60, %v9739_v61 }
 0x253   : > { %v11804_v1 = vld [vmem:[%s12372_s18 + $0x1254] sm:$0xf]  ;;  %v10839_v2 = vld [vmem:[%s12372_s18 + $0x12ec] sm:$0xf0]  ;;  %v12526_v3 = vor.u32 %v11217_v63, %v8481_v62  ;;  %v11433_v7 = vld [vmem:[%s12372_s18 + $0x6b8] sm:$0xf0] }
 0x254   : > { %6084 = vmatpush.bf16.msra.mxu0 %v8646_v20  ;;  %6111 = vmatpush.bf16.msra.mxu2 %v8806_v37  ;;  %v8483_v9 = vld [vmem:[#allocation2 + $0x8] sm:$0xf0]  ;;  %v10525_v10 = vld [vmem:[%s12372_s18 + $0xfe0] sm:$0xf]  ;;  %v11745_v11 = vld [vmem:[%s12372_s18 + $0x1078] sm:$0xf0]  ;;  %v10842_v15 = vor.u32 %v11804_v1, %v10839_v2  ;;  %v9278_v18 = vor.u32 %v11433_v7, %v9277_v6 }
 0x255   : > { %6098 = vmatpush.bf16.msra.mxu1 %v9894_v29  ;;  %6125 = vmatpush.bf16.msra.mxu3 %v10054_v40  ;;  %v12533_v14 = vor.u32 %v11216_v4, %v8483_v9  ;;  %v11453_v17 = vld [vmem:[%s12372_s18 + $0x75c] sm:$0xf]  ;;  %v9435_v55 = vld [vmem:[%s12372_s18 + $0x7f4] sm:$0xf0]  ;;  %v10526_v22 = vor.u32 %v11745_v11, %v10525_v10  ;;  %v9121_v23 = vld [vmem:[%s12372_s18 + $0x4e8] sm:$0xf] }
 0x256   : > { %v11765_v19 = vld [vmem:[%s12372_s18 + $0x111c] sm:$0xf]  ;;  %v10683_v21 = vld [vmem:[%s12372_s18 + $0x11b4] sm:$0xf0]  ;;  %v11394_v24 = vld [vmem:[%s12372_s18 + $0x580] sm:$0xf0]  ;;  %v9438_v26 = vor.u32 %v11453_v17, %v9435_v55 }
 0x257   : > { %v10369_v33 = vld [vmem:[%s12372_s18 + $0xea8] sm:$0xf]  ;;  %v11706_v25 = vld [vmem:[%s12372_s18 + $0xf40] sm:$0xf0]  ;;  %v10686_v16 = vor.u32 %v11765_v19, %v10683_v21  ;;  %v9279_v27 = vld [vmem:[%s12372_s18 + $0x6bc] sm:$0xf0]  ;;  %v9122_v32 = vor.u32 %v11394_v24, %v9121_v23 }
 0x258   : > { %6085 = vmatpush.bf16.msra.mxu0 %v8490_v43  ;;  %6112 = vmatpush.bf16.msra.mxu2 %v8650_v53  ;;  %v11414_v20 = vld [vmem:[%s12372_s18 + $0x624] sm:$0xf]  ;;  %v10527_v29 = vld [vmem:[%s12372_s18 + $0x107c] sm:$0xf0]  ;;  %v10370_v30 = vor.u32 %v11706_v25, %v10369_v33  ;;  %v8965_v31 = vld [vmem:[%s12372_s18 + $0x3b0] sm:$0xf] }
 0x259   : > { %6099 = vmatpush.bf16.msra.mxu1 %v9738_v46  ;;  %6126 = vmatpush.bf16.msra.mxu3 %v9898_v57  ;;  %v11726_v28 = vld [vmem:[%s12372_s18 + $0xfe4] sm:$0xf]  ;;  %v11355_v34 = vld [vmem:[%s12372_s18 + $0x448] sm:$0xf0]  ;;  %v10213_v37 = vld [vmem:[%s12372_s18 + $0xd70] sm:$0xf]  ;;  %v9282_v36 = vor.u32 %v11414_v20, %v9279_v27 }
 0x25a   : > { %v11667_v35 = vld [vmem:[%s12372_s18 + $0xe08] sm:$0xf0]  ;;  %v10530_v38 = vor.u32 %v11726_v28, %v10527_v29  ;;  %v9123_v40 = vld [vmem:[%s12372_s18 + $0x584] sm:$0xf0]  ;;  %v8966_v41 = vor.u32 %v11355_v34, %v8965_v31  ;;  %v8809_v45 = vld [vmem:[%s12372_s18 + $0x278] sm:$0xf] }
 0x25b   : > { %6086 = vmatmul.bf16.vlgmr.msra.gmra.mxu0 %v12526_v3  ;;  %v11375_v39 = vld [vmem:[%s12372_s18 + $0x4ec] sm:$0xf]  ;;  %v10371_v43 = vld [vmem:[%s12372_s18 + $0xf44] sm:$0xf0]  ;;  %v10214_v44 = vor.u32 %v11667_v35, %v10213_v37  ;;  %v11316_v46 = vld [vmem:[%s12372_s18 + $0x310] sm:$0xf0] }
 0x25c   : > { %6134 = vmatpush.bf16.msrb.mxu0 %v9590_v47  ;;  %6100 = vmatmul.bf16.vlgmr.msra.gmra.mxu1 %v12533_v14  ;;  %v11687_v42 = vld [vmem:[%s12372_s18 + $0xeac] sm:$0xf]  ;;  %v10057_v47 = vld [vmem:[%s12372_s18 + $0xc38] sm:$0xf]  ;;  %v11628_v48 = vld [vmem:[%s12372_s18 + $0xcd0] sm:$0xf0]  ;;  %v9126_v49 = vor.u32 %v11375_v39, %v9123_v40  ;;  %v8810_v53 = vor.u32 %v11316_v46, %v8809_v45 }
 0x25d   : > { %6148 = vmatpush.bf16.msrb.mxu1 %v10838_v51  ;;  %6113 = vmatpush.bf16.msra.mxu2 %v8494_v8  ;;  %v10374_v50 = vor.u32 %v11687_v42, %v10371_v43  ;;  %v11336_v51 = vld [vmem:[%s12372_s18 + $0x3b4] sm:$0xf]  ;;  %v8967_v52 = vld [vmem:[%s12372_s18 + $0x44c] sm:$0xf0]  ;;  %v10058_v57 = vor.u32 %v11628_v48, %v10057_v47  ;;  %v8653_v58 = vld [vmem:[%s12372_s18 + $0x140] sm:$0xf] }
 0x25e   : > { %6127 = vmatpush.bf16.msra.mxu3 %v9742_v13  ;;  %v11648_v54 = vld [vmem:[%s12372_s18 + $0xd74] sm:$0xf]  ;;  %v10215_v56 = vld [vmem:[%s12372_s18 + $0xe0c] sm:$0xf0]  ;;  %v11277_v59 = vld [vmem:[%s12372_s18 + $0x1d8] sm:$0xf0]  ;;  %v8970_v62 = vor.u32 %v11336_v51, %v8967_v52 }
 0x25f   : > { %v9901_v60 = vld [vmem:[%s12372_s18 + $0xb00] sm:$0xf]  ;;  %v11589_v61 = vld [vmem:[%s12372_s18 + $0xb98] sm:$0xf0]  ;;  %v10218_v63 = vor.u32 %v11648_v54, %v10215_v56  ;;  %v8811_v1 = vld [vmem:[%s12372_s18 + $0x314] sm:$0xf0]  ;;  %v8654_v2 = vor.u32 %v11277_v59, %v8653_v58 }
 0x260   : > { %6135 = vmatpush.bf16.msrb.mxu0 %v9434_v0  ;;  %6114 = vmatmul.bf16.vlgmr.msra.gmra.mxu2 %v12526_v3  ;;  %v11297_v0 = vld [vmem:[%s12372_s18 + $0x27c] sm:$0xf]  ;;  %v8497_v4 = vld [vmem:[%s12372_s18 + $0x8] sm:$0xf]  ;;  %v10059_v6 = vld [vmem:[%s12372_s18 + $0xcd4] sm:$0xf0]  ;;  %v9902_v7 = vor.u32 %v11589_v61, %v9901_v60 }
 0x261   : > { %6149 = vmatpush.bf16.msrb.mxu1 %v10682_v5  ;;  %6162 = vmatpush.bf16.msrb.mxu2 %v9594_v12  ;;  %v11609_v5 = vld [vmem:[%s12372_s18 + $0xc3c] sm:$0xf]  ;;  %v11238_v8 = vld [vmem:[%s12372_s18 + $0xa0] sm:$0xf0]  ;;  %v9745_v9 = vld [vmem:[%s12372_s18 + $0x9c8] sm:$0xf] }
 0x262   : > { %6176 = vmatpush.bf16.msrb.mxu3 %v10842_v15  ;;  %v11550_v10 = vld [vmem:[%s12372_s18 + $0xa60] sm:$0xf0]  ;;  %v9597_v11 = vld [vmem:[%s12372_s18 + $0x898] sm:$0xf]  ;;  %v11512_v12 = vld [vmem:[%s12372_s18 + $0x930] sm:$0xf0]  ;;  %v8814_v15 = vor.u32 %v11297_v0, %v8811_v1  ;;  %v10062_v55 = vor.u32 %v11609_v5, %v10059_v6  ;;  %v8498_v21 = vor.u32 %v11238_v8, %v8497_v4 }
 0x263   : > { %6128 = vmatmul.bf16.vlgmr.msra.gmra.mxu3 %v12533_v14  ;;  %v10845_v13 = vld [vmem:[%s12372_s18 + $0x1258] sm:$0xf]  ;;  %v11824_v17 = vld [vmem:[%s12372_s18 + $0x12f0] sm:$0xf0]  ;;  %v8655_v19 = vld [vmem:[%s12372_s18 + $0x1dc] sm:$0xf0]  ;;  %v9746_v24 = vor.u32 %v11550_v10, %v9745_v9  ;;  %v9598_v33 = vor.u32 %v11512_v12, %v9597_v11 }
 0x264   : > { %6136 = vmatpush.bf16.msrb.mxu0 %v9278_v18  ;;  %v11258_v18 = vld [vmem:[%s12372_s18 + $0x144] sm:$0xf]  ;;  %v9903_v23 = vld [vmem:[%s12372_s18 + $0xb9c] sm:$0xf0]  ;;  %v11785_v27 = vld [vmem:[%s12372_s18 + $0x11b8] sm:$0xf0] }
 0x265   : > { %6150 = vmatpush.bf16.msrb.mxu1 %v10526_v22  ;;  %6163 = vmatpush.bf16.msrb.mxu2 %v9438_v26  ;;  %v11570_v22 = vld [vmem:[%s12372_s18 + $0xb04] sm:$0xf]  ;;  %v9441_v25 = vld [vmem:[%s12372_s18 + $0x760] sm:$0xf]  ;;  %v10846_v26 = vor.u32 %v11824_v17, %v10845_v13  ;;  %v11219_v29 = vld [vmem:[%s12372_s18 + $0xc] sm:$0xf] }
 0x266   : > { %6177 = vmatpush.bf16.msrb.mxu3 %v10686_v16  ;;  %v11473_v16 = vld [vmem:[%s12372_s18 + $0x7f8] sm:$0xf0]  ;;  %v10689_v20 = vld [vmem:[%s12372_s18 + $0x1120] sm:$0xf]  ;;  %v9906_v28 = vor.u32 %v11570_v22, %v9903_v23  ;;  %v9599_v34 = vld [vmem:[%s12372_s18 + $0x934] sm:$0xf0] }
 0x267   : > { %v11493_v31 = vld [vmem:[%s12372_s18 + $0x89c] sm:$0xf]  ;;  %v11531_v37 = vld [vmem:[%s12372_s18 + $0x9cc] sm:$0xf]  ;;  %v9747_v35 = vld [vmem:[%s12372_s18 + $0xa64] sm:$0xf0]  ;;  %v10690_v40 = vor.u32 %v11785_v27, %v10689_v20 }
 0x268   : > { %6137 = vmatpush.bf16.msrb.mxu0 %v9122_v32  ;;  %v8658_v32 = vor.u32 %v11258_v18, %v8655_v19  ;;  %v10847_v39 = vld [vmem:[%s12372_s18 + $0x12f4] sm:$0xf0]  ;;  %v11434_v42 = vld [vmem:[%s12372_s18 + $0x6c0] sm:$0xf0]  ;;  %v9602_v46 = vor.u32 %v11493_v31, %v9599_v34  ;;  %v9750_v47 = vor.u32 %v11531_v37, %v9747_v35  ;;  %v9129_v56 = vld [vmem:[%s12372_s18 + $0x4f0] sm:$0xf] }
 0x269   : > { %6151 = vmatpush.bf16.msrb.mxu1 %v10370_v30  ;;  %6164 = vmatpush.bf16.msrb.mxu2 %v9282_v36  ;;  %v8499_v30 = vld [vmem:[%s12372_s18 + $0xa4] sm:$0xf0]  ;;  %v9442_v36 = vor.u32 %v11473_v16, %v9441_v25  ;;  %v11746_v45 = vld [vmem:[%s12372_s18 + $0x1080] sm:$0xf0]  ;;  %v10377_v58 = vld [vmem:[%s12372_s18 + $0xeb0] sm:$0xf] }
 0x26a   : > { %6178 = vmatpush.bf16.msrb.mxu3 %v10530_v38  ;;  %v11805_v38 = vld [vmem:[%s12372_s18 + $0x125c] sm:$0xf]  ;;  %v8502_v43 = vor.u32 %v11219_v29, %v8499_v30  ;;  %v11766_v52 = vld [vmem:[%s12372_s18 + $0x1124] sm:$0xf]  ;;  %v11707_v59 = vld [vmem:[%s12372_s18 + $0xf48] sm:$0xf0] }
 0x26b   : > { %v10850_v48 = vor.u32 %v11805_v38, %v10847_v39  ;;  %v11727_v1 = vld [vmem:[%s12372_s18 + $0xfec] sm:$0xf]  ;;  %v10378_v4 = vor.u32 %v11707_v59, %v10377_v58  ;;  %v8973_v5 = vld [vmem:[%s12372_s18 + $0x3b8] sm:$0xf]  ;;  %v11356_v6 = vld [vmem:[%s12372_s18 + $0x450] sm:$0xf0] }
 0x26c   : > { %6138 = vmatpush.bf16.msrb.mxu0 %v8966_v41  ;;  %v9285_v41 = vld [vmem:[%s12372_s18 + $0x628] sm:$0xf]  ;;  %v11668_v8 = vld [vmem:[%s12372_s18 + $0xe10] sm:$0xf0]  ;;  %v9131_v12 = vld [vmem:[%s12372_s18 + $0x58c] sm:$0xf0]  ;;  %v8974_v13 = vor.u32 %v11356_v6, %v8973_v5 }
 0x26d   : > { %6152 = vmatpush.bf16.msrb.mxu1 %v10214_v44  ;;  %6165 = vmatpush.bf16.msrb.mxu2 %v9126_v49  ;;  %v10533_v44 = vld [vmem:[%s12372_s18 + $0xfe8] sm:$0xf]  ;;  %v11454_v49 = vld [vmem:[%s12372_s18 + $0x764] sm:$0xf]  ;;  %v9286_v51 = vor.u32 %v11434_v42, %v9285_v41  ;;  %v11376_v11 = vld [vmem:[%s12372_s18 + $0x4f4] sm:$0xf] }
 0x26e   : > { %6179 = vmatpush.bf16.msrb.mxu3 %v10374_v50  ;;  %v9443_v50 = vld [vmem:[%s12372_s18 + $0x7fc] sm:$0xf0]  ;;  %v10534_v54 = vor.u32 %v11746_v45, %v10533_v44  ;;  %v10379_v17 = vld [vmem:[%s12372_s18 + $0xf4c] sm:$0xf0]  ;;  %v11317_v19 = vld [vmem:[%s12372_s18 + $0x318] sm:$0xf0]  ;;  %v9134_v23 = vor.u32 %v11376_v11, %v9131_v12 }
 0x26f   : > { %v9446_v60 = vor.u32 %v11454_v49, %v9443_v50  ;;  %v8817_v18 = vld [vmem:[%s12372_s18 + $0x280] sm:$0xf]  ;;  %v11629_v22 = vld [vmem:[%s12372_s18 + $0xcd8] sm:$0xf0]  ;;  %v8975_v25 = vld [vmem:[%s12372_s18 + $0x454] sm:$0xf0] }
 0x270   : > { %6139 = vmatpush.bf16.msrb.mxu0 %v8810_v53  ;;  %v10691_v53 = vld [vmem:[%s12372_s18 + $0x11bc] sm:$0xf0]  ;;  %v11649_v16 = vld [vmem:[%s12372_s18 + $0xd7c] sm:$0xf]  ;;  %v10223_v20 = vld [vmem:[%s12372_s18 + $0xe14] sm:$0xf0] }
 0x271   : > { %6153 = vmatpush.bf16.msrb.mxu1 %v10058_v57  ;;  %6166 = vmatpush.bf16.msrb.mxu2 %v8970_v62  ;;  %v11395_v57 = vld [vmem:[%s12372_s18 + $0x588] sm:$0xf0]  ;;  %v10694_v61 = vor.u32 %v11766_v52, %v10691_v53  ;;  %v9909_v29 = vld [vmem:[%s12372_s18 + $0xb08] sm:$0xf]  ;;  %v11590_v30 = vld [vmem:[%s12372_s18 + $0xba0] sm:$0xf0]  ;;  %v10226_v34 = vor.u32 %v11649_v16, %v10223_v20 }
 0x272   : > { %6180 = vmatpush.bf16.msrb.mxu3 %v10218_v63  ;;  %v11415_v62 = vld [vmem:[%s12372_s18 + $0x62c] sm:$0xf]  ;;  %v9287_v63 = vld [vmem:[%s12372_s18 + $0x6c4] sm:$0xf0]  ;;  %v9130_v0 = vor.u32 %v11395_v57, %v9129_v56  ;;  %v11298_v37 = vld [vmem:[%s12372_s18 + $0x284] sm:$0xf]  ;;  %v9910_v41 = vor.u32 %v11590_v30, %v9909_v29 }
 0x273   : > { %v9290_v9 = vor.u32 %v11415_v62, %v9287_v63  ;;  %v8819_v35 = vld [vmem:[%s12372_s18 + $0x31c] sm:$0xf0]  ;;  %v8505_v38 = vld [vmem:[%s12372_s18 + $0x10] sm:$0xf]  ;;  %v11610_v39 = vld [vmem:[%s12372_s18 + $0xc44] sm:$0xf] }
 0x274   : > { %6140 = vmatpush.bf16.msrb.mxu0 %v8654_v2  ;;  %v10535_v2 = vld [vmem:[%s12372_s18 + $0x1084] sm:$0xf0]  ;;  %v11239_v42 = vld [vmem:[%s12372_s18 + $0xa8] sm:$0xf0]  ;;  %v9605_v45 = vld [vmem:[%s12372_s18 + $0x8a0] sm:$0xf] }
 0x275   : > { %6154 = vmatpush.bf16.msrb.mxu1 %v9902_v7  ;;  %6167 = vmatpush.bf16.msrb.mxu2 %v8814_v15  ;;  %v10221_v7 = vld [vmem:[%s12372_s18 + $0xd78] sm:$0xf]  ;;  %v10538_v10 = vor.u32 %v11727_v1, %v10535_v2  ;;  %v11688_v15 = vld [vmem:[%s12372_s18 + $0xeb4] sm:$0xf]  ;;  %v11551_v44 = vld [vmem:[%s12372_s18 + $0xa68] sm:$0xf0]  ;;  %v8506_v53 = vor.u32 %v11239_v42, %v8505_v38 }
 0x276   : > { %6181 = vmatpush.bf16.msrb.mxu3 %v10062_v55  ;;  %v10222_v55 = vor.u32 %v11668_v8, %v10221_v7  ;;  %v11825_v49 = vld [vmem:[%s12372_s18 + $0x12f8] sm:$0xf0]  ;;  %v8663_v52 = vld [vmem:[%s12372_s18 + $0x1e4] sm:$0xf0]  ;;  %v11786_v63 = vld [vmem:[%s12372_s18 + $0x11c0] sm:$0xf0] }
 0x277   : > { %v9911_v56 = vld [vmem:[%s12372_s18 + $0xba4] sm:$0xf0]  ;;  %v11220_v2 = vld [vmem:[%s12372_s18 + $0x14] sm:$0xf]  ;;  %v11494_v5 = vld [vmem:[%s12372_s18 + $0x8a4] sm:$0xf] }
 0x278   : > { %6141 = vmatpush.bf16.msrb.mxu0 %v8498_v21  ;;  %v10065_v21 = vld [vmem:[%s12372_s18 + $0xc40] sm:$0xf]  ;;  %v9449_v59 = vld [vmem:[%s12372_s18 + $0x768] sm:$0xf]  ;;  %v11532_v7 = vld [vmem:[%s12372_s18 + $0x9d4] sm:$0xf] }
 0x279   : > { %6155 = vmatpush.bf16.msrb.mxu1 %v9746_v24  ;;  %6168 = vmatpush.bf16.msrb.mxu2 %v8658_v32  ;;  %v10382_v24 = vor.u32 %v11688_v15, %v10379_v17  ;;  %v10066_v27 = vor.u32 %v11629_v22, %v10065_v21  ;;  %v8661_v32 = vld [vmem:[%s12372_s18 + $0x148] sm:$0xf]  ;;  %v9607_v6 = vld [vmem:[%s12372_s18 + $0x93c] sm:$0xf0]  ;;  %v9755_v8 = vld [vmem:[%s12372_s18 + $0xa6c] sm:$0xf0] }
 0x27a   : > { %6182 = vmatpush.bf16.msrb.mxu3 %v9906_v28  ;;  %v11278_v28 = vld [vmem:[%s12372_s18 + $0x1e0] sm:$0xf0]  ;;  %v10697_v62 = vld [vmem:[%s12372_s18 + $0x1128] sm:$0xf]  ;;  %v10855_v11 = vld [vmem:[%s12372_s18 + $0x12fc] sm:$0xf0]  ;;  %v9758_v21 = vor.u32 %v11532_v7, %v9755_v8 }
 0x27b   : > { %6142 = vmatmul.bf16.vlgmr.msrb.gmra.mxu0 %v12526_v3  ;;  %v10698_v12 = vor.u32 %v11786_v63, %v10697_v62  ;;  %v11435_v15 = vld [vmem:[%s12372_s18 + $0x6c8] sm:$0xf0]  ;;  %v9137_v20 = vld [vmem:[%s12372_s18 + $0x4f8] sm:$0xf]  ;;  %v11669_v42 = vld [vmem:[%s12372_s18 + $0xe18] sm:$0xf0] }
 0x27c   : > { %6190 = vmatpush.bf16.msra.mxu0 %v9598_v33  ;;  %6156 = vmatmul.bf16.vlgmr.msrb.gmra.mxu1 %v12533_v14  ;;  %v11337_v33 = vld [vmem:[%s12372_s18 + $0x3bc] sm:$0xf]  ;;  %v10231_v62 = vld [vmem:[%s12372_s18 + $0xe1c] sm:$0xf0]  ;;  %v11299_v7 = vld [vmem:[%s12372_s18 + $0x28c] sm:$0xf] }
 0x27d   : > { %6204 = vmatpush.bf16.msra.mxu1 %v10846_v26  ;;  %6169 = vmatpush.bf16.msrb.mxu2 %v8502_v43  ;;  %v8818_v26 = vor.u32 %v11317_v19, %v8817_v18  ;;  %v8978_v31 = vor.u32 %v11337_v33, %v8975_v25  ;;  %v9753_v43 = vld [vmem:[%s12372_s18 + $0x9d0] sm:$0xf]  ;;  %v11747_v18 = vld [vmem:[%s12372_s18 + $0x1088] sm:$0xf0]  ;;  %v9610_v19 = vor.u32 %v11494_v5, %v9607_v6  ;;  %v8827_v8 = vld [vmem:[%s12372_s18 + $0x324] sm:$0xf0] }
 0x27e   : > { %6183 = vmatpush.bf16.msrb.mxu3 %v9750_v47  ;;  %v10853_v47 = vld [vmem:[%s12372_s18 + $0x1260] sm:$0xf]  ;;  %v9754_v57 = vor.u32 %v11551_v44, %v9753_v43  ;;  %v11767_v25 = vld [vmem:[%s12372_s18 + $0x112c] sm:$0xf] }
 0x280   : > { %6191 = vmatpush.bf16.msra.mxu0 %v9442_v36  ;;  %6170 = vmatmul.bf16.vlgmr.msrb.gmra.mxu2 %v12526_v3  ;;  %v8662_v36 = vor.u32 %v11278_v28, %v8661_v32  ;;  %v10385_v32 = vld [vmem:[%s12372_s18 + $0xeb8] sm:$0xf]  ;;  %v11708_v28 = vld [vmem:[%s12372_s18 + $0xf50] sm:$0xf0] }
 0x281   : > { %6205 = vmatpush.bf16.msra.mxu1 %v10690_v40  ;;  %6218 = vmatpush.bf16.msra.mxu2 %v9602_v46  ;;  %v10067_v40 = vld [vmem:[%s12372_s18 + $0xcdc] sm:$0xf0]  ;;  %v11513_v46 = vld [vmem:[%s12372_s18 + $0x938] sm:$0xf0]  ;;  %v10386_v38 = vor.u32 %v11708_v28, %v10385_v32  ;;  %v9457_v28 = vld [vmem:[%s12372_s18 + $0x770] sm:$0xf] }
 0x282   : > { %6232 = vmatpush.bf16.msra.mxu3 %v10850_v48  ;;  %v8822_v48 = vor.u32 %v11298_v37, %v8819_v35  ;;  %v10070_v50 = vor.u32 %v11610_v39, %v10067_v40  ;;  %v9606_v58 = vor.u32 %v11513_v46, %v9605_v45  ;;  %v11728_v35 = vld [vmem:[%s12372_s18 + $0xff4] sm:$0xf]  ;;  %v8981_v39 = vld [vmem:[%s12372_s18 + $0x3c0] sm:$0xf]  ;;  %v11357_v40 = vld [vmem:[%s12372_s18 + $0x458] sm:$0xf0] }
 0x283   : > { %6184 = vmatmul.bf16.vlgmr.msrb.gmra.mxu3 %v12533_v14  ;;  %v11377_v45 = vld [vmem:[%s12372_s18 + $0x4fc] sm:$0xf]  ;;  %v9139_v46 = vld [vmem:[%s12372_s18 + $0x594] sm:$0xf0] }
 0x284   : > { %6192 = vmatpush.bf16.msra.mxu0 %v9286_v51  ;;  %v11259_v51 = vld [vmem:[%s12372_s18 + $0x14c] sm:$0xf] }
 0x285   : > { %6206 = vmatpush.bf16.msra.mxu1 %v10534_v54  ;;  %6219 = vmatpush.bf16.msra.mxu2 %v9446_v60  ;;  %v11571_v54 = vld [vmem:[%s12372_s18 + $0xb0c] sm:$0xf]  ;;  %v10854_v60 = vor.u32 %v11825_v49, %v10853_v47  ;;  %v8982_v47 = vor.u32 %v11357_v40, %v8981_v39  ;;  %v10387_v49 = vld [vmem:[%s12372_s18 + $0xf54] sm:$0xf0]  ;;  %v9615_v40 = vld [vmem:[%s12372_s18 + $0x944] sm:$0xf0] }
 0x286   : > { %6233 = vmatpush.bf16.msra.mxu3 %v10694_v61  ;;  %v11474_v61 = vld [vmem:[%s12372_s18 + $0x800] sm:$0xf0]  ;;  %v9914_v1 = vor.u32 %v11571_v54, %v9911_v56  ;;  %v9142_v56 = vor.u32 %v11377_v45, %v9139_v46  ;;  %v11495_v39 = vld [vmem:[%s12372_s18 + $0x8ac] sm:$0xf]  ;;  %v10863_v45 = vld [vmem:[%s12372_s18 + $0x1304] sm:$0xf0] }
 0x287   : > { %v11630_v54 = vld [vmem:[%s12372_s18 + $0xce0] sm:$0xf0] }
 0x288   : > { %6193 = vmatpush.bf16.msra.mxu0 %v9130_v0  ;;  %v8666_v0 = vor.u32 %v11259_v51, %v8663_v52  ;;  %v8825_v51 = vld [vmem:[%s12372_s18 + $0x288] sm:$0xf]  ;;  %v11318_v52 = vld [vmem:[%s12372_s18 + $0x320] sm:$0xf0] }
 0x289   : > { %6207 = vmatpush.bf16.msra.mxu1 %v10378_v4  ;;  %6220 = vmatpush.bf16.msra.mxu2 %v9290_v9  ;;  %v8507_v4 = vld [vmem:[%s12372_s18 + $0xac] sm:$0xf0]  ;;  %v9450_v9 = vor.u32 %v11474_v61, %v9449_v59  ;;  %v8983_v59 = vld [vmem:[%s12372_s18 + $0x45c] sm:$0xf0]  ;;  %v11650_v61 = vld [vmem:[%s12372_s18 + $0xd84] sm:$0xf] }
 0x28a   : > { %6234 = vmatpush.bf16.msra.mxu3 %v10538_v10  ;;  %v11806_v10 = vld [vmem:[%s12372_s18 + $0x1264] sm:$0xf]  ;;  %v8510_v17 = vor.u32 %v11220_v2, %v8507_v4  ;;  %v9917_v2 = vld [vmem:[%s12372_s18 + $0xb10] sm:$0xf]  ;;  %v11591_v4 = vld [vmem:[%s12372_s18 + $0xba8] sm:$0xf0]  ;;  %v10234_v6 = vor.u32 %v11650_v61, %v10231_v62 }
 0x28b   : > { %v10858_v22 = vor.u32 %v11806_v10, %v10855_v11  ;;  %v8513_v10 = vld [vmem:[%s12372_s18 + $0x18] sm:$0xf]  ;;  %v11611_v11 = vld [vmem:[%s12372_s18 + $0xc4c] sm:$0xf]  ;;  %v9145_v62 = vld [vmem:[%s12372_s18 + $0x500] sm:$0xf] }
 0x28c   : > { %6194 = vmatpush.bf16.msra.mxu0 %v8974_v13  ;;  %v9293_v13 = vld [vmem:[%s12372_s18 + $0x630] sm:$0xf] }
 0x28d   : > { %6208 = vmatpush.bf16.msra.mxu1 %v10222_v55  ;;  %6221 = vmatpush.bf16.msra.mxu2 %v9134_v23  ;;  %v10541_v55 = vld [vmem:[%s12372_s18 + $0xff0] sm:$0xf]  ;;  %v11455_v23 = vld [vmem:[%s12372_s18 + $0x76c] sm:$0xf]  ;;  %v9294_v33 = vor.u32 %v11435_v15, %v9293_v13  ;;  %v9918_v13 = vor.u32 %v11591_v4, %v9917_v2  ;;  %v11240_v15 = vld [vmem:[%s12372_s18 + $0xb0] sm:$0xf0] }
 0x28e   : > { %6235 = vmatpush.bf16.msra.mxu3 %v10382_v24  ;;  %v9451_v24 = vld [vmem:[%s12372_s18 + $0x804] sm:$0xf0]  ;;  %v10542_v16 = vor.u32 %v11747_v18, %v10541_v55  ;;  %v11552_v55 = vld [vmem:[%s12372_s18 + $0xa70] sm:$0xf0] }
 0x28f   : > { %v9454_v29 = vor.u32 %v11455_v23, %v9451_v24  ;;  %v9613_v18 = vld [vmem:[%s12372_s18 + $0x8a8] sm:$0xf]  ;;  %v11826_v23 = vld [vmem:[%s12372_s18 + $0x1300] sm:$0xf0] }
 0x290   : > { %6195 = vmatpush.bf16.msra.mxu0 %v8818_v26  ;;  %v10699_v26 = vld [vmem:[%s12372_s18 + $0x11c4] sm:$0xf0] }
 0x291   : > { %6209 = vmatpush.bf16.msra.mxu1 %v10066_v27  ;;  %6222 = vmatpush.bf16.msra.mxu2 %v8978_v31  ;;  %v11396_v27 = vld [vmem:[%s12372_s18 + $0x590] sm:$0xf0]  ;;  %v10702_v30 = vor.u32 %v11767_v25, %v10699_v26  ;;  %v8671_v25 = vld [vmem:[%s12372_s18 + $0x1ec] sm:$0xf0]  ;;  %v8514_v26 = vor.u32 %v11240_v15, %v8513_v10  ;;  %v11670_v15 = vld [vmem:[%s12372_s18 + $0xe20] sm:$0xf0] }
 0x292   : > { %6236 = vmatpush.bf16.msra.mxu3 %v10226_v34  ;;  %v11416_v31 = vld [vmem:[%s12372_s18 + $0x634] sm:$0xf]  ;;  %v9295_v34 = vld [vmem:[%s12372_s18 + $0x6cc] sm:$0xf0]  ;;  %v9138_v37 = vor.u32 %v11396_v27, %v9137_v20 }
 0x293   : > { %v9298_v43 = vor.u32 %v11416_v31, %v9295_v34  ;;  %v9919_v20 = vld [vmem:[%s12372_s18 + $0xbac] sm:$0xf0]  ;;  %v11787_v34 = vld [vmem:[%s12372_s18 + $0x11c8] sm:$0xf0] }
 0x294   : > { %6196 = vmatpush.bf16.msra.mxu0 %v8662_v36  ;;  %v10543_v36 = vld [vmem:[%s12372_s18 + $0x108c] sm:$0xf0] }
 0x295   : > { %6210 = vmatpush.bf16.msra.mxu1 %v9910_v41  ;;  %6223 = vmatpush.bf16.msra.mxu2 %v8822_v48  ;;  %v10229_v41 = vld [vmem:[%s12372_s18 + $0xd80] sm:$0xf]  ;;  %v10546_v44 = vor.u32 %v11728_v35, %v10543_v36  ;;  %v11689_v48 = vld [vmem:[%s12372_s18 + $0xebc] sm:$0xf]  ;;  %v10705_v31 = vld [vmem:[%s12372_s18 + $0x1130] sm:$0xf] }
 0x296   : > { %6237 = vmatpush.bf16.msra.mxu3 %v10070_v50  ;;  %v10230_v50 = vor.u32 %v11669_v42, %v10229_v41  ;;  %v11221_v36 = vld [vmem:[%s12372_s18 + $0x1c] sm:$0xf]  ;;  %v9763_v42 = vld [vmem:[%s12372_s18 + $0xa74] sm:$0xf0]  ;;  %v10706_v46 = vor.u32 %v11787_v34, %v10705_v31  ;;  %v10239_v31 = vld [vmem:[%s12372_s18 + $0xe24] sm:$0xf0] }
 0x297   : > { %v11533_v41 = vld [vmem:[%s12372_s18 + $0x9dc] sm:$0xf] }
 0x298   : > { %6197 = vmatpush.bf16.msra.mxu0 %v8506_v53  ;;  %v10073_v53 = vld [vmem:[%s12372_s18 + $0xc48] sm:$0xf] }
 0x299   : > { %6211 = vmatpush.bf16.msra.mxu1 %v9754_v57  ;;  %6224 = vmatpush.bf16.msra.mxu2 %v8666_v0  ;;  %v10390_v57 = vor.u32 %v11689_v48, %v10387_v49  ;;  %v10074_v63 = vor.u32 %v11630_v54, %v10073_v53  ;;  %v8669_v0 = vld [vmem:[%s12372_s18 + $0x150] sm:$0xf]  ;;  %v11436_v48 = vld [vmem:[%s12372_s18 + $0x6d0] sm:$0xf0]  ;;  %v9766_v53 = vor.u32 %v11533_v41, %v9763_v42 }
 0x29a   : > { %6238 = vmatpush.bf16.msra.mxu3 %v9914_v1  ;;  %v11279_v1 = vld [vmem:[%s12372_s18 + $0x1e8] sm:$0xf0]  ;;  %v11300_v41 = vld [vmem:[%s12372_s18 + $0x294] sm:$0xf]  ;;  %v8835_v42 = vld [vmem:[%s12372_s18 + $0x32c] sm:$0xf0] }
 0x29b   : > { %6198 = vmatmul.bf16.vlgmr.msra.gmra.mxu0 %v12526_v3 }
 0x29c   : > { %6246 = vmatpush.bf16.msrb.mxu0 %v9606_v58  ;;  %6212 = vmatmul.bf16.vlgmr.msra.gmra.mxu1 %v12533_v14  ;;  %v11338_v58 = vld [vmem:[%s12372_s18 + $0x3c4] sm:$0xf] }
 0x29d   : > { %6260 = vmatpush.bf16.msrb.mxu1 %v10854_v60  ;;  %6225 = vmatpush.bf16.msra.mxu2 %v8510_v17  ;;  %v8826_v60 = vor.u32 %v11318_v52, %v8825_v51  ;;  %v8986_v5 = vor.u32 %v11338_v58, %v8983_v59  ;;  %v9761_v17 = vld [vmem:[%s12372_s18 + $0x9d8] sm:$0xf]  ;;  %v11748_v51 = vld [vmem:[%s12372_s18 + $0x1090] sm:$0xf0]  ;;  %v9618_v52 = vor.u32 %v11495_v39, %v9615_v40 }
 0x29e   : > { %6239 = vmatpush.bf16.msra.mxu3 %v9758_v21  ;;  %v10861_v21 = vld [vmem:[%s12372_s18 + $0x1268] sm:$0xf]  ;;  %v9762_v27 = vor.u32 %v11552_v55, %v9761_v17  ;;  %v11768_v59 = vld [vmem:[%s12372_s18 + $0x1134] sm:$0xf] }
 0x2a0   : > { %6247 = vmatpush.bf16.msrb.mxu0 %v9450_v9  ;;  %6226 = vmatmul.bf16.vlgmr.msra.gmra.mxu2 %v12526_v3  ;;  %v8670_v9 = vor.u32 %v11279_v1, %v8669_v0  ;;  %v10393_v0 = vld [vmem:[%s12372_s18 + $0xec0] sm:$0xf]  ;;  %v11709_v1 = vld [vmem:[%s12372_s18 + $0xf58] sm:$0xf0] }
 0x2a1   : > { %6261 = vmatpush.bf16.msrb.mxu1 %v10698_v12  ;;  %6274 = vmatpush.bf16.msrb.mxu2 %v9610_v19  ;;  %v10075_v12 = vld [vmem:[%s12372_s18 + $0xce4] sm:$0xf0]  ;;  %v11514_v19 = vld [vmem:[%s12372_s18 + $0x940] sm:$0xf0]  ;;  %v10394_v10 = vor.u32 %v11709_v1, %v10393_v0  ;;  %v9465_v1 = vld [vmem:[%s12372_s18 + $0x778] sm:$0xf] }
 0x2a2   : > { %6288 = vmatpush.bf16.msrb.mxu3 %v10858_v22  ;;  %v8830_v22 = vor.u32 %v11299_v7, %v8827_v8  ;;  %v10078_v24 = vor.u32 %v11611_v11, %v10075_v12  ;;  %v9614_v32 = vor.u32 %v11514_v19, %v9613_v18  ;;  %v11729_v8 = vld [vmem:[%s12372_s18 + $0xffc] sm:$0xf]  ;;  %v8989_v11 = vld [vmem:[%s12372_s18 + $0x3c8] sm:$0xf]  ;;  %v11358_v12 = vld [vmem:[%s12372_s18 + $0x460] sm:$0xf0] }
 0x2a3   : > { %6240 = vmatmul.bf16.vlgmr.msra.gmra.mxu3 %v12533_v14  ;;  %v11378_v18 = vld [vmem:[%s12372_s18 + $0x504] sm:$0xf]  ;;  %v9147_v19 = vld [vmem:[%s12372_s18 + $0x59c] sm:$0xf0] }
 0x2a4   : > { %6248 = vmatpush.bf16.msrb.mxu0 %v9294_v33  ;;  %v11260_v33 = vld [vmem:[%s12372_s18 + $0x154] sm:$0xf] }
 0x2a5   : > { %6262 = vmatpush.bf16.msrb.mxu1 %v10542_v16  ;;  %6275 = vmatpush.bf16.msrb.mxu2 %v9454_v29  ;;  %v11572_v16 = vld [vmem:[%s12372_s18 + $0xb14] sm:$0xf]  ;;  %v10862_v29 = vor.u32 %v11826_v23, %v10861_v21  ;;  %v8990_v21 = vor.u32 %v11358_v12, %v8989_v11  ;;  %v10395_v23 = vld [vmem:[%s12372_s18 + $0xf5c] sm:$0xf0]  ;;  %v9623_v12 = vld [vmem:[%s12372_s18 + $0x94c] sm:$0xf0] }
 0x2a6   : > { %6289 = vmatpush.bf16.msrb.mxu3 %v10702_v30  ;;  %v11475_v30 = vld [vmem:[%s12372_s18 + $0x808] sm:$0xf0]  ;;  %v9922_v35 = vor.u32 %v11572_v16, %v9919_v20  ;;  %v9150_v20 = vor.u32 %v11378_v18, %v9147_v19  ;;  %v11496_v11 = vld [vmem:[%s12372_s18 + $0x8b4] sm:$0xf]  ;;  %v10871_v18 = vld [vmem:[%s12372_s18 + $0x130c] sm:$0xf0] }
 0x2a7   : > { %v11631_v16 = vld [vmem:[%s12372_s18 + $0xce8] sm:$0xf0] }
 0x2a8   : > { %6249 = vmatpush.bf16.msrb.mxu0 %v9138_v37  ;;  %v8674_v37 = vor.u32 %v11260_v33, %v8671_v25  ;;  %v8833_v33 = vld [vmem:[%s12372_s18 + $0x290] sm:$0xf]  ;;  %v11319_v25 = vld [vmem:[%s12372_s18 + $0x328] sm:$0xf0] }
 0x2a9   : > { %6263 = vmatpush.bf16.msrb.mxu1 %v10386_v38  ;;  %6276 = vmatpush.bf16.msrb.mxu2 %v9298_v43  ;;  %v8515_v38 = vld [vmem:[%s12372_s18 + $0xb4] sm:$0xf0]  ;;  %v9458_v43 = vor.u32 %v11475_v30, %v9457_v28  ;;  %v8991_v28 = vld [vmem:[%s12372_s18 + $0x464] sm:$0xf0]  ;;  %v11651_v30 = vld [vmem:[%s12372_s18 + $0xd8c] sm:$0xf] }
 0x2aa   : > { %6290 = vmatpush.bf16.msrb.mxu3 %v10546_v44  ;;  %v11807_v44 = vld [vmem:[%s12372_s18 + $0x126c] sm:$0xf]  ;;  %v8518_v49 = vor.u32 %v11221_v36, %v8515_v38  ;;  %v9925_v36 = vld [vmem:[%s12372_s18 + $0xb18] sm:$0xf]  ;;  %v11592_v38 = vld [vmem:[%s12372_s18 + $0xbb0] sm:$0xf0]  ;;  %v10242_v40 = vor.u32 %v11651_v30, %v10239_v31 }
 0x2ab   : > { %v10866_v54 = vor.u32 %v11807_v44, %v10863_v45  ;;  %v8521_v44 = vld [vmem:[%s12372_s18 + $0x20] sm:$0xf]  ;;  %v11612_v45 = vld [vmem:[%s12372_s18 + $0xc54] sm:$0xf]  ;;  %v9153_v31 = vld [vmem:[%s12372_s18 + $0x508] sm:$0xf] }
 0x2ac   : > { %6250 = vmatpush.bf16.msrb.mxu0 %v8982_v47  ;;  %v9301_v47 = vld [vmem:[%s12372_s18 + $0x638] sm:$0xf] }
 0x2ad   : > { %6264 = vmatpush.bf16.msrb.mxu1 %v10230_v50  ;;  %6277 = vmatpush.bf16.msrb.mxu2 %v9142_v56  ;;  %v10549_v50 = vld [vmem:[%s12372_s18 + $0xff8] sm:$0xf]  ;;  %v11456_v56 = vld [vmem:[%s12372_s18 + $0x774] sm:$0xf]  ;;  %v9302_v58 = vor.u32 %v11436_v48, %v9301_v47  ;;  %v9926_v47 = vor.u32 %v11592_v38, %v9925_v36  ;;  %v11241_v48 = vld [vmem:[%s12372_s18 + $0xb8] sm:$0xf0] }
 0x2ae   : > { %6291 = vmatpush.bf16.msrb.mxu3 %v10390_v57  ;;  %v9459_v57 = vld [vmem:[%s12372_s18 + $0x80c] sm:$0xf0]  ;;  %v10550_v61 = vor.u32 %v11748_v51, %v10549_v50  ;;  %v11553_v50 = vld [vmem:[%s12372_s18 + $0xa78] sm:$0xf0]  ;;  %v11710_v36 = vld [vmem:[%s12372_s18 + $0xf60] sm:$0xf0] }
 0x2af   : > { %v9462_v2 = vor.u32 %v11456_v56, %v9459_v57  ;;  %v9621_v51 = vld [vmem:[%s12372_s18 + $0x8b0] sm:$0xf]  ;;  %v11827_v56 = vld [vmem:[%s12372_s18 + $0x1308] sm:$0xf0] }
 0x2b0   : > { %6251 = vmatpush.bf16.msrb.mxu0 %v8826_v60  ;;  %v10707_v60 = vld [vmem:[%s12372_s18 + $0x11cc] sm:$0xf0] }
 0x2b1   : > { %6265 = vmatpush.bf16.msrb.mxu1 %v10074_v63  ;;  %6278 = vmatpush.bf16.msrb.mxu2 %v8986_v5  ;;  %v11397_v63 = vld [vmem:[%s12372_s18 + $0x598] sm:$0xf0]  ;;  %v10710_v4 = vor.u32 %v11768_v59, %v10707_v60  ;;  %v8679_v59 = vld [vmem:[%s12372_s18 + $0x1f4] sm:$0xf0]  ;;  %v8522_v60 = vor.u32 %v11241_v48, %v8521_v44  ;;  %v10559_v44 = vld [vmem:[%s12372_s18 + $0x109c] sm:$0xf0] }
 0x2b2   : > { %6292 = vmatpush.bf16.msrb.mxu3 %v10234_v6  ;;  %v11417_v5 = vld [vmem:[%s12372_s18 + $0x63c] sm:$0xf]  ;;  %v9303_v6 = vld [vmem:[%s12372_s18 + $0x6d4] sm:$0xf0]  ;;  %v9146_v7 = vor.u32 %v11397_v63, %v9145_v62  ;;  %v11359_v48 = vld [vmem:[%s12372_s18 + $0x468] sm:$0xf0] }
 0x2b3   : > { %v9306_v17 = vor.u32 %v11417_v5, %v9303_v6  ;;  %v9927_v62 = vld [vmem:[%s12372_s18 + $0xbb4] sm:$0xf0]  ;;  %v11788_v6 = vld [vmem:[%s12372_s18 + $0x11d0] sm:$0xf0] }
 0x2b4   : > { %6252 = vmatpush.bf16.msrb.mxu0 %v8670_v9  ;;  %v10551_v9 = vld [vmem:[%s12372_s18 + $0x1094] sm:$0xf0] }
 0x2b5   : > { %6266 = vmatpush.bf16.msrb.mxu1 %v9918_v13  ;;  %6279 = vmatpush.bf16.msrb.mxu2 %v8830_v22  ;;  %v10237_v13 = vld [vmem:[%s12372_s18 + $0xd88] sm:$0xf]  ;;  %v10554_v55 = vor.u32 %v11729_v8, %v10551_v9  ;;  %v11690_v22 = vld [vmem:[%s12372_s18 + $0xec4] sm:$0xf]  ;;  %v10713_v5 = vld [vmem:[%s12372_s18 + $0x1138] sm:$0xf] }
 0x2b6   : > { %6293 = vmatpush.bf16.msrb.mxu3 %v10078_v24  ;;  %v10238_v24 = vor.u32 %v11670_v15, %v10237_v13  ;;  %v11222_v9 = vld [vmem:[%s12372_s18 + $0x24] sm:$0xf]  ;;  %v9771_v15 = vld [vmem:[%s12372_s18 + $0xa7c] sm:$0xf0]  ;;  %v10714_v19 = vor.u32 %v11788_v6, %v10713_v5 }
 0x2b7   : > { %v11534_v13 = vld [vmem:[%s12372_s18 + $0x9e4] sm:$0xf] }
 0x2b8   : > { %6253 = vmatpush.bf16.msrb.mxu0 %v8514_v26  ;;  %v10081_v26 = vld [vmem:[%s12372_s18 + $0xc50] sm:$0xf] }
 0x2b9   : > { %6267 = vmatpush.bf16.msrb.mxu1 %v9762_v27  ;;  %6280 = vmatpush.bf16.msrb.mxu2 %v8674_v37  ;;  %v10398_v27 = vor.u32 %v11690_v22, %v10395_v23  ;;  %v10082_v34 = vor.u32 %v11631_v16, %v10081_v26  ;;  %v8677_v37 = vld [vmem:[%s12372_s18 + $0x158] sm:$0xf]  ;;  %v11437_v22 = vld [vmem:[%s12372_s18 + $0x6d8] sm:$0xf0]  ;;  %v9774_v26 = vor.u32 %v11534_v13, %v9771_v15  ;;  %v8685_v13 = vld [vmem:[%s12372_s18 + $0x160] sm:$0xf] }
 0x2ba   : > { %6294 = vmatpush.bf16.msrb.mxu3 %v9922_v35  ;;  %v11280_v35 = vld [vmem:[%s12372_s18 + $0x1f0] sm:$0xf0]  ;;  %v11281_v15 = vld [vmem:[%s12372_s18 + $0x1f8] sm:$0xf0] }
 0x2bb   : > { %6254 = vmatmul.bf16.vlgmr.msrb.gmra.mxu0 %v12526_v3 }
 0x2bc   : > { %6302 = vmatpush.bf16.msra.mxu0 %v9614_v32  ;;  %6268 = vmatmul.bf16.vlgmr.msrb.gmra.mxu1 %v12533_v14  ;;  %v11339_v32 = vld [vmem:[%s12372_s18 + $0x3cc] sm:$0xf] }
 0x2bd   : > { %6316 = vmatpush.bf16.msra.mxu1 %v10862_v29  ;;  %6281 = vmatpush.bf16.msrb.mxu2 %v8518_v49  ;;  %v8834_v29 = vor.u32 %v11319_v25, %v8833_v33  ;;  %v8994_v39 = vor.u32 %v11339_v32, %v8991_v28  ;;  %v9769_v49 = vld [vmem:[%s12372_s18 + $0x9e0] sm:$0xf]  ;;  %v11749_v33 = vld [vmem:[%s12372_s18 + $0x1098] sm:$0xf0]  ;;  %v9626_v25 = vor.u32 %v11496_v11, %v9623_v12  ;;  %v10247_v11 = vld [vmem:[%s12372_s18 + $0xe2c] sm:$0xf0] }
 0x2be   : > { %6295 = vmatpush.bf16.msrb.mxu3 %v9766_v53  ;;  %v10869_v53 = vld [vmem:[%s12372_s18 + $0x1270] sm:$0xf]  ;;  %v9770_v63 = vor.u32 %v11553_v50, %v9769_v49  ;;  %v11769_v28 = vld [vmem:[%s12372_s18 + $0x113c] sm:$0xf]  ;;  %v11671_v50 = vld [vmem:[%s12372_s18 + $0xe28] sm:$0xf0] }
 0x2bf   : > { %v10245_v49 = vld [vmem:[%s12372_s18 + $0xd90] sm:$0xf] }
 0x2c0   : > { %6303 = vmatpush.bf16.msra.mxu0 %v9458_v43  ;;  %6282 = vmatmul.bf16.vlgmr.msrb.gmra.mxu2 %v12526_v3  ;;  %v8678_v43 = vor.u32 %v11280_v35, %v8677_v37  ;;  %v12815_v37 = vld [vmem:[%s12378_s16] sm:$0xff] }
 0x2c1   : > { %6317 = vmatpush.bf16.msra.mxu1 %v10706_v46  ;;  %6330 = vmatpush.bf16.msra.mxu2 %v9618_v52  ;;  %v10083_v46 = vld [vmem:[%s12372_s18 + $0xcec] sm:$0xf0]  ;;  %v11515_v52 = vld [vmem:[%s12372_s18 + $0x948] sm:$0xf0]  ;;  %v10401_v35 = vld [vmem:[%s12372_s18 + $0xec8] sm:$0xf] }
 0x2c2   : > { %6344 = vmatpush.bf16.msra.mxu3 %v10866_v54  ;;  %v8838_v54 = vor.u32 %v11300_v41, %v8835_v42  ;;  %v10086_v57 = vor.u32 %v11612_v45, %v10083_v46  ;;  %v9622_v0 = vor.u32 %v11515_v52, %v9621_v51  ;;  %v9311_v41 = vld [vmem:[%s12372_s18 + $0x6dc] sm:$0xf0]  ;;  %v2854_v45 = vperm.slane %v12815_v37, 0 }
 0x2c3   : > { %6296 = vmatmul.bf16.vlgmr.msrb.gmra.mxu3 %v12533_v14  ;;  %v10402_v46 = vor.u32 %v11710_v36, %v10401_v35 }
 0x2c4   : > { %6304 = vmatpush.bf16.msra.mxu0 %v9302_v58  ;;  %v11261_v58 = vld [vmem:[%s12372_s18 + $0x15c] sm:$0xf] }
 0x2c5   : > { %6318 = vmatpush.bf16.msra.mxu1 %v10550_v61  ;;  %6331 = vmatpush.bf16.msra.mxu2 %v9462_v2  ;;  %v11573_v61 = vld [vmem:[%s12372_s18 + $0xb1c] sm:$0xf]  ;;  %v10870_v2 = vor.u32 %v11827_v56, %v10869_v53  ;;  %v11379_v53 = vld [vmem:[%s12372_s18 + $0x50c] sm:$0xf] }
 0x2c6   : > { %6345 = vmatpush.bf16.msra.mxu3 %v10710_v4  ;;  %v11476_v4 = vld [vmem:[%s12372_s18 + $0x810] sm:$0xf0]  ;;  %v9930_v8 = vor.u32 %v11573_v61, %v9927_v62  ;;  %v10246_v61 = vor.u32 %v11671_v50, %v10245_v49  ;;  %v8841_v62 = vld [vmem:[%s12372_s18 + $0x298] sm:$0xf]  ;;  %v10721_v50 = vld [vmem:[%s12372_s18 + $0x1140] sm:$0xf] }
 0x2c8   : > { %6305 = vmatpush.bf16.msra.mxu0 %v9146_v7  ;;  %v8682_v7 = vor.u32 %v11261_v58, %v8679_v59  ;;  %v11691_v58 = vld [vmem:[%s12372_s18 + $0xecc] sm:$0xf]  ;;  %v10403_v59 = vld [vmem:[%s12372_s18 + $0xf64] sm:$0xf0] }
 0x2c9   : > { %6319 = vmatpush.bf16.msra.mxu1 %v10394_v10  ;;  %6332 = vmatpush.bf16.msra.mxu2 %v9306_v17  ;;  %v8523_v10 = vld [vmem:[%s12372_s18 + $0xbc] sm:$0xf0]  ;;  %v9466_v17 = vor.u32 %v11476_v4, %v9465_v1  ;;  %v10089_v1 = vld [vmem:[%s12372_s18 + $0xc58] sm:$0xf]  ;;  %v10406_v6 = vor.u32 %v11691_v58, %v10403_v59  ;;  %v2855_v58 = vperm.slane %v12815_v37, 1 }
 0x2ca   : > { %6346 = vmatpush.bf16.msra.mxu3 %v10554_v55  ;;  %v11808_v55 = vld [vmem:[%s12372_s18 + $0x1274] sm:$0xf]  ;;  %v8526_v23 = vor.u32 %v11222_v9, %v8523_v10 }
 0x2cb   : > { %v10874_v16 = vor.u32 %v11808_v55, %v10871_v18  ;;  %v11652_v10 = vld [vmem:[%s12372_s18 + $0xd94] sm:$0xf]  ;;  %v11593_v55 = vld [vmem:[%s12372_s18 + $0xbb8] sm:$0xf0] }
 0x2cc   : > { %6306 = vmatpush.bf16.msra.mxu0 %v8990_v21  ;;  %v9309_v21 = vld [vmem:[%s12372_s18 + $0x640] sm:$0xf] }
 0x2cd   : > { %6320 = vmatpush.bf16.msra.mxu1 %v10238_v24  ;;  %6333 = vmatpush.bf16.msra.mxu2 %v9150_v20  ;;  %v10557_v24 = vld [vmem:[%s12372_s18 + $0x1000] sm:$0xf]  ;;  %v11457_v20 = vld [vmem:[%s12372_s18 + $0x77c] sm:$0xf]  ;;  %v9310_v32 = vor.u32 %v11437_v22, %v9309_v21  ;;  %v8843_v22 = vld [vmem:[%s12372_s18 + $0x334] sm:$0xf0] }
 0x2ce   : > { %6347 = vmatpush.bf16.msra.mxu3 %v10398_v27  ;;  %v9467_v27 = vld [vmem:[%s12372_s18 + $0x814] sm:$0xf0]  ;;  %v10558_v30 = vor.u32 %v11749_v33, %v10557_v24  ;;  %v11301_v21 = vld [vmem:[%s12372_s18 + $0x29c] sm:$0xf]  ;;  %v8686_v24 = vor.u32 %v11281_v15, %v8685_v13  ;;  %v8529_v33 = vld [vmem:[%s12372_s18 + $0x28] sm:$0xf] }
 0x2cf   : > { %v9470_v38 = vor.u32 %v11457_v20, %v9467_v27  ;;  %v11242_v27 = vld [vmem:[%s12372_s18 + $0xc0] sm:$0xf0]  ;;  %v8846_v35 = vor.u32 %v11301_v21, %v8843_v22  ;;  %v10723_v21 = vld [vmem:[%s12372_s18 + $0x11dc] sm:$0xf0] }
 0x2d0   : > { %6307 = vmatpush.bf16.msra.mxu0 %v8834_v29  ;;  %v10715_v29 = vld [vmem:[%s12372_s18 + $0x11d4] sm:$0xf0] }
 0x2d1   : > { %6321 = vmatpush.bf16.msra.mxu1 %v10082_v34  ;;  %6334 = vmatpush.bf16.msra.mxu2 %v8994_v39  ;;  %v11398_v34 = vld [vmem:[%s12372_s18 + $0x5a0] sm:$0xf0]  ;;  %v10718_v39 = vor.u32 %v11769_v28, %v10715_v29 }
 0x2d2   : > { %6348 = vmatpush.bf16.msra.mxu3 %v10242_v40  ;;  %v11418_v40 = vld [vmem:[%s12372_s18 + $0x644] sm:$0xf]  ;;  %v9154_v42 = vor.u32 %v11398_v34, %v9153_v31  ;;  %v11516_v31 = vld [vmem:[%s12372_s18 + $0x950] sm:$0xf0]  ;;  %v10877_v34 = vld [vmem:[%s12372_s18 + $0x1278] sm:$0xf] }
 0x2d3   : > { %v9314_v51 = vor.u32 %v11418_v40, %v9311_v41  ;;  %v11554_v28 = vld [vmem:[%s12372_s18 + $0xa80] sm:$0xf0]  ;;  %v8687_v41 = vld [vmem:[%s12372_s18 + $0x1fc] sm:$0xf0] }
 0x2d4   : > { %6308 = vmatpush.bf16.msra.mxu0 %v8678_v43  ;;  %v11730_v43 = vld [vmem:[%s12372_s18 + $0x1004] sm:$0xf] }
 0x2d5   : > { %6322 = vmatpush.bf16.msra.mxu1 %v9926_v47  ;;  %6335 = vmatpush.bf16.msra.mxu2 %v8838_v54  ;;  %v8997_v47 = vld [vmem:[%s12372_s18 + $0x3d0] sm:$0xf]  ;;  %v10562_v52 = vor.u32 %v11730_v43, %v10559_v44  ;;  %v9155_v54 = vld [vmem:[%s12372_s18 + $0x5a4] sm:$0xf0]  ;;  %v11262_v40 = vld [vmem:[%s12372_s18 + $0x164] sm:$0xf] }
 0x2d6   : > { %6349 = vmatpush.bf16.msra.mxu3 %v10086_v57  ;;  %v8998_v57 = vor.u32 %v11359_v48, %v8997_v47  ;;  %v9158_v4 = vor.u32 %v11379_v53, %v9155_v54  ;;  %v11574_v43 = vld [vmem:[%s12372_s18 + $0xb24] sm:$0xf]  ;;  %v9935_v44 = vld [vmem:[%s12372_s18 + $0xbbc] sm:$0xf0]  ;;  %v11477_v48 = vld [vmem:[%s12372_s18 + $0x818] sm:$0xf0] }
 0x2d7   : > { %v9473_v47 = vld [vmem:[%s12372_s18 + $0x780] sm:$0xf]  ;;  %v11223_v53 = vld [vmem:[%s12372_s18 + $0x2c] sm:$0xf]  ;;  %v9938_v54 = vor.u32 %v11574_v43, %v9935_v44 }
 0x2d8   : > { %6309 = vmatpush.bf16.msra.mxu0 %v8522_v60  ;;  %v6087_v56 = vpop.f32.mrf.mxu0 }
 0x2d9   : > { %6323 = vmatpush.bf16.msra.mxu1 %v9770_v63  ;;  %6336 = vmatpush.bf16.msra.mxu2 %v8682_v7  ;;  %v6088_v60 = vadd.f32 %v6087_v56, %v2854_v45  ;;  %v11320_v63 = vld [vmem:[%s12372_s18 + $0x330] sm:$0xf0]  ;;  %v8531_v56 = vld [vmem:[%s12372_s18 + $0xc4] sm:$0xf0] }
 0x2da   : > { %6350 = vmatpush.bf16.msra.mxu3 %v9930_v8  ;;  %v11340_v7 = vld [vmem:[%s12372_s18 + $0x3d4] sm:$0xf]  ;;  %v8999_v8 = vld [vmem:[%s12372_s18 + $0x46c] sm:$0xf0]  ;;  %v8842_v9 = vor.u32 %v11320_v63, %v8841_v62  ;;  %v11535_v62 = vld [vmem:[%s12372_s18 + $0x9ec] sm:$0xf] }
 0x2db   : > { %6310 = vmatmul.bf16.vlgmr.msra.gmra.mxu0 %v12526_v3  ;;  %v9002_v18 = vor.u32 %v11340_v7, %v8999_v8  ;;  %v9779_v63 = vld [vmem:[%s12372_s18 + $0xa84] sm:$0xf0]  ;;  %v11438_v7 = vld [vmem:[%s12372_s18 + $0x6e0] sm:$0xf0]  ;;  %v8534_v8 = vor.u32 %v11223_v53, %v8531_v56  ;;  %v11321_v56 = vld [vmem:[%s12372_s18 + $0x338] sm:$0xf0] }
 0x2dc   : > { %6358 = vmatpush.bf16.msrb.mxu0 %v9622_v0  ;;  %6324 = vmatmul.bf16.vlgmr.msra.gmra.mxu1 %v12533_v14  ;;  %v6101_v0 = vpop.f32.mrf.mxu1 }
 0x2dd   : > { %6372 = vmatpush.bf16.msrb.mxu1 %v10870_v2  ;;  %6337 = vmatpush.bf16.msra.mxu2 %v8526_v23  ;;  %v11632_v2 = vld [vmem:[%s12372_s18 + $0xcf0] sm:$0xf0]  ;;  %v6102_v5 = vadd.f32 %v6101_v0, %v6088_v60  ;;  %v9474_v0 = vor.u32 %v11477_v48, %v9473_v47 }
 0x2de   : > { %6351 = vmatpush.bf16.msra.mxu3 %v9774_v26  ;;  %v10090_v12 = vor.u32 %v11632_v2, %v10089_v1  ;;  %v10091_v26 = vld [vmem:[%s12372_s18 + $0xcf4] sm:$0xf0]  ;;  %v11809_v1 = vld [vmem:[%s12372_s18 + $0x127c] sm:$0xf] }
 0x2df   : > { %7170 = vst [vmem:[%s12380_s10] sm:$0xff] %v6102_v5  ;;  %v10879_v2 = vld [vmem:[%s12372_s18 + $0x1314] sm:$0xf0] }
 0x2e0   : > { %6359 = vmatpush.bf16.msrb.mxu0 %v9466_v17  ;;  %6338 = vmatmul.bf16.vlgmr.msra.gmra.mxu2 %v12526_v3  ;;  %v9933_v17 = vld [vmem:[%s12372_s18 + $0xb20] sm:$0xf]  ;;  %v6089_v23 = vpop.f32.mrf.mxu0  ;;  %v10882_v15 = vor.u32 %v11809_v1, %v10879_v2  ;;  %v11653_v1 = vld [vmem:[%s12372_s18 + $0xd9c] sm:$0xf]  ;;  %v10255_v2 = vld [vmem:[%s12372_s18 + $0xe34] sm:$0xf0] }
 0x2e1   : > { %6373 = vmatpush.bf16.msrb.mxu1 %v10714_v19  ;;  %6386 = vmatpush.bf16.msrb.mxu2 %v9626_v25  ;;  %v10250_v19 = vor.u32 %v11652_v10, %v10247_v11  ;;  %v11613_v25 = vld [vmem:[%s12372_s18 + $0xc5c] sm:$0xf]  ;;  %v9934_v20 = vor.u32 %v11593_v55, %v9933_v17  ;;  %v11750_v10 = vld [vmem:[%s12372_s18 + $0x10a0] sm:$0xf0]  ;;  %v9475_v55 = vld [vmem:[%s12372_s18 + $0x81c] sm:$0xf0] }
 0x2e2   : > { %6400 = vmatpush.bf16.msrb.mxu3 %v10874_v16  ;;  %v6090_v16 = vadd.f32 %v6089_v23, %v2854_v45  ;;  %v11458_v17 = vld [vmem:[%s12372_s18 + $0x784] sm:$0xf]  ;;  %v9161_v23 = vld [vmem:[%s12372_s18 + $0x510] sm:$0xf] }
 0x2e3   : > { %6352 = vmatmul.bf16.vlgmr.msra.gmra.mxu3 %v12533_v14  ;;  %v6115_v59 = vpop.f32.mrf.mxu2 }
 0x2e4   : > { %6360 = vmatpush.bf16.msrb.mxu0 %v9310_v32  ;;  %v9777_v32 = vld [vmem:[%s12372_s18 + $0x9e8] sm:$0xf]  ;;  %v6103_v29 = vpop.f32.mrf.mxu1 }
 0x2e5   : > { %6374 = vmatpush.bf16.msrb.mxu1 %v10558_v30  ;;  %6387 = vmatpush.bf16.msrb.mxu2 %v9470_v38  ;;  %v9629_v30 = vld [vmem:[%s12372_s18 + $0x8b8] sm:$0xf]  ;;  %v6104_v36 = vadd.f32 %v6103_v29, %v6090_v16  ;;  %v11828_v38 = vld [vmem:[%s12372_s18 + $0x1310] sm:$0xf0]  ;;  %v9778_v45 = vor.u32 %v11554_v28, %v9777_v32  ;;  %v11419_v32 = vld [vmem:[%s12372_s18 + $0x64c] sm:$0xf] }
 0x2e6   : > { %6401 = vmatpush.bf16.msrb.mxu3 %v10718_v39  ;;  %v10094_v39 = vor.u32 %v11613_v25, %v10091_v26  ;;  %v10878_v49 = vor.u32 %v11828_v38, %v10877_v34  ;;  %v6129_v60 = vpop.f32.mrf.mxu3  ;;  %v11711_v25 = vld [vmem:[%s12372_s18 + $0xf68] sm:$0xf0]  ;;  %v9478_v26 = vor.u32 %v11458_v17, %v9475_v55  ;;  %v9319_v28 = vld [vmem:[%s12372_s18 + $0x6e4] sm:$0xf0]  ;;  %v9005_v38 = vld [vmem:[%s12372_s18 + $0x3d8] sm:$0xf] }
 0x2e7   : > { %7209 = vst [vmem:[%s12380_s10 + $0x138] sm:$0xff] %v6104_v36  ;;  %v10567_v34 = vld [vmem:[%s12372_s18 + $0x10a4] sm:$0xf0]  ;;  %v9322_v43 = vor.u32 %v11419_v32, %v9319_v28  ;;  %v8537_v17 = vld [vmem:[%s12372_s18 + $0x30] sm:$0xf] }
 0x2e8   : > { %6361 = vmatpush.bf16.msrb.mxu0 %v9154_v42  ;;  %v8530_v42 = vor.u32 %v11242_v27, %v8529_v33  ;;  %v10409_v33 = vld [vmem:[%s12372_s18 + $0xed0] sm:$0xf]  ;;  %v11614_v55 = vld [vmem:[%s12372_s18 + $0xc64] sm:$0xf]  ;;  %v11829_v32 = vld [vmem:[%s12372_s18 + $0x1318] sm:$0xf0] }
 0x2e9   : > { %6375 = vmatpush.bf16.msrb.mxu1 %v10402_v46  ;;  %6388 = vmatpush.bf16.msrb.mxu2 %v9314_v51  ;;  %v9630_v46 = vor.u32 %v11516_v31, %v9629_v30  ;;  %v11789_v51 = vld [vmem:[%s12372_s18 + $0x11d8] sm:$0xf0]  ;;  %v11731_v31 = vld [vmem:[%s12372_s18 + $0x100c] sm:$0xf]  ;;  %v10410_v36 = vor.u32 %v11711_v25, %v10409_v33  ;;  %v9637_v25 = vld [vmem:[%s12372_s18 + $0x8c0] sm:$0xf] }
 0x2ea   : > { %6402 = vmatpush.bf16.msrb.mxu3 %v10562_v52  ;;  %v8690_v52 = vor.u32 %v11262_v40, %v8687_v41  ;;  %v10722_v5 = vor.u32 %v11789_v51, %v10721_v50  ;;  %v10253_v41 = vld [vmem:[%s12372_s18 + $0xd98] sm:$0xf]  ;;  %v10570_v44 = vor.u32 %v11731_v31, %v10567_v34  ;;  %v10411_v50 = vld [vmem:[%s12372_s18 + $0xf6c] sm:$0xf0]  ;;  %v11555_v33 = vld [vmem:[%s12372_s18 + $0xa88] sm:$0xf0] }
 0x2eb   : > { %v6117_v16 = vpop.f32.mrf.mxu2  ;;  %v11575_v34 = vld [vmem:[%s12372_s18 + $0xb2c] sm:$0xf] }
 0x2ec   : > { %6362 = vmatpush.bf16.msrb.mxu0 %v8998_v57  ;;  %v11497_v57 = vld [vmem:[%s12372_s18 + $0x8bc] sm:$0xf]  ;;  %v6118_v29 = vadd.f32 %v6117_v16, %v2855_v58  ;;  %v10885_v16 = vld [vmem:[%s12372_s18 + $0x1280] sm:$0xf] }
 0x2ed   : > { %6376 = vmatpush.bf16.msrb.mxu1 %v10246_v61  ;;  %6389 = vmatpush.bf16.msrb.mxu2 %v9158_v4  ;;  %v9631_v61 = vld [vmem:[%s12372_s18 + $0x954] sm:$0xf0]  ;;  %v6116_v4 = vadd.f32 %v6115_v59, %v2855_v58  ;;  %v11633_v58 = vld [vmem:[%s12372_s18 + $0xcf8] sm:$0xf0] }
 0x2ee   : > { %6403 = vmatpush.bf16.msrb.mxu3 %v10406_v6  ;;  %v9317_v6 = vld [vmem:[%s12372_s18 + $0x648] sm:$0xf]  ;;  %v9634_v11 = vor.u32 %v11497_v57, %v9631_v61  ;;  %v10097_v57 = vld [vmem:[%s12372_s18 + $0xc60] sm:$0xf] }
 0x2ef   : > { %v6130_v13 = vadd.f32 %v6129_v60, %v6116_v4  ;;  %v10098_v4 = vor.u32 %v11633_v58, %v10097_v57  ;;  %v11810_v57 = vld [vmem:[%s12372_s18 + $0x1284] sm:$0xf]  ;;  %v10887_v58 = vld [vmem:[%s12372_s18 + $0x131c] sm:$0xf0] }
 0x2f0   : > { %6363 = vmatpush.bf16.msrb.mxu0 %v8842_v9  ;;  %v10565_v9 = vld [vmem:[%s12372_s18 + $0x1008] sm:$0xf] }
 0x2f1   : > { %6377 = vmatpush.bf16.msrb.mxu1 %v10090_v12  ;;  %6390 = vmatpush.bf16.msrb.mxu2 %v9002_v18  ;;  %v9782_v12 = vor.u32 %v11535_v62, %v9779_v63  ;;  %v9318_v18 = vor.u32 %v11438_v7, %v9317_v6  ;;  %7171 = vst [vmem:[%s12380_s10 + $0x8] sm:$0xff] %v6130_v13  ;;  %v11341_v62 = vld [vmem:[%s12372_s18 + $0x3dc] sm:$0xf]  ;;  %v9007_v63 = vld [vmem:[%s12372_s18 + $0x474] sm:$0xf0] }
 0x2f2   : > { %6404 = vmatpush.bf16.msrb.mxu3 %v10250_v19  ;;  %v11770_v19 = vld [vmem:[%s12372_s18 + $0x1144] sm:$0xf]  ;;  %v10566_v22 = vor.u32 %v11750_v10, %v10565_v9  ;;  %v9941_v7 = vld [vmem:[%s12372_s18 + $0xb28] sm:$0xf]  ;;  %v9010_v9 = vor.u32 %v11341_v62, %v9007_v63  ;;  %v10258_v10 = vor.u32 %v11653_v1, %v10255_v2  ;;  %v11439_v62 = vld [vmem:[%s12372_s18 + $0x6e8] sm:$0xf0] }
 0x2f3   : > { %v10726_v27 = vor.u32 %v11770_v19, %v10723_v21  ;;  %v11282_v6 = vld [vmem:[%s12372_s18 + $0x200] sm:$0xf0]  ;;  %v11751_v1 = vld [vmem:[%s12372_s18 + $0x10a8] sm:$0xf0] }
 0x2f4   : > { %6364 = vmatpush.bf16.msrb.mxu0 %v8686_v24  ;;  %v11399_v24 = vld [vmem:[%s12372_s18 + $0x5a8] sm:$0xf0] }
 0x2f5   : > { %6378 = vmatpush.bf16.msrb.mxu1 %v9934_v20  ;;  %6391 = vmatpush.bf16.msrb.mxu2 %v8846_v35  ;;  %v6131_v20 = vpop.f32.mrf.mxu3  ;;  %v9162_v30 = vor.u32 %v11399_v24, %v9161_v23  ;;  %v2856_v35 = vperm.slane %v12815_v37, 2  ;;  %v11243_v23 = vld [vmem:[%s12372_s18 + $0xc8] sm:$0xf0]  ;;  %v9785_v24 = vld [vmem:[%s12372_s18 + $0x9f0] sm:$0xf] }
 0x2f6   : > { %6405 = vmatpush.bf16.msrb.mxu3 %v10094_v39  ;;  %v11360_v39 = vld [vmem:[%s12372_s18 + $0x470] sm:$0xf0]  ;;  %v6132_v40 = vadd.f32 %v6131_v20, %v6118_v29  ;;  %v11263_v29 = vld [vmem:[%s12372_s18 + $0x16c] sm:$0xf]  ;;  %v8538_v31 = vor.u32 %v11243_v23, %v8537_v17  ;;  %v10417_v17 = vld [vmem:[%s12372_s18 + $0xed8] sm:$0xf] }
 0x2f7   : > { %v9006_v48 = vor.u32 %v11360_v39, %v9005_v38  ;;  %v9481_v39 = vld [vmem:[%s12372_s18 + $0x788] sm:$0xf]  ;;  %v11420_v23 = vld [vmem:[%s12372_s18 + $0x654] sm:$0xf] }
 0x2f8   : > { %6365 = vmatpush.bf16.msrb.mxu0 %v8530_v42  ;;  %v11672_v42 = vld [vmem:[%s12372_s18 + $0xe30] sm:$0xf0]  ;;  %v6143_v47 = vpop.f32.mrf.mxu0  ;;  %7210 = vst [vmem:[%s12380_s10 + $0x140] sm:$0xff] %v6132_v40  ;;  %v11478_v40 = vld [vmem:[%s12372_s18 + $0x820] sm:$0xf0] }
 0x2f9   : > { %6379 = vmatpush.bf16.msrb.mxu1 %v9778_v45  ;;  %6392 = vmatpush.bf16.msrb.mxu2 %v8690_v52  ;;  %v11380_v45 = vld [vmem:[%s12372_s18 + $0x514] sm:$0xf]  ;;  %v6144_v51 = vadd.f32 %v6143_v47, %v2856_v35  ;;  %v6157_v52 = vpop.f32.mrf.mxu1  ;;  %v10254_v53 = vor.u32 %v11672_v42, %v10253_v41  ;;  %v10886_v41 = vor.u32 %v11829_v32, %v10885_v16  ;;  %v10729_v42 = vld [vmem:[%s12372_s18 + $0x1148] sm:$0xf]  ;;  %v8539_v47 = vld [vmem:[%s12372_s18 + $0xcc] sm:$0xf0] }
 0x2fa   : > { %6406 = vmatpush.bf16.msrb.mxu3 %v9938_v54  ;;  %v8849_v54 = vld [vmem:[%s12372_s18 + $0x2a0] sm:$0xf]  ;;  %v10575_v16 = vld [vmem:[%s12372_s18 + $0x10ac] sm:$0xf0] }
 0x2fb   : > { %6366 = vmatmul.bf16.vlgmr.msrb.gmra.mxu0 %v12526_v3  ;;  %v6158_v60 = vadd.f32 %v6157_v52, %v6144_v51  ;;  %v9639_v52 = vld [vmem:[%s12372_s18 + $0x95c] sm:$0xf0] }
 0x2fc   : > { %6414 = vmatpush.bf16.msra.mxu0 %v9630_v46  ;;  %6380 = vmatmul.bf16.vlgmr.msrb.gmra.mxu1 %v12533_v14  ;;  %v9163_v46 = vld [vmem:[%s12372_s18 + $0x5ac] sm:$0xf0]  ;;  %v9013_v32 = vld [vmem:[%s12372_s18 + $0x3e0] sm:$0xf] }
 0x2fd   : > { %6428 = vmatpush.bf16.msra.mxu1 %v10878_v49  ;;  %6393 = vmatpush.bf16.msrb.mxu2 %v8534_v8  ;;  %v11692_v49 = vld [vmem:[%s12372_s18 + $0xed4] sm:$0xf]  ;;  %v9166_v59 = vor.u32 %v11380_v45, %v9163_v46  ;;  %7172 = vst [vmem:[%s12380_s10 + $0x10] sm:$0xff] %v6158_v60  ;;  %v11594_v8 = vld [vmem:[%s12372_s18 + $0xbc0] sm:$0xf0] }
 0x2fe   : > { %6407 = vmatpush.bf16.msrb.mxu3 %v9782_v12  ;;  %v10414_v61 = vor.u32 %v11692_v49, %v10411_v50  ;;  %v8851_v12 = vld [vmem:[%s12372_s18 + $0x33c] sm:$0xf0]  ;;  %v11224_v45 = vld [vmem:[%s12372_s18 + $0x34] sm:$0xf]  ;;  %v2857_v49 = vperm.slane %v12815_v37, 3 }
 0x2ff   : > { %v8542_v63 = vor.u32 %v11224_v45, %v8539_v47  ;;  %v11322_v47 = vld [vmem:[%s12372_s18 + $0x340] sm:$0xf0] }
 0x300   : > { %6415 = vmatpush.bf16.msra.mxu0 %v9474_v0  ;;  %6394 = vmatmul.bf16.vlgmr.msrb.gmra.mxu2 %v12526_v3  ;;  %v8850_v0 = vor.u32 %v11321_v56, %v8849_v54  ;;  %v6145_v13 = vpop.f32.mrf.mxu0  ;;  %v9787_v54 = vld [vmem:[%s12372_s18 + $0xa8c] sm:$0xf0]  ;;  %v9482_v56 = vor.u32 %v11478_v40, %v9481_v39 }
 0x301   : > { %6429 = vmatpush.bf16.msra.mxu1 %v10722_v5  ;;  %6442 = vmatpush.bf16.msra.mxu2 %v9634_v11  ;;  %v8693_v5 = vld [vmem:[%s12372_s18 + $0x168] sm:$0xf]  ;;  %v11302_v11 = vld [vmem:[%s12372_s18 + $0x2a4] sm:$0xf]  ;;  %v6146_v19 = vadd.f32 %v6145_v13, %v2856_v35  ;;  %v6159_v21 = vpop.f32.mrf.mxu1  ;;  %v9169_v13 = vld [vmem:[%s12372_s18 + $0x518] sm:$0xf] }
 0x302   : > { %6456 = vmatpush.bf16.msra.mxu3 %v10882_v15  ;;  %v8694_v15 = vor.u32 %v11282_v6, %v8693_v5  ;;  %v8854_v20 = vor.u32 %v11302_v11, %v8851_v12  ;;  %v9943_v35 = vld [vmem:[%s12372_s18 + $0xbc4] sm:$0xf0]  ;;  %v10890_v6 = vor.u32 %v11810_v57, %v10887_v58  ;;  %v11654_v57 = vld [vmem:[%s12372_s18 + $0xda4] sm:$0xf]  ;;  %v10263_v58 = vld [vmem:[%s12372_s18 + $0xe3c] sm:$0xf0] }
 0x303   : > { %6408 = vmatmul.bf16.vlgmr.msrb.gmra.mxu3 %v12533_v14  ;;  %v9946_v46 = vor.u32 %v11575_v34, %v9943_v35  ;;  %v6171_v50 = vpop.f32.mrf.mxu2  ;;  %v10731_v11 = vld [vmem:[%s12372_s18 + $0x11e4] sm:$0xf0] }
 0x304   : > { %6416 = vmatpush.bf16.msra.mxu0 %v9318_v18  ;;  %v10099_v18 = vld [vmem:[%s12372_s18 + $0xcfc] sm:$0xf0] }
 0x305   : > { %6430 = vmatpush.bf16.msra.mxu1 %v10566_v22  ;;  %6443 = vmatpush.bf16.msra.mxu2 %v9478_v26  ;;  %v9942_v22 = vor.u32 %v11594_v8, %v9941_v7  ;;  %v11517_v26 = vld [vmem:[%s12372_s18 + $0x958] sm:$0xf0]  ;;  %v10102_v28 = vor.u32 %v11614_v55, %v10099_v18  ;;  %v11459_v7 = vld [vmem:[%s12372_s18 + $0x78c] sm:$0xf]  ;;  %v9483_v8 = vld [vmem:[%s12372_s18 + $0x824] sm:$0xf0] }
 0x306   : > { %6457 = vmatpush.bf16.msra.mxu3 %v10726_v27  ;;  %v6160_v27 = vadd.f32 %v6159_v21, %v6146_v19  ;;  %v9638_v38 = vor.u32 %v11517_v26, %v9637_v25  ;;  %v6185_v51 = vpop.f32.mrf.mxu3  ;;  %v11712_v55 = vld [vmem:[%s12372_s18 + $0xf70] sm:$0xf0]  ;;  %v9486_v18 = vor.u32 %v11459_v7, %v9483_v8  ;;  %v8545_v7 = vld [vmem:[%s12372_s18 + $0x38] sm:$0xf]  ;;  %v11615_v8 = vld [vmem:[%s12372_s18 + $0xc6c] sm:$0xf] }
 0x307   : > { %v11732_v26 = vld [vmem:[%s12372_s18 + $0x1014] sm:$0xf] }
 0x308   : > { %6417 = vmatpush.bf16.msra.mxu0 %v9162_v30  ;;  %v8695_v30 = vld [vmem:[%s12372_s18 + $0x204] sm:$0xf0]  ;;  %7211 = vst [vmem:[%s12380_s10 + $0x148] sm:$0xff] %v6160_v27  ;;  %v10418_v27 = vor.u32 %v11712_v55, %v10417_v17  ;;  %v10578_v35 = vor.u32 %v11732_v26, %v10575_v16  ;;  %v11556_v17 = vld [vmem:[%s12372_s18 + $0xa90] sm:$0xf0] }
 0x309   : > { %6431 = vmatpush.bf16.msra.mxu1 %v10410_v36  ;;  %6444 = vmatpush.bf16.msra.mxu2 %v9322_v43  ;;  %v9786_v36 = vor.u32 %v11555_v33, %v9785_v24  ;;  %v11790_v43 = vld [vmem:[%s12372_s18 + $0x11e0] sm:$0xf0]  ;;  %v9327_v24 = vld [vmem:[%s12372_s18 + $0x6ec] sm:$0xf0]  ;;  %v9645_v55 = vld [vmem:[%s12372_s18 + $0x8c8] sm:$0xf] }
 0x30a   : > { %6458 = vmatpush.bf16.msra.mxu3 %v10570_v44  ;;  %v8698_v44 = vor.u32 %v11263_v29, %v8695_v30  ;;  %v10730_v60 = vor.u32 %v11790_v43, %v10729_v42  ;;  %v10261_v30 = vld [vmem:[%s12372_s18 + $0xda0] sm:$0xf]  ;;  %v9330_v34 = vor.u32 %v11420_v23, %v9327_v24  ;;  %v10419_v42 = vld [vmem:[%s12372_s18 + $0xf74] sm:$0xf0]  ;;  %v11830_v23 = vld [vmem:[%s12372_s18 + $0x1320] sm:$0xf0] }
 0x30b   : > { %v6173_v19 = vpop.f32.mrf.mxu2  ;;  %v11576_v16 = vld [vmem:[%s12372_s18 + $0xb34] sm:$0xf] }
 0x30c   : > { %6418 = vmatpush.bf16.msra.mxu0 %v9006_v48  ;;  %v11498_v48 = vld [vmem:[%s12372_s18 + $0x8c4] sm:$0xf]  ;;  %v6174_v33 = vadd.f32 %v6173_v19, %v2857_v49  ;;  %v10893_v19 = vld [vmem:[%s12372_s18 + $0x1288] sm:$0xf] }
 0x30d   : > { %6432 = vmatpush.bf16.msra.mxu1 %v10254_v53  ;;  %6445 = vmatpush.bf16.msra.mxu2 %v9166_v59  ;;  %v11536_v53 = vld [vmem:[%s12372_s18 + $0x9f4] sm:$0xf]  ;;  %v6172_v59 = vadd.f32 %v6171_v50, %v2857_v49  ;;  %v9642_v2 = vor.u32 %v11498_v48, %v9639_v52  ;;  %v10105_v48 = vld [vmem:[%s12372_s18 + $0xc68] sm:$0xf]  ;;  %v11634_v49 = vld [vmem:[%s12372_s18 + $0xd00] sm:$0xf0] }
 0x30e   : > { %6459 = vmatpush.bf16.msra.mxu3 %v10414_v61  ;;  %v9325_v61 = vld [vmem:[%s12372_s18 + $0x650] sm:$0xf]  ;;  %v6187_v21 = vpop.f32.mrf.mxu3 }
 0x30f   : > { %v6186_v5 = vadd.f32 %v6185_v51, %v6172_v59  ;;  %v6188_v29 = vadd.f32 %v6187_v21, %v6174_v33  ;;  %v10106_v59 = vor.u32 %v11634_v49, %v10105_v48  ;;  %v11264_v33 = vld [vmem:[%s12372_s18 + $0x174] sm:$0xf]  ;;  %v11811_v48 = vld [vmem:[%s12372_s18 + $0x128c] sm:$0xf]  ;;  %v10895_v49 = vld [vmem:[%s12372_s18 + $0x1324] sm:$0xf0] }
 0x310   : > { %6419 = vmatpush.bf16.msra.mxu0 %v8850_v0  ;;  %v10573_v0 = vld [vmem:[%s12372_s18 + $0x1010] sm:$0xf] }
 0x311   : > { %6433 = vmatpush.bf16.msra.mxu1 %v10098_v4  ;;  %6446 = vmatpush.bf16.msra.mxu2 %v9010_v9  ;;  %v9790_v4 = vor.u32 %v11536_v53, %v9787_v54  ;;  %v9326_v9 = vor.u32 %v11439_v62, %v9325_v61  ;;  %7173 = vst [vmem:[%s12380_s10 + $0x18] sm:$0xff] %v6186_v5  ;;  %v11342_v53 = vld [vmem:[%s12372_s18 + $0x3e4] sm:$0xf]  ;;  %v9015_v54 = vld [vmem:[%s12372_s18 + $0x47c] sm:$0xf0] }
 0x312   : > { %6460 = vmatpush.bf16.msra.mxu3 %v10258_v10  ;;  %v11771_v10 = vld [vmem:[%s12372_s18 + $0x114c] sm:$0xf]  ;;  %v10574_v12 = vor.u32 %v11751_v1, %v10573_v0  ;;  %7212 = vst [vmem:[%s12380_s10 + $0x150] sm:$0xff] %v6188_v29  ;;  %v9949_v62 = vld [vmem:[%s12372_s18 + $0xb30] sm:$0xf]  ;;  %v9018_v0 = vor.u32 %v11342_v53, %v9015_v54  ;;  %v10266_v1 = vor.u32 %v11654_v57, %v10263_v58 }
 0x313   : > { %v11283_v61 = vld [vmem:[%s12372_s18 + $0x208] sm:$0xf0]  ;;  %v11440_v53 = vld [vmem:[%s12372_s18 + $0x6f0] sm:$0xf0] }
 0x314   : > { %6420 = vmatpush.bf16.msra.mxu0 %v8694_v15  ;;  %v11400_v15 = vld [vmem:[%s12372_s18 + $0x5b0] sm:$0xf0]  ;;  %v11479_v29 = vld [vmem:[%s12372_s18 + $0x828] sm:$0xf0] }
 0x315   : > { %6434 = vmatpush.bf16.msra.mxu1 %v9942_v22  ;;  %6447 = vmatpush.bf16.msra.mxu2 %v8854_v20  ;;  %v10734_v22 = vor.u32 %v11771_v10, %v10731_v11  ;;  %v9170_v25 = vor.u32 %v11400_v15, %v9169_v13  ;;  %v2858_v20 = vperm.slane %v12815_v37, 4  ;;  %v11244_v13 = vld [vmem:[%s12372_s18 + $0xd0] sm:$0xf0]  ;;  %v9793_v15 = vld [vmem:[%s12372_s18 + $0x9f8] sm:$0xf] }
 0x316   : > { %6461 = vmatpush.bf16.msra.mxu3 %v10102_v28  ;;  %v11361_v28 = vld [vmem:[%s12372_s18 + $0x478] sm:$0xf0]  ;;  %v8546_v26 = vor.u32 %v11244_v13, %v8545_v7  ;;  %v11752_v57 = vld [vmem:[%s12372_s18 + $0x10b0] sm:$0xf0]  ;;  %v10425_v7 = vld [vmem:[%s12372_s18 + $0xee0] sm:$0xf] }
 0x317   : > { %v9014_v40 = vor.u32 %v11361_v28, %v9013_v32  ;;  %v9489_v28 = vld [vmem:[%s12372_s18 + $0x790] sm:$0xf]  ;;  %v11421_v13 = vld [vmem:[%s12372_s18 + $0x65c] sm:$0xf] }
 0x318   : > { %6421 = vmatpush.bf16.msra.mxu0 %v8538_v31  ;;  %v11673_v31 = vld [vmem:[%s12372_s18 + $0xe38] sm:$0xf0]  ;;  %v6199_v39 = vpop.f32.mrf.mxu0 }
 0x319   : > { %6435 = vmatpush.bf16.msra.mxu1 %v9786_v36  ;;  %6448 = vmatpush.bf16.msra.mxu2 %v8698_v44  ;;  %v11381_v36 = vld [vmem:[%s12372_s18 + $0x51c] sm:$0xf]  ;;  %v6200_v43 = vadd.f32 %v6199_v39, %v2858_v20  ;;  %v6213_v44 = vpop.f32.mrf.mxu1  ;;  %v10262_v45 = vor.u32 %v11673_v31, %v10261_v30  ;;  %v10894_v30 = vor.u32 %v11830_v23, %v10893_v19  ;;  %v10737_v31 = vld [vmem:[%s12372_s18 + $0x1150] sm:$0xf]  ;;  %v8547_v39 = vld [vmem:[%s12372_s18 + $0xd4] sm:$0xf0] }
 0x31a   : > { %6462 = vmatpush.bf16.msra.mxu3 %v9946_v46  ;;  %v8857_v46 = vld [vmem:[%s12372_s18 + $0x2a8] sm:$0xf]  ;;  %v10583_v19 = vld [vmem:[%s12372_s18 + $0x10b4] sm:$0xf0] }
 0x31b   : > { %6422 = vmatmul.bf16.vlgmr.msra.gmra.mxu0 %v12526_v3  ;;  %v6214_v51 = vadd.f32 %v6213_v44, %v6200_v43  ;;  %v9647_v44 = vld [vmem:[%s12372_s18 + $0x964] sm:$0xf0] }
 0x31c   : > { %6470 = vmatpush.bf16.msrb.mxu0 %v9638_v38  ;;  %6436 = vmatmul.bf16.vlgmr.msra.gmra.mxu1 %v12533_v14  ;;  %v9171_v38 = vld [vmem:[%s12372_s18 + $0x5b4] sm:$0xf0]  ;;  %v9021_v23 = vld [vmem:[%s12372_s18 + $0x3e8] sm:$0xf] }
 0x31d   : > { %6484 = vmatpush.bf16.msrb.mxu1 %v10886_v41  ;;  %6449 = vmatpush.bf16.msra.mxu2 %v8542_v63  ;;  %v11693_v41 = vld [vmem:[%s12372_s18 + $0xedc] sm:$0xf]  ;;  %v9174_v50 = vor.u32 %v11381_v36, %v9171_v38  ;;  %7174 = vst [vmem:[%s12380_s10 + $0x20] sm:$0xff] %v6214_v51  ;;  %v11595_v63 = vld [vmem:[%s12372_s18 + $0xbc8] sm:$0xf0] }
 0x31e   : > { %6463 = vmatpush.bf16.msra.mxu3 %v9790_v4  ;;  %v10422_v52 = vor.u32 %v11693_v41, %v10419_v42  ;;  %v8859_v4 = vld [vmem:[%s12372_s18 + $0x344] sm:$0xf0]  ;;  %v11225_v36 = vld [vmem:[%s12372_s18 + $0x3c] sm:$0xf]  ;;  %v2859_v41 = vperm.slane %v12815_v37, 5 }
 0x31f   : > { %v8550_v54 = vor.u32 %v11225_v36, %v8547_v39  ;;  %v8865_v36 = vld [vmem:[%s12372_s18 + $0x2b0] sm:$0xf] }
 0x320   : > { %6471 = vmatpush.bf16.msrb.mxu0 %v9482_v56  ;;  %6450 = vmatmul.bf16.vlgmr.msra.gmra.mxu2 %v12526_v3  ;;  %v8858_v56 = vor.u32 %v11322_v47, %v8857_v46  ;;  %v6201_v5 = vpop.f32.mrf.mxu0  ;;  %v9795_v46 = vld [vmem:[%s12372_s18 + $0xa94] sm:$0xf0]  ;;  %v9490_v47 = vor.u32 %v11479_v29, %v9489_v28  ;;  %v11694_v29 = vld [vmem:[%s12372_s18 + $0xee4] sm:$0xf]  ;;  %v10113_v39 = vld [vmem:[%s12372_s18 + $0xc70] sm:$0xf] }
 0x321   : > { %6485 = vmatpush.bf16.msrb.mxu1 %v10730_v60  ;;  %6498 = vmatpush.bf16.msrb.mxu2 %v9642_v2  ;;  %v8701_v60 = vld [vmem:[%s12372_s18 + $0x170] sm:$0xf]  ;;  %v11303_v2 = vld [vmem:[%s12372_s18 + $0x2ac] sm:$0xf]  ;;  %v6202_v10 = vadd.f32 %v6201_v5, %v2858_v20  ;;  %v6215_v11 = vpop.f32.mrf.mxu1  ;;  %v9177_v5 = vld [vmem:[%s12372_s18 + $0x520] sm:$0xf] }
 0x322   : > { %6512 = vmatpush.bf16.msrb.mxu3 %v10890_v6  ;;  %v8702_v6 = vor.u32 %v11283_v61, %v8701_v60  ;;  %v8862_v21 = vor.u32 %v11303_v2, %v8859_v4  ;;  %v9951_v20 = vld [vmem:[%s12372_s18 + $0xbcc] sm:$0xf0]  ;;  %v10898_v61 = vor.u32 %v11811_v48, %v10895_v49  ;;  %v10271_v48 = vld [vmem:[%s12372_s18 + $0xe44] sm:$0xf0] }
 0x323   : > { %6464 = vmatmul.bf16.vlgmr.msra.gmra.mxu3 %v12533_v14  ;;  %v9954_v38 = vor.u32 %v11576_v16, %v9951_v20  ;;  %v6227_v42 = vpop.f32.mrf.mxu2  ;;  %v10739_v2 = vld [vmem:[%s12372_s18 + $0x11ec] sm:$0xf0]  ;;  %v11382_v20 = vld [vmem:[%s12372_s18 + $0x524] sm:$0xf] }
 0x324   : > { %6472 = vmatpush.bf16.msrb.mxu0 %v9326_v9  ;;  %v10107_v9 = vld [vmem:[%s12372_s18 + $0xd04] sm:$0xf0] }
 0x325   : > { %6486 = vmatpush.bf16.msrb.mxu1 %v10574_v12  ;;  %6499 = vmatpush.bf16.msrb.mxu2 %v9486_v18  ;;  %v9950_v12 = vor.u32 %v11595_v63, %v9949_v62  ;;  %v11518_v18 = vld [vmem:[%s12372_s18 + $0x960] sm:$0xf0]  ;;  %v10110_v24 = vor.u32 %v11615_v8, %v10107_v9  ;;  %v11460_v62 = vld [vmem:[%s12372_s18 + $0x794] sm:$0xf]  ;;  %v9491_v63 = vld [vmem:[%s12372_s18 + $0x82c] sm:$0xf0] }
 0x326   : > { %6513 = vmatpush.bf16.msrb.mxu3 %v10734_v22  ;;  %v6216_v22 = vadd.f32 %v6215_v11, %v6202_v10  ;;  %v9646_v32 = vor.u32 %v11518_v18, %v9645_v55  ;;  %v6241_v43 = vpop.f32.mrf.mxu3  ;;  %v11713_v8 = vld [vmem:[%s12372_s18 + $0xf78] sm:$0xf0]  ;;  %v9494_v9 = vor.u32 %v11460_v62, %v9491_v63  ;;  %v11616_v62 = vld [vmem:[%s12372_s18 + $0xc74] sm:$0xf]  ;;  %v10115_v63 = vld [vmem:[%s12372_s18 + $0xd0c] sm:$0xf0] }
 0x327   : > { %v11733_v18 = vld [vmem:[%s12372_s18 + $0x101c] sm:$0xf] }
 0x328   : > { %6473 = vmatpush.bf16.msrb.mxu0 %v9170_v25  ;;  %v8703_v25 = vld [vmem:[%s12372_s18 + $0x20c] sm:$0xf0]  ;;  %7213 = vst [vmem:[%s12380_s10 + $0x158] sm:$0xff] %v6216_v22  ;;  %v10426_v22 = vor.u32 %v11713_v8, %v10425_v7  ;;  %v11519_v8 = vld [vmem:[%s12372_s18 + $0x968] sm:$0xf0] }
 0x329   : > { %6487 = vmatpush.bf16.msrb.mxu1 %v10418_v27  ;;  %6500 = vmatpush.bf16.msrb.mxu2 %v9330_v34  ;;  %v9794_v27 = vor.u32 %v11556_v17, %v9793_v15  ;;  %v11791_v34 = vld [vmem:[%s12372_s18 + $0x11e8] sm:$0xf0]  ;;  %v9335_v15 = vld [vmem:[%s12372_s18 + $0x6f4] sm:$0xf0]  ;;  %v9653_v7 = vld [vmem:[%s12372_s18 + $0x8d0] sm:$0xf] }
 0x32a   : > { %6514 = vmatpush.bf16.msrb.mxu3 %v10578_v35  ;;  %v8706_v35 = vor.u32 %v11264_v33, %v8703_v25  ;;  %v10738_v51 = vor.u32 %v11791_v34, %v10737_v31  ;;  %v10269_v25 = vld [vmem:[%s12372_s18 + $0xda8] sm:$0xf]  ;;  %v9338_v16 = vor.u32 %v11421_v13, %v9335_v15  ;;  %v10118_v13 = vor.u32 %v11616_v62, %v10115_v63  ;;  %v11265_v15 = vld [vmem:[%s12372_s18 + $0x17c] sm:$0xf]  ;;  %v11714_v63 = vld [vmem:[%s12372_s18 + $0xf80] sm:$0xf0] }
 0x32b   : > { %v6229_v10 = vpop.f32.mrf.mxu2  ;;  %v10433_v62 = vld [vmem:[%s12372_s18 + $0xee8] sm:$0xf] }
 0x32c   : > { %6474 = vmatpush.bf16.msrb.mxu0 %v9014_v40  ;;  %v11499_v40 = vld [vmem:[%s12372_s18 + $0x8cc] sm:$0xf]  ;;  %v6230_v17 = vadd.f32 %v6229_v10, %v2859_v41 }
 0x32d   : > { %6488 = vmatpush.bf16.msrb.mxu1 %v10262_v45  ;;  %6501 = vmatpush.bf16.msrb.mxu2 %v9174_v50  ;;  %v11537_v45 = vld [vmem:[%s12372_s18 + $0x9fc] sm:$0xf]  ;;  %v6228_v50 = vadd.f32 %v6227_v42, %v2859_v41  ;;  %v9650_v58 = vor.u32 %v11499_v40, %v9647_v44  ;;  %v11635_v40 = vld [vmem:[%s12372_s18 + $0xd08] sm:$0xf0] }
 0x32e   : > { %6515 = vmatpush.bf16.msrb.mxu3 %v10422_v52  ;;  %v9333_v52 = vld [vmem:[%s12372_s18 + $0x658] sm:$0xf]  ;;  %v6243_v11 = vpop.f32.mrf.mxu3  ;;  %v11343_v44 = vld [vmem:[%s12372_s18 + $0x3ec] sm:$0xf]  ;;  %v10114_v49 = vor.u32 %v11635_v40, %v10113_v39  ;;  %v11812_v39 = vld [vmem:[%s12372_s18 + $0x1294] sm:$0xf] }
 0x32f   : > { %v6242_v60 = vadd.f32 %v6241_v43, %v6228_v50  ;;  %v6244_v33 = vadd.f32 %v6243_v11, %v6230_v17  ;;  %v8709_v50 = vld [vmem:[%s12372_s18 + $0x178] sm:$0xf]  ;;  %v10903_v40 = vld [vmem:[%s12372_s18 + $0x132c] sm:$0xf0] }
 0x330   : > { %6475 = vmatpush.bf16.msrb.mxu0 %v8858_v56  ;;  %v10581_v56 = vld [vmem:[%s12372_s18 + $0x1018] sm:$0xf] }
 0x331   : > { %6489 = vmatpush.bf16.msrb.mxu1 %v10106_v59  ;;  %6502 = vmatpush.bf16.msrb.mxu2 %v9018_v0  ;;  %v9798_v59 = vor.u32 %v11537_v45, %v9795_v46  ;;  %v9334_v0 = vor.u32 %v11440_v53, %v9333_v52  ;;  %7175 = vst [vmem:[%s12380_s10 + $0x28] sm:$0xff] %v6242_v60  ;;  %v9023_v45 = vld [vmem:[%s12372_s18 + $0x484] sm:$0xf0]  ;;  %v9957_v52 = vld [vmem:[%s12372_s18 + $0xb38] sm:$0xf] }
 0x332   : > { %6516 = vmatpush.bf16.msrb.mxu3 %v10266_v1  ;;  %v11772_v1 = vld [vmem:[%s12372_s18 + $0x1154] sm:$0xf]  ;;  %v10582_v4 = vor.u32 %v11752_v57, %v10581_v56  ;;  %7214 = vst [vmem:[%s12380_s10 + $0x160] sm:$0xff] %v6244_v33  ;;  %v8711_v17 = vld [vmem:[%s12372_s18 + $0x214] sm:$0xf0] }
 0x333   : > { %v11596_v53 = vld [vmem:[%s12372_s18 + $0xbd0] sm:$0xf0] }
 0x334   : > { %6476 = vmatpush.bf16.msrb.mxu0 %v8702_v6  ;;  %v11401_v6 = vld [vmem:[%s12372_s18 + $0x5b8] sm:$0xf0]  ;;  %v11304_v57 = vld [vmem:[%s12372_s18 + $0x2b4] sm:$0xf] }
 0x335   : > { %6490 = vmatpush.bf16.msrb.mxu1 %v9950_v12  ;;  %6503 = vmatpush.bf16.msrb.mxu2 %v8862_v21  ;;  %v10742_v12 = vor.u32 %v11772_v1, %v10739_v2  ;;  %v9178_v55 = vor.u32 %v11401_v6, %v9177_v5  ;;  %v2860_v21 = vperm.slane %v12815_v37, 6  ;;  %v10586_v37 = vor.u32 %v11733_v18, %v10583_v19  ;;  %v9801_v5 = vld [vmem:[%s12372_s18 + $0xa00] sm:$0xf]  ;;  %v11557_v6 = vld [vmem:[%s12372_s18 + $0xa98] sm:$0xf0] }
 0x336   : > { %6517 = vmatpush.bf16.msrb.mxu3 %v10110_v24  ;;  %v11362_v24 = vld [vmem:[%s12372_s18 + $0x480] sm:$0xf0]  ;;  %v9958_v2 = vor.u32 %v11596_v53, %v9957_v52  ;;  %v11577_v18 = vld [vmem:[%s12372_s18 + $0xb3c] sm:$0xf]  ;;  %v9959_v19 = vld [vmem:[%s12372_s18 + $0xbd4] sm:$0xf0] }
 0x337   : > { %v9022_v28 = vor.u32 %v11362_v24, %v9021_v23  ;;  %v9497_v23 = vld [vmem:[%s12372_s18 + $0x798] sm:$0xf]  ;;  %v11480_v24 = vld [vmem:[%s12372_s18 + $0x830] sm:$0xf0]  ;;  %v11461_v52 = vld [vmem:[%s12372_s18 + $0x79c] sm:$0xf] }
 0x338   : > { %6477 = vmatpush.bf16.msrb.mxu0 %v8546_v26  ;;  %v11674_v26 = vld [vmem:[%s12372_s18 + $0xe40] sm:$0xf0]  ;;  %v9499_v53 = vld [vmem:[%s12372_s18 + $0x834] sm:$0xf0] }
 0x339   : > { %6491 = vmatpush.bf16.msrb.mxu1 %v9794_v27  ;;  %6504 = vmatpush.bf16.msrb.mxu2 %v8706_v35  ;;  %v9179_v27 = vld [vmem:[%s12372_s18 + $0x5bc] sm:$0xf0]  ;;  %v6269_v34 = vpop.f32.mrf.mxu1  ;;  %v10270_v35 = vor.u32 %v11674_v26, %v10269_v25  ;;  %v10745_v25 = vld [vmem:[%s12372_s18 + $0x1158] sm:$0xf]  ;;  %v11792_v26 = vld [vmem:[%s12372_s18 + $0x11f0] sm:$0xf0] }
 0x33a   : > { %6518 = vmatpush.bf16.msrb.mxu3 %v9954_v38  ;;  %v11323_v38 = vld [vmem:[%s12372_s18 + $0x348] sm:$0xf0]  ;;  %v9182_v41 = vor.u32 %v11382_v20, %v9179_v27  ;;  %v9962_v20 = vor.u32 %v11577_v18, %v9959_v19  ;;  %v8555_v27 = vld [vmem:[%s12372_s18 + $0xdc] sm:$0xf0] }
 0x33b   : > { %6478 = vmatmul.bf16.vlgmr.msrb.gmra.mxu0 %v12526_v3  ;;  %v8866_v46 = vor.u32 %v11323_v38, %v8865_v36  ;;  %v9803_v36 = vld [vmem:[%s12372_s18 + $0xa9c] sm:$0xf0]  ;;  %v9498_v38 = vor.u32 %v11480_v24, %v9497_v23  ;;  %v11675_v18 = vld [vmem:[%s12372_s18 + $0xe48] sm:$0xf0]  ;;  %v9187_v23 = vld [vmem:[%s12372_s18 + $0x5c4] sm:$0xf0] }
 0x33c   : > { %6526 = vmatpush.bf16.msra.mxu0 %v9646_v32  ;;  %6492 = vmatmul.bf16.vlgmr.msrb.gmra.mxu1 %v12533_v14  ;;  %v6255_v32 = vpop.f32.mrf.mxu0 }
 0x33d   : > { %6540 = vmatpush.bf16.msra.mxu1 %v10894_v30  ;;  %6505 = vmatpush.bf16.msrb.mxu2 %v8550_v54  ;;  %v10427_v30 = vld [vmem:[%s12372_s18 + $0xf7c] sm:$0xf0]  ;;  %v6256_v31 = vadd.f32 %v6255_v32, %v2860_v21  ;;  %v9026_v54 = vor.u32 %v11343_v44, %v9023_v45  ;;  %v11500_v32 = vld [vmem:[%s12372_s18 + $0x8d4] sm:$0xf]  ;;  %v11441_v44 = vld [vmem:[%s12372_s18 + $0x6f8] sm:$0xf0] }
 0x33e   : > { %6519 = vmatpush.bf16.msrb.mxu3 %v9798_v59  ;;  %v10430_v43 = vor.u32 %v11694_v29, %v10427_v30 }
 0x33f   : > { %v6270_v42 = vadd.f32 %v6269_v34, %v6256_v31  ;;  %v9655_v34 = vld [vmem:[%s12372_s18 + $0x96c] sm:$0xf0] }
 0x340   : > { %6527 = vmatpush.bf16.msra.mxu0 %v9490_v47  ;;  %6506 = vmatmul.bf16.vlgmr.msrb.gmra.mxu2 %v12526_v3  ;;  %v11655_v47 = vld [vmem:[%s12372_s18 + $0xdac] sm:$0xf] }
 0x341   : > { %6541 = vmatpush.bf16.msra.mxu1 %v10738_v51  ;;  %6554 = vmatpush.bf16.msra.mxu2 %v9650_v58  ;;  %7176 = vst [vmem:[%s12380_s10 + $0x30] sm:$0xff] %v6270_v42  ;;  %v11284_v51 = vld [vmem:[%s12372_s18 + $0x210] sm:$0xf0]  ;;  %v10274_v56 = vor.u32 %v11655_v47, %v10271_v48  ;;  %v8867_v58 = vld [vmem:[%s12372_s18 + $0x34c] sm:$0xf0]  ;;  %v6271_v1 = vpop.f32.mrf.mxu1  ;;  %v10746_v42 = vor.u32 %v11792_v26, %v10745_v25 }
 0x342   : > { %6568 = vmatpush.bf16.msra.mxu3 %v10898_v61  ;;  %v8710_v60 = vor.u32 %v11284_v51, %v8709_v50  ;;  %v8553_v61 = vld [vmem:[%s12372_s18 + $0x40] sm:$0xf]  ;;  %v8870_v10 = vor.u32 %v11304_v57, %v8867_v58  ;;  %v11753_v47 = vld [vmem:[%s12372_s18 + $0x10b8] sm:$0xf0]  ;;  %v9658_v48 = vor.u32 %v11500_v32, %v9655_v34  ;;  %v10906_v51 = vor.u32 %v11812_v39, %v10903_v40  ;;  %v10747_v57 = vld [vmem:[%s12372_s18 + $0x11f4] sm:$0xf0] }
 0x343   : > { %6520 = vmatmul.bf16.vlgmr.msrb.gmra.mxu3 %v12533_v14  ;;  %v6283_v30 = vpop.f32.mrf.mxu2  ;;  %v11695_v25 = vld [vmem:[%s12372_s18 + $0xeec] sm:$0xf]  ;;  %v10435_v26 = vld [vmem:[%s12372_s18 + $0xf84] sm:$0xf0]  ;;  %v11324_v32 = vld [vmem:[%s12372_s18 + $0x350] sm:$0xf0] }
 0x344   : > { %6528 = vmatpush.bf16.msra.mxu0 %v9334_v0  ;;  %v6257_v59 = vpop.f32.mrf.mxu0  ;;  %v10438_v34 = vor.u32 %v11695_v25, %v10435_v26  ;;  %v11656_v39 = vld [vmem:[%s12372_s18 + $0xdb4] sm:$0xf]  ;;  %v10279_v40 = vld [vmem:[%s12372_s18 + $0xe4c] sm:$0xf0] }
 0x345   : > { %6542 = vmatpush.bf16.msra.mxu1 %v10582_v4  ;;  %6555 = vmatpush.bf16.msra.mxu2 %v9494_v9  ;;  %v6258_v0 = vadd.f32 %v6257_v59, %v2860_v21  ;;  %v11245_v4 = vld [vmem:[%s12372_s18 + $0xd8] sm:$0xf0]  ;;  %v10901_v9 = vld [vmem:[%s12372_s18 + $0x1290] sm:$0xf]  ;;  %v9802_v21 = vor.u32 %v11557_v6, %v9801_v5  ;;  %v9185_v59 = vld [vmem:[%s12372_s18 + $0x528] sm:$0xf] }
 0x346   : > { %6569 = vmatpush.bf16.msra.mxu3 %v10742_v12  ;;  %v11831_v12 = vld [vmem:[%s12372_s18 + $0x1328] sm:$0xf0]  ;;  %v6297_v31 = vpop.f32.mrf.mxu3  ;;  %v11422_v5 = vld [vmem:[%s12372_s18 + $0x664] sm:$0xf]  ;;  %v9343_v6 = vld [vmem:[%s12372_s18 + $0x6fc] sm:$0xf0] }
 0x347   : > { %v6272_v11 = vadd.f32 %v6271_v1, %v6258_v0  ;;  %v10902_v33 = vor.u32 %v11831_v12, %v10901_v9  ;;  %v9502_v0 = vor.u32 %v11461_v52, %v9499_v53  ;;  %v11734_v9 = vld [vmem:[%s12372_s18 + $0x1024] sm:$0xf]  ;;  %v10434_v12 = vor.u32 %v11714_v63, %v10433_v62  ;;  %v8561_v52 = vld [vmem:[%s12372_s18 + $0x48] sm:$0xf]  ;;  %v11617_v53 = vld [vmem:[%s12372_s18 + $0xc7c] sm:$0xf] }
 0x348   : > { %6529 = vmatpush.bf16.msra.mxu0 %v9178_v55  ;;  %v8554_v55 = vor.u32 %v11245_v4, %v8553_v61  ;;  %v13113_v61 = vld [vmem:[%s12378_s16 + $0x8] sm:$0xff]  ;;  %v9346_v19 = vor.u32 %v11422_v5, %v9343_v6  ;;  %v11558_v62 = vld [vmem:[%s12372_s18 + $0xaa0] sm:$0xf0]  ;;  %v9661_v63 = vld [vmem:[%s12372_s18 + $0x8d8] sm:$0xf] }
 0x349   : > { %6543 = vmatpush.bf16.msra.mxu1 %v10426_v22  ;;  %6556 = vmatpush.bf16.msra.mxu2 %v9338_v16  ;;  %7215 = vst [vmem:[%s12380_s10 + $0x168] sm:$0xff] %v6272_v11  ;;  %v9654_v22 = vor.u32 %v11519_v8, %v9653_v7  ;;  %v8714_v16 = vor.u32 %v11265_v15, %v8711_v17  ;;  %v2862_v11 = vperm.slane %v13113_v61, 0  ;;  %v11363_v15 = vld [vmem:[%s12372_s18 + $0x488] sm:$0xf0]  ;;  %v11832_v5 = vld [vmem:[%s12372_s18 + $0x1330] sm:$0xf0] }
 0x34a   : > { %6570 = vmatpush.bf16.msra.mxu3 %v10586_v37  ;;  %v11226_v37 = vld [vmem:[%s12372_s18 + $0x44] sm:$0xf]  ;;  %v2863_v25 = vperm.slane %v13113_v61, 1 }
 0x34b   : > { %v8558_v45 = vor.u32 %v11226_v37, %v8555_v27  ;;  %v6285_v1 = vpop.f32.mrf.mxu2  ;;  %v8873_v27 = vld [vmem:[%s12372_s18 + $0x2b8] sm:$0xf] }
 0x34c   : > { %6530 = vmatpush.bf16.msra.mxu0 %v9022_v28  ;;  %v11940_v28 = vld [vmem:[%s12378_s16] sm:$0xff] }
 0x34d   : > { %6544 = vmatpush.bf16.msra.mxu1 %v10270_v35  ;;  %6557 = vmatpush.bf16.msra.mxu2 %v9182_v41  ;;  %v2861_v29 = vperm.slane %v11940_v28, 7  ;;  %v11538_v35 = vld [vmem:[%s12372_s18 + $0xa04] sm:$0xf]  ;;  %v10121_v28 = vld [vmem:[%s12372_s18 + $0xc78] sm:$0xf] }
 0x34e   : > { %6571 = vmatpush.bf16.msra.mxu3 %v10430_v43  ;;  %v9341_v43 = vld [vmem:[%s12372_s18 + $0x660] sm:$0xf] }
 0x34f   : > { %v6284_v41 = vadd.f32 %v6283_v30, %v2861_v29  ;;  %v6286_v7 = vadd.f32 %v6285_v1, %v2861_v29  ;;  %v11636_v29 = vld [vmem:[%s12372_s18 + $0xd10] sm:$0xf0]  ;;  %v10909_v1 = vld [vmem:[%s12372_s18 + $0x1298] sm:$0xf] }
 0x350   : > { %6531 = vmatpush.bf16.msra.mxu0 %v8866_v46  ;;  %v10589_v46 = vld [vmem:[%s12372_s18 + $0x1020] sm:$0xf] }
 0x351   : > { %6545 = vmatpush.bf16.msra.mxu1 %v10114_v49  ;;  %6558 = vmatpush.bf16.msra.mxu2 %v9026_v54  ;;  %v9806_v49 = vor.u32 %v11538_v35, %v9803_v36  ;;  %v6298_v50 = vadd.f32 %v6297_v31, %v6284_v41  ;;  %v9342_v54 = vor.u32 %v11441_v44, %v9341_v43  ;;  %v11344_v35 = vld [vmem:[%s12372_s18 + $0x3f4] sm:$0xf]  ;;  %v9031_v36 = vld [vmem:[%s12372_s18 + $0x48c] sm:$0xf0]  ;;  %v11285_v43 = vld [vmem:[%s12372_s18 + $0x218] sm:$0xf0] }
 0x352   : > { %6572 = vmatpush.bf16.msra.mxu3 %v10274_v56  ;;  %v11773_v56 = vld [vmem:[%s12372_s18 + $0x115c] sm:$0xf]  ;;  %v10590_v58 = vor.u32 %v11753_v47, %v10589_v46  ;;  %v10122_v41 = vor.u32 %v11636_v29, %v10121_v28  ;;  %v9965_v44 = vld [vmem:[%s12372_s18 + $0xb40] sm:$0xf]  ;;  %v9034_v46 = vor.u32 %v11344_v35, %v9031_v36  ;;  %v10282_v47 = vor.u32 %v11656_v39, %v10279_v40  ;;  %v10911_v29 = vld [vmem:[%s12372_s18 + $0x1334] sm:$0xf0] }
 0x353   : > { %7177 = vst [vmem:[%s12380_s10 + $0x38] sm:$0xff] %v6298_v50  ;;  %v10750_v4 = vor.u32 %v11773_v56, %v10747_v57  ;;  %v11813_v28 = vld [vmem:[%s12372_s18 + $0x129c] sm:$0xf]  ;;  %v11442_v35 = vld [vmem:[%s12372_s18 + $0x700] sm:$0xf0] }
 0x354   : > { %6532 = vmatpush.bf16.msra.mxu0 %v8710_v60  ;;  %v11402_v60 = vld [vmem:[%s12372_s18 + $0x5c0] sm:$0xf0] }
 0x355   : > { %6546 = vmatpush.bf16.msra.mxu1 %v9958_v2  ;;  %6559 = vmatpush.bf16.msra.mxu2 %v8870_v10  ;;  %v6299_v2 = vpop.f32.mrf.mxu3  ;;  %v9186_v8 = vor.u32 %v11402_v60, %v9185_v59  ;;  %v10591_v10 = vld [vmem:[%s12372_s18 + $0x10bc] sm:$0xf0]  ;;  %v11246_v59 = vld [vmem:[%s12372_s18 + $0xe0] sm:$0xf0]  ;;  %v9809_v60 = vld [vmem:[%s12372_s18 + $0xa08] sm:$0xf] }
 0x356   : > { %6573 = vmatpush.bf16.msra.mxu3 %v10118_v13  ;;  %v9029_v13 = vld [vmem:[%s12372_s18 + $0x3f0] sm:$0xf]  ;;  %v6300_v17 = vadd.f32 %v6299_v2, %v6286_v7  ;;  %v11266_v7 = vld [vmem:[%s12372_s18 + $0x184] sm:$0xf] }
 0x357   : > { %v11754_v39 = vld [vmem:[%s12372_s18 + $0x10c0] sm:$0xf0] }
 0x358   : > { %6533 = vmatpush.bf16.msra.mxu0 %v8554_v55  ;;  %v10277_v55 = vld [vmem:[%s12372_s18 + $0xdb0] sm:$0xf]  ;;  %v6311_v24 = vpop.f32.mrf.mxu0  ;;  %7216 = vst [vmem:[%s12380_s10 + $0x170] sm:$0xff] %v6300_v17  ;;  %v11481_v17 = vld [vmem:[%s12372_s18 + $0x838] sm:$0xf0] }
 0x359   : > { %6547 = vmatpush.bf16.msra.mxu1 %v9802_v21  ;;  %6560 = vmatpush.bf16.msra.mxu2 %v8714_v16  ;;  %v10594_v21 = vor.u32 %v11734_v9, %v10591_v10  ;;  %v6312_v16 = vadd.f32 %v6311_v24, %v2862_v11  ;;  %v6325_v37 = vpop.f32.mrf.mxu1  ;;  %v8562_v9 = vor.u32 %v11246_v59, %v8561_v52  ;;  %v11578_v10 = vld [vmem:[%s12372_s18 + $0xb44] sm:$0xf]  ;;  %v8563_v24 = vld [vmem:[%s12372_s18 + $0xe4] sm:$0xf0]  ;;  %v10441_v52 = vld [vmem:[%s12372_s18 + $0xef0] sm:$0xf] }
 0x35a   : > { %6574 = vmatpush.bf16.msra.mxu3 %v9962_v20  ;;  %v10278_v20 = vor.u32 %v11675_v18, %v10277_v55  ;;  %v10910_v55 = vor.u32 %v11832_v5, %v10909_v1  ;;  %v10753_v18 = vld [vmem:[%s12372_s18 + $0x1160] sm:$0xf]  ;;  %v11423_v59 = vld [vmem:[%s12372_s18 + $0x66c] sm:$0xf]  ;;  %v10599_v1 = vld [vmem:[%s12372_s18 + $0x10c4] sm:$0xf0] }
 0x35b   : > { %6534 = vmatmul.bf16.vlgmr.msra.gmra.mxu0 %v12526_v3  ;;  %v6326_v31 = vadd.f32 %v6325_v37, %v6312_v16  ;;  %v9663_v37 = vld [vmem:[%s12372_s18 + $0x974] sm:$0xf0] }
 0x35c   : > { %6582 = vmatpush.bf16.msrb.mxu0 %v9654_v22  ;;  %6548 = vmatmul.bf16.vlgmr.msra.gmra.mxu1 %v12533_v14  ;;  %v11383_v22 = vld [vmem:[%s12372_s18 + $0x52c] sm:$0xf]  ;;  %v9037_v5 = vld [vmem:[%s12372_s18 + $0x3f8] sm:$0xf] }
 0x35d   : > { %6596 = vmatpush.bf16.msrb.mxu1 %v10902_v33  ;;  %6561 = vmatpush.bf16.msra.mxu2 %v8558_v45  ;;  %v9030_v33 = vor.u32 %v11363_v15, %v9029_v13  ;;  %v9190_v30 = vor.u32 %v11383_v22, %v9187_v23  ;;  %7178 = vst [vmem:[%s12380_s10 + $0x40] sm:$0xff] %v6326_v31  ;;  %v11597_v45 = vld [vmem:[%s12372_s18 + $0xbd8] sm:$0xf0]  ;;  %v9505_v15 = vld [vmem:[%s12372_s18 + $0x7a0] sm:$0xf] }
 0x35e   : > { %6575 = vmatpush.bf16.msra.mxu3 %v9806_v49  ;;  %v8875_v49 = vld [vmem:[%s12372_s18 + $0x354] sm:$0xf0]  ;;  %v11227_v22 = vld [vmem:[%s12372_s18 + $0x4c] sm:$0xf] }
 0x35f   : > { %v8566_v36 = vor.u32 %v11227_v22, %v8563_v24  ;;  %v11325_v24 = vld [vmem:[%s12372_s18 + $0x358] sm:$0xf0] }
 0x360   : > { %6583 = vmatpush.bf16.msrb.mxu0 %v9498_v38  ;;  %6562 = vmatmul.bf16.vlgmr.msra.gmra.mxu2 %v12526_v3  ;;  %v8874_v38 = vor.u32 %v11324_v32, %v8873_v27  ;;  %v6313_v50 = vpop.f32.mrf.mxu0  ;;  %v9811_v27 = vld [vmem:[%s12372_s18 + $0xaa4] sm:$0xf0]  ;;  %v9506_v32 = vor.u32 %v11481_v17, %v9505_v15 }
 0x361   : > { %6597 = vmatpush.bf16.msrb.mxu1 %v10746_v42  ;;  %6610 = vmatpush.bf16.msrb.mxu2 %v9658_v48  ;;  %v8717_v42 = vld [vmem:[%s12372_s18 + $0x180] sm:$0xf]  ;;  %v11305_v48 = vld [vmem:[%s12372_s18 + $0x2bc] sm:$0xf]  ;;  %v6314_v56 = vadd.f32 %v6313_v50, %v2862_v11  ;;  %v6327_v57 = vpop.f32.mrf.mxu1  ;;  %v9193_v50 = vld [vmem:[%s12372_s18 + $0x530] sm:$0xf] }
 0x362   : > { %6624 = vmatpush.bf16.msrb.mxu3 %v10906_v51  ;;  %v8718_v51 = vor.u32 %v11285_v43, %v8717_v42  ;;  %v8878_v2 = vor.u32 %v11305_v48, %v8875_v49  ;;  %v9967_v11 = vld [vmem:[%s12372_s18 + $0xbdc] sm:$0xf0]  ;;  %v10914_v43 = vor.u32 %v11813_v28, %v10911_v29  ;;  %v11657_v28 = vld [vmem:[%s12372_s18 + $0xdbc] sm:$0xf]  ;;  %v10287_v29 = vld [vmem:[%s12372_s18 + $0xe54] sm:$0xf0] }
 0x363   : > { %6576 = vmatmul.bf16.vlgmr.msra.gmra.mxu3 %v12533_v14  ;;  %v9970_v23 = vor.u32 %v11578_v10, %v9967_v11  ;;  %v6339_v26 = vpop.f32.mrf.mxu2  ;;  %v10755_v48 = vld [vmem:[%s12372_s18 + $0x11fc] sm:$0xf0] }
 0x364   : > { %6584 = vmatpush.bf16.msrb.mxu0 %v9342_v54  ;;  %v10123_v54 = vld [vmem:[%s12372_s18 + $0xd14] sm:$0xf0] }
 0x365   : > { %6598 = vmatpush.bf16.msrb.mxu1 %v10590_v58  ;;  %6611 = vmatpush.bf16.msrb.mxu2 %v9502_v0  ;;  %v9966_v58 = vor.u32 %v11597_v45, %v9965_v44  ;;  %v11520_v0 = vld [vmem:[%s12372_s18 + $0x970] sm:$0xf0]  ;;  %v10126_v6 = vor.u32 %v11617_v53, %v10123_v54  ;;  %v11462_v44 = vld [vmem:[%s12372_s18 + $0x7a4] sm:$0xf]  ;;  %v9507_v45 = vld [vmem:[%s12372_s18 + $0x83c] sm:$0xf0] }
 0x366   : > { %6625 = vmatpush.bf16.msrb.mxu3 %v10750_v4  ;;  %v6328_v4 = vadd.f32 %v6327_v57, %v6314_v56  ;;  %v9662_v13 = vor.u32 %v11520_v0, %v9661_v63  ;;  %v6353_v16 = vpop.f32.mrf.mxu3  ;;  %v11715_v53 = vld [vmem:[%s12372_s18 + $0xf88] sm:$0xf0]  ;;  %v9510_v54 = vor.u32 %v11462_v44, %v9507_v45  ;;  %v8569_v44 = vld [vmem:[%s12372_s18 + $0x50] sm:$0xf]  ;;  %v11618_v45 = vld [vmem:[%s12372_s18 + $0xc84] sm:$0xf] }
 0x367   : > { %v11735_v0 = vld [vmem:[%s12372_s18 + $0x102c] sm:$0xf] }
 0x368   : > { %6585 = vmatpush.bf16.msrb.mxu0 %v9186_v8  ;;  %v8719_v8 = vld [vmem:[%s12372_s18 + $0x21c] sm:$0xf0]  ;;  %7217 = vst [vmem:[%s12380_s10 + $0x178] sm:$0xff] %v6328_v4  ;;  %v10442_v4 = vor.u32 %v11715_v53, %v10441_v52  ;;  %v10602_v11 = vor.u32 %v11735_v0, %v10599_v1  ;;  %v11559_v52 = vld [vmem:[%s12372_s18 + $0xaa8] sm:$0xf0] }
 0x369   : > { %6599 = vmatpush.bf16.msrb.mxu1 %v10434_v12  ;;  %6612 = vmatpush.bf16.msrb.mxu2 %v9346_v19  ;;  %v9810_v12 = vor.u32 %v11558_v62, %v9809_v60  ;;  %v11793_v19 = vld [vmem:[%s12372_s18 + $0x11f8] sm:$0xf0]  ;;  %v9351_v60 = vld [vmem:[%s12372_s18 + $0x704] sm:$0xf0]  ;;  %v9669_v53 = vld [vmem:[%s12372_s18 + $0x8e0] sm:$0xf] }
 0x36a   : > { %6626 = vmatpush.bf16.msrb.mxu3 %v10594_v21  ;;  %v8722_v21 = vor.u32 %v11266_v7, %v8719_v8  ;;  %v10754_v31 = vor.u32 %v11793_v19, %v10753_v18  ;;  %v10285_v8 = vld [vmem:[%s12372_s18 + $0xdb8] sm:$0xf]  ;;  %v9354_v10 = vor.u32 %v11423_v59, %v9351_v60  ;;  %v10443_v18 = vld [vmem:[%s12372_s18 + $0xf8c] sm:$0xf0]  ;;  %v11833_v59 = vld [vmem:[%s12372_s18 + $0x1338] sm:$0xf0] }
 0x36b   : > { %v6341_v56 = vpop.f32.mrf.mxu2  ;;  %v11579_v1 = vld [vmem:[%s12372_s18 + $0xb4c] sm:$0xf] }
 0x36c   : > { %6586 = vmatpush.bf16.msrb.mxu0 %v9030_v33  ;;  %v11501_v33 = vld [vmem:[%s12372_s18 + $0x8dc] sm:$0xf]  ;;  %v6342_v62 = vadd.f32 %v6341_v56, %v2863_v25  ;;  %v10917_v56 = vld [vmem:[%s12372_s18 + $0x12a0] sm:$0xf] }
 0x36d   : > { %6600 = vmatpush.bf16.msrb.mxu1 %v10278_v20  ;;  %6613 = vmatpush.bf16.msrb.mxu2 %v9190_v30  ;;  %v11539_v20 = vld [vmem:[%s12372_s18 + $0xa0c] sm:$0xf]  ;;  %v6340_v30 = vadd.f32 %v6339_v26, %v2863_v25  ;;  %v9666_v40 = vor.u32 %v11501_v33, %v9663_v37  ;;  %v10129_v33 = vld [vmem:[%s12372_s18 + $0xc80] sm:$0xf]  ;;  %v11637_v25 = vld [vmem:[%s12372_s18 + $0xd18] sm:$0xf0] }
 0x36e   : > { %6627 = vmatpush.bf16.msrb.mxu3 %v10438_v34  ;;  %v9349_v34 = vld [vmem:[%s12372_s18 + $0x668] sm:$0xf]  ;;  %v6355_v57 = vpop.f32.mrf.mxu3 }
 0x36f   : > { %v6354_v42 = vadd.f32 %v6353_v16, %v6340_v30  ;;  %v6356_v7 = vadd.f32 %v6355_v57, %v6342_v62  ;;  %v10130_v30 = vor.u32 %v11637_v25, %v10129_v33  ;;  %v11267_v62 = vld [vmem:[%s12372_s18 + $0x18c] sm:$0xf]  ;;  %v11814_v33 = vld [vmem:[%s12372_s18 + $0x12a4] sm:$0xf]  ;;  %v10919_v25 = vld [vmem:[%s12372_s18 + $0x133c] sm:$0xf0] }
 0x370   : > { %6587 = vmatpush.bf16.msrb.mxu0 %v8874_v38  ;;  %v10597_v38 = vld [vmem:[%s12372_s18 + $0x1028] sm:$0xf] }
 0x371   : > { %6601 = vmatpush.bf16.msrb.mxu1 %v10122_v41  ;;  %6614 = vmatpush.bf16.msrb.mxu2 %v9034_v46  ;;  %v9814_v41 = vor.u32 %v11539_v20, %v9811_v27  ;;  %v9350_v46 = vor.u32 %v11442_v35, %v9349_v34  ;;  %7179 = vst [vmem:[%s12380_s10 + $0x48] sm:$0xff] %v6354_v42  ;;  %v11345_v20 = vld [vmem:[%s12372_s18 + $0x3fc] sm:$0xf]  ;;  %v9039_v27 = vld [vmem:[%s12372_s18 + $0x494] sm:$0xf0] }
 0x372   : > { %6628 = vmatpush.bf16.msrb.mxu3 %v10282_v47  ;;  %v11774_v47 = vld [vmem:[%s12372_s18 + $0x1164] sm:$0xf]  ;;  %v10598_v49 = vor.u32 %v11754_v39, %v10597_v38  ;;  %7218 = vst [vmem:[%s12380_s10 + $0x180] sm:$0xff] %v6356_v7  ;;  %v9973_v35 = vld [vmem:[%s12372_s18 + $0xb48] sm:$0xf]  ;;  %v9042_v38 = vor.u32 %v11345_v20, %v9039_v27  ;;  %v10290_v39 = vor.u32 %v11657_v28, %v10287_v29 }
 0x373   : > { %v11286_v34 = vld [vmem:[%s12372_s18 + $0x220] sm:$0xf0]  ;;  %v11443_v20 = vld [vmem:[%s12372_s18 + $0x708] sm:$0xf0] }
 0x374   : > { %6588 = vmatpush.bf16.msrb.mxu0 %v8718_v51  ;;  %v11403_v51 = vld [vmem:[%s12372_s18 + $0x5c8] sm:$0xf0]  ;;  %v11482_v7 = vld [vmem:[%s12372_s18 + $0x840] sm:$0xf0] }
 0x375   : > { %6602 = vmatpush.bf16.msrb.mxu1 %v9966_v58  ;;  %6615 = vmatpush.bf16.msrb.mxu2 %v8878_v2  ;;  %v10758_v58 = vor.u32 %v11774_v47, %v10755_v48  ;;  %v9194_v63 = vor.u32 %v11403_v51, %v9193_v50  ;;  %v2864_v2 = vperm.slane %v13113_v61, 2  ;;  %v11247_v50 = vld [vmem:[%s12372_s18 + $0xe8] sm:$0xf0]  ;;  %v9817_v51 = vld [vmem:[%s12372_s18 + $0xa10] sm:$0xf] }
 0x376   : > { %6629 = vmatpush.bf16.msrb.mxu3 %v10126_v6  ;;  %v11364_v6 = vld [vmem:[%s12372_s18 + $0x490] sm:$0xf0]  ;;  %v8570_v0 = vor.u32 %v11247_v50, %v8569_v44  ;;  %v11755_v28 = vld [vmem:[%s12372_s18 + $0x10c8] sm:$0xf0]  ;;  %v10449_v44 = vld [vmem:[%s12372_s18 + $0xef8] sm:$0xf] }
 0x377   : > { %v9038_v17 = vor.u32 %v11364_v6, %v9037_v5  ;;  %v9513_v6 = vld [vmem:[%s12372_s18 + $0x7a8] sm:$0xf]  ;;  %v11424_v50 = vld [vmem:[%s12372_s18 + $0x674] sm:$0xf] }
 0x378   : > { %6589 = vmatpush.bf16.msrb.mxu0 %v8562_v9  ;;  %v11676_v9 = vld [vmem:[%s12372_s18 + $0xe50] sm:$0xf0]  ;;  %v6367_v15 = vpop.f32.mrf.mxu0 }
 0x379   : > { %6603 = vmatpush.bf16.msrb.mxu1 %v9810_v12  ;;  %6616 = vmatpush.bf16.msrb.mxu2 %v8722_v21  ;;  %v11384_v12 = vld [vmem:[%s12372_s18 + $0x534] sm:$0xf]  ;;  %v6368_v19 = vadd.f32 %v6367_v15, %v2864_v2  ;;  %v6381_v21 = vpop.f32.mrf.mxu1  ;;  %v10286_v22 = vor.u32 %v11676_v9, %v10285_v8  ;;  %v10918_v8 = vor.u32 %v11833_v59, %v10917_v56  ;;  %v10761_v9 = vld [vmem:[%s12372_s18 + $0x1168] sm:$0xf]  ;;  %v8571_v15 = vld [vmem:[%s12372_s18 + $0xec] sm:$0xf0] }
 0x37a   : > { %6630 = vmatpush.bf16.msrb.mxu3 %v9970_v23  ;;  %v8881_v23 = vld [vmem:[%s12372_s18 + $0x2c0] sm:$0xf]  ;;  %v10607_v56 = vld [vmem:[%s12372_s18 + $0x10cc] sm:$0xf0] }
 0x37b   : > { %6590 = vmatmul.bf16.vlgmr.msrb.gmra.mxu0 %v12526_v3  ;;  %v6382_v16 = vadd.f32 %v6381_v21, %v6368_v19  ;;  %v9671_v21 = vld [vmem:[%s12372_s18 + $0x97c] sm:$0xf0] }
 0x37c   : > { %6638 = vmatpush.bf16.msra.mxu0 %v9662_v13  ;;  %6604 = vmatmul.bf16.vlgmr.msrb.gmra.mxu1 %v12533_v14  ;;  %v9195_v13 = vld [vmem:[%s12372_s18 + $0x5cc] sm:$0xf0]  ;;  %v9045_v59 = vld [vmem:[%s12372_s18 + $0x400] sm:$0xf] }
 0x37d   : > { %6652 = vmatpush.bf16.msra.mxu1 %v10910_v55  ;;  %6617 = vmatpush.bf16.msrb.mxu2 %v8566_v36  ;;  %v11696_v55 = vld [vmem:[%s12372_s18 + $0xef4] sm:$0xf]  ;;  %v9198_v26 = vor.u32 %v11384_v12, %v9195_v13  ;;  %7180 = vst [vmem:[%s12380_s10 + $0x50] sm:$0xff] %v6382_v16  ;;  %v11598_v36 = vld [vmem:[%s12372_s18 + $0xbe0] sm:$0xf0] }
 0x37e   : > { %6631 = vmatpush.bf16.msrb.mxu3 %v9814_v41  ;;  %v10446_v37 = vor.u32 %v11696_v55, %v10443_v18  ;;  %v8883_v41 = vld [vmem:[%s12372_s18 + $0x35c] sm:$0xf0]  ;;  %v11228_v12 = vld [vmem:[%s12372_s18 + $0x54] sm:$0xf]  ;;  %v2865_v55 = vperm.slane %v13113_v61, 3 }
 0x37f   : > { %v8574_v27 = vor.u32 %v11228_v12, %v8571_v15  ;;  %v11326_v15 = vld [vmem:[%s12372_s18 + $0x360] sm:$0xf0] }
 0x380   : > { %6639 = vmatpush.bf16.msra.mxu0 %v9506_v32  ;;  %6618 = vmatmul.bf16.vlgmr.msrb.gmra.mxu2 %v12526_v3  ;;  %v8882_v32 = vor.u32 %v11325_v24, %v8881_v23  ;;  %v6369_v42 = vpop.f32.mrf.mxu0  ;;  %v9819_v23 = vld [vmem:[%s12372_s18 + $0xaac] sm:$0xf0]  ;;  %v9514_v24 = vor.u32 %v11482_v7, %v9513_v6 }
 0x381   : > { %6653 = vmatpush.bf16.msra.mxu1 %v10754_v31  ;;  %6666 = vmatpush.bf16.msra.mxu2 %v9666_v40  ;;  %v8725_v31 = vld [vmem:[%s12372_s18 + $0x188] sm:$0xf]  ;;  %v11306_v40 = vld [vmem:[%s12372_s18 + $0x2c4] sm:$0xf]  ;;  %v6370_v47 = vadd.f32 %v6369_v42, %v2864_v2  ;;  %v6383_v48 = vpop.f32.mrf.mxu1  ;;  %v9201_v42 = vld [vmem:[%s12372_s18 + $0x538] sm:$0xf] }
 0x382   : > { %6680 = vmatpush.bf16.msra.mxu3 %v10914_v43  ;;  %v8726_v43 = vor.u32 %v11286_v34, %v8725_v31  ;;  %v8886_v57 = vor.u32 %v11306_v40, %v8883_v41  ;;  %v9975_v2 = vld [vmem:[%s12372_s18 + $0xbe4] sm:$0xf0]  ;;  %v10922_v34 = vor.u32 %v11814_v33, %v10919_v25  ;;  %v11658_v33 = vld [vmem:[%s12372_s18 + $0xdc4] sm:$0xf]  ;;  %v10295_v25 = vld [vmem:[%s12372_s18 + $0xe5c] sm:$0xf0] }
 0x383   : > { %6632 = vmatmul.bf16.vlgmr.msrb.gmra.mxu3 %v12533_v14  ;;  %v9978_v13 = vor.u32 %v11579_v1, %v9975_v2  ;;  %v6395_v18 = vpop.f32.mrf.mxu2  ;;  %v10763_v40 = vld [vmem:[%s12372_s18 + $0x1204] sm:$0xf0] }
 0x384   : > { %6640 = vmatpush.bf16.msra.mxu0 %v9350_v46  ;;  %v10131_v46 = vld [vmem:[%s12372_s18 + $0xd1c] sm:$0xf0] }
 0x385   : > { %6654 = vmatpush.bf16.msra.mxu1 %v10598_v49  ;;  %6667 = vmatpush.bf16.msra.mxu2 %v9510_v54  ;;  %v9974_v49 = vor.u32 %v11598_v36, %v9973_v35  ;;  %v11521_v54 = vld [vmem:[%s12372_s18 + $0x978] sm:$0xf0]  ;;  %v10134_v60 = vor.u32 %v11618_v45, %v10131_v46  ;;  %v11463_v35 = vld [vmem:[%s12372_s18 + $0x7ac] sm:$0xf]  ;;  %v9515_v36 = vld [vmem:[%s12372_s18 + $0x844] sm:$0xf0] }
 0x386   : > { %6681 = vmatpush.bf16.msra.mxu3 %v10758_v58  ;;  %v6384_v58 = vadd.f32 %v6383_v48, %v6370_v47  ;;  %v9670_v5 = vor.u32 %v11521_v54, %v9669_v53  ;;  %v6409_v19 = vpop.f32.mrf.mxu3  ;;  %v11716_v45 = vld [vmem:[%s12372_s18 + $0xf90] sm:$0xf0]  ;;  %v9518_v46 = vor.u32 %v11463_v35, %v9515_v36  ;;  %v8577_v35 = vld [vmem:[%s12372_s18 + $0x58] sm:$0xf]  ;;  %v11619_v36 = vld [vmem:[%s12372_s18 + $0xc8c] sm:$0xf] }
 0x387   : > { %v11736_v54 = vld [vmem:[%s12372_s18 + $0x1034] sm:$0xf] }
 0x388   : > { %6641 = vmatpush.bf16.msra.mxu0 %v9194_v63  ;;  %v8727_v63 = vld [vmem:[%s12372_s18 + $0x224] sm:$0xf0]  ;;  %7219 = vst [vmem:[%s12380_s10 + $0x188] sm:$0xff] %v6384_v58  ;;  %v10450_v58 = vor.u32 %v11716_v45, %v10449_v44  ;;  %v10610_v2 = vor.u32 %v11736_v54, %v10607_v56  ;;  %v11560_v44 = vld [vmem:[%s12372_s18 + $0xab0] sm:$0xf0] }
 0x389   : > { %6655 = vmatpush.bf16.msra.mxu1 %v10442_v4  ;;  %6668 = vmatpush.bf16.msra.mxu2 %v9354_v10  ;;  %v9818_v4 = vor.u32 %v11559_v52, %v9817_v51  ;;  %v11794_v10 = vld [vmem:[%s12372_s18 + $0x1200] sm:$0xf0]  ;;  %v9359_v51 = vld [vmem:[%s12372_s18 + $0x70c] sm:$0xf0]  ;;  %v9677_v45 = vld [vmem:[%s12372_s18 + $0x8e8] sm:$0xf] }
 0x38a   : > { %6682 = vmatpush.bf16.msra.mxu3 %v10602_v11  ;;  %v8730_v11 = vor.u32 %v11267_v62, %v8727_v63  ;;  %v10762_v16 = vor.u32 %v11794_v10, %v10761_v9  ;;  %v10293_v63 = vld [vmem:[%s12372_s18 + $0xdc0] sm:$0xf]  ;;  %v9362_v1 = vor.u32 %v11424_v50, %v9359_v51  ;;  %v10451_v9 = vld [vmem:[%s12372_s18 + $0xf94] sm:$0xf0]  ;;  %v11834_v50 = vld [vmem:[%s12372_s18 + $0x1340] sm:$0xf0] }
 0x38b   : > { %v6397_v47 = vpop.f32.mrf.mxu2  ;;  %v11580_v56 = vld [vmem:[%s12372_s18 + $0xb54] sm:$0xf] }
 0x38c   : > { %6642 = vmatpush.bf16.msra.mxu0 %v9038_v17  ;;  %v11502_v17 = vld [vmem:[%s12372_s18 + $0x8e4] sm:$0xf]  ;;  %v6398_v52 = vadd.f32 %v6397_v47, %v2865_v55  ;;  %v10925_v47 = vld [vmem:[%s12372_s18 + $0x12a8] sm:$0xf] }
 0x38d   : > { %6656 = vmatpush.bf16.msra.mxu1 %v10286_v22  ;;  %6669 = vmatpush.bf16.msra.mxu2 %v9198_v26  ;;  %v11540_v22 = vld [vmem:[%s12372_s18 + $0xa14] sm:$0xf]  ;;  %v6396_v26 = vadd.f32 %v6395_v18, %v2865_v55  ;;  %v9674_v29 = vor.u32 %v11502_v17, %v9671_v21  ;;  %v10137_v17 = vld [vmem:[%s12372_s18 + $0xc88] sm:$0xf]  ;;  %v11638_v55 = vld [vmem:[%s12372_s18 + $0xd20] sm:$0xf0] }
 0x38e   : > { %6683 = vmatpush.bf16.msra.mxu3 %v10446_v37  ;;  %v9357_v37 = vld [vmem:[%s12372_s18 + $0x670] sm:$0xf]  ;;  %v6411_v48 = vpop.f32.mrf.mxu3 }
 0x38f   : > { %v6410_v31 = vadd.f32 %v6409_v19, %v6396_v26  ;;  %v6412_v62 = vadd.f32 %v6411_v48, %v6398_v52  ;;  %v10138_v26 = vor.u32 %v11638_v55, %v10137_v17  ;;  %v11268_v52 = vld [vmem:[%s12372_s18 + $0x194] sm:$0xf]  ;;  %v11815_v17 = vld [vmem:[%s12372_s18 + $0x12ac] sm:$0xf]  ;;  %v10927_v55 = vld [vmem:[%s12372_s18 + $0x1344] sm:$0xf0] }
 0x390   : > { %6643 = vmatpush.bf16.msra.mxu0 %v8882_v32  ;;  %v10605_v32 = vld [vmem:[%s12372_s18 + $0x1030] sm:$0xf] }
 0x391   : > { %6657 = vmatpush.bf16.msra.mxu1 %v10130_v30  ;;  %6670 = vmatpush.bf16.msra.mxu2 %v9042_v38  ;;  %v9822_v30 = vor.u32 %v11540_v22, %v9819_v23  ;;  %v9358_v38 = vor.u32 %v11443_v20, %v9357_v37  ;;  %7181 = vst [vmem:[%s12380_s10 + $0x58] sm:$0xff] %v6410_v31  ;;  %v11346_v22 = vld [vmem:[%s12372_s18 + $0x404] sm:$0xf]  ;;  %v9047_v23 = vld [vmem:[%s12372_s18 + $0x49c] sm:$0xf0] }
 0x392   : > { %6684 = vmatpush.bf16.msra.mxu3 %v10290_v39  ;;  %v11775_v39 = vld [vmem:[%s12372_s18 + $0x116c] sm:$0xf]  ;;  %v10606_v41 = vor.u32 %v11755_v28, %v10605_v32  ;;  %7220 = vst [vmem:[%s12380_s10 + $0x190] sm:$0xff] %v6412_v62  ;;  %v9981_v20 = vld [vmem:[%s12372_s18 + $0xb50] sm:$0xf]  ;;  %v9050_v32 = vor.u32 %v11346_v22, %v9047_v23  ;;  %v10298_v28 = vor.u32 %v11658_v33, %v10295_v25 }
 0x393   : > { %v11287_v37 = vld [vmem:[%s12372_s18 + $0x228] sm:$0xf0]  ;;  %v11444_v22 = vld [vmem:[%s12372_s18 + $0x710] sm:$0xf0] }
 0x394   : > { %6644 = vmatpush.bf16.msra.mxu0 %v8726_v43  ;;  %v11404_v43 = vld [vmem:[%s12372_s18 + $0x5d0] sm:$0xf0]  ;;  %v11483_v62 = vld [vmem:[%s12372_s18 + $0x848] sm:$0xf0] }
 0x395   : > { %6658 = vmatpush.bf16.msra.mxu1 %v9974_v49  ;;  %6671 = vmatpush.bf16.msra.mxu2 %v8886_v57  ;;  %v10766_v49 = vor.u32 %v11775_v39, %v10763_v40  ;;  %v9202_v53 = vor.u32 %v11404_v43, %v9201_v42  ;;  %v2866_v57 = vperm.slane %v13113_v61, 4  ;;  %v11248_v42 = vld [vmem:[%s12372_s18 + $0xf0] sm:$0xf0]  ;;  %v9825_v43 = vld [vmem:[%s12372_s18 + $0xa18] sm:$0xf] }
 0x396   : > { %6685 = vmatpush.bf16.msra.mxu3 %v10134_v60  ;;  %v11365_v60 = vld [vmem:[%s12372_s18 + $0x498] sm:$0xf0]  ;;  %v8578_v54 = vor.u32 %v11248_v42, %v8577_v35  ;;  %v11756_v33 = vld [vmem:[%s12372_s18 + $0x10d0] sm:$0xf0]  ;;  %v10457_v35 = vld [vmem:[%s12372_s18 + $0xf00] sm:$0xf] }
 0x397   : > { %v9046_v7 = vor.u32 %v11365_v60, %v9045_v59  ;;  %v9521_v60 = vld [vmem:[%s12372_s18 + $0x7b0] sm:$0xf]  ;;  %v11425_v42 = vld [vmem:[%s12372_s18 + $0x67c] sm:$0xf] }
 0x398   : > { %6645 = vmatpush.bf16.msra.mxu0 %v8570_v0  ;;  %v11677_v0 = vld [vmem:[%s12372_s18 + $0xe58] sm:$0xf0]  ;;  %v6423_v6 = vpop.f32.mrf.mxu0 }
 0x399   : > { %6659 = vmatpush.bf16.msra.mxu1 %v9818_v4  ;;  %6672 = vmatpush.bf16.msra.mxu2 %v8730_v11  ;;  %v11385_v4 = vld [vmem:[%s12372_s18 + $0x53c] sm:$0xf]  ;;  %v6424_v10 = vadd.f32 %v6423_v6, %v2866_v57  ;;  %v6437_v11 = vpop.f32.mrf.mxu1  ;;  %v10294_v12 = vor.u32 %v11677_v0, %v10293_v63  ;;  %v10926_v63 = vor.u32 %v11834_v50, %v10925_v47  ;;  %v10769_v0 = vld [vmem:[%s12372_s18 + $0x1170] sm:$0xf]  ;;  %v8579_v6 = vld [vmem:[%s12372_s18 + $0xf4] sm:$0xf0] }
 0x39a   : > { %6686 = vmatpush.bf16.msra.mxu3 %v9978_v13  ;;  %v8889_v13 = vld [vmem:[%s12372_s18 + $0x2c8] sm:$0xf]  ;;  %v10615_v47 = vld [vmem:[%s12372_s18 + $0x10d4] sm:$0xf0] }
 0x39b   : > { %6646 = vmatmul.bf16.vlgmr.msra.gmra.mxu0 %v12526_v3  ;;  %v6438_v19 = vadd.f32 %v6437_v11, %v6424_v10  ;;  %v9679_v11 = vld [vmem:[%s12372_s18 + $0x984] sm:$0xf0] }
 0x39c   : > { %6694 = vmatpush.bf16.msrb.mxu0 %v9670_v5  ;;  %6660 = vmatmul.bf16.vlgmr.msra.gmra.mxu1 %v12533_v14  ;;  %v9203_v5 = vld [vmem:[%s12372_s18 + $0x5d4] sm:$0xf0]  ;;  %v9053_v50 = vld [vmem:[%s12372_s18 + $0x408] sm:$0xf] }
 0x39d   : > { %6708 = vmatpush.bf16.msrb.mxu1 %v10918_v8  ;;  %6673 = vmatpush.bf16.msra.mxu2 %v8574_v27  ;;  %v11697_v8 = vld [vmem:[%s12372_s18 + $0xefc] sm:$0xf]  ;;  %v9206_v18 = vor.u32 %v11385_v4, %v9203_v5  ;;  %7182 = vst [vmem:[%s12380_s10 + $0x60] sm:$0xff] %v6438_v19  ;;  %v11599_v27 = vld [vmem:[%s12372_s18 + $0xbe8] sm:$0xf0] }
 0x39e   : > { %6687 = vmatpush.bf16.msra.mxu3 %v9822_v30  ;;  %v10454_v21 = vor.u32 %v11697_v8, %v10451_v9  ;;  %v8891_v30 = vld [vmem:[%s12372_s18 + $0x364] sm:$0xf0]  ;;  %v11229_v4 = vld [vmem:[%s12372_s18 + $0x5c] sm:$0xf]  ;;  %v2867_v8 = vperm.slane %v13113_v61, 5 }
 0x39f   : > { %v8582_v23 = vor.u32 %v11229_v4, %v8579_v6  ;;  %v8897_v4 = vld [vmem:[%s12372_s18 + $0x2d0] sm:$0xf] }
 0x3a0   : > { %6695 = vmatpush.bf16.msrb.mxu0 %v9514_v24  ;;  %6674 = vmatmul.bf16.vlgmr.msra.gmra.mxu2 %v12526_v3  ;;  %v8890_v24 = vor.u32 %v11326_v15, %v8889_v13  ;;  %v6425_v31 = vpop.f32.mrf.mxu0  ;;  %v9827_v13 = vld [vmem:[%s12372_s18 + $0xab4] sm:$0xf0]  ;;  %v9522_v15 = vor.u32 %v11483_v62, %v9521_v60  ;;  %v11698_v62 = vld [vmem:[%s12372_s18 + $0xf04] sm:$0xf]  ;;  %v10145_v6 = vld [vmem:[%s12372_s18 + $0xc90] sm:$0xf] }
 0x3a1   : > { %6709 = vmatpush.bf16.msrb.mxu1 %v10762_v16  ;;  %6722 = vmatpush.bf16.msrb.mxu2 %v9674_v29  ;;  %v8733_v16 = vld [vmem:[%s12372_s18 + $0x190] sm:$0xf]  ;;  %v11307_v29 = vld [vmem:[%s12372_s18 + $0x2cc] sm:$0xf]  ;;  %v6426_v39 = vadd.f32 %v6425_v31, %v2866_v57  ;;  %v6439_v40 = vpop.f32.mrf.mxu1  ;;  %v9209_v31 = vld [vmem:[%s12372_s18 + $0x540] sm:$0xf] }
 0x3a2   : > { %6736 = vmatpush.bf16.msrb.mxu3 %v10922_v34  ;;  %v8734_v34 = vor.u32 %v11287_v37, %v8733_v16  ;;  %v8894_v48 = vor.u32 %v11307_v29, %v8891_v30  ;;  %v9983_v57 = vld [vmem:[%s12372_s18 + $0xbec] sm:$0xf0]  ;;  %v10930_v37 = vor.u32 %v11815_v17, %v10927_v55  ;;  %v10303_v17 = vld [vmem:[%s12372_s18 + $0xe64] sm:$0xf0] }
 0x3a3   : > { %6688 = vmatmul.bf16.vlgmr.msra.gmra.mxu3 %v12533_v14  ;;  %v9986_v5 = vor.u32 %v11580_v56, %v9983_v57  ;;  %v6451_v9 = vpop.f32.mrf.mxu2  ;;  %v10771_v29 = vld [vmem:[%s12372_s18 + $0x120c] sm:$0xf0]  ;;  %v11386_v57 = vld [vmem:[%s12372_s18 + $0x544] sm:$0xf] }
 0x3a4   : > { %6696 = vmatpush.bf16.msrb.mxu0 %v9358_v38  ;;  %v10139_v38 = vld [vmem:[%s12372_s18 + $0xd24] sm:$0xf0] }
 0x3a5   : > { %6710 = vmatpush.bf16.msrb.mxu1 %v10606_v41  ;;  %6723 = vmatpush.bf16.msrb.mxu2 %v9518_v46  ;;  %v9982_v41 = vor.u32 %v11599_v27, %v9981_v20  ;;  %v11522_v46 = vld [vmem:[%s12372_s18 + $0x980] sm:$0xf0]  ;;  %v10142_v51 = vor.u32 %v11619_v36, %v10139_v38  ;;  %v11464_v20 = vld [vmem:[%s12372_s18 + $0x7b4] sm:$0xf]  ;;  %v9523_v27 = vld [vmem:[%s12372_s18 + $0x84c] sm:$0xf0] }
 0x3a6   : > { %6737 = vmatpush.bf16.msrb.mxu3 %v10766_v49  ;;  %v6440_v49 = vadd.f32 %v6439_v40, %v6426_v39  ;;  %v9678_v59 = vor.u32 %v11522_v46, %v9677_v45  ;;  %v6465_v10 = vpop.f32.mrf.mxu3  ;;  %v11717_v36 = vld [vmem:[%s12372_s18 + $0xf98] sm:$0xf0]  ;;  %v9526_v38 = vor.u32 %v11464_v20, %v9523_v27  ;;  %v11620_v20 = vld [vmem:[%s12372_s18 + $0xc94] sm:$0xf]  ;;  %v10147_v27 = vld [vmem:[%s12372_s18 + $0xd2c] sm:$0xf0] }
 0x3a7   : > { %v11737_v46 = vld [vmem:[%s12372_s18 + $0x103c] sm:$0xf] }
 0x3a8   : > { %6697 = vmatpush.bf16.msrb.mxu0 %v9202_v53  ;;  %v8735_v53 = vld [vmem:[%s12372_s18 + $0x22c] sm:$0xf0]  ;;  %7221 = vst [vmem:[%s12380_s10 + $0x198] sm:$0xff] %v6440_v49  ;;  %v10458_v49 = vor.u32 %v11717_v36, %v10457_v35  ;;  %v11523_v36 = vld [vmem:[%s12372_s18 + $0x988] sm:$0xf0] }
 0x3a9   : > { %6711 = vmatpush.bf16.msrb.mxu1 %v10450_v58  ;;  %6724 = vmatpush.bf16.msrb.mxu2 %v9362_v1  ;;  %v9826_v58 = vor.u32 %v11560_v44, %v9825_v43  ;;  %v11795_v1 = vld [vmem:[%s12372_s18 + $0x1208] sm:$0xf0]  ;;  %v9367_v43 = vld [vmem:[%s12372_s18 + $0x714] sm:$0xf0]  ;;  %v9685_v35 = vld [vmem:[%s12372_s18 + $0x8f0] sm:$0xf] }
 0x3aa   : > { %6738 = vmatpush.bf16.msrb.mxu3 %v10610_v2  ;;  %v8738_v2 = vor.u32 %v11268_v52, %v8735_v53  ;;  %v10770_v19 = vor.u32 %v11795_v1, %v10769_v0  ;;  %v10301_v53 = vld [vmem:[%s12372_s18 + $0xdc8] sm:$0xf]  ;;  %v9370_v56 = vor.u32 %v11425_v42, %v9367_v43  ;;  %v10150_v42 = vor.u32 %v11620_v20, %v10147_v27  ;;  %v11269_v43 = vld [vmem:[%s12372_s18 + $0x19c] sm:$0xf]  ;;  %v11718_v27 = vld [vmem:[%s12372_s18 + $0xfa0] sm:$0xf0] }
 0x3ab   : > { %v6453_v39 = vpop.f32.mrf.mxu2  ;;  %v10465_v20 = vld [vmem:[%s12372_s18 + $0xf08] sm:$0xf] }
 0x3ac   : > { %6698 = vmatpush.bf16.msrb.mxu0 %v9046_v7  ;;  %v11503_v7 = vld [vmem:[%s12372_s18 + $0x8ec] sm:$0xf]  ;;  %v6454_v44 = vadd.f32 %v6453_v39, %v2867_v8 }
 0x3ad   : > { %6712 = vmatpush.bf16.msrb.mxu1 %v10294_v12  ;;  %6725 = vmatpush.bf16.msrb.mxu2 %v9206_v18  ;;  %v11541_v12 = vld [vmem:[%s12372_s18 + $0xa1c] sm:$0xf]  ;;  %v6452_v18 = vadd.f32 %v6451_v9, %v2867_v8  ;;  %v9682_v25 = vor.u32 %v11503_v7, %v9679_v11  ;;  %v11639_v7 = vld [vmem:[%s12372_s18 + $0xd28] sm:$0xf0] }
 0x3ae   : > { %6739 = vmatpush.bf16.msrb.mxu3 %v10454_v21  ;;  %v9365_v21 = vld [vmem:[%s12372_s18 + $0x678] sm:$0xf]  ;;  %v6467_v40 = vpop.f32.mrf.mxu3  ;;  %v11347_v11 = vld [vmem:[%s12372_s18 + $0x40c] sm:$0xf]  ;;  %v10146_v55 = vor.u32 %v11639_v7, %v10145_v6  ;;  %v11816_v6 = vld [vmem:[%s12372_s18 + $0x12b4] sm:$0xf] }
 0x3af   : > { %v6466_v16 = vadd.f32 %v6465_v10, %v6452_v18  ;;  %v6468_v52 = vadd.f32 %v6467_v40, %v6454_v44  ;;  %v8741_v18 = vld [vmem:[%s12372_s18 + $0x198] sm:$0xf]  ;;  %v10935_v7 = vld [vmem:[%s12372_s18 + $0x134c] sm:$0xf0] }
 0x3b0   : > { %6699 = vmatpush.bf16.msrb.mxu0 %v8890_v24  ;;  %v10613_v24 = vld [vmem:[%s12372_s18 + $0x1038] sm:$0xf] }
 0x3b1   : > { %6713 = vmatpush.bf16.msrb.mxu1 %v10138_v26  ;;  %6726 = vmatpush.bf16.msrb.mxu2 %v9050_v32  ;;  %v9830_v26 = vor.u32 %v11541_v12, %v9827_v13  ;;  %v9366_v32 = vor.u32 %v11444_v22, %v9365_v21  ;;  %7183 = vst [vmem:[%s12380_s10 + $0x68] sm:$0xff] %v6466_v16  ;;  %v9055_v12 = vld [vmem:[%s12372_s18 + $0x4a4] sm:$0xf0]  ;;  %v9989_v21 = vld [vmem:[%s12372_s18 + $0xb58] sm:$0xf] }
 0x3b2   : > { %6740 = vmatpush.bf16.msrb.mxu3 %v10298_v28  ;;  %v11776_v28 = vld [vmem:[%s12372_s18 + $0x1174] sm:$0xf]  ;;  %v10614_v30 = vor.u32 %v11756_v33, %v10613_v24  ;;  %7222 = vst [vmem:[%s12380_s10 + $0x1a0] sm:$0xff] %v6468_v52  ;;  %v8743_v44 = vld [vmem:[%s12372_s18 + $0x234] sm:$0xf0] }
 0x3b3   : > { %v11600_v22 = vld [vmem:[%s12372_s18 + $0xbf0] sm:$0xf0] }
 0x3b4   : > { %6700 = vmatpush.bf16.msrb.mxu0 %v8734_v34  ;;  %v11405_v34 = vld [vmem:[%s12372_s18 + $0x5d8] sm:$0xf0]  ;;  %v11308_v33 = vld [vmem:[%s12372_s18 + $0x2d4] sm:$0xf] }
 0x3b5   : > { %6714 = vmatpush.bf16.msrb.mxu1 %v9982_v41  ;;  %6727 = vmatpush.bf16.msrb.mxu2 %v8894_v48  ;;  %v10774_v41 = vor.u32 %v11776_v28, %v10771_v29  ;;  %v9210_v45 = vor.u32 %v11405_v34, %v9209_v31  ;;  %v2868_v48 = vperm.slane %v13113_v61, 6  ;;  %v10618_v61 = vor.u32 %v11737_v46, %v10615_v47  ;;  %v9833_v31 = vld [vmem:[%s12372_s18 + $0xa20] sm:$0xf]  ;;  %v11561_v34 = vld [vmem:[%s12372_s18 + $0xab8] sm:$0xf0] }
 0x3b6   : > { %6741 = vmatpush.bf16.msrb.mxu3 %v10142_v51  ;;  %v11366_v51 = vld [vmem:[%s12372_s18 + $0x4a0] sm:$0xf0]  ;;  %v9990_v29 = vor.u32 %v11600_v22, %v9989_v21  ;;  %v11581_v46 = vld [vmem:[%s12372_s18 + $0xb5c] sm:$0xf]  ;;  %v9991_v47 = vld [vmem:[%s12372_s18 + $0xbf4] sm:$0xf0] }
 0x3b7   : > { %v9054_v60 = vor.u32 %v11366_v51, %v9053_v50  ;;  %v9529_v50 = vld [vmem:[%s12372_s18 + $0x7b8] sm:$0xf]  ;;  %v11484_v51 = vld [vmem:[%s12372_s18 + $0x850] sm:$0xf0]  ;;  %v11465_v21 = vld [vmem:[%s12372_s18 + $0x7bc] sm:$0xf] }
 0x3b8   : > { %6701 = vmatpush.bf16.msrb.mxu0 %v8578_v54  ;;  %v11678_v54 = vld [vmem:[%s12372_s18 + $0xe60] sm:$0xf0]  ;;  %v9531_v22 = vld [vmem:[%s12372_s18 + $0x854] sm:$0xf0] }
 0x3b9   : > { %6715 = vmatpush.bf16.msrb.mxu1 %v9826_v58  ;;  %6728 = vmatpush.bf16.msrb.mxu2 %v8738_v2  ;;  %v9211_v58 = vld [vmem:[%s12372_s18 + $0x5dc] sm:$0xf0]  ;;  %v6493_v1 = vpop.f32.mrf.mxu1  ;;  %v10302_v2 = vor.u32 %v11678_v54, %v10301_v53  ;;  %v10777_v53 = vld [vmem:[%s12372_s18 + $0x1178] sm:$0xf]  ;;  %v11796_v54 = vld [vmem:[%s12372_s18 + $0x1210] sm:$0xf0] }
 0x3ba   : > { %6742 = vmatpush.bf16.msrb.mxu3 %v9986_v5  ;;  %v11327_v5 = vld [vmem:[%s12372_s18 + $0x368] sm:$0xf0]  ;;  %v9214_v8 = vor.u32 %v11386_v57, %v9211_v58  ;;  %v9994_v57 = vor.u32 %v11581_v46, %v9991_v47  ;;  %v8587_v58 = vld [vmem:[%s12372_s18 + $0xfc] sm:$0xf0] }
 0x3bb   : > { %6702 = vmatmul.bf16.vlgmr.msrb.gmra.mxu0 %v12526_v3  ;;  %v8898_v13 = vor.u32 %v11327_v5, %v8897_v4  ;;  %v9835_v4 = vld [vmem:[%s12372_s18 + $0xabc] sm:$0xf0]  ;;  %v9530_v5 = vor.u32 %v11484_v51, %v9529_v50  ;;  %v11679_v46 = vld [vmem:[%s12372_s18 + $0xe68] sm:$0xf0]  ;;  %v9219_v50 = vld [vmem:[%s12372_s18 + $0x5e4] sm:$0xf0] }
 0x3bc   : > { %6750 = vmatpush.bf16.msra.mxu0 %v9678_v59  ;;  %6716 = vmatmul.bf16.vlgmr.msrb.gmra.mxu1 %v12533_v14  ;;  %v6479_v59 = vpop.f32.mrf.mxu0 }
 0x3bd   : > { %6764 = vmatpush.bf16.msra.mxu1 %v10926_v63  ;;  %6729 = vmatpush.bf16.msrb.mxu2 %v8582_v23  ;;  %v10459_v63 = vld [vmem:[%s12372_s18 + $0xf9c] sm:$0xf0]  ;;  %v6480_v0 = vadd.f32 %v6479_v59, %v2868_v48  ;;  %v9058_v23 = vor.u32 %v11347_v11, %v9055_v12  ;;  %v11504_v59 = vld [vmem:[%s12372_s18 + $0x8f4] sm:$0xf]  ;;  %v11445_v11 = vld [vmem:[%s12372_s18 + $0x718] sm:$0xf0] }
 0x3be   : > { %6743 = vmatpush.bf16.msrb.mxu3 %v9830_v26  ;;  %v10462_v10 = vor.u32 %v11698_v62, %v10459_v63 }
 0x3bf   : > { %v6494_v9 = vadd.f32 %v6493_v1, %v6480_v0  ;;  %v9687_v1 = vld [vmem:[%s12372_s18 + $0x98c] sm:$0xf0] }
 0x3c0   : > { %6751 = vmatpush.bf16.msra.mxu0 %v9522_v15  ;;  %6730 = vmatmul.bf16.vlgmr.msrb.gmra.mxu2 %v12526_v3  ;;  %v11659_v15 = vld [vmem:[%s12372_s18 + $0xdcc] sm:$0xf] }
 0x3c1   : > { %6765 = vmatpush.bf16.msra.mxu1 %v10770_v19  ;;  %6778 = vmatpush.bf16.msra.mxu2 %v9682_v25  ;;  %7184 = vst [vmem:[%s12380_s10 + $0x70] sm:$0xff] %v6494_v9  ;;  %v11288_v19 = vld [vmem:[%s12372_s18 + $0x230] sm:$0xf0]  ;;  %v10306_v24 = vor.u32 %v11659_v15, %v10303_v17  ;;  %v8899_v25 = vld [vmem:[%s12372_s18 + $0x36c] sm:$0xf0]  ;;  %v6495_v28 = vpop.f32.mrf.mxu1  ;;  %v10778_v9 = vor.u32 %v11796_v54, %v10777_v53 }
 0x3c2   : > { %6792 = vmatpush.bf16.msra.mxu3 %v10930_v37  ;;  %v8742_v16 = vor.u32 %v11288_v19, %v8741_v18  ;;  %v8585_v37 = vld [vmem:[%s12372_s18 + $0x60] sm:$0xf]  ;;  %v8902_v39 = vor.u32 %v11308_v33, %v8899_v25  ;;  %v11757_v15 = vld [vmem:[%s12372_s18 + $0x10d8] sm:$0xf0]  ;;  %v9690_v17 = vor.u32 %v11504_v59, %v9687_v1  ;;  %v10938_v19 = vor.u32 %v11816_v6, %v10935_v7  ;;  %v10779_v33 = vld [vmem:[%s12372_s18 + $0x1214] sm:$0xf0] }
 0x3c3   : > { %6744 = vmatmul.bf16.vlgmr.msrb.gmra.mxu3 %v12533_v14  ;;  %v6507_v63 = vpop.f32.mrf.mxu2  ;;  %v11699_v53 = vld [vmem:[%s12372_s18 + $0xf0c] sm:$0xf]  ;;  %v10467_v54 = vld [vmem:[%s12372_s18 + $0xfa4] sm:$0xf0]  ;;  %v11328_v59 = vld [vmem:[%s12372_s18 + $0x370] sm:$0xf0] }
 0x3c4   : > { %6752 = vmatpush.bf16.msra.mxu0 %v9366_v32  ;;  %v6481_v26 = vpop.f32.mrf.mxu0  ;;  %v10470_v1 = vor.u32 %v11699_v53, %v10467_v54  ;;  %v11660_v6 = vld [vmem:[%s12372_s18 + $0xdd4] sm:$0xf]  ;;  %v10311_v7 = vld [vmem:[%s12372_s18 + $0xe6c] sm:$0xf0] }
 0x3c5   : > { %6766 = vmatpush.bf16.msra.mxu1 %v10614_v30  ;;  %6779 = vmatpush.bf16.msra.mxu2 %v9526_v38  ;;  %v6482_v32 = vadd.f32 %v6481_v26, %v2868_v48  ;;  %v11249_v30 = vld [vmem:[%s12372_s18 + $0xf8] sm:$0xf0]  ;;  %v10933_v38 = vld [vmem:[%s12372_s18 + $0x12b0] sm:$0xf]  ;;  %v9834_v48 = vor.u32 %v11561_v34, %v9833_v31  ;;  %v9217_v26 = vld [vmem:[%s12372_s18 + $0x548] sm:$0xf] }
 0x3c6   : > { %6793 = vmatpush.bf16.msra.mxu3 %v10774_v41  ;;  %v11835_v41 = vld [vmem:[%s12372_s18 + $0x1348] sm:$0xf0]  ;;  %v6521_v0 = vpop.f32.mrf.mxu3  ;;  %v11426_v31 = vld [vmem:[%s12372_s18 + $0x684] sm:$0xf]  ;;  %v9375_v34 = vld [vmem:[%s12372_s18 + $0x71c] sm:$0xf0] }
 0x3c7   : > { %v6496_v40 = vadd.f32 %v6495_v28, %v6482_v32  ;;  %v10934_v52 = vor.u32 %v11835_v41, %v10933_v38  ;;  %v9534_v32 = vor.u32 %v11465_v21, %v9531_v22  ;;  %v11738_v38 = vld [vmem:[%s12372_s18 + $0x1044] sm:$0xf]  ;;  %v10466_v41 = vor.u32 %v11718_v27, %v10465_v20  ;;  %v8593_v21 = vld [vmem:[%s12372_s18 + $0x68] sm:$0xf]  ;;  %v11621_v22 = vld [vmem:[%s12372_s18 + $0xc9c] sm:$0xf] }
 0x3c8   : > { %6753 = vmatpush.bf16.msra.mxu0 %v9210_v45  ;;  %v8586_v45 = vor.u32 %v11249_v30, %v8585_v37  ;;  %v13412_v37 = vld [vmem:[%s12378_s16 + $0x10] sm:$0xff]  ;;  %v9378_v47 = vor.u32 %v11426_v31, %v9375_v34  ;;  %v11562_v20 = vld [vmem:[%s12372_s18 + $0xac0] sm:$0xf0] }
 0x3c9   : > { %6767 = vmatpush.bf16.msra.mxu1 %v10458_v49  ;;  %6780 = vmatpush.bf16.msra.mxu2 %v9370_v56  ;;  %7223 = vst [vmem:[%s12380_s10 + $0x1a8] sm:$0xff] %v6496_v40  ;;  %v9686_v49 = vor.u32 %v11523_v36, %v9685_v35  ;;  %v8746_v56 = vor.u32 %v11269_v43, %v8743_v44  ;;  %v2870_v40 = vperm.slane %v13412_v37, 0  ;;  %v11367_v43 = vld [vmem:[%s12372_s18 + $0x4a8] sm:$0xf0]  ;;  %v9693_v27 = vld [vmem:[%s12372_s18 + $0x8f8] sm:$0xf] }
 0x3ca   : > { %6794 = vmatpush.bf16.msra.mxu3 %v10618_v61  ;;  %v11230_v61 = vld [vmem:[%s12372_s18 + $0x64] sm:$0xf]  ;;  %v11836_v31 = vld [vmem:[%s12372_s18 + $0x1350] sm:$0xf0]  ;;  %v2871_v53 = vperm.slane %v13412_v37, 1 }
 0x3cb   : > { %v8590_v12 = vor.u32 %v11230_v61, %v8587_v58  ;;  %v6509_v28 = vpop.f32.mrf.mxu2  ;;  %v8905_v58 = vld [vmem:[%s12372_s18 + $0x2d8] sm:$0xf] }
 0x3cc   : > { %6754 = vmatpush.bf16.msra.mxu0 %v9054_v60  ;;  %v11941_v60 = vld [vmem:[%s12378_s16 + $0x8] sm:$0xff] }
 0x3cd   : > { %6768 = vmatpush.bf16.msra.mxu1 %v10302_v2  ;;  %6781 = vmatpush.bf16.msra.mxu2 %v9214_v8  ;;  %v2869_v62 = vperm.slane %v11941_v60, 7  ;;  %v11542_v2 = vld [vmem:[%s12372_s18 + $0xa24] sm:$0xf]  ;;  %v10153_v60 = vld [vmem:[%s12372_s18 + $0xc98] sm:$0xf] }
 0x3ce   : > { %6795 = vmatpush.bf16.msra.mxu3 %v10462_v10  ;;  %v9373_v10 = vld [vmem:[%s12372_s18 + $0x680] sm:$0xf] }
 0x3cf   : > { %v6508_v8 = vadd.f32 %v6507_v63, %v2869_v62  ;;  %v6510_v35 = vadd.f32 %v6509_v28, %v2869_v62  ;;  %v11640_v62 = vld [vmem:[%s12372_s18 + $0xd30] sm:$0xf0]  ;;  %v10941_v28 = vld [vmem:[%s12372_s18 + $0x12b8] sm:$0xf] }
 0x3d0   : > { %6755 = vmatpush.bf16.msra.mxu0 %v8898_v13  ;;  %v10621_v13 = vld [vmem:[%s12372_s18 + $0x1040] sm:$0xf] }
 0x3d1   : > { %6769 = vmatpush.bf16.msra.mxu1 %v10146_v55  ;;  %6782 = vmatpush.bf16.msra.mxu2 %v9058_v23  ;;  %v9838_v55 = vor.u32 %v11542_v2, %v9835_v4  ;;  %v6522_v18 = vadd.f32 %v6521_v0, %v6508_v8  ;;  %v9374_v23 = vor.u32 %v11445_v11, %v9373_v10  ;;  %v11348_v2 = vld [vmem:[%s12372_s18 + $0x414] sm:$0xf]  ;;  %v9063_v4 = vld [vmem:[%s12372_s18 + $0x4ac] sm:$0xf0]  ;;  %v11289_v10 = vld [vmem:[%s12372_s18 + $0x238] sm:$0xf0] }
 0x3d2   : > { %6796 = vmatpush.bf16.msra.mxu3 %v10306_v24  ;;  %v11777_v24 = vld [vmem:[%s12372_s18 + $0x117c] sm:$0xf]  ;;  %v10622_v25 = vor.u32 %v11757_v15, %v10621_v13  ;;  %v10154_v8 = vor.u32 %v11640_v62, %v10153_v60  ;;  %v9997_v11 = vld [vmem:[%s12372_s18 + $0xb60] sm:$0xf]  ;;  %v9066_v13 = vor.u32 %v11348_v2, %v9063_v4  ;;  %v10314_v15 = vor.u32 %v11660_v6, %v10311_v7  ;;  %v10943_v62 = vld [vmem:[%s12372_s18 + $0x1354] sm:$0xf0] }
 0x3d3   : > { %7185 = vst [vmem:[%s12380_s10 + $0x78] sm:$0xff] %v6522_v18  ;;  %v10782_v30 = vor.u32 %v11777_v24, %v10779_v33  ;;  %v11817_v60 = vld [vmem:[%s12372_s18 + $0x12bc] sm:$0xf]  ;;  %v11446_v2 = vld [vmem:[%s12372_s18 + $0x720] sm:$0xf0] }
 0x3d4   : > { %6756 = vmatpush.bf16.msra.mxu0 %v8742_v16  ;;  %v11406_v16 = vld [vmem:[%s12372_s18 + $0x5e0] sm:$0xf0] }
 0x3d5   : > { %6770 = vmatpush.bf16.msra.mxu1 %v9990_v29  ;;  %6783 = vmatpush.bf16.msra.mxu2 %v8902_v39  ;;  %v6523_v29 = vpop.f32.mrf.mxu3  ;;  %v9218_v36 = vor.u32 %v11406_v16, %v9217_v26  ;;  %v10623_v39 = vld [vmem:[%s12372_s18 + $0x10dc] sm:$0xf0]  ;;  %v11250_v26 = vld [vmem:[%s12372_s18 + $0x100] sm:$0xf0]  ;;  %v9841_v16 = vld [vmem:[%s12372_s18 + $0xa28] sm:$0xf] }
 0x3d6   : > { %6797 = vmatpush.bf16.msra.mxu3 %v10150_v42  ;;  %v9061_v42 = vld [vmem:[%s12372_s18 + $0x410] sm:$0xf]  ;;  %v6524_v44 = vadd.f32 %v6523_v29, %v6510_v35  ;;  %v11270_v35 = vld [vmem:[%s12372_s18 + $0x1a4] sm:$0xf] }
 0x3d7   : > { %v11758_v6 = vld [vmem:[%s12372_s18 + $0x10e0] sm:$0xf0] }
 0x3d8   : > { %6757 = vmatpush.bf16.msra.mxu0 %v8586_v45  ;;  %v10309_v45 = vld [vmem:[%s12372_s18 + $0xdd0] sm:$0xf]  ;;  %v6535_v51 = vpop.f32.mrf.mxu0  ;;  %7224 = vst [vmem:[%s12380_s10 + $0x1b0] sm:$0xff] %v6524_v44  ;;  %v11485_v44 = vld [vmem:[%s12372_s18 + $0x858] sm:$0xf0] }
 0x3d9   : > { %6771 = vmatpush.bf16.msra.mxu1 %v9834_v48  ;;  %6784 = vmatpush.bf16.msra.mxu2 %v8746_v56  ;;  %v10626_v48 = vor.u32 %v11738_v38, %v10623_v39  ;;  %v6536_v56 = vadd.f32 %v6535_v51, %v2870_v40  ;;  %v6549_v61 = vpop.f32.mrf.mxu1  ;;  %v8594_v38 = vor.u32 %v11250_v26, %v8593_v21  ;;  %v11582_v39 = vld [vmem:[%s12372_s18 + $0xb64] sm:$0xf]  ;;  %v8595_v51 = vld [vmem:[%s12372_s18 + $0x104] sm:$0xf0]  ;;  %v10473_v21 = vld [vmem:[%s12372_s18 + $0xf10] sm:$0xf] }
 0x3da   : > { %6798 = vmatpush.bf16.msra.mxu3 %v9994_v57  ;;  %v10310_v57 = vor.u32 %v11679_v46, %v10309_v45  ;;  %v10942_v45 = vor.u32 %v11836_v31, %v10941_v28  ;;  %v10785_v46 = vld [vmem:[%s12372_s18 + $0x1180] sm:$0xf]  ;;  %v11427_v26 = vld [vmem:[%s12372_s18 + $0x68c] sm:$0xf]  ;;  %v10631_v28 = vld [vmem:[%s12372_s18 + $0x10e4] sm:$0xf0] }
 0x3db   : > { %6758 = vmatmul.bf16.vlgmr.msra.gmra.mxu0 %v12526_v3  ;;  %v6550_v0 = vadd.f32 %v6549_v61, %v6536_v56  ;;  %v9695_v61 = vld [vmem:[%s12372_s18 + $0x994] sm:$0xf0] }
 0x3dc   : > { %6806 = vmatpush.bf16.msrb.mxu0 %v9686_v49  ;;  %6772 = vmatmul.bf16.vlgmr.msra.gmra.mxu1 %v12533_v14  ;;  %v11387_v49 = vld [vmem:[%s12372_s18 + $0x54c] sm:$0xf]  ;;  %v9069_v31 = vld [vmem:[%s12372_s18 + $0x418] sm:$0xf] }
 0x3dd   : > { %6820 = vmatpush.bf16.msrb.mxu1 %v10934_v52  ;;  %6785 = vmatpush.bf16.msra.mxu2 %v8590_v12  ;;  %v9062_v52 = vor.u32 %v11367_v43, %v9061_v42  ;;  %v9222_v63 = vor.u32 %v11387_v49, %v9219_v50  ;;  %7186 = vst [vmem:[%s12380_s10 + $0x80] sm:$0xff] %v6550_v0  ;;  %v11601_v12 = vld [vmem:[%s12372_s18 + $0xbf8] sm:$0xf0]  ;;  %v9537_v43 = vld [vmem:[%s12372_s18 + $0x7c0] sm:$0xf] }
 0x3de   : > { %6799 = vmatpush.bf16.msra.mxu3 %v9838_v55  ;;  %v8907_v55 = vld [vmem:[%s12372_s18 + $0x374] sm:$0xf0]  ;;  %v11231_v49 = vld [vmem:[%s12372_s18 + $0x6c] sm:$0xf] }
 0x3df   : > { %v8598_v4 = vor.u32 %v11231_v49, %v8595_v51  ;;  %v11329_v51 = vld [vmem:[%s12372_s18 + $0x378] sm:$0xf0] }
 0x3e0   : > { %6807 = vmatpush.bf16.msrb.mxu0 %v9530_v5  ;;  %6786 = vmatmul.bf16.vlgmr.msra.gmra.mxu2 %v12526_v3  ;;  %v8906_v5 = vor.u32 %v11328_v59, %v8905_v58  ;;  %v6537_v18 = vpop.f32.mrf.mxu0  ;;  %v9843_v58 = vld [vmem:[%s12372_s18 + $0xac4] sm:$0xf0]  ;;  %v9538_v59 = vor.u32 %v11485_v44, %v9537_v43 }
 0x3e1   : > { %6821 = vmatpush.bf16.msrb.mxu1 %v10778_v9  ;;  %6834 = vmatpush.bf16.msrb.mxu2 %v9690_v17  ;;  %v8749_v9 = vld [vmem:[%s12372_s18 + $0x1a0] sm:$0xf]  ;;  %v11309_v17 = vld [vmem:[%s12372_s18 + $0x2dc] sm:$0xf]  ;;  %v6538_v24 = vadd.f32 %v6537_v18, %v2870_v40  ;;  %v6551_v33 = vpop.f32.mrf.mxu1  ;;  %v9225_v18 = vld [vmem:[%s12372_s18 + $0x550] sm:$0xf] }
 0x3e2   : > { %6848 = vmatpush.bf16.msrb.mxu3 %v10938_v19  ;;  %v8750_v19 = vor.u32 %v11289_v10, %v8749_v9  ;;  %v8910_v29 = vor.u32 %v11309_v17, %v8907_v55  ;;  %v9999_v40 = vld [vmem:[%s12372_s18 + $0xbfc] sm:$0xf0]  ;;  %v10946_v10 = vor.u32 %v11817_v60, %v10943_v62  ;;  %v11661_v60 = vld [vmem:[%s12372_s18 + $0xddc] sm:$0xf]  ;;  %v10319_v62 = vld [vmem:[%s12372_s18 + $0xe74] sm:$0xf0] }
 0x3e3   : > { %6800 = vmatmul.bf16.vlgmr.msra.gmra.mxu3 %v12533_v14  ;;  %v10002_v50 = vor.u32 %v11582_v39, %v9999_v40  ;;  %v6563_v54 = vpop.f32.mrf.mxu2  ;;  %v10787_v17 = vld [vmem:[%s12372_s18 + $0x121c] sm:$0xf0] }
 0x3e4   : > { %6808 = vmatpush.bf16.msrb.mxu0 %v9374_v23  ;;  %v10155_v23 = vld [vmem:[%s12372_s18 + $0xd34] sm:$0xf0] }
 0x3e5   : > { %6822 = vmatpush.bf16.msrb.mxu1 %v10622_v25  ;;  %6835 = vmatpush.bf16.msrb.mxu2 %v9534_v32  ;;  %v9998_v25 = vor.u32 %v11601_v12, %v9997_v11  ;;  %v11524_v32 = vld [vmem:[%s12372_s18 + $0x990] sm:$0xf0]  ;;  %v10158_v34 = vor.u32 %v11621_v22, %v10155_v23  ;;  %v11466_v11 = vld [vmem:[%s12372_s18 + $0x7c4] sm:$0xf]  ;;  %v9539_v12 = vld [vmem:[%s12372_s18 + $0x85c] sm:$0xf0] }
 0x3e6   : > { %6849 = vmatpush.bf16.msrb.mxu3 %v10782_v30  ;;  %v6552_v30 = vadd.f32 %v6551_v33, %v6538_v24  ;;  %v9694_v42 = vor.u32 %v11524_v32, %v9693_v27  ;;  %v6577_v56 = vpop.f32.mrf.mxu3  ;;  %v11719_v22 = vld [vmem:[%s12372_s18 + $0xfa8] sm:$0xf0]  ;;  %v9542_v23 = vor.u32 %v11466_v11, %v9539_v12  ;;  %v8601_v11 = vld [vmem:[%s12372_s18 + $0x70] sm:$0xf]  ;;  %v11622_v12 = vld [vmem:[%s12372_s18 + $0xca4] sm:$0xf] }
 0x3e7   : > { %v11739_v32 = vld [vmem:[%s12372_s18 + $0x104c] sm:$0xf] }
 0x3e8   : > { %6809 = vmatpush.bf16.msrb.mxu0 %v9218_v36  ;;  %v8751_v36 = vld [vmem:[%s12372_s18 + $0x23c] sm:$0xf0]  ;;  %7225 = vst [vmem:[%s12380_s10 + $0x1b8] sm:$0xff] %v6552_v30  ;;  %v10474_v30 = vor.u32 %v11719_v22, %v10473_v21  ;;  %v10634_v40 = vor.u32 %v11739_v32, %v10631_v28  ;;  %v11563_v21 = vld [vmem:[%s12372_s18 + $0xac8] sm:$0xf0] }
 0x3e9   : > { %6823 = vmatpush.bf16.msrb.mxu1 %v10466_v41  ;;  %6836 = vmatpush.bf16.msrb.mxu2 %v9378_v47  ;;  %v9842_v41 = vor.u32 %v11562_v20, %v9841_v16  ;;  %v11797_v47 = vld [vmem:[%s12372_s18 + $0x1218] sm:$0xf0]  ;;  %v9383_v16 = vld [vmem:[%s12372_s18 + $0x724] sm:$0xf0]  ;;  %v9701_v22 = vld [vmem:[%s12372_s18 + $0x900] sm:$0xf] }
 0x3ea   : > { %6850 = vmatpush.bf16.msrb.mxu3 %v10626_v48  ;;  %v8754_v48 = vor.u32 %v11270_v35, %v8751_v36  ;;  %v10786_v0 = vor.u32 %v11797_v47, %v10785_v46  ;;  %v10317_v36 = vld [vmem:[%s12372_s18 + $0xdd8] sm:$0xf]  ;;  %v9386_v39 = vor.u32 %v11427_v26, %v9383_v16  ;;  %v10475_v46 = vld [vmem:[%s12372_s18 + $0xfac] sm:$0xf0]  ;;  %v11837_v26 = vld [vmem:[%s12372_s18 + $0x1358] sm:$0xf0] }
 0x3eb   : > { %v6565_v24 = vpop.f32.mrf.mxu2  ;;  %v11583_v28 = vld [vmem:[%s12372_s18 + $0xb6c] sm:$0xf] }
 0x3ec   : > { %6810 = vmatpush.bf16.msrb.mxu0 %v9062_v52  ;;  %v11505_v52 = vld [vmem:[%s12372_s18 + $0x8fc] sm:$0xf]  ;;  %v6566_v20 = vadd.f32 %v6565_v24, %v2871_v53  ;;  %v10949_v24 = vld [vmem:[%s12372_s18 + $0x12c0] sm:$0xf] }
 0x3ed   : > { %6824 = vmatpush.bf16.msrb.mxu1 %v10310_v57  ;;  %6837 = vmatpush.bf16.msrb.mxu2 %v9222_v63  ;;  %v11543_v57 = vld [vmem:[%s12372_s18 + $0xa2c] sm:$0xf]  ;;  %v6564_v63 = vadd.f32 %v6563_v54, %v2871_v53  ;;  %v9698_v7 = vor.u32 %v11505_v52, %v9695_v61  ;;  %v10161_v52 = vld [vmem:[%s12372_s18 + $0xca0] sm:$0xf]  ;;  %v11641_v53 = vld [vmem:[%s12372_s18 + $0xd38] sm:$0xf0] }
 0x3ee   : > { %6851 = vmatpush.bf16.msrb.mxu3 %v10470_v1  ;;  %v9381_v1 = vld [vmem:[%s12372_s18 + $0x688] sm:$0xf]  ;;  %v6579_v33 = vpop.f32.mrf.mxu3 }
 0x3ef   : > { %v6578_v9 = vadd.f32 %v6577_v56, %v6564_v63  ;;  %v6580_v35 = vadd.f32 %v6579_v33, %v6566_v20  ;;  %v10162_v63 = vor.u32 %v11641_v53, %v10161_v52  ;;  %v11271_v20 = vld [vmem:[%s12372_s18 + $0x1ac] sm:$0xf]  ;;  %v11818_v52 = vld [vmem:[%s12372_s18 + $0x12c4] sm:$0xf]  ;;  %v10951_v53 = vld [vmem:[%s12372_s18 + $0x135c] sm:$0xf0] }
 0x3f0   : > { %6811 = vmatpush.bf16.msrb.mxu0 %v8906_v5  ;;  %v10629_v5 = vld [vmem:[%s12372_s18 + $0x1048] sm:$0xf] }
 0x3f1   : > { %6825 = vmatpush.bf16.msrb.mxu1 %v10154_v8  ;;  %6838 = vmatpush.bf16.msrb.mxu2 %v9066_v13  ;;  %v9846_v8 = vor.u32 %v11543_v57, %v9843_v58  ;;  %v9382_v13 = vor.u32 %v11446_v2, %v9381_v1  ;;  %7187 = vst [vmem:[%s12380_s10 + $0x88] sm:$0xff] %v6578_v9  ;;  %v11349_v57 = vld [vmem:[%s12372_s18 + $0x41c] sm:$0xf]  ;;  %v9071_v58 = vld [vmem:[%s12372_s18 + $0x4b4] sm:$0xf0] }
 0x3f2   : > { %6852 = vmatpush.bf16.msrb.mxu3 %v10314_v15  ;;  %v11778_v15 = vld [vmem:[%s12372_s18 + $0x1184] sm:$0xf]  ;;  %v10630_v55 = vor.u32 %v11758_v6, %v10629_v5  ;;  %7226 = vst [vmem:[%s12380_s10 + $0x1c0] sm:$0xff] %v6580_v35  ;;  %v10005_v2 = vld [vmem:[%s12372_s18 + $0xb68] sm:$0xf]  ;;  %v9074_v5 = vor.u32 %v11349_v57, %v9071_v58  ;;  %v10322_v6 = vor.u32 %v11661_v60, %v10319_v62 }
 0x3f3   : > { %v11290_v1 = vld [vmem:[%s12372_s18 + $0x240] sm:$0xf0]  ;;  %v11447_v57 = vld [vmem:[%s12372_s18 + $0x728] sm:$0xf0] }
 0x3f4   : > { %6812 = vmatpush.bf16.msrb.mxu0 %v8750_v19  ;;  %v11407_v19 = vld [vmem:[%s12372_s18 + $0x5e8] sm:$0xf0]  ;;  %v11486_v35 = vld [vmem:[%s12372_s18 + $0x860] sm:$0xf0] }
 0x3f5   : > { %6826 = vmatpush.bf16.msrb.mxu1 %v9998_v25  ;;  %6839 = vmatpush.bf16.msrb.mxu2 %v8910_v29  ;;  %v10790_v25 = vor.u32 %v11778_v15, %v10787_v17  ;;  %v9226_v27 = vor.u32 %v11407_v19, %v9225_v18  ;;  %v2872_v29 = vperm.slane %v13412_v37, 2  ;;  %v11251_v18 = vld [vmem:[%s12372_s18 + $0x108] sm:$0xf0]  ;;  %v9849_v19 = vld [vmem:[%s12372_s18 + $0xa30] sm:$0xf] }
 0x3f6   : > { %6853 = vmatpush.bf16.msrb.mxu3 %v10158_v34  ;;  %v11368_v34 = vld [vmem:[%s12372_s18 + $0x4b0] sm:$0xf0]  ;;  %v8602_v32 = vor.u32 %v11251_v18, %v8601_v11  ;;  %v11759_v60 = vld [vmem:[%s12372_s18 + $0x10e8] sm:$0xf0]  ;;  %v10481_v11 = vld [vmem:[%s12372_s18 + $0xf18] sm:$0xf] }
 0x3f7   : > { %v9070_v44 = vor.u32 %v11368_v34, %v9069_v31  ;;  %v9545_v34 = vld [vmem:[%s12372_s18 + $0x7c8] sm:$0xf]  ;;  %v11428_v18 = vld [vmem:[%s12372_s18 + $0x694] sm:$0xf] }
 0x3f8   : > { %6813 = vmatpush.bf16.msrb.mxu0 %v8594_v38  ;;  %v11680_v38 = vld [vmem:[%s12372_s18 + $0xe70] sm:$0xf0]  ;;  %v6591_v43 = vpop.f32.mrf.mxu0 }
 0x3f9   : > { %6827 = vmatpush.bf16.msrb.mxu1 %v9842_v41  ;;  %6840 = vmatpush.bf16.msrb.mxu2 %v8754_v48  ;;  %v11388_v41 = vld [vmem:[%s12372_s18 + $0x554] sm:$0xf]  ;;  %v6592_v47 = vadd.f32 %v6591_v43, %v2872_v29  ;;  %v6605_v48 = vpop.f32.mrf.mxu1  ;;  %v10318_v49 = vor.u32 %v11680_v38, %v10317_v36  ;;  %v10950_v36 = vor.u32 %v11837_v26, %v10949_v24  ;;  %v10793_v38 = vld [vmem:[%s12372_s18 + $0x1188] sm:$0xf]  ;;  %v8603_v43 = vld [vmem:[%s12372_s18 + $0x10c] sm:$0xf0] }
 0x3fa   : > { %6854 = vmatpush.bf16.msrb.mxu3 %v10002_v50  ;;  %v8913_v50 = vld [vmem:[%s12372_s18 + $0x2e0] sm:$0xf]  ;;  %v10639_v24 = vld [vmem:[%s12372_s18 + $0x10ec] sm:$0xf0] }
 0x3fb   : > { %6814 = vmatmul.bf16.vlgmr.msrb.gmra.mxu0 %v12526_v3  ;;  %v6606_v56 = vadd.f32 %v6605_v48, %v6592_v47  ;;  %v9703_v48 = vld [vmem:[%s12372_s18 + $0x99c] sm:$0xf0] }
 0x3fc   : > { %6862 = vmatpush.bf16.msra.mxu0 %v9694_v42  ;;  %6828 = vmatmul.bf16.vlgmr.msrb.gmra.mxu1 %v12533_v14  ;;  %v9227_v42 = vld [vmem:[%s12372_s18 + $0x5ec] sm:$0xf0]  ;;  %v9077_v26 = vld [vmem:[%s12372_s18 + $0x420] sm:$0xf] }
 0x3fd   : > { %6876 = vmatpush.bf16.msra.mxu1 %v10942_v45  ;;  %6841 = vmatpush.bf16.msrb.mxu2 %v8598_v4  ;;  %v11700_v45 = vld [vmem:[%s12372_s18 + $0xf14] sm:$0xf]  ;;  %v9230_v54 = vor.u32 %v11388_v41, %v9227_v42  ;;  %7188 = vst [vmem:[%s12380_s10 + $0x90] sm:$0xff] %v6606_v56  ;;  %v11602_v4 = vld [vmem:[%s12372_s18 + $0xc00] sm:$0xf0] }
 0x3fe   : > { %6855 = vmatpush.bf16.msrb.mxu3 %v9846_v8  ;;  %v10478_v61 = vor.u32 %v11700_v45, %v10475_v46  ;;  %v8915_v8 = vld [vmem:[%s12372_s18 + $0x37c] sm:$0xf0]  ;;  %v11232_v41 = vld [vmem:[%s12372_s18 + $0x74] sm:$0xf]  ;;  %v2873_v45 = vperm.slane %v13412_v37, 3 }
 0x3ff   : > { %v8606_v58 = vor.u32 %v11232_v41, %v8603_v43  ;;  %v11330_v43 = vld [vmem:[%s12372_s18 + $0x380] sm:$0xf0] }
 0x400   : > { %6863 = vmatpush.bf16.msra.mxu0 %v9538_v59  ;;  %6842 = vmatmul.bf16.vlgmr.msrb.gmra.mxu2 %v12526_v3  ;;  %v8914_v59 = vor.u32 %v11329_v51, %v8913_v50  ;;  %v6593_v9 = vpop.f32.mrf.mxu0  ;;  %v9851_v50 = vld [vmem:[%s12372_s18 + $0xacc] sm:$0xf0]  ;;  %v9546_v51 = vor.u32 %v11486_v35, %v9545_v34 }
 0x401   : > { %6877 = vmatpush.bf16.msra.mxu1 %v10786_v0  ;;  %6890 = vmatpush.bf16.msra.mxu2 %v9698_v7  ;;  %v8757_v0 = vld [vmem:[%s12372_s18 + $0x1a8] sm:$0xf]  ;;  %v11310_v7 = vld [vmem:[%s12372_s18 + $0x2e4] sm:$0xf]  ;;  %v6594_v15 = vadd.f32 %v6593_v9, %v2872_v29  ;;  %v6607_v17 = vpop.f32.mrf.mxu1  ;;  %v9233_v9 = vld [vmem:[%s12372_s18 + $0x558] sm:$0xf] }
 0x402   : > { %6904 = vmatpush.bf16.msra.mxu3 %v10946_v10  ;;  %v8758_v10 = vor.u32 %v11290_v1, %v8757_v0  ;;  %v8918_v33 = vor.u32 %v11310_v7, %v8915_v8  ;;  %v10007_v29 = vld [vmem:[%s12372_s18 + $0xc04] sm:$0xf0]  ;;  %v10954_v1 = vor.u32 %v11818_v52, %v10951_v53  ;;  %v11662_v52 = vld [vmem:[%s12372_s18 + $0xde4] sm:$0xf]  ;;  %v10327_v53 = vld [vmem:[%s12372_s18 + $0xe7c] sm:$0xf0] }
 0x403   : > { %6856 = vmatmul.bf16.vlgmr.msrb.gmra.mxu3 %v12533_v14  ;;  %v10010_v42 = vor.u32 %v11583_v28, %v10007_v29  ;;  %v6619_v46 = vpop.f32.mrf.mxu2  ;;  %v10795_v7 = vld [vmem:[%s12372_s18 + $0x1224] sm:$0xf0] }
 0x404   : > { %6864 = vmatpush.bf16.msra.mxu0 %v9382_v13  ;;  %v10163_v13 = vld [vmem:[%s12372_s18 + $0xd3c] sm:$0xf0] }
 0x405   : > { %6878 = vmatpush.bf16.msra.mxu1 %v10630_v55  ;;  %6891 = vmatpush.bf16.msra.mxu2 %v9542_v23  ;;  %v10006_v55 = vor.u32 %v11602_v4, %v10005_v2  ;;  %v11525_v23 = vld [vmem:[%s12372_s18 + $0x998] sm:$0xf0]  ;;  %v10166_v16 = vor.u32 %v11622_v12, %v10163_v13  ;;  %v11467_v2 = vld [vmem:[%s12372_s18 + $0x7cc] sm:$0xf]  ;;  %v9547_v4 = vld [vmem:[%s12372_s18 + $0x864] sm:$0xf0] }
 0x406   : > { %6905 = vmatpush.bf16.msra.mxu3 %v10790_v25  ;;  %v6608_v25 = vadd.f32 %v6607_v17, %v6594_v15  ;;  %v9702_v31 = vor.u32 %v11525_v23, %v9701_v22  ;;  %v6633_v47 = vpop.f32.mrf.mxu3  ;;  %v11720_v12 = vld [vmem:[%s12372_s18 + $0xfb0] sm:$0xf0]  ;;  %v9550_v13 = vor.u32 %v11467_v2, %v9547_v4  ;;  %v8609_v2 = vld [vmem:[%s12372_s18 + $0x78] sm:$0xf]  ;;  %v11623_v4 = vld [vmem:[%s12372_s18 + $0xcac] sm:$0xf] }
 0x407   : > { %v11740_v23 = vld [vmem:[%s12372_s18 + $0x1054] sm:$0xf] }
 0x408   : > { %6865 = vmatpush.bf16.msra.mxu0 %v9226_v27  ;;  %v8759_v27 = vld [vmem:[%s12372_s18 + $0x244] sm:$0xf0]  ;;  %7227 = vst [vmem:[%s12380_s10 + $0x1c8] sm:$0xff] %v6608_v25  ;;  %v10482_v25 = vor.u32 %v11720_v12, %v10481_v11  ;;  %v10642_v29 = vor.u32 %v11740_v23, %v10639_v24  ;;  %v11564_v11 = vld [vmem:[%s12372_s18 + $0xad0] sm:$0xf0] }
 0x409   : > { %6879 = vmatpush.bf16.msra.mxu1 %v10474_v30  ;;  %6892 = vmatpush.bf16.msra.mxu2 %v9386_v39  ;;  %v9850_v30 = vor.u32 %v11563_v21, %v9849_v19  ;;  %v11798_v39 = vld [vmem:[%s12372_s18 + $0x1220] sm:$0xf0]  ;;  %v9391_v19 = vld [vmem:[%s12372_s18 + $0x72c] sm:$0xf0]  ;;  %v9709_v12 = vld [vmem:[%s12372_s18 + $0x908] sm:$0xf] }
 0x40a   : > { %6906 = vmatpush.bf16.msra.mxu3 %v10634_v40  ;;  %v8762_v40 = vor.u32 %v11271_v20, %v8759_v27  ;;  %v10794_v56 = vor.u32 %v11798_v39, %v10793_v38  ;;  %v10325_v27 = vld [vmem:[%s12372_s18 + $0xde0] sm:$0xf]  ;;  %v9394_v28 = vor.u32 %v11428_v18, %v9391_v19  ;;  %v10483_v38 = vld [vmem:[%s12372_s18 + $0xfb4] sm:$0xf0]  ;;  %v11838_v18 = vld [vmem:[%s12372_s18 + $0x1360] sm:$0xf0] }
 0x40b   : > { %v6621_v15 = vpop.f32.mrf.mxu2  ;;  %v11584_v24 = vld [vmem:[%s12372_s18 + $0xb74] sm:$0xf] }
 0x40c   : > { %6866 = vmatpush.bf16.msra.mxu0 %v9070_v44  ;;  %v11506_v44 = vld [vmem:[%s12372_s18 + $0x904] sm:$0xf]  ;;  %v6622_v21 = vadd.f32 %v6621_v15, %v2873_v45  ;;  %v10957_v15 = vld [vmem:[%s12372_s18 + $0x12c8] sm:$0xf] }
 0x40d   : > { %6880 = vmatpush.bf16.msra.mxu1 %v10318_v49  ;;  %6893 = vmatpush.bf16.msra.mxu2 %v9230_v54  ;;  %v11544_v49 = vld [vmem:[%s12372_s18 + $0xa34] sm:$0xf]  ;;  %v6620_v54 = vadd.f32 %v6619_v46, %v2873_v45  ;;  %v9706_v62 = vor.u32 %v11506_v44, %v9703_v48  ;;  %v10169_v44 = vld [vmem:[%s12372_s18 + $0xca8] sm:$0xf]  ;;  %v11642_v45 = vld [vmem:[%s12372_s18 + $0xd40] sm:$0xf0] }
 0x40e   : > { %6907 = vmatpush.bf16.msra.mxu3 %v10478_v61  ;;  %v9389_v61 = vld [vmem:[%s12372_s18 + $0x690] sm:$0xf]  ;;  %v6635_v17 = vpop.f32.mrf.mxu3 }
 0x40f   : > { %v6634_v0 = vadd.f32 %v6633_v47, %v6620_v54  ;;  %v6636_v20 = vadd.f32 %v6635_v17, %v6622_v21  ;;  %v10170_v54 = vor.u32 %v11642_v45, %v10169_v44  ;;  %v11272_v21 = vld [vmem:[%s12372_s18 + $0x1b4] sm:$0xf]  ;;  %v11819_v44 = vld [vmem:[%s12372_s18 + $0x12cc] sm:$0xf]  ;;  %v10959_v45 = vld [vmem:[%s12372_s18 + $0x1364] sm:$0xf0] }
 0x410   : > { %6867 = vmatpush.bf16.msra.mxu0 %v8914_v59  ;;  %v10637_v59 = vld [vmem:[%s12372_s18 + $0x1050] sm:$0xf] }
 0x411   : > { %6881 = vmatpush.bf16.msra.mxu1 %v10162_v63  ;;  %6894 = vmatpush.bf16.msra.mxu2 %v9074_v5  ;;  %v9854_v63 = vor.u32 %v11544_v49, %v9851_v50  ;;  %v9390_v5 = vor.u32 %v11447_v57, %v9389_v61  ;;  %7189 = vst [vmem:[%s12380_s10 + $0x98] sm:$0xff] %v6634_v0  ;;  %v11350_v49 = vld [vmem:[%s12372_s18 + $0x424] sm:$0xf]  ;;  %v9079_v50 = vld [vmem:[%s12372_s18 + $0x4bc] sm:$0xf0] }
 0x412   : > { %6908 = vmatpush.bf16.msra.mxu3 %v10322_v6  ;;  %v11779_v6 = vld [vmem:[%s12372_s18 + $0x118c] sm:$0xf]  ;;  %v10638_v8 = vor.u32 %v11759_v60, %v10637_v59  ;;  %7228 = vst [vmem:[%s12380_s10 + $0x1d0] sm:$0xff] %v6636_v20  ;;  %v10013_v57 = vld [vmem:[%s12372_s18 + $0xb70] sm:$0xf]  ;;  %v9082_v59 = vor.u32 %v11350_v49, %v9079_v50  ;;  %v10330_v60 = vor.u32 %v11662_v52, %v10327_v53 }
 0x413   : > { %v11291_v61 = vld [vmem:[%s12372_s18 + $0x248] sm:$0xf0]  ;;  %v11448_v49 = vld [vmem:[%s12372_s18 + $0x730] sm:$0xf0] }
 0x414   : > { %6868 = vmatpush.bf16.msra.mxu0 %v8758_v10  ;;  %v11408_v10 = vld [vmem:[%s12372_s18 + $0x5f0] sm:$0xf0]  ;;  %v11487_v20 = vld [vmem:[%s12372_s18 + $0x868] sm:$0xf0] }
 0x415   : > { %6882 = vmatpush.bf16.msra.mxu1 %v10006_v55  ;;  %6895 = vmatpush.bf16.msra.mxu2 %v8918_v33  ;;  %v10798_v55 = vor.u32 %v11779_v6, %v10795_v7  ;;  %v9234_v22 = vor.u32 %v11408_v10, %v9233_v9  ;;  %v2874_v33 = vperm.slane %v13412_v37, 4  ;;  %v11252_v9 = vld [vmem:[%s12372_s18 + $0x110] sm:$0xf0]  ;;  %v9857_v10 = vld [vmem:[%s12372_s18 + $0xa38] sm:$0xf] }
 0x416   : > { %6909 = vmatpush.bf16.msra.mxu3 %v10166_v16  ;;  %v11369_v16 = vld [vmem:[%s12372_s18 + $0x4b8] sm:$0xf0]  ;;  %v8610_v23 = vor.u32 %v11252_v9, %v8609_v2  ;;  %v11760_v52 = vld [vmem:[%s12372_s18 + $0x10f0] sm:$0xf0]  ;;  %v10489_v2 = vld [vmem:[%s12372_s18 + $0xf20] sm:$0xf] }
 0x417   : > { %v9078_v35 = vor.u32 %v11369_v16, %v9077_v26  ;;  %v9553_v16 = vld [vmem:[%s12372_s18 + $0x7d0] sm:$0xf]  ;;  %v11429_v9 = vld [vmem:[%s12372_s18 + $0x69c] sm:$0xf] }
 0x418   : > { %6869 = vmatpush.bf16.msra.mxu0 %v8602_v32  ;;  %v11681_v32 = vld [vmem:[%s12372_s18 + $0xe78] sm:$0xf0]  ;;  %v6647_v34 = vpop.f32.mrf.mxu0 }
 0x419   : > { %6883 = vmatpush.bf16.msra.mxu1 %v9850_v30  ;;  %6896 = vmatpush.bf16.msra.mxu2 %v8762_v40  ;;  %v11389_v30 = vld [vmem:[%s12372_s18 + $0x55c] sm:$0xf]  ;;  %v6648_v39 = vadd.f32 %v6647_v34, %v2874_v33  ;;  %v6661_v40 = vpop.f32.mrf.mxu1  ;;  %v10326_v41 = vor.u32 %v11681_v32, %v10325_v27  ;;  %v10958_v27 = vor.u32 %v11838_v18, %v10957_v15  ;;  %v10801_v32 = vld [vmem:[%s12372_s18 + $0x1190] sm:$0xf]  ;;  %v8611_v34 = vld [vmem:[%s12372_s18 + $0x114] sm:$0xf0] }
 0x41a   : > { %6910 = vmatpush.bf16.msra.mxu3 %v10010_v42  ;;  %v8921_v42 = vld [vmem:[%s12372_s18 + $0x2e8] sm:$0xf]  ;;  %v10647_v15 = vld [vmem:[%s12372_s18 + $0x10f4] sm:$0xf0] }
 0x41b   : > { %6870 = vmatmul.bf16.vlgmr.msra.gmra.mxu0 %v12526_v3  ;;  %v6662_v47 = vadd.f32 %v6661_v40, %v6648_v39  ;;  %v9711_v40 = vld [vmem:[%s12372_s18 + $0x9a4] sm:$0xf0] }
 0x41c   : > { %6918 = vmatpush.bf16.msrb.mxu0 %v9702_v31  ;;  %6884 = vmatmul.bf16.vlgmr.msra.gmra.mxu1 %v12533_v14  ;;  %v9235_v31 = vld [vmem:[%s12372_s18 + $0x5f4] sm:$0xf0]  ;;  %v9085_v18 = vld [vmem:[%s12372_s18 + $0x428] sm:$0xf] }
 0x41d   : > { %6932 = vmatpush.bf16.msrb.mxu1 %v10950_v36  ;;  %6897 = vmatpush.bf16.msra.mxu2 %v8606_v58  ;;  %v11701_v36 = vld [vmem:[%s12372_s18 + $0xf1c] sm:$0xf]  ;;  %v9238_v46 = vor.u32 %v11389_v30, %v9235_v31  ;;  %7190 = vst [vmem:[%s12380_s10 + $0xa0] sm:$0xff] %v6662_v47  ;;  %v11603_v58 = vld [vmem:[%s12372_s18 + $0xc08] sm:$0xf0] }
 0x41e   : > { %6911 = vmatpush.bf16.msra.mxu3 %v9854_v63  ;;  %v10486_v48 = vor.u32 %v11701_v36, %v10483_v38  ;;  %v8923_v63 = vld [vmem:[%s12372_s18 + $0x384] sm:$0xf0]  ;;  %v11233_v30 = vld [vmem:[%s12372_s18 + $0x7c] sm:$0xf]  ;;  %v2875_v36 = vperm.slane %v13412_v37, 5 }
 0x41f   : > { %v8614_v50 = vor.u32 %v11233_v30, %v8611_v34  ;;  %v8929_v30 = vld [vmem:[%s12372_s18 + $0x2f0] sm:$0xf] }
 0x420   : > { %6919 = vmatpush.bf16.msrb.mxu0 %v9546_v51  ;;  %6898 = vmatmul.bf16.vlgmr.msra.gmra.mxu2 %v12526_v3  ;;  %v8922_v51 = vor.u32 %v11330_v43, %v8921_v42  ;;  %v6649_v0 = vpop.f32.mrf.mxu0  ;;  %v9859_v42 = vld [vmem:[%s12372_s18 + $0xad4] sm:$0xf0]  ;;  %v9554_v43 = vor.u32 %v11487_v20, %v9553_v16  ;;  %v11702_v20 = vld [vmem:[%s12372_s18 + $0xf24] sm:$0xf]  ;;  %v10177_v34 = vld [vmem:[%s12372_s18 + $0xcb0] sm:$0xf] }
 0x421   : > { %6933 = vmatpush.bf16.msrb.mxu1 %v10794_v56  ;;  %6946 = vmatpush.bf16.msrb.mxu2 %v9706_v62  ;;  %v8765_v56 = vld [vmem:[%s12372_s18 + $0x1b0] sm:$0xf]  ;;  %v11311_v62 = vld [vmem:[%s12372_s18 + $0x2ec] sm:$0xf]  ;;  %v6650_v6 = vadd.f32 %v6649_v0, %v2874_v33  ;;  %v6663_v7 = vpop.f32.mrf.mxu1  ;;  %v9241_v0 = vld [vmem:[%s12372_s18 + $0x560] sm:$0xf] }
 0x422   : > { %6960 = vmatpush.bf16.msrb.mxu3 %v10954_v1  ;;  %v8766_v1 = vor.u32 %v11291_v61, %v8765_v56  ;;  %v8926_v17 = vor.u32 %v11311_v62, %v8923_v63  ;;  %v10015_v33 = vld [vmem:[%s12372_s18 + $0xc0c] sm:$0xf0]  ;;  %v10962_v61 = vor.u32 %v11819_v44, %v10959_v45  ;;  %v10335_v44 = vld [vmem:[%s12372_s18 + $0xe84] sm:$0xf0] }
 0x423   : > { %6912 = vmatmul.bf16.vlgmr.msra.gmra.mxu3 %v12533_v14  ;;  %v10018_v31 = vor.u32 %v11584_v24, %v10015_v33  ;;  %v6675_v38 = vpop.f32.mrf.mxu2  ;;  %v10803_v62 = vld [vmem:[%s12372_s18 + $0x122c] sm:$0xf0]  ;;  %v11390_v33 = vld [vmem:[%s12372_s18 + $0x564] sm:$0xf] }
 0x424   : > { %6920 = vmatpush.bf16.msrb.mxu0 %v9390_v5  ;;  %v10171_v5 = vld [vmem:[%s12372_s18 + $0xd44] sm:$0xf0] }
 0x425   : > { %6934 = vmatpush.bf16.msrb.mxu1 %v10638_v8  ;;  %6947 = vmatpush.bf16.msrb.mxu2 %v9550_v13  ;;  %v10014_v8 = vor.u32 %v11603_v58, %v10013_v57  ;;  %v11526_v13 = vld [vmem:[%s12372_s18 + $0x9a0] sm:$0xf0]  ;;  %v10174_v19 = vor.u32 %v11623_v4, %v10171_v5  ;;  %v11468_v57 = vld [vmem:[%s12372_s18 + $0x7d4] sm:$0xf]  ;;  %v9555_v58 = vld [vmem:[%s12372_s18 + $0x86c] sm:$0xf0] }
 0x426   : > { %6961 = vmatpush.bf16.msrb.mxu3 %v10798_v55  ;;  %v6664_v55 = vadd.f32 %v6663_v7, %v6650_v6  ;;  %v9710_v26 = vor.u32 %v11526_v13, %v9709_v12  ;;  %v6689_v39 = vpop.f32.mrf.mxu3  ;;  %v11721_v4 = vld [vmem:[%s12372_s18 + $0xfb8] sm:$0xf0]  ;;  %v9558_v5 = vor.u32 %v11468_v57, %v9555_v58  ;;  %v11624_v57 = vld [vmem:[%s12372_s18 + $0xcb4] sm:$0xf]  ;;  %v10179_v58 = vld [vmem:[%s12372_s18 + $0xd4c] sm:$0xf0] }
 0x427   : > { %v11741_v13 = vld [vmem:[%s12372_s18 + $0x105c] sm:$0xf] }
 0x428   : > { %6921 = vmatpush.bf16.msrb.mxu0 %v9234_v22  ;;  %v8767_v22 = vld [vmem:[%s12372_s18 + $0x24c] sm:$0xf0]  ;;  %7229 = vst [vmem:[%s12380_s10 + $0x1d8] sm:$0xff] %v6664_v55  ;;  %v10490_v55 = vor.u32 %v11721_v4, %v10489_v2  ;;  %v11527_v4 = vld [vmem:[%s12372_s18 + $0x9a8] sm:$0xf0] }
 0x429   : > { %6935 = vmatpush.bf16.msrb.mxu1 %v10482_v25  ;;  %6948 = vmatpush.bf16.msrb.mxu2 %v9394_v28  ;;  %v9858_v25 = vor.u32 %v11564_v11, %v9857_v10  ;;  %v11799_v28 = vld [vmem:[%s12372_s18 + $0x1228] sm:$0xf0]  ;;  %v9399_v10 = vld [vmem:[%s12372_s18 + $0x734] sm:$0xf0]  ;;  %v9717_v2 = vld [vmem:[%s12372_s18 + $0x910] sm:$0xf] }
 0x42a   : > { %6962 = vmatpush.bf16.msrb.mxu3 %v10642_v29  ;;  %v8770_v29 = vor.u32 %v11272_v21, %v8767_v22  ;;  %v10802_v47 = vor.u32 %v11799_v28, %v10801_v32  ;;  %v10333_v22 = vld [vmem:[%s12372_s18 + $0xde8] sm:$0xf]  ;;  %v9402_v24 = vor.u32 %v11429_v9, %v9399_v10  ;;  %v10182_v9 = vor.u32 %v11624_v57, %v10179_v58  ;;  %v11273_v10 = vld [vmem:[%s12372_s18 + $0x1bc] sm:$0xf]  ;;  %v11722_v58 = vld [vmem:[%s12372_s18 + $0xfc0] sm:$0xf0] }
 0x42b   : > { %v6677_v6 = vpop.f32.mrf.mxu2  ;;  %v10497_v57 = vld [vmem:[%s12372_s18 + $0xf28] sm:$0xf] }
 0x42c   : > { %6922 = vmatpush.bf16.msrb.mxu0 %v9078_v35  ;;  %v11507_v35 = vld [vmem:[%s12372_s18 + $0x90c] sm:$0xf]  ;;  %v6678_v11 = vadd.f32 %v6677_v6, %v2875_v36 }
 0x42d   : > { %6936 = vmatpush.bf16.msrb.mxu1 %v10326_v41  ;;  %6949 = vmatpush.bf16.msrb.mxu2 %v9238_v46  ;;  %v11545_v41 = vld [vmem:[%s12372_s18 + $0xa3c] sm:$0xf]  ;;  %v6676_v46 = vadd.f32 %v6675_v38, %v2875_v36  ;;  %v9714_v53 = vor.u32 %v11507_v35, %v9711_v40  ;;  %v11643_v35 = vld [vmem:[%s12372_s18 + $0xd48] sm:$0xf0] }
 0x42e   : > { %6963 = vmatpush.bf16.msrb.mxu3 %v10486_v48  ;;  %v9397_v48 = vld [vmem:[%s12372_s18 + $0x698] sm:$0xf]  ;;  %v6691_v7 = vpop.f32.mrf.mxu3  ;;  %v11351_v40 = vld [vmem:[%s12372_s18 + $0x42c] sm:$0xf]  ;;  %v10178_v45 = vor.u32 %v11643_v35, %v10177_v34  ;;  %v11820_v34 = vld [vmem:[%s12372_s18 + $0x12d4] sm:$0xf] }
 0x42f   : > { %v6690_v56 = vadd.f32 %v6689_v39, %v6676_v46  ;;  %v6692_v21 = vadd.f32 %v6691_v7, %v6678_v11  ;;  %v8773_v46 = vld [vmem:[%s12372_s18 + $0x1b8] sm:$0xf]  ;;  %v10967_v35 = vld [vmem:[%s12372_s18 + $0x136c] sm:$0xf0] }
 0x430   : > { %6923 = vmatpush.bf16.msrb.mxu0 %v8922_v51  ;;  %v10645_v51 = vld [vmem:[%s12372_s18 + $0x1058] sm:$0xf] }
 0x431   : > { %6937 = vmatpush.bf16.msrb.mxu1 %v10170_v54  ;;  %6950 = vmatpush.bf16.msrb.mxu2 %v9082_v59  ;;  %v9862_v54 = vor.u32 %v11545_v41, %v9859_v42  ;;  %v9398_v59 = vor.u32 %v11448_v49, %v9397_v48  ;;  %7191 = vst [vmem:[%s12380_s10 + $0xa8] sm:$0xff] %v6690_v56  ;;  %v9087_v41 = vld [vmem:[%s12372_s18 + $0x4c4] sm:$0xf0]  ;;  %v10021_v48 = vld [vmem:[%s12372_s18 + $0xb78] sm:$0xf] }
 0x432   : > { %6964 = vmatpush.bf16.msrb.mxu3 %v10330_v60  ;;  %v11780_v60 = vld [vmem:[%s12372_s18 + $0x1194] sm:$0xf]  ;;  %v10646_v63 = vor.u32 %v11760_v52, %v10645_v51  ;;  %7230 = vst [vmem:[%s12380_s10 + $0x1e0] sm:$0xff] %v6692_v21  ;;  %v8775_v11 = vld [vmem:[%s12372_s18 + $0x254] sm:$0xf0] }
 0x433   : > { %v11604_v49 = vld [vmem:[%s12372_s18 + $0xc10] sm:$0xf0] }
 0x434   : > { %6924 = vmatpush.bf16.msrb.mxu0 %v8766_v1  ;;  %v11409_v1 = vld [vmem:[%s12372_s18 + $0x5f8] sm:$0xf0]  ;;  %v11312_v52 = vld [vmem:[%s12372_s18 + $0x2f4] sm:$0xf] }
 0x435   : > { %6938 = vmatpush.bf16.msrb.mxu1 %v10014_v8  ;;  %6951 = vmatpush.bf16.msrb.mxu2 %v8926_v17  ;;  %v10806_v8 = vor.u32 %v11780_v60, %v10803_v62  ;;  %v9242_v12 = vor.u32 %v11409_v1, %v9241_v0  ;;  %v2876_v17 = vperm.slane %v13412_v37, 6  ;;  %v10650_v37 = vor.u32 %v11741_v13, %v10647_v15  ;;  %v9865_v0 = vld [vmem:[%s12372_s18 + $0xa40] sm:$0xf]  ;;  %v11565_v1 = vld [vmem:[%s12372_s18 + $0xad8] sm:$0xf0] }
 0x436   : > { %6965 = vmatpush.bf16.msrb.mxu3 %v10174_v19  ;;  %v11370_v19 = vld [vmem:[%s12372_s18 + $0x4c0] sm:$0xf0]  ;;  %v10022_v62 = vor.u32 %v11604_v49, %v10021_v48  ;;  %v11585_v13 = vld [vmem:[%s12372_s18 + $0xb7c] sm:$0xf]  ;;  %v10023_v15 = vld [vmem:[%s12372_s18 + $0xc14] sm:$0xf0] }
 0x437   : > { %v9086_v16 = vor.u32 %v11370_v19, %v9085_v18  ;;  %v9561_v18 = vld [vmem:[%s12372_s18 + $0x7d8] sm:$0xf]  ;;  %v11488_v19 = vld [vmem:[%s12372_s18 + $0x870] sm:$0xf0]  ;;  %v11469_v48 = vld [vmem:[%s12372_s18 + $0x7dc] sm:$0xf] }
 0x438   : > { %6925 = vmatpush.bf16.msrb.mxu0 %v8610_v23  ;;  %v11682_v23 = vld [vmem:[%s12372_s18 + $0xe80] sm:$0xf0]  ;;  %v9563_v49 = vld [vmem:[%s12372_s18 + $0x874] sm:$0xf0] }
 0x439   : > { %6939 = vmatpush.bf16.msrb.mxu1 %v9858_v25  ;;  %6952 = vmatpush.bf16.msrb.mxu2 %v8770_v29  ;;  %v9243_v25 = vld [vmem:[%s12372_s18 + $0x5fc] sm:$0xf0]  ;;  %v6717_v28 = vpop.f32.mrf.mxu1  ;;  %v10334_v29 = vor.u32 %v11682_v23, %v10333_v22  ;;  %v10809_v22 = vld [vmem:[%s12372_s18 + $0x1198] sm:$0xf]  ;;  %v11800_v23 = vld [vmem:[%s12372_s18 + $0x1230] sm:$0xf0] }
 0x43a   : > { %6966 = vmatpush.bf16.msrb.mxu3 %v10018_v31  ;;  %v11331_v31 = vld [vmem:[%s12372_s18 + $0x388] sm:$0xf0]  ;;  %v9246_v36 = vor.u32 %v11390_v33, %v9243_v25  ;;  %v10026_v33 = vor.u32 %v11585_v13, %v10023_v15  ;;  %v8619_v25 = vld [vmem:[%s12372_s18 + $0x11c] sm:$0xf0] }
 0x43b   : > { %6926 = vmatmul.bf16.vlgmr.msrb.gmra.mxu0 %v12526_v3  ;;  %v8930_v42 = vor.u32 %v11331_v31, %v8929_v30  ;;  %v9867_v30 = vld [vmem:[%s12372_s18 + $0xadc] sm:$0xf0]  ;;  %v9562_v31 = vor.u32 %v11488_v19, %v9561_v18  ;;  %v11683_v13 = vld [vmem:[%s12372_s18 + $0xe88] sm:$0xf0]  ;;  %v9251_v18 = vld [vmem:[%s12372_s18 + $0x604] sm:$0xf0] }
 0x43c   : > { %6974 = vmatpush.bf16.msra.mxu0 %v9710_v26  ;;  %6940 = vmatmul.bf16.vlgmr.msrb.gmra.mxu1 %v12533_v14  ;;  %v6703_v26 = vpop.f32.mrf.mxu0 }
 0x43d   : > { %6988 = vmatpush.bf16.msra.mxu1 %v10958_v27  ;;  %6953 = vmatpush.bf16.msrb.mxu2 %v8614_v50  ;;  %v10491_v27 = vld [vmem:[%s12372_s18 + $0xfbc] sm:$0xf0]  ;;  %v6704_v32 = vadd.f32 %v6703_v26, %v2876_v17  ;;  %v9090_v50 = vor.u32 %v11351_v40, %v9087_v41  ;;  %v11508_v26 = vld [vmem:[%s12372_s18 + $0x914] sm:$0xf]  ;;  %v11449_v40 = vld [vmem:[%s12372_s18 + $0x738] sm:$0xf0] }
 0x43e   : > { %6967 = vmatpush.bf16.msrb.mxu3 %v9862_v54  ;;  %v10494_v39 = vor.u32 %v11702_v20, %v10491_v27 }
 0x43f   : > { %v6718_v38 = vadd.f32 %v6717_v28, %v6704_v32  ;;  %v9719_v28 = vld [vmem:[%s12372_s18 + $0x9ac] sm:$0xf0] }
 0x440   : > { %6975 = vmatpush.bf16.msra.mxu0 %v9554_v43  ;;  %6954 = vmatmul.bf16.vlgmr.msrb.gmra.mxu2 %v12526_v3  ;;  %v11663_v43 = vld [vmem:[%s12372_s18 + $0xdec] sm:$0xf] }
 0x441   : > { %6989 = vmatpush.bf16.msra.mxu1 %v10802_v47  ;;  %7002 = vmatpush.bf16.msra.mxu2 %v9714_v53  ;;  %7192 = vst [vmem:[%s12380_s10 + $0xb0] sm:$0xff] %v6718_v38  ;;  %v11292_v47 = vld [vmem:[%s12372_s18 + $0x250] sm:$0xf0]  ;;  %v10338_v51 = vor.u32 %v11663_v43, %v10335_v44  ;;  %v8931_v53 = vld [vmem:[%s12372_s18 + $0x38c] sm:$0xf0]  ;;  %v6719_v60 = vpop.f32.mrf.mxu1  ;;  %v10810_v38 = vor.u32 %v11800_v23, %v10809_v22 }
 0x442   : > { %7016 = vmatpush.bf16.msra.mxu3 %v10962_v61  ;;  %v8774_v56 = vor.u32 %v11292_v47, %v8773_v46  ;;  %v8617_v61 = vld [vmem:[%s12372_s18 + $0x80] sm:$0xf]  ;;  %v8934_v6 = vor.u32 %v11312_v52, %v8931_v53  ;;  %v11761_v43 = vld [vmem:[%s12372_s18 + $0x10f8] sm:$0xf0]  ;;  %v9722_v44 = vor.u32 %v11508_v26, %v9719_v28  ;;  %v10970_v47 = vor.u32 %v11820_v34, %v10967_v35  ;;  %v10811_v52 = vld [vmem:[%s12372_s18 + $0x1234] sm:$0xf0] }
 0x443   : > { %6968 = vmatmul.bf16.vlgmr.msrb.gmra.mxu3 %v12533_v14  ;;  %v6731_v27 = vpop.f32.mrf.mxu2  ;;  %v11703_v22 = vld [vmem:[%s12372_s18 + $0xf2c] sm:$0xf]  ;;  %v10499_v23 = vld [vmem:[%s12372_s18 + $0xfc4] sm:$0xf0]  ;;  %v11332_v26 = vld [vmem:[%s12372_s18 + $0x390] sm:$0xf0] }
 0x444   : > { %6976 = vmatpush.bf16.msra.mxu0 %v9398_v59  ;;  %v6705_v54 = vpop.f32.mrf.mxu0  ;;  %v10502_v28 = vor.u32 %v11703_v22, %v10499_v23  ;;  %v11664_v34 = vld [vmem:[%s12372_s18 + $0xdf4] sm:$0xf]  ;;  %v10343_v35 = vld [vmem:[%s12372_s18 + $0xe8c] sm:$0xf0] }
 0x445   : > { %6990 = vmatpush.bf16.msra.mxu1 %v10646_v63  ;;  %7003 = vmatpush.bf16.msra.mxu2 %v9558_v5  ;;  %v6706_v59 = vadd.f32 %v6705_v54, %v2876_v17  ;;  %v11253_v63 = vld [vmem:[%s12372_s18 + $0x118] sm:$0xf0]  ;;  %v10965_v5 = vld [vmem:[%s12372_s18 + $0x12d0] sm:$0xf]  ;;  %v9866_v17 = vor.u32 %v11565_v1, %v9865_v0  ;;  %v9249_v54 = vld [vmem:[%s12372_s18 + $0x568] sm:$0xf] }
 0x446   : > { %7017 = vmatpush.bf16.msra.mxu3 %v10806_v8  ;;  %v11839_v8 = vld [vmem:[%s12372_s18 + $0x1368] sm:$0xf0]  ;;  %v6745_v32 = vpop.f32.mrf.mxu3  ;;  %v11430_v0 = vld [vmem:[%s12372_s18 + $0x6a4] sm:$0xf]  ;;  %v9407_v1 = vld [vmem:[%s12372_s18 + $0x73c] sm:$0xf0] }
 0x447   : > { %v6720_v7 = vadd.f32 %v6719_v60, %v6706_v59  ;;  %v10966_v21 = vor.u32 %v11839_v8, %v10965_v5  ;;  %v9566_v59 = vor.u32 %v11469_v48, %v9563_v49  ;;  %v11742_v5 = vld [vmem:[%s12372_s18 + $0x1064] sm:$0xf]  ;;  %v10498_v8 = vor.u32 %v11722_v58, %v10497_v57  ;;  %v8625_v48 = vld [vmem:[%s12372_s18 + $0x88] sm:$0xf]  ;;  %v11625_v49 = vld [vmem:[%s12372_s18 + $0xcbc] sm:$0xf] }
 0x448   : > { %6977 = vmatpush.bf16.msra.mxu0 %v9242_v12  ;;  %v8618_v12 = vor.u32 %v11253_v63, %v8617_v61  ;;  %v13711_v61 = vld [vmem:[%s12378_s16 + $0x18] sm:$0xff]  ;;  %v9410_v15 = vor.u32 %v11430_v0, %v9407_v1  ;;  %v11840_v0 = vld [vmem:[%s12372_s18 + $0x1370] sm:$0xf0] }
 0x449   : > { %6991 = vmatpush.bf16.msra.mxu1 %v10490_v55  ;;  %7004 = vmatpush.bf16.msra.mxu2 %v9402_v24  ;;  %7231 = vst [vmem:[%s12380_s10 + $0x1e8] sm:$0xff] %v6720_v7  ;;  %v9718_v55 = vor.u32 %v11527_v4, %v9717_v2  ;;  %v8778_v24 = vor.u32 %v11273_v10, %v8775_v11  ;;  %v2878_v7 = vperm.slane %v13711_v61, 0  ;;  %v11371_v10 = vld [vmem:[%s12372_s18 + $0x4c8] sm:$0xf0]  ;;  %v11566_v57 = vld [vmem:[%s12372_s18 + $0xae0] sm:$0xf0] }
 0x44a   : > { %7018 = vmatpush.bf16.msra.mxu3 %v10650_v37  ;;  %v11234_v37 = vld [vmem:[%s12372_s18 + $0x84] sm:$0xf]  ;;  %v9725_v58 = vld [vmem:[%s12372_s18 + $0x918] sm:$0xf]  ;;  %v2879_v22 = vperm.slane %v13711_v61, 1 }
 0x44b   : > { %v8622_v41 = vor.u32 %v11234_v37, %v8619_v25  ;;  %v6733_v60 = vpop.f32.mrf.mxu2  ;;  %v8937_v25 = vld [vmem:[%s12372_s18 + $0x2f8] sm:$0xf] }
 0x44c   : > { %6978 = vmatpush.bf16.msra.mxu0 %v9086_v16  ;;  %v11942_v16 = vld [vmem:[%s12378_s16 + $0x10] sm:$0xff] }
 0x44d   : > { %6992 = vmatpush.bf16.msra.mxu1 %v10334_v29  ;;  %7005 = vmatpush.bf16.msra.mxu2 %v9246_v36  ;;  %v2877_v20 = vperm.slane %v11942_v16, 7  ;;  %v11546_v29 = vld [vmem:[%s12372_s18 + $0xa44] sm:$0xf]  ;;  %v10185_v16 = vld [vmem:[%s12372_s18 + $0xcb8] sm:$0xf] }
 0x44e   : > { %7019 = vmatpush.bf16.msra.mxu3 %v10494_v39  ;;  %v9405_v39 = vld [vmem:[%s12372_s18 + $0x6a0] sm:$0xf] }
 0x44f   : > { %v6732_v36 = vadd.f32 %v6731_v27, %v2877_v20  ;;  %v6734_v2 = vadd.f32 %v6733_v60, %v2877_v20  ;;  %v11644_v20 = vld [vmem:[%s12372_s18 + $0xd50] sm:$0xf0]  ;;  %v10973_v60 = vld [vmem:[%s12372_s18 + $0x12d8] sm:$0xf] }
 0x450   : > { %6979 = vmatpush.bf16.msra.mxu0 %v8930_v42  ;;  %v10653_v42 = vld [vmem:[%s12372_s18 + $0x1060] sm:$0xf] }
 0x451   : > { %6993 = vmatpush.bf16.msra.mxu1 %v10178_v45  ;;  %7006 = vmatpush.bf16.msra.mxu2 %v9090_v50  ;;  %v9870_v45 = vor.u32 %v11546_v29, %v9867_v30  ;;  %v6746_v46 = vadd.f32 %v6745_v32, %v6732_v36  ;;  %v9406_v50 = vor.u32 %v11449_v40, %v9405_v39  ;;  %v11352_v29 = vld [vmem:[%s12372_s18 + $0x434] sm:$0xf]  ;;  %v9095_v30 = vld [vmem:[%s12372_s18 + $0x4cc] sm:$0xf0]  ;;  %v11293_v39 = vld [vmem:[%s12372_s18 + $0x258] sm:$0xf0] }
 0x452   : > { %7020 = vmatpush.bf16.msra.mxu3 %v10338_v51  ;;  %v11781_v51 = vld [vmem:[%s12372_s18 + $0x119c] sm:$0xf]  ;;  %v10654_v53 = vor.u32 %v11761_v43, %v10653_v42  ;;  %v10186_v36 = vor.u32 %v11644_v20, %v10185_v16  ;;  %v10029_v40 = vld [vmem:[%s12372_s18 + $0xb80] sm:$0xf]  ;;  %v9098_v42 = vor.u32 %v11352_v29, %v9095_v30  ;;  %v10346_v43 = vor.u32 %v11664_v34, %v10343_v35  ;;  %v10975_v20 = vld [vmem:[%s12372_s18 + $0x1374] sm:$0xf0] }
 0x453   : > { %7193 = vst [vmem:[%s12380_s10 + $0xb8] sm:$0xff] %v6746_v46  ;;  %v10814_v63 = vor.u32 %v11781_v51, %v10811_v52  ;;  %v11821_v16 = vld [vmem:[%s12372_s18 + $0x12dc] sm:$0xf]  ;;  %v11450_v29 = vld [vmem:[%s12372_s18 + $0x740] sm:$0xf0] }
 0x454   : > { %6980 = vmatpush.bf16.msra.mxu0 %v8774_v56  ;;  %v11410_v56 = vld [vmem:[%s12372_s18 + $0x600] sm:$0xf0] }
 0x455   : > { %6994 = vmatpush.bf16.msra.mxu1 %v10022_v62  ;;  %7007 = vmatpush.bf16.msra.mxu2 %v8934_v6  ;;  %v6747_v62 = vpop.f32.mrf.mxu3  ;;  %v9250_v4 = vor.u32 %v11410_v56, %v9249_v54  ;;  %v10655_v6 = vld [vmem:[%s12372_s18 + $0x10fc] sm:$0xf0]  ;;  %v11254_v54 = vld [vmem:[%s12372_s18 + $0x120] sm:$0xf0]  ;;  %v9873_v56 = vld [vmem:[%s12372_s18 + $0xa48] sm:$0xf] }
 0x456   : > { %7021 = vmatpush.bf16.msra.mxu3 %v10182_v9  ;;  %v9093_v9 = vld [vmem:[%s12372_s18 + $0x430] sm:$0xf]  ;;  %v6748_v11 = vadd.f32 %v6747_v62, %v6734_v2  ;;  %v11274_v2 = vld [vmem:[%s12372_s18 + $0x1c4] sm:$0xf] }
 0x457   : > { %v11762_v34 = vld [vmem:[%s12372_s18 + $0x1100] sm:$0xf0] }
 0x458   : > { %6981 = vmatpush.bf16.msra.mxu0 %v8618_v12  ;;  %v10341_v12 = vld [vmem:[%s12372_s18 + $0xdf0] sm:$0xf]  ;;  %v6759_v19 = vpop.f32.mrf.mxu0  ;;  %7232 = vst [vmem:[%s12380_s10 + $0x1f0] sm:$0xff] %v6748_v11  ;;  %v11489_v11 = vld [vmem:[%s12372_s18 + $0x878] sm:$0xf0] }
 0x459   : > { %6995 = vmatpush.bf16.msra.mxu1 %v9866_v17  ;;  %7008 = vmatpush.bf16.msra.mxu2 %v8778_v24  ;;  %v10658_v17 = vor.u32 %v11742_v5, %v10655_v6  ;;  %v6760_v24 = vadd.f32 %v6759_v19, %v2878_v7  ;;  %v6773_v37 = vpop.f32.mrf.mxu1  ;;  %v8626_v5 = vor.u32 %v11254_v54, %v8625_v48  ;;  %v11586_v6 = vld [vmem:[%s12372_s18 + $0xb84] sm:$0xf]  ;;  %v8627_v19 = vld [vmem:[%s12372_s18 + $0x124] sm:$0xf0]  ;;  %v10505_v48 = vld [vmem:[%s12372_s18 + $0xf30] sm:$0xf] }
 0x45a   : > { %7022 = vmatpush.bf16.msra.mxu3 %v10026_v33  ;;  %v10342_v33 = vor.u32 %v11683_v13, %v10341_v12  ;;  %v10974_v12 = vor.u32 %v11840_v0, %v10973_v60  ;;  %v10817_v13 = vld [vmem:[%s12372_s18 + $0x11a0] sm:$0xf]  ;;  %v11431_v54 = vld [vmem:[%s12372_s18 + $0x6ac] sm:$0xf]  ;;  %v10663_v60 = vld [vmem:[%s12372_s18 + $0x1104] sm:$0xf0] }
 0x45b   : > { %6982 = vmatmul.bf16.vlgmr.msra.gmra.mxu0 %v12526_v3  ;;  %v6774_v32 = vadd.f32 %v6773_v37, %v6760_v24  ;;  %v9727_v37 = vld [vmem:[%s12372_s18 + $0x9b4] sm:$0xf0] }
 0x45c   : > { %7030 = vmatpush.bf16.msrb.mxu0 %v9718_v55  ;;  %6996 = vmatmul.bf16.vlgmr.msra.gmra.mxu1 %v12533_v14  ;;  %v11391_v55 = vld [vmem:[%s12372_s18 + $0x56c] sm:$0xf]  ;;  %v9101_v0 = vld [vmem:[%s12372_s18 + $0x438] sm:$0xf] }
 0x45d   : > { %7044 = vmatpush.bf16.msrb.mxu1 %v10966_v21  ;;  %7009 = vmatpush.bf16.msra.mxu2 %v8622_v41  ;;  %v9094_v21 = vor.u32 %v11371_v10, %v9093_v9  ;;  %v9254_v27 = vor.u32 %v11391_v55, %v9251_v18  ;;  %7194 = vst [vmem:[%s12380_s10 + $0xc0] sm:$0xff] %v6774_v32  ;;  %v11605_v41 = vld [vmem:[%s12372_s18 + $0xc18] sm:$0xf0]  ;;  %v9569_v10 = vld [vmem:[%s12372_s18 + $0x7e0] sm:$0xf] }
 0x45e   : > { %7023 = vmatpush.bf16.msra.mxu3 %v9870_v45  ;;  %v8939_v45 = vld [vmem:[%s12372_s18 + $0x394] sm:$0xf0]  ;;  %v11235_v55 = vld [vmem:[%s12372_s18 + $0x8c] sm:$0xf] }
 0x45f   : > { %v8630_v30 = vor.u32 %v11235_v55, %v8627_v19  ;;  %v11333_v19 = vld [vmem:[%s12372_s18 + $0x398] sm:$0xf0] }
 0x460   : > { %7031 = vmatpush.bf16.msrb.mxu0 %v9562_v31  ;;  %7010 = vmatmul.bf16.vlgmr.msra.gmra.mxu2 %v12526_v3  ;;  %v8938_v31 = vor.u32 %v11332_v26, %v8937_v25  ;;  %v6761_v46 = vpop.f32.mrf.mxu0  ;;  %v9875_v25 = vld [vmem:[%s12372_s18 + $0xae4] sm:$0xf0]  ;;  %v9570_v26 = vor.u32 %v11489_v11, %v9569_v10 }
 0x461   : > { %7045 = vmatpush.bf16.msrb.mxu1 %v10810_v38  ;;  %7058 = vmatpush.bf16.msrb.mxu2 %v9722_v44  ;;  %v8781_v38 = vld [vmem:[%s12372_s18 + $0x1c0] sm:$0xf]  ;;  %v11313_v44 = vld [vmem:[%s12372_s18 + $0x2fc] sm:$0xf]  ;;  %v6762_v51 = vadd.f32 %v6761_v46, %v2878_v7  ;;  %v6775_v52 = vpop.f32.mrf.mxu1  ;;  %v9257_v46 = vld [vmem:[%s12372_s18 + $0x570] sm:$0xf] }
 0x462   : > { %7072 = vmatpush.bf16.msrb.mxu3 %v10970_v47  ;;  %v8782_v47 = vor.u32 %v11293_v39, %v8781_v38  ;;  %v8942_v62 = vor.u32 %v11313_v44, %v8939_v45  ;;  %v10031_v7 = vld [vmem:[%s12372_s18 + $0xc1c] sm:$0xf0]  ;;  %v10978_v39 = vor.u32 %v11821_v16, %v10975_v20  ;;  %v11665_v16 = vld [vmem:[%s12372_s18 + $0xdfc] sm:$0xf]  ;;  %v10351_v20 = vld [vmem:[%s12372_s18 + $0xe94] sm:$0xf0] }
 0x463   : > { %7024 = vmatmul.bf16.vlgmr.msra.gmra.mxu3 %v12533_v14  ;;  %v10034_v18 = vor.u32 %v11586_v6, %v10031_v7  ;;  %v6787_v23 = vpop.f32.mrf.mxu2  ;;  %v10819_v44 = vld [vmem:[%s12372_s18 + $0x123c] sm:$0xf0] }
 0x464   : > { %7032 = vmatpush.bf16.msrb.mxu0 %v9406_v50  ;;  %v10187_v50 = vld [vmem:[%s12372_s18 + $0xd54] sm:$0xf0] }
 0x465   : > { %7046 = vmatpush.bf16.msrb.mxu1 %v10654_v53  ;;  %7059 = vmatpush.bf16.msrb.mxu2 %v9566_v59  ;;  %v10030_v53 = vor.u32 %v11605_v41, %v10029_v40  ;;  %v11528_v59 = vld [vmem:[%s12372_s18 + $0x9b0] sm:$0xf0]  ;;  %v10190_v1 = vor.u32 %v11625_v49, %v10187_v50  ;;  %v11470_v40 = vld [vmem:[%s12372_s18 + $0x7e4] sm:$0xf]  ;;  %v9571_v41 = vld [vmem:[%s12372_s18 + $0x87c] sm:$0xf0] }
 0x466   : > { %7073 = vmatpush.bf16.msrb.mxu3 %v10814_v63  ;;  %v6776_v63 = vadd.f32 %v6775_v52, %v6762_v51  ;;  %v9726_v9 = vor.u32 %v11528_v59, %v9725_v58  ;;  %v6801_v24 = vpop.f32.mrf.mxu3  ;;  %v11723_v49 = vld [vmem:[%s12372_s18 + $0xfc8] sm:$0xf0]  ;;  %v9574_v50 = vor.u32 %v11470_v40, %v9571_v41  ;;  %v8633_v40 = vld [vmem:[%s12372_s18 + $0x90] sm:$0xf]  ;;  %v11626_v41 = vld [vmem:[%s12372_s18 + $0xcc4] sm:$0xf] }
 0x467   : > { %v11743_v59 = vld [vmem:[%s12372_s18 + $0x106c] sm:$0xf] }
 0x468   : > { %7033 = vmatpush.bf16.msrb.mxu0 %v9250_v4  ;;  %v8783_v4 = vld [vmem:[%s12372_s18 + $0x25c] sm:$0xf0]  ;;  %7233 = vst [vmem:[%s12380_s10 + $0x1f8] sm:$0xff] %v6776_v63  ;;  %v10506_v63 = vor.u32 %v11723_v49, %v10505_v48  ;;  %v10666_v7 = vor.u32 %v11743_v59, %v10663_v60  ;;  %v11567_v48 = vld [vmem:[%s12372_s18 + $0xae8] sm:$0xf0] }
 0x469   : > { %7047 = vmatpush.bf16.msrb.mxu1 %v10498_v8  ;;  %7060 = vmatpush.bf16.msrb.mxu2 %v9410_v15  ;;  %v9874_v8 = vor.u32 %v11566_v57, %v9873_v56  ;;  %v11801_v15 = vld [vmem:[%s12372_s18 + $0x1238] sm:$0xf0]  ;;  %v9415_v56 = vld [vmem:[%s12372_s18 + $0x744] sm:$0xf0]  ;;  %v9733_v49 = vld [vmem:[%s12372_s18 + $0x920] sm:$0xf] }
 0x46a   : > { %7074 = vmatpush.bf16.msrb.mxu3 %v10658_v17  ;;  %v8786_v17 = vor.u32 %v11274_v2, %v8783_v4  ;;  %v10818_v32 = vor.u32 %v11801_v15, %v10817_v13  ;;  %v10349_v4 = vld [vmem:[%s12372_s18 + $0xdf8] sm:$0xf]  ;;  %v9418_v6 = vor.u32 %v11431_v54, %v9415_v56  ;;  %v10507_v13 = vld [vmem:[%s12372_s18 + $0xfcc] sm:$0xf0]  ;;  %v11841_v54 = vld [vmem:[%s12372_s18 + $0x1378] sm:$0xf0] }
 0x46b   : > { %v6789_v51 = vpop.f32.mrf.mxu2  ;;  %v11587_v60 = vld [vmem:[%s12372_s18 + $0xb8c] sm:$0xf] }
 0x46c   : > { %7034 = vmatpush.bf16.msrb.mxu0 %v9094_v21  ;;  %v11509_v21 = vld [vmem:[%s12372_s18 + $0x91c] sm:$0xf]  ;;  %v6790_v57 = vadd.f32 %v6789_v51, %v2879_v22  ;;  %v10981_v51 = vld [vmem:[%s12372_s18 + $0x12e0] sm:$0xf] }
 0x46d   : > { %7048 = vmatpush.bf16.msrb.mxu1 %v10342_v33  ;;  %7061 = vmatpush.bf16.msrb.mxu2 %v9254_v27  ;;  %v11547_v33 = vld [vmem:[%s12372_s18 + $0xa4c] sm:$0xf]  ;;  %v6788_v27 = vadd.f32 %v6787_v23, %v2879_v22  ;;  %v9730_v35 = vor.u32 %v11509_v21, %v9727_v37  ;;  %v10193_v21 = vld [vmem:[%s12372_s18 + $0xcc0] sm:$0xf]  ;;  %v11645_v22 = vld [vmem:[%s12372_s18 + $0xd58] sm:$0xf0] }
 0x46e   : > { %7075 = vmatpush.bf16.msrb.mxu3 %v10502_v28  ;;  %v9413_v28 = vld [vmem:[%s12372_s18 + $0x6a8] sm:$0xf]  ;;  %v6803_v52 = vpop.f32.mrf.mxu3 }
 0x46f   : > { %v6802_v38 = vadd.f32 %v6801_v24, %v6788_v27  ;;  %v6804_v2 = vadd.f32 %v6803_v52, %v6790_v57  ;;  %v10194_v27 = vor.u32 %v11645_v22, %v10193_v21  ;;  %v11275_v57 = vld [vmem:[%s12372_s18 + $0x1cc] sm:$0xf]  ;;  %v9421_v21 = vld [vmem:[%s12372_s18 + $0x6b0] sm:$0xf] }
 0x470   : > { %7035 = vmatpush.bf16.msrb.mxu0 %v8938_v31  ;;  %v10661_v31 = vld [vmem:[%s12372_s18 + $0x1068] sm:$0xf]  ;;  %v11451_v22 = vld [vmem:[%s12372_s18 + $0x748] sm:$0xf0] }
 0x471   : > { %7049 = vmatpush.bf16.msrb.mxu1 %v10186_v36  ;;  %7062 = vmatpush.bf16.msrb.mxu2 %v9098_v42  ;;  %v9878_v36 = vor.u32 %v11547_v33, %v9875_v25  ;;  %v9414_v42 = vor.u32 %v11450_v29, %v9413_v28  ;;  %7195 = vst [vmem:[%s12380_s10 + $0xc8] sm:$0xff] %v6802_v38  ;;  %v11353_v33 = vld [vmem:[%s12372_s18 + $0x43c] sm:$0xf]  ;;  %v9103_v25 = vld [vmem:[%s12372_s18 + $0x4d4] sm:$0xf0] }
 0x472   : > { %7076 = vmatpush.bf16.msrb.mxu3 %v10346_v43  ;;  %v11782_v43 = vld [vmem:[%s12372_s18 + $0x11a4] sm:$0xf]  ;;  %v10662_v45 = vor.u32 %v11762_v34, %v10661_v31  ;;  %7234 = vst [vmem:[%s12380_s10 + $0x200] sm:$0xff] %v6804_v2  ;;  %v10037_v29 = vld [vmem:[%s12372_s18 + $0xb88] sm:$0xf]  ;;  %v9106_v31 = vor.u32 %v11353_v33, %v9103_v25  ;;  %v10354_v34 = vor.u32 %v11665_v16, %v10351_v20 }
 0x473   : > { %v11294_v28 = vld [vmem:[%s12372_s18 + $0x260] sm:$0xf0]  ;;  %v10982_v2 = vor.u32 %v11841_v54, %v10981_v51  ;;  %v11763_v33 = vld [vmem:[%s12372_s18 + $0x1108] sm:$0xf0]  ;;  %v9265_v20 = vld [vmem:[%s12372_s18 + $0x578] sm:$0xf] }
 0x474   : > { %7036 = vmatpush.bf16.msrb.mxu0 %v8782_v47  ;;  %v11411_v47 = vld [vmem:[%s12372_s18 + $0x608] sm:$0xf0]  ;;  %v11646_v51 = vld [vmem:[%s12372_s18 + $0xd60] sm:$0xf0] }
 0x475   : > { %7050 = vmatpush.bf16.msrb.mxu1 %v10030_v53  ;;  %7063 = vmatpush.bf16.msrb.mxu2 %v8942_v62  ;;  %v10822_v53 = vor.u32 %v11782_v43, %v10819_v44  ;;  %v9258_v58 = vor.u32 %v11411_v47, %v9257_v46  ;;  %v2880_v62 = vperm.slane %v13711_v61, 2  ;;  %v11255_v46 = vld [vmem:[%s12372_s18 + $0x128] sm:$0xf0]  ;;  %v9881_v47 = vld [vmem:[%s12372_s18 + $0xa50] sm:$0xf] }
 0x476   : > { %7077 = vmatpush.bf16.msrb.mxu3 %v10190_v1  ;;  %v11372_v1 = vld [vmem:[%s12372_s18 + $0x4d0] sm:$0xf0]  ;;  %v8634_v59 = vor.u32 %v11255_v46, %v8633_v40 }
 0x477   : > { %v9102_v11 = vor.u32 %v11372_v1, %v9101_v0  ;;  %v9577_v1 = vld [vmem:[%s12372_s18 + $0x7e8] sm:$0xf] }
 0x478   : > { %7037 = vmatpush.bf16.msrb.mxu0 %v8626_v5  ;;  %v11684_v5 = vld [vmem:[%s12372_s18 + $0xe90] sm:$0xf0]  ;;  %v6815_v10 = vpop.f32.mrf.mxu0 }
 0x479   : > { %7051 = vmatpush.bf16.msrb.mxu1 %v9874_v8  ;;  %7064 = vmatpush.bf16.msrb.mxu2 %v8786_v17  ;;  %v11392_v8 = vld [vmem:[%s12372_s18 + $0x574] sm:$0xf]  ;;  %v6816_v15 = vadd.f32 %v6815_v10, %v2880_v62  ;;  %v6829_v17 = vpop.f32.mrf.mxu1  ;;  %v10350_v55 = vor.u32 %v11684_v5, %v10349_v4  ;;  %v11490_v4 = vld [vmem:[%s12372_s18 + $0x880] sm:$0xf0]  ;;  %v10825_v5 = vld [vmem:[%s12372_s18 + $0x11a8] sm:$0xf] }
 0x47a   : > { %7078 = vmatpush.bf16.msrb.mxu3 %v10034_v18  ;;  %v8945_v18 = vld [vmem:[%s12372_s18 + $0x300] sm:$0xf] }
 0x47b   : > { %7038 = vmatmul.bf16.vlgmr.msrb.gmra.mxu0 %v12526_v3  ;;  %v6830_v24 = vadd.f32 %v6829_v17, %v6816_v15  ;;  %v9883_v15 = vld [vmem:[%s12372_s18 + $0xaec] sm:$0xf0] }
 0x47c   : > { %7086 = vmatpush.bf16.msra.mxu0 %v9726_v9  ;;  %7052 = vmatmul.bf16.vlgmr.msrb.gmra.mxu1 %v12533_v14  ;;  %v9259_v9 = vld [vmem:[%s12372_s18 + $0x60c] sm:$0xf0] }
 0x47d   : > { %7100 = vmatpush.bf16.msra.mxu1 %v10974_v12  ;;  %7065 = vmatpush.bf16.msrb.mxu2 %v8630_v30  ;;  %v11704_v12 = vld [vmem:[%s12372_s18 + $0xf34] sm:$0xf]  ;;  %v9262_v23 = vor.u32 %v11392_v8, %v9259_v9  ;;  %7196 = vst [vmem:[%s12380_s10 + $0xd0] sm:$0xff] %v6830_v24  ;;  %v11606_v30 = vld [vmem:[%s12372_s18 + $0xc20] sm:$0xf0] }
 0x47e   : > { %7079 = vmatpush.bf16.msrb.mxu3 %v9878_v36  ;;  %v10510_v37 = vor.u32 %v11704_v12, %v10507_v13  ;;  %v8947_v36 = vld [vmem:[%s12372_s18 + $0x39c] sm:$0xf0]  ;;  %v11802_v9 = vld [vmem:[%s12372_s18 + $0x1240] sm:$0xf0]  ;;  %v8635_v12 = vld [vmem:[%s12372_s18 + $0x12c] sm:$0xf0] }
 0x47f   : > { %v11548_v13 = vld [vmem:[%s12372_s18 + $0xa54] sm:$0xf] }
 0x480   : > { %7087 = vmatpush.bf16.msra.mxu0 %v9570_v26  ;;  %7066 = vmatmul.bf16.vlgmr.msrb.gmra.mxu2 %v12526_v3  ;;  %v8946_v26 = vor.u32 %v11333_v19, %v8945_v18  ;;  %v6817_v38 = vpop.f32.mrf.mxu0  ;;  %v10826_v19 = vor.u32 %v11802_v9, %v10825_v5  ;;  %v9886_v25 = vor.u32 %v11548_v13, %v9883_v15  ;;  %v11256_v5 = vld [vmem:[%s12372_s18 + $0x130] sm:$0xf0] }
 0x481   : > { %7101 = vmatpush.bf16.msra.mxu1 %v10818_v32  ;;  %7114 = vmatpush.bf16.msra.mxu2 %v9730_v35  ;;  %v8789_v32 = vld [vmem:[%s12372_s18 + $0x1c8] sm:$0xf]  ;;  %v11314_v35 = vld [vmem:[%s12372_s18 + $0x304] sm:$0xf]  ;;  %v6818_v43 = vadd.f32 %v6817_v38, %v2880_v62  ;;  %v6831_v44 = vpop.f32.mrf.mxu1  ;;  %v9109_v38 = vld [vmem:[%s12372_s18 + $0x440] sm:$0xf] }
 0x482   : > { %7128 = vmatpush.bf16.msra.mxu3 %v10978_v39  ;;  %v8790_v39 = vor.u32 %v11294_v28, %v8789_v32  ;;  %v8950_v52 = vor.u32 %v11314_v35, %v8947_v36  ;;  %v10039_v62 = vld [vmem:[%s12372_s18 + $0xc24] sm:$0xf0]  ;;  %v10513_v28 = vld [vmem:[%s12372_s18 + $0xf38] sm:$0xf] }
 0x483   : > { %7080 = vmatmul.bf16.vlgmr.msrb.gmra.mxu3 %v12533_v14  ;;  %v6843_v8 = vpop.f32.mrf.mxu2  ;;  %v10042_v10 = vor.u32 %v11587_v60, %v10039_v62 }
 0x484   : > { %7088 = vmatpush.bf16.msra.mxu0 %v9414_v42  ;;  %v10195_v42 = vld [vmem:[%s12372_s18 + $0xd5c] sm:$0xf0] }
 0x485   : > { %7102 = vmatpush.bf16.msra.mxu1 %v10662_v45  ;;  %7115 = vmatpush.bf16.msra.mxu2 %v9574_v50  ;;  %v10038_v45 = vor.u32 %v11606_v30, %v10037_v29  ;;  %v11529_v50 = vld [vmem:[%s12372_s18 + $0x9b8] sm:$0xf0]  ;;  %v10198_v56 = vor.u32 %v11626_v41, %v10195_v42  ;;  %v11724_v29 = vld [vmem:[%s12372_s18 + $0xfd0] sm:$0xf0]  ;;  %v10357_v41 = vld [vmem:[%s12372_s18 + $0xe00] sm:$0xf] }
 0x486   : > { %7129 = vmatpush.bf16.msra.mxu3 %v10822_v53  ;;  %v6832_v53 = vadd.f32 %v6831_v44, %v6818_v43  ;;  %v9734_v0 = vor.u32 %v11529_v50, %v9733_v49  ;;  %v6857_v18 = vpop.f32.mrf.mxu3  ;;  %v10514_v36 = vor.u32 %v11724_v29, %v10513_v28  ;;  %v11685_v42 = vld [vmem:[%s12372_s18 + $0xe98] sm:$0xf0]  ;;  %v11334_v49 = vld [vmem:[%s12372_s18 + $0x3a0] sm:$0xf0]  ;;  %v10201_v50 = vld [vmem:[%s12372_s18 + $0xcc8] sm:$0xf] }
 0x487   : > { %v10202_v54 = vor.u32 %v11646_v51, %v10201_v50 }
 0x488   : > { %7089 = vmatpush.bf16.msra.mxu0 %v9258_v58  ;;  %v8791_v58 = vld [vmem:[%s12372_s18 + $0x264] sm:$0xf0]  ;;  %7235 = vst [vmem:[%s12380_s10 + $0x208] sm:$0xff] %v6832_v53 }
 0x489   : > { %7103 = vmatpush.bf16.msra.mxu1 %v10506_v63  ;;  %7116 = vmatpush.bf16.msra.mxu2 %v9418_v6  ;;  %v9882_v63 = vor.u32 %v11567_v48, %v9881_v47  ;;  %v8794_v6 = vor.u32 %v11275_v57, %v8791_v58  ;;  %v10358_v47 = vor.u32 %v11685_v42, %v10357_v41  ;;  %v8953_v48 = vld [vmem:[%s12372_s18 + $0x308] sm:$0xf]  ;;  %v11295_v57 = vld [vmem:[%s12372_s18 + $0x268] sm:$0xf0]  ;;  %v10045_v58 = vld [vmem:[%s12372_s18 + $0xb90] sm:$0xf] }
 0x48a   : > { %7130 = vmatpush.bf16.msra.mxu3 %v10666_v7  ;;  %v2881_v7 = vperm.slane %v13711_v61, 3  ;;  %v8954_v53 = vor.u32 %v11334_v49, %v8953_v48 }
 0x48b   : > { %v6845_v32 = vpop.f32.mrf.mxu2 }
 0x48c   : > { %7090 = vmatpush.bf16.msra.mxu0 %v9102_v11  ;;  %v11236_v11 = vld [vmem:[%s12372_s18 + $0x94] sm:$0xf]  ;;  %v6844_v17 = vadd.f32 %v6843_v8, %v2881_v7  ;;  %v6846_v30 = vadd.f32 %v6845_v32, %v2881_v7 }
 0x48d   : > { %7104 = vmatpush.bf16.msra.mxu1 %v10350_v55  ;;  %7117 = vmatpush.bf16.msra.mxu2 %v9262_v23  ;;  %v9578_v55 = vor.u32 %v11490_v4, %v9577_v1  ;;  %v8638_v23 = vor.u32 %v11236_v11, %v8635_v12  ;;  %v2883_v1 = vperm.slane %v13711_v61, 5  ;;  %v8641_v4 = vld [vmem:[%s12372_s18 + $0x98] sm:$0xf]  ;;  %v11568_v7 = vld [vmem:[%s12372_s18 + $0xaf0] sm:$0xf0] }
 0x48e   : > { %7131 = vmatpush.bf16.msra.mxu3 %v10510_v37  ;;  %v6858_v24 = vadd.f32 %v6857_v18, %v6844_v17  ;;  %v10669_v37 = vld [vmem:[%s12372_s18 + $0x1070] sm:$0xf]  ;;  %v6859_v35 = vpop.f32.mrf.mxu3 }
 0x48f   : > { %v10670_v16 = vor.u32 %v11763_v33, %v10669_v37  ;;  %v6860_v40 = vadd.f32 %v6859_v35, %v6846_v30 }
 0x490   : > { %7091 = vmatpush.bf16.msra.mxu0 %v8946_v26  ;;  %7197 = vst [vmem:[%s12380_s10 + $0xd8] sm:$0xff] %v6858_v24  ;;  %v9422_v26 = vor.u32 %v11451_v22, %v9421_v21  ;;  %v2884_v21 = vperm.slane %v13711_v61, 6 }
 0x491   : > { %7105 = vmatpush.bf16.msra.mxu1 %v10194_v27  ;;  %7118 = vmatpush.bf16.msra.mxu2 %v9106_v31  ;;  %v11412_v27 = vld [vmem:[%s12372_s18 + $0x610] sm:$0xf0]  ;;  %7236 = vst [vmem:[%s12380_s10 + $0x210] sm:$0xff] %v6860_v40 }
 0x492   : > { %7132 = vmatpush.bf16.msra.mxu3 %v10354_v34  ;;  %v9266_v31 = vor.u32 %v11412_v27, %v9265_v20  ;;  %v2882_v34 = vperm.slane %v13711_v61, 4 }
 0x494   : > { %7092 = vmatpush.bf16.msra.mxu0 %v8790_v39  ;;  %v11373_v39 = vld [vmem:[%s12372_s18 + $0x4d8] sm:$0xf0] }
 0x495   : > { %7106 = vmatpush.bf16.msra.mxu1 %v10038_v45  ;;  %7119 = vmatpush.bf16.msra.mxu2 %v8950_v52  ;;  %v9110_v44 = vor.u32 %v11373_v39, %v9109_v38 }
 0x496   : > { %7133 = vmatpush.bf16.msra.mxu3 %v10198_v56  ;;  %v8797_v56 = vld [vmem:[%s12372_s18 + $0x1d0] sm:$0xf] }
 0x497   : > { %v8798_v62 = vor.u32 %v11295_v57, %v8797_v56 }
 0x498   : > { %7093 = vmatpush.bf16.msra.mxu0 %v8634_v59  ;;  %v6871_v43 = vpop.f32.mrf.mxu0  ;;  %v11607_v59 = vld [vmem:[%s12372_s18 + $0xc28] sm:$0xf0] }
 0x499   : > { %7107 = vmatpush.bf16.msra.mxu1 %v9882_v63  ;;  %7120 = vmatpush.bf16.msra.mxu2 %v8794_v6  ;;  %v6872_v45 = vadd.f32 %v6871_v43, %v2882_v34  ;;  %v6885_v46 = vpop.f32.mrf.mxu1  ;;  %v9889_v6 = vld [vmem:[%s12372_s18 + $0xa58] sm:$0xf]  ;;  %s11842_s18 = smul.u32 (%p12270_p10), 312, %s12241_s28 }
 0x49a   : > { %7134 = vmatpush.bf16.msra.mxu3 %v10042_v10  ;;  %v8642_v10 = vor.u32 %v11256_v5, %v8641_v4  ;;  %v9890_v13 = vor.u32 %v11568_v7, %v9889_v6 }
 0x49b   : > { %7094 = vmatmul.bf16.vlgmr.msra.gmra.mxu0 %v12526_v3  ;;  %v6886_v52 = vadd.f32 %v6885_v46, %v6872_v45  ;;  %s13920_s22 = scalar_lea.vmem (%p12270_p10), %s14096_s7, %s11842_s18 }
 0x49c   : > { %7142 = vmatpush.bf16.msrb.mxu0 %v9734_v0  ;;  %7108 = vmatmul.bf16.vlgmr.msra.gmra.mxu1 %v12533_v14 }
 0x49d   : > { %7156 = vmatpush.bf16.msrb.mxu1 %v10982_v2  ;;  %7121 = vmatpush.bf16.msra.mxu2 %v8638_v23  ;;  %7198 = vst [vmem:[%s12380_s10 + $0xe0] sm:$0xff] %v6886_v52  ;;  %v10046_v2 = vor.u32 %v11607_v59, %v10045_v58 }
 0x49e   : > { %7135 = vmatpush.bf16.msra.mxu3 %v9886_v25 }
 0x4a0   : > { %7143 = vmatpush.bf16.msrb.mxu0 %v9578_v55  ;;  %7122 = vmatmul.bf16.vlgmr.msra.gmra.mxu2 %v12526_v3  ;;  %v6873_v60 = vpop.f32.mrf.mxu0 }
 0x4a1   : > { %7157 = vmatpush.bf16.msrb.mxu1 %v10826_v19  ;;  %7136 = vmatmul.bf16.vlgmr.msra.gmra.mxu3 %v12533_v14  ;;  %v6874_v63 = vadd.f32 %v6873_v60, %v2882_v34  ;;  %v6887_v0 = vpop.f32.mrf.mxu1 }
 0x4a3   : > { %v6888_v8 = vadd.f32 %v6887_v0, %v6874_v63  ;;  %v6899_v9 = vpop.f32.mrf.mxu2 }
 0x4a4   : > { %7144 = vmatpush.bf16.msrb.mxu0 %v9422_v26  ;;  %v6900_v11 = vadd.f32 %v6899_v9, %v2883_v1 }
 0x4a5   : > { %7158 = vmatpush.bf16.msrb.mxu1 %v10670_v16  ;;  %7237 = vst [vmem:[%s12380_s10 + $0x218] sm:$0xff] %v6888_v8 }
 0x4a6   : > { %v6913_v12 = vpop.f32.mrf.mxu3 }
 0x4a7   : > { %v6914_v15 = vadd.f32 %v6913_v12, %v6900_v11 }
 0x4a8   : > { %7145 = vmatpush.bf16.msrb.mxu0 %v9266_v31  ;;  %v13888_v31 = vld [vmem:[%s12378_s16 + $0x20] sm:$0xff] }
 0x4a9   : > { %7159 = vmatpush.bf16.msrb.mxu1 %v10514_v36  ;;  %7199 = vst [vmem:[%s12380_s10 + $0xe8] sm:$0xff] %v6914_v15  ;;  %v2886_v35 = vperm.slane %v13888_v31, 0  ;;  %v2887_v43 = vperm.slane %v13888_v31, 1  ;;  %v2889_v63 = vperm.slane %v13888_v31, 3 }
 0x4ab   : > { %v6901_v17 = vpop.f32.mrf.mxu2 }
 0x4ac   : > { %7146 = vmatpush.bf16.msrb.mxu0 %v9110_v44  ;;  %v6902_v55 = vadd.f32 %v6901_v17, %v2883_v1 }
 0x4ad   : > { %7160 = vmatpush.bf16.msrb.mxu1 %v10358_v47 }
 0x4ae   : > { %v6915_v18 = vpop.f32.mrf.mxu3 }
 0x4af   : > { %v6916_v19 = vadd.f32 %v6915_v18, %v6902_v55 }
 0x4b0   : > { %7147 = vmatpush.bf16.msrb.mxu0 %v8954_v53  ;;  %v2888_v53 = vperm.slane %v13888_v31, 2 }
 0x4b1   : > { %7161 = vmatpush.bf16.msrb.mxu1 %v10202_v54  ;;  %7238 = vst [vmem:[%s12380_s10 + $0x220] sm:$0xff] %v6916_v19  ;;  %v2891_v19 = vperm.slane %v13888_v31, 5 }
 0x4b4   : > { %7148 = vmatpush.bf16.msrb.mxu0 %v8798_v62 }
 0x4b5   : > { %7162 = vmatpush.bf16.msrb.mxu1 %v10046_v2 }
 0x4b8   : > { %7149 = vmatpush.bf16.msrb.mxu0 %v8642_v10  ;;  %v6927_v22 = vpop.f32.mrf.mxu0  ;;  %v2890_v10 = vperm.slane %v13888_v31, 4 }
 0x4b9   : > { %7163 = vmatpush.bf16.msrb.mxu1 %v9890_v13  ;;  %v6928_v23 = vadd.f32 %v6927_v22, %v2884_v21  ;;  %v6941_v24 = vpop.f32.mrf.mxu1 }
 0x4bb   : > { %7150 = vmatmul.bf16.vlgmr.msrb.gmra.mxu0 %v12526_v3  ;;  %v6942_v37 = vadd.f32 %v6941_v24, %v6928_v23 }
 0x4bc   : > { %7164 = vmatmul.bf16.vlgmr.msrb.gmra.mxu1 %v12533_v14  ;;  %v2885_v14 = vperm.slane %v13711_v61, 7 }
 0x4bd   : > { %7200 = vst [vmem:[%s12380_s10 + $0xf0] sm:$0xff] %v6942_v37 }
 0x4c0   : > { %v6929_v33 = vpop.f32.mrf.mxu0 }
 0x4c1   : > { %v6930_v3 = vadd.f32 %v6929_v33, %v2884_v21  ;;  %v6943_v25 = vpop.f32.mrf.mxu1 }
 0x4c3   : > { %v6944_v26 = vadd.f32 %v6943_v25, %v6930_v3  ;;  %v6955_v16 = vpop.f32.mrf.mxu2 }
 0x4c4   : > { %v6956_v20 = vadd.f32 %v6955_v16, %v2885_v14 }
 0x4c5   : > { %7239 = vst [vmem:[%s12380_s10 + $0x228] sm:$0xff] %v6944_v26  ;;  %v2892_v26 = vperm.slane %v13888_v31, 6  ;;  %v7270_v31 = vld [vmem:[%s12380_s10] sm:$0xff] (%p12270_p10) }
 0x4c6   : > { %v6969_v27 = vpop.f32.mrf.mxu3  ;;  %7271 = vst [vmem:[%s13920_s22] sm:$0xff] (%p12270_p10), %v7270_v31  ;;  %v7398_v31 = vld [vmem:[%s12380_s10 + $0x200] sm:$0xff] (%p12270_p10) }
 0x4c7   : > { %v6970_v32 = vadd.f32 %v6969_v27, %v6956_v20  ;;  %7399 = vst [vmem:[%s13920_s22 + $0x338] sm:$0xff] (%p12270_p10), %v7398_v31 }
 0x4c9   : > { %7201 = vst [vmem:[%s12380_s10 + $0xf8] sm:$0xff] %v6970_v32 }
 0x4cb   : > { %v6957_v28 = vpop.f32.mrf.mxu2 }
 0x4cc   : > { %v6958_v29 = vadd.f32 %v6957_v28, %v2885_v14 }
 0x4ce   : > { %v6971_v30 = vpop.f32.mrf.mxu3 }
 0x4cf   : > { %v6972_v34 = vadd.f32 %v6971_v30, %v6958_v29 }
 0x4d1   : > { %7240 = vst [vmem:[%s12380_s10 + $0x230] sm:$0xff] %v6972_v34 }
 0x4d8   : > { %v6983_v61 = vpop.f32.mrf.mxu0 }
 0x4d9   : > { %v6984_v36 = vadd.f32 %v6983_v61, %v2886_v35  ;;  %v6997_v38 = vpop.f32.mrf.mxu1  ;;  %v7274_v61 = vld [vmem:[%s12380_s10 + $0x10] sm:$0xff] (%p12270_p10) }
 0x4da   : > { %7275 = vst [vmem:[%s13920_s22 + $0x10] sm:$0xff] (%p12270_p10), %v7274_v61  ;;  %v7402_v61 = vld [vmem:[%s12380_s10 + $0x210] sm:$0xff] (%p12270_p10) }
 0x4db   : > { %v6998_v39 = vadd.f32 %v6997_v38, %v6984_v36  ;;  %v7276_v36 = vld [vmem:[%s12380_s10 + $0x18] sm:$0xff] (%p12270_p10)  ;;  %v7278_v38 = vld [vmem:[%s12380_s10 + $0x20] sm:$0xff] (%p12270_p10)  ;;  %7403 = vst [vmem:[%s13920_s22 + $0x348] sm:$0xff] (%p12270_p10), %v7402_v61 }
 0x4dc   : > { %7277 = vst [vmem:[%s13920_s22 + $0x18] sm:$0xff] (%p12270_p10), %v7276_v36  ;;  %v7404_v36 = vld [vmem:[%s12380_s10 + $0x218] sm:$0xff] (%p12270_p10) }
 0x4dd   : > { %7202 = vst [vmem:[%s12380_s10 + $0x100] sm:$0xff] %v6998_v39  ;;  %v7280_v39 = vld [vmem:[%s12380_s10 + $0x28] sm:$0xff] (%p12270_p10) }
 0x4de   : > { %7279 = vst [vmem:[%s13920_s22 + $0x20] sm:$0xff] (%p12270_p10), %v7278_v38  ;;  %v7406_v38 = vld [vmem:[%s12380_s10 + $0x220] sm:$0xff] (%p12270_p10) }
 0x4df   : > { %7281 = vst [vmem:[%s13920_s22 + $0x28] sm:$0xff] (%p12270_p10), %v7280_v39  ;;  %v7408_v39 = vld [vmem:[%s12380_s10 + $0x228] sm:$0xff] (%p12270_p10) }
 0x4e0   : > { %v6985_v40 = vpop.f32.mrf.mxu0  ;;  %7405 = vst [vmem:[%s13920_s22 + $0x350] sm:$0xff] (%p12270_p10), %v7404_v36 }
 0x4e1   : > { %v6986_v41 = vadd.f32 %v6985_v40, %v2886_v35  ;;  %v6999_v42 = vpop.f32.mrf.mxu1  ;;  %v7272_v35 = vld [vmem:[%s12380_s10 + $0x8] sm:$0xff] (%p12270_p10)  ;;  %v7282_v40 = vld [vmem:[%s12380_s10 + $0x30] sm:$0xff] (%p12270_p10)  ;;  %7407 = vst [vmem:[%s13920_s22 + $0x358] sm:$0xff] (%p12270_p10), %v7406_v38 }
 0x4e2   : > { %7273 = vst [vmem:[%s13920_s22 + $0x8] sm:$0xff] (%p12270_p10), %v7272_v35  ;;  %v7400_v35 = vld [vmem:[%s12380_s10 + $0x208] sm:$0xff] (%p12270_p10) }
 0x4e3   : > { %v7000_v44 = vadd.f32 %v6999_v42, %v6986_v41  ;;  %v7011_v45 = vpop.f32.mrf.mxu2  ;;  %v7284_v41 = vld [vmem:[%s12380_s10 + $0x38] sm:$0xff] (%p12270_p10)  ;;  %v7286_v42 = vld [vmem:[%s12380_s10 + $0x40] sm:$0xff] (%p12270_p10)  ;;  %7283 = vst [vmem:[%s13920_s22 + $0x30] sm:$0xff] (%p12270_p10), %v7282_v40  ;;  %v7410_v40 = vld [vmem:[%s12380_s10 + $0x230] sm:$0xff] (%p12270_p10) }
 0x4e4   : > { %v7012_v46 = vadd.f32 %v7011_v45, %v2887_v43  ;;  %7285 = vst [vmem:[%s13920_s22 + $0x38] sm:$0xff] (%p12270_p10), %v7284_v41  ;;  %v7292_v45 = vld [vmem:[%s12380_s10 + $0x58] sm:$0xff] (%p12270_p10) }
 0x4e5   : > { %7241 = vst [vmem:[%s12380_s10 + $0x238] sm:$0xff] %v7000_v44  ;;  %v7290_v44 = vld [vmem:[%s12380_s10 + $0x50] sm:$0xff] (%p12270_p10) }
 0x4e6   : > { %v7025_v47 = vpop.f32.mrf.mxu3  ;;  %7287 = vst [vmem:[%s13920_s22 + $0x40] sm:$0xff] (%p12270_p10), %v7286_v42 }
 0x4e7   : > { %v7026_v48 = vadd.f32 %v7025_v47, %v7012_v46  ;;  %v7294_v46 = vld [vmem:[%s12380_s10 + $0x60] sm:$0xff] (%p12270_p10)  ;;  %7291 = vst [vmem:[%s13920_s22 + $0x50] sm:$0xff] (%p12270_p10), %v7290_v44  ;;  %v7296_v47 = vld [vmem:[%s12380_s10 + $0x68] sm:$0xff] (%p12270_p10) }
 0x4e8   : > { %7293 = vst [vmem:[%s13920_s22 + $0x58] sm:$0xff] (%p12270_p10), %v7292_v45 }
 0x4e9   : > { %7203 = vst [vmem:[%s12380_s10 + $0x108] sm:$0xff] %v7026_v48  ;;  %v7298_v48 = vld [vmem:[%s12380_s10 + $0x70] sm:$0xff] (%p12270_p10) }
 0x4ea   : > { %7295 = vst [vmem:[%s13920_s22 + $0x60] sm:$0xff] (%p12270_p10), %v7294_v46 }
 0x4eb   : > { %v7013_v49 = vpop.f32.mrf.mxu2  ;;  %7297 = vst [vmem:[%s13920_s22 + $0x68] sm:$0xff] (%p12270_p10), %v7296_v47 }
 0x4ec   : > { %v7014_v50 = vadd.f32 %v7013_v49, %v2887_v43  ;;  %v7288_v43 = vld [vmem:[%s12380_s10 + $0x48] sm:$0xff] (%p12270_p10)  ;;  %v7300_v49 = vld [vmem:[%s12380_s10 + $0x78] sm:$0xff] (%p12270_p10)  ;;  %7299 = vst [vmem:[%s13920_s22 + $0x70] sm:$0xff] (%p12270_p10), %v7298_v48 }
 0x4ed   : > { %7289 = vst [vmem:[%s13920_s22 + $0x48] sm:$0xff] (%p12270_p10), %v7288_v43  ;;  %v7412_v41 = vld [vmem:[%s12380_s10 + $0x238] sm:$0xff] (%p12270_p10) }
 0x4ee   : > { %v7027_v51 = vpop.f32.mrf.mxu3  ;;  %7301 = vst [vmem:[%s13920_s22 + $0x78] sm:$0xff] (%p12270_p10), %v7300_v49 }
 0x4ef   : > { %v7028_v52 = vadd.f32 %v7027_v51, %v7014_v50  ;;  %v7302_v50 = vld [vmem:[%s12380_s10 + $0x80] sm:$0xff] (%p12270_p10)  ;;  %v7304_v51 = vld [vmem:[%s12380_s10 + $0x88] sm:$0xff] (%p12270_p10)  ;;  %7401 = vst [vmem:[%s13920_s22 + $0x340] sm:$0xff] (%p12270_p10), %v7400_v35 }
 0x4f0   : > { %7303 = vst [vmem:[%s13920_s22 + $0x80] sm:$0xff] (%p12270_p10), %v7302_v50 }
 0x4f1   : > { %7242 = vst [vmem:[%s12380_s10 + $0x240] sm:$0xff] %v7028_v52  ;;  %v7306_v52 = vld [vmem:[%s12380_s10 + $0x90] sm:$0xff] (%p12270_p10) }
 0x4f2   : > { %7305 = vst [vmem:[%s13920_s22 + $0x88] sm:$0xff] (%p12270_p10), %v7304_v51 }
 0x4f3   : > { %7307 = vst [vmem:[%s13920_s22 + $0x90] sm:$0xff] (%p12270_p10), %v7306_v52 }
 0x4f4   : > { %7409 = vst [vmem:[%s13920_s22 + $0x360] sm:$0xff] (%p12270_p10), %v7408_v39 }
 0x4f5   : > { %7411 = vst [vmem:[%s13920_s22 + $0x368] sm:$0xff] (%p12270_p10), %v7410_v40 }
 0x4f6   : > { %7413 = vst [vmem:[%s13920_s22 + $0x370] sm:$0xff] (%p12270_p10), %v7412_v41 }
 0x4f8   : > { %v7039_v54 = vpop.f32.mrf.mxu0  ;;  %v7414_v42 = vld [vmem:[%s12380_s10 + $0x240] sm:$0xff] (%p12270_p10) }
 0x4f9   : > { %v7040_v56 = vadd.f32 %v7039_v54, %v2888_v53  ;;  %v7053_v57 = vpop.f32.mrf.mxu1  ;;  %v7310_v54 = vld [vmem:[%s12380_s10 + $0xa0] sm:$0xff] (%p12270_p10)  ;;  %7415 = vst [vmem:[%s13920_s22 + $0x378] sm:$0xff] (%p12270_p10), %v7414_v42 }
 0x4fa   : > { %7311 = vst [vmem:[%s13920_s22 + $0xa0] sm:$0xff] (%p12270_p10), %v7310_v54 }
 0x4fb   : > { %v7054_v58 = vadd.f32 %v7053_v57, %v7040_v56  ;;  %v7312_v56 = vld [vmem:[%s12380_s10 + $0xa8] sm:$0xff] (%p12270_p10)  ;;  %v7314_v57 = vld [vmem:[%s12380_s10 + $0xb0] sm:$0xff] (%p12270_p10) }
 0x4fc   : > { %7313 = vst [vmem:[%s13920_s22 + $0xa8] sm:$0xff] (%p12270_p10), %v7312_v56 }
 0x4fd   : > { %7204 = vst [vmem:[%s12380_s10 + $0x110] sm:$0xff] %v7054_v58  ;;  %v7316_v58 = vld [vmem:[%s12380_s10 + $0xb8] sm:$0xff] (%p12270_p10) }
 0x4fe   : > { %7315 = vst [vmem:[%s13920_s22 + $0xb0] sm:$0xff] (%p12270_p10), %v7314_v57 }
 0x4ff   : > { %7317 = vst [vmem:[%s13920_s22 + $0xb8] sm:$0xff] (%p12270_p10), %v7316_v58 }
 0x500   : > { %v7041_v59 = vpop.f32.mrf.mxu0 }
 0x501   : > { %v7042_v60 = vadd.f32 %v7041_v59, %v2888_v53  ;;  %v7055_v62 = vpop.f32.mrf.mxu1  ;;  %v7308_v53 = vld [vmem:[%s12380_s10 + $0x98] sm:$0xff] (%p12270_p10)  ;;  %v7318_v59 = vld [vmem:[%s12380_s10 + $0xc0] sm:$0xff] (%p12270_p10) }
 0x502   : > { %7309 = vst [vmem:[%s13920_s22 + $0x98] sm:$0xff] (%p12270_p10), %v7308_v53 }
 0x503   : > { %v7056_v0 = vadd.f32 %v7055_v62, %v7042_v60  ;;  %v7067_v1 = vpop.f32.mrf.mxu2  ;;  %v7320_v60 = vld [vmem:[%s12380_s10 + $0xc8] sm:$0xff] (%p12270_p10)  ;;  %v7322_v62 = vld [vmem:[%s12380_s10 + $0xd0] sm:$0xff] (%p12270_p10)  ;;  %7319 = vst [vmem:[%s13920_s22 + $0xc0] sm:$0xff] (%p12270_p10), %v7318_v59 }
 0x504   : > { %v7068_v2 = vadd.f32 %v7067_v1, %v2889_v63  ;;  %7321 = vst [vmem:[%s13920_s22 + $0xc8] sm:$0xff] (%p12270_p10), %v7320_v60  ;;  %v7328_v1 = vld [vmem:[%s12380_s10 + $0xe8] sm:$0xff] (%p12270_p10) }
 0x505   : > { %7243 = vst [vmem:[%s12380_s10 + $0x248] sm:$0xff] %v7056_v0  ;;  %v7326_v0 = vld [vmem:[%s12380_s10 + $0xe0] sm:$0xff] (%p12270_p10) }
 0x506   : > { %v7081_v4 = vpop.f32.mrf.mxu3  ;;  %7323 = vst [vmem:[%s13920_s22 + $0xd0] sm:$0xff] (%p12270_p10), %v7322_v62 }
 0x507   : > { %v7082_v5 = vadd.f32 %v7081_v4, %v7068_v2  ;;  %v7330_v2 = vld [vmem:[%s12380_s10 + $0xf0] sm:$0xff] (%p12270_p10)  ;;  %7327 = vst [vmem:[%s13920_s22 + $0xe0] sm:$0xff] (%p12270_p10), %v7326_v0  ;;  %v7332_v4 = vld [vmem:[%s12380_s10 + $0xf8] sm:$0xff] (%p12270_p10) }
 0x508   : > { %7329 = vst [vmem:[%s13920_s22 + $0xe8] sm:$0xff] (%p12270_p10), %v7328_v1 }
 0x509   : > { %7205 = vst [vmem:[%s12380_s10 + $0x118] sm:$0xff] %v7082_v5  ;;  %v7334_v5 = vld [vmem:[%s12380_s10 + $0x100] sm:$0xff] (%p12270_p10) }
 0x50a   : > { %7331 = vst [vmem:[%s13920_s22 + $0xf0] sm:$0xff] (%p12270_p10), %v7330_v2 }
 0x50b   : > { %v7069_v6 = vpop.f32.mrf.mxu2  ;;  %7333 = vst [vmem:[%s13920_s22 + $0xf8] sm:$0xff] (%p12270_p10), %v7332_v4 }
 0x50c   : > { %v7070_v7 = vadd.f32 %v7069_v6, %v2889_v63  ;;  %v7324_v63 = vld [vmem:[%s12380_s10 + $0xd8] sm:$0xff] (%p12270_p10)  ;;  %v7336_v6 = vld [vmem:[%s12380_s10 + $0x108] sm:$0xff] (%p12270_p10)  ;;  %7335 = vst [vmem:[%s13920_s22 + $0x100] sm:$0xff] (%p12270_p10), %v7334_v5 }
 0x50d   : > { %7325 = vst [vmem:[%s13920_s22 + $0xd8] sm:$0xff] (%p12270_p10), %v7324_v63  ;;  %v7416_v43 = vld [vmem:[%s12380_s10 + $0x248] sm:$0xff] (%p12270_p10) }
 0x50e   : > { %v7083_v8 = vpop.f32.mrf.mxu3  ;;  %7337 = vst [vmem:[%s13920_s22 + $0x108] sm:$0xff] (%p12270_p10), %v7336_v6 }
 0x50f   : > { %v7084_v9 = vadd.f32 %v7083_v8, %v7070_v7  ;;  %v7338_v7 = vld [vmem:[%s12380_s10 + $0x110] sm:$0xff] (%p12270_p10)  ;;  %7417 = vst [vmem:[%s13920_s22 + $0x380] sm:$0xff] (%p12270_p10), %v7416_v43 }
 0x510   : > { %v7340_v8 = vld [vmem:[%s12380_s10 + $0x118] sm:$0xff] (%p12270_p10)  ;;  %7339 = vst [vmem:[%s13920_s22 + $0x110] sm:$0xff] (%p12270_p10), %v7338_v7 }
 0x511   : > { %7244 = vst [vmem:[%s12380_s10 + $0x250] sm:$0xff] %v7084_v9 }
 0x512   : > { %7341 = vst [vmem:[%s13920_s22 + $0x118] sm:$0xff] (%p12270_p10), %v7340_v8 }
 0x518   : > { %v7095_v11 = vpop.f32.mrf.mxu0  ;;  %v7418_v44 = vld [vmem:[%s12380_s10 + $0x250] sm:$0xff] (%p12270_p10) }
 0x519   : > { %v7096_v12 = vadd.f32 %v7095_v11, %v2890_v10  ;;  %v7109_v13 = vpop.f32.mrf.mxu1  ;;  %7419 = vst [vmem:[%s13920_s22 + $0x388] sm:$0xff] (%p12270_p10), %v7418_v44 }
 0x51b   : > { %v7110_v15 = vadd.f32 %v7109_v13, %v7096_v12  ;;  %v7348_v12 = vld [vmem:[%s12380_s10 + $0x138] sm:$0xff] (%p12270_p10)  ;;  %v7350_v13 = vld [vmem:[%s12380_s10 + $0x140] sm:$0xff] (%p12270_p10) }
 0x51c   : > { %7349 = vst [vmem:[%s13920_s22 + $0x270] sm:$0xff] (%p12270_p10), %v7348_v12 }
 0x51d   : > { %7206 = vst [vmem:[%s12380_s10 + $0x120] sm:$0xff] %v7110_v15  ;;  %v7352_v15 = vld [vmem:[%s12380_s10 + $0x148] sm:$0xff] (%p12270_p10) }
 0x51e   : > { %7351 = vst [vmem:[%s13920_s22 + $0x278] sm:$0xff] (%p12270_p10), %v7350_v13 }
 0x51f   : > { %7353 = vst [vmem:[%s13920_s22 + $0x280] sm:$0xff] (%p12270_p10), %v7352_v15 }
 0x520   : > { %v7097_v17 = vpop.f32.mrf.mxu0 }
 0x521   : > { %v7098_v55 = vadd.f32 %v7097_v17, %v2890_v10  ;;  %v7111_v18 = vpop.f32.mrf.mxu1  ;;  %v7354_v17 = vld [vmem:[%s12380_s10 + $0x150] sm:$0xff] (%p12270_p10) }
 0x522   : > { %7355 = vst [vmem:[%s13920_s22 + $0x288] sm:$0xff] (%p12270_p10), %v7354_v17 }
 0x523   : > { %v7112_v21 = vadd.f32 %v7111_v18, %v7098_v55  ;;  %v7123_v22 = vpop.f32.mrf.mxu2  ;;  %v7356_v55 = vld [vmem:[%s12380_s10 + $0x158] sm:$0xff] (%p12270_p10)  ;;  %v7358_v18 = vld [vmem:[%s12380_s10 + $0x160] sm:$0xff] (%p12270_p10) }
 0x524   : > { %v7124_v23 = vadd.f32 %v7123_v22, %v2891_v19  ;;  %v7137_v24 = vpop.f32.mrf.mxu3  ;;  %v7342_v9 = vld [vmem:[%s12380_s10 + $0x120] sm:$0xff] (%p12270_p10)  ;;  %7357 = vst [vmem:[%s13920_s22 + $0x290] sm:$0xff] (%p12270_p10), %v7356_v55  ;;  %v7364_v22 = vld [vmem:[%s12380_s10 + $0x178] sm:$0xff] (%p12270_p10) }
 0x525   : > { %7245 = vst [vmem:[%s12380_s10 + $0x258] sm:$0xff] %v7112_v21  ;;  %v7362_v21 = vld [vmem:[%s12380_s10 + $0x170] sm:$0xff] (%p12270_p10) }
 0x526   : > { %v7138_v37 = vadd.f32 %v7137_v24, %v7124_v23  ;;  %7343 = vst [vmem:[%s13920_s22 + $0x120] sm:$0xff] (%p12270_p10), %v7342_v9  ;;  %v7366_v23 = vld [vmem:[%s12380_s10 + $0x180] sm:$0xff] (%p12270_p10)  ;;  %v7368_v24 = vld [vmem:[%s12380_s10 + $0x188] sm:$0xff] (%p12270_p10) }
 0x527   : > { %7359 = vst [vmem:[%s13920_s22 + $0x298] sm:$0xff] (%p12270_p10), %v7358_v18 }
 0x528   : > { %7207 = vst [vmem:[%s12380_s10 + $0x128] sm:$0xff] %v7138_v37  ;;  %v7370_v37 = vld [vmem:[%s12380_s10 + $0x190] sm:$0xff] (%p12270_p10) }
 0x529   : > { %7363 = vst [vmem:[%s13920_s22 + $0x2a8] sm:$0xff] (%p12270_p10), %v7362_v21 }
 0x52a   : > { %7365 = vst [vmem:[%s13920_s22 + $0x2b0] sm:$0xff] (%p12270_p10), %v7364_v22 }
 0x52b   : > { %v7125_v33 = vpop.f32.mrf.mxu2  ;;  %7367 = vst [vmem:[%s13920_s22 + $0x2b8] sm:$0xff] (%p12270_p10), %v7366_v23 }
 0x52c   : > { %v7126_v3 = vadd.f32 %v7125_v33, %v2891_v19  ;;  %v7139_v25 = vpop.f32.mrf.mxu3  ;;  %v7360_v19 = vld [vmem:[%s12380_s10 + $0x168] sm:$0xff] (%p12270_p10)  ;;  %v7372_v33 = vld [vmem:[%s12380_s10 + $0x198] sm:$0xff] (%p12270_p10)  ;;  %7369 = vst [vmem:[%s13920_s22 + $0x2c0] sm:$0xff] (%p12270_p10), %v7368_v24 }
 0x52d   : > { %7361 = vst [vmem:[%s13920_s22 + $0x2a0] sm:$0xff] (%p12270_p10), %v7360_v19  ;;  %v7420_v45 = vld [vmem:[%s12380_s10 + $0x258] sm:$0xff] (%p12270_p10) }
 0x52e   : > { %v7140_v14 = vadd.f32 %v7139_v25, %v7126_v3  ;;  %v7374_v3 = vld [vmem:[%s12380_s10 + $0x1a0] sm:$0xff] (%p12270_p10)  ;;  %7371 = vst [vmem:[%s13920_s22 + $0x2c8] sm:$0xff] (%p12270_p10), %v7370_v37  ;;  %v7376_v25 = vld [vmem:[%s12380_s10 + $0x1a8] sm:$0xff] (%p12270_p10) }
 0x52f   : > { %v7344_v10 = vld [vmem:[%s12380_s10 + $0x128] sm:$0xff] (%p12270_p10)  ;;  %7373 = vst [vmem:[%s13920_s22 + $0x2d0] sm:$0xff] (%p12270_p10), %v7372_v33 }
 0x530   : > { %7246 = vst [vmem:[%s12380_s10 + $0x260] sm:$0xff] %v7140_v14  ;;  %v7378_v14 = vld [vmem:[%s12380_s10 + $0x1b0] sm:$0xff] (%p12270_p10) }
 0x531   : > { %7345 = vst [vmem:[%s13920_s22 + $0x128] sm:$0xff] (%p12270_p10), %v7344_v10 }
 0x532   : > { %7375 = vst [vmem:[%s13920_s22 + $0x2d8] sm:$0xff] (%p12270_p10), %v7374_v3 }
 0x533   : > { %7377 = vst [vmem:[%s13920_s22 + $0x2e0] sm:$0xff] (%p12270_p10), %v7376_v25 }
 0x534   : > { %7379 = vst [vmem:[%s13920_s22 + $0x2e8] sm:$0xff] (%p12270_p10), %v7378_v14 }
 0x535   : > { %7421 = vst [vmem:[%s13920_s22 + $0x390] sm:$0xff] (%p12270_p10), %v7420_v45 }
 0x537   : > { %v7422_v46 = vld [vmem:[%s12380_s10 + $0x260] sm:$0xff] (%p12270_p10) }
 0x538   : > { %v7151_v16 = vpop.f32.mrf.mxu0  ;;  %7423 = vst [vmem:[%s13920_s22 + $0x398] sm:$0xff] (%p12270_p10), %v7422_v46 }
 0x539   : > { %v7152_v20 = vadd.f32 %v7151_v16, %v2892_v26  ;;  %v7165_v27 = vpop.f32.mrf.mxu1  ;;  %v7382_v16 = vld [vmem:[%s12380_s10 + $0x1c0] sm:$0xff] (%p12270_p10) }
 0x53a   : > { %7383 = vst [vmem:[%s13920_s22 + $0x2f8] sm:$0xff] (%p12270_p10), %v7382_v16 }
 0x53b   : > { %v7166_v32 = vadd.f32 %v7165_v27, %v7152_v20  ;;  %v7384_v20 = vld [vmem:[%s12380_s10 + $0x1c8] sm:$0xff] (%p12270_p10)  ;;  %v7386_v27 = vld [vmem:[%s12380_s10 + $0x1d0] sm:$0xff] (%p12270_p10) }
 0x53c   : > { %7385 = vst [vmem:[%s13920_s22 + $0x300] sm:$0xff] (%p12270_p10), %v7384_v20 }
 0x53d   : > { %7208 = vst [vmem:[%s12380_s10 + $0x130] sm:$0xff] %v7166_v32  ;;  %v7388_v32 = vld [vmem:[%s12380_s10 + $0x1d8] sm:$0xff] (%p12270_p10) }
 0x53e   : > { %7387 = vst [vmem:[%s13920_s22 + $0x308] sm:$0xff] (%p12270_p10), %v7386_v27 }
 0x53f   : > { %7389 = vst [vmem:[%s13920_s22 + $0x310] sm:$0xff] (%p12270_p10), %v7388_v32 }
 0x540   : > { %v7153_v28 = vpop.f32.mrf.mxu0 }
 0x541   : > { %v7154_v29 = vadd.f32 %v7153_v28, %v2892_v26  ;;  %v7167_v30 = vpop.f32.mrf.mxu1  ;;  %7254 = sbr.rel (!%p12270_p10) target bundleno = 1358 (0x54e), region = 80  ;;  %v7380_v26 = vld [vmem:[%s12380_s10 + $0x1b8] sm:$0xff] (%p12270_p10)  ;;  %v7390_v28 = vld [vmem:[%s12380_s10 + $0x1e0] sm:$0xff] (%p12270_p10) }
 0x542   : > { %7381 = vst [vmem:[%s13920_s22 + $0x2f0] sm:$0xff] (%p12270_p10), %v7380_v26 }
 0x543   : > { %v7168_v34 = vadd.f32 %v7167_v30, %v7154_v29  ;;  %v7392_v29 = vld [vmem:[%s12380_s10 + $0x1e8] sm:$0xff] (%p12270_p10)  ;;  %v7394_v30 = vld [vmem:[%s12380_s10 + $0x1f0] sm:$0xff] (%p12270_p10)  ;;  %7391 = vst [vmem:[%s13920_s22 + $0x318] sm:$0xff] (%p12270_p10), %v7390_v28 }
 0x544   : > { %v7346_v11 = vld [vmem:[%s12380_s10 + $0x130] sm:$0xff] (%p12270_p10)  ;;  %7393 = vst [vmem:[%s13920_s22 + $0x320] sm:$0xff] (%p12270_p10), %v7392_v29 }
 0x545   : > { %7247 = vst [vmem:[%s12380_s10 + $0x268] sm:$0xff] %v7168_v34  ;;  %v7396_v34 = vld [vmem:[%s12380_s10 + $0x1f8] sm:$0xff] (%p12270_p10) }
 0x546   : > { %7347 = vst [vmem:[%s13920_s22 + $0x130] sm:$0xff] %v7346_v11 }
 0x547   : > { %7395 = vst [vmem:[%s13920_s22 + $0x328] sm:$0xff] %v7394_v30 }
 0x548   : > { %7397 = vst [vmem:[%s13920_s22 + $0x330] sm:$0xff] %v7396_v34 }
 0x54c   : > { %v7424_v47 = vld [vmem:[%s12380_s10 + $0x268] sm:$0xff] }
 0x54d   : > { %7425 = vst [vmem:[%s13920_s22 + $0x3a0] sm:$0xff] %v7424_v47 }
 0x54e PF: > { %s14116_s27 = sld [smem:[#allocation17_spill]]  ;;  %s14118_s24 = smov %s12161_s25 }
 0x54f   : > { %s14117_s28 = sld [smem:[#allocation18_spill]]  ;;  %s14119_s25 = smov %s12165_s26 }
 0x554   : > { %p17_p8 = scmp.ge.s32.totalorder %s14116_s27, 4  }
 0x555   : > { %s14120_s26 = smov %s14117_s28 }
 0x556   :  { %19 = sbr.rel (!%p17_p8) target bundleno = 8 (0x8), region = 141 }
 0x55b   :  { %7441 = vsyncpa [#allocation4], 1 }
 0x55c   :  { %7443 = vsyncpa [#allocation4 + $0x1], 1 }
 0x55d   :  { %7444 = vsyncpa [#allocation6], 1 }
 0x55e   :  { %7445 = vsyncpa [#allocation9], 1 }

</bundles_post_ra>
